<compile_context>
chip_gen: v5e
topology: v5e:2x2
jax: 0.10.0
libtpu: 0.0.40
codegen_flags: <defaults>
</compile_context>

<pallas_src>
import functools

import jax
import jax.numpy as jnp
from jax import lax
from jax.experimental import pallas as pl
from jax.experimental.pallas import tpu as pltpu

BN_EPS = 1e-5
LRELU_SLOPE = 0.01
LANE = 128
SUBLANE = 8
_VMEM_BUDGET = 20 * 2**20          # cap on estimated per-call VMEM use


def _round_up(n, m):
    return (n + m - 1) // m * m


def _cdiv(a, b):
    return (a + b - 1) // b


def _apply_act(x, act_type):
    if act_type == "relu":
        return jnp.maximum(x, 0.0)
    if act_type == "leakyrelu":
        return jnp.where(x > 0, x, LRELU_SLOPE * x)
    if act_type == "tanh":
        return jnp.tanh(x)
    return x  # act_type is None


# ----------------------------------------------------------------------------
# Glue: im2col patch extraction (stride > 1 fallback only)
# ----------------------------------------------------------------------------
def _extract_patches(x_nhwc, k, s, p):
    x = jnp.pad(x_nhwc, ((0, 0), (p, p), (p, p), (0, 0)))
    B, H, W, C = x.shape
    Ho = (H - k) // s + 1
    Wo = (W - k) // s + 1
    cols = []
    for i in range(k):
        for j in range(k):
            cols.append(x[:, i:i + s * Ho:s, j:j + s * Wo:s, :])
    patches = jnp.concatenate(cols, axis=-1)          # [B, Ho, Wo, k*k*C]
    return patches.reshape(B * Ho * Wo, k * k * C), (B, Ho, Wo)


# ----------------------------------------------------------------------------
# Shared in-kernel conv body: shifted-window tap accumulation (f32 result)
# ----------------------------------------------------------------------------
def _conv_taps(x_ref, h_ref, w_ref, *, offsets, tm, kdim):
    if len(offsets) == 1 and offsets[0] == 0:
        # im2col fallback: single tap, window == row tile.
        return jnp.dot(x_ref[...], w_ref[0], preferred_element_type=jnp.float32)
    # Window = row tile + halo rows (held in f32 so the unaligned sublane
    # slices below hit the plain 32-bit relayout path).
    win = jnp.concatenate(
        [x_ref[...].astype(jnp.float32), h_ref[0].astype(jnp.float32)], axis=0)
    acc = None
    for t, d in enumerate(offsets):                   # Python-unrolled taps
        xs = lax.slice(win, (d, 0), (d + tm, kdim)).astype(jnp.bfloat16)
        part = jnp.dot(xs, w_ref[t], preferred_element_type=jnp.float32)
        acc = part if acc is None else acc + part
    return acc


# ----------------------------------------------------------------------------
# Kernel 1: conv + bias + activation (bn=False path)
# ----------------------------------------------------------------------------
def _conv_bias_act_kernel(x_ref, h_ref, w_ref, b_ref, o_ref, *,
                          offsets, tm, kdim, act_type):
    acc = _conv_taps(x_ref, h_ref, w_ref, offsets=offsets, tm=tm, kdim=kdim)
    acc = acc + b_ref[...]
    o_ref[...] = _apply_act(acc, act_type).astype(o_ref.dtype)


# ----------------------------------------------------------------------------
# Kernel 2a (BN pass 1): conv + per-tile partial per-channel sum / sumsq
#   - intermediate stored in bf16, stats taken from the f32 accumulator
#   - partial stats are per-tile outputs -> row grid axis stays "parallel"
# ----------------------------------------------------------------------------
def _conv_stats_kernel(x_ref, h_ref, w_ref, m_ref, y_ref, sum_ref, sq_ref, *,
                       offsets, tm, kdim):
    acc = _conv_taps(x_ref, h_ref, w_ref, offsets=offsets, tm=tm, kdim=kdim)
    y_ref[...] = acc.astype(y_ref.dtype)              # bf16 intermediate
    am = acc * m_ref[...]                             # mask out garbage rows
    sum_ref[0] = jnp.sum(am, axis=0, keepdims=True)
    sq_ref[0] = jnp.sum(acc * am, axis=0, keepdims=True)


# ----------------------------------------------------------------------------
# Kernel 2b (BN pass 2): y * scale + shift, then activation
# ----------------------------------------------------------------------------
def _scale_shift_act_kernel(y_ref, sc_ref, sh_ref, o_ref, *, act_type):
    x = y_ref[...].astype(jnp.float32) * sc_ref[...] + sh_ref[...]
    o_ref[...] = _apply_act(x, act_type).astype(o_ref.dtype)


# ----------------------------------------------------------------------------
# Tiling / VMEM sizing
# ----------------------------------------------------------------------------
def _pick_tiling(m_rows, kdim, cout_p, hb, n_taps, tile_m):
    def vmem_bytes(tm):
        stream = tm * kdim * 2 + hb * kdim * 2 + tm * 4       # rows + halo + mask
        outs = tm * cout_p * (4 + 2)                          # f32 out + bf16 mid
        weights = n_taps * kdim * cout_p * 2
        vectors = 6 * cout_p * 4
        scratch = 2 * (tm + hb) * kdim * 4 + tm * cout_p * 4  # f32 window/acc temps
        return 2 * (stream + outs + weights + vectors) + scratch

    tm = max(SUBLANE, min(tile_m, _round_up(m_rows, SUBLANE)))
    tm = _round_up(tm, SUBLANE)
    while tm > 256 and vmem_bytes(tm) > _VMEM_BUDGET:
        tm = _round_up(tm // 2, SUBLANE)
    # Balanced tiles: padding is at most 7 zero rows per tile.
    nt = max(1, _cdiv(m_rows, tm))
    tm = _round_up(_cdiv(m_rows, nt), SUBLANE)
    tm = max(tm, hb)                                   # halo must fit in one tile
    nt = _cdiv(m_rows, tm)
    return tm, nt, vmem_bytes(tm)


# ----------------------------------------------------------------------------
# Public forward: matches nn.Sequential(Conv2d, [BatchNorm2d], [act])
# ----------------------------------------------------------------------------
def conv_block_forward(x_nchw, params, *, kernel=3, stride=1, pad=0, bn=True,
                       act_type="relu", tile_m=1024):
    w_hwio = params["w"]                               # (k, k, Cin, Cout)
    k = kernel
    cin, cout = int(w_hwio.shape[2]), int(w_hwio.shape[3])
    cout_p = _round_up(cout, LANE)

    x = jnp.transpose(x_nchw, (0, 2, 3, 1)).astype(jnp.float32)   # NCHW -> NHWC
    B, H, W, _ = x.shape
    Ho = (H + 2 * pad - k) // stride + 1
    Wo = (W + 2 * pad - k) // stride + 1

    if stride == 1:
        # ---- shifted-window formulation: stream the padded input once ----
        Hp, Wp = H + 2 * pad, W + 2 * pad
        xp = jnp.pad(x, ((0, 0), (pad, pad), (pad, pad), (0, 0)))
        kdim = cin if cin < LANE else _round_up(cin, LANE)
        if kdim != cin:
            xp = jnp.pad(xp, ((0, 0), (0, 0), (0, 0), (0, kdim - cin)))
        rows = xp.reshape(B * Hp * Wp, kdim)
        m_rows = B * Hp * Wp
        offsets = [i * Wp + j for i in range(k) for j in range(k)]
        w_stack = jnp.pad(w_hwio.reshape(k * k, cin, cout),
                          ((0, 0), (0, kdim - cin), (0, cout_p - cout)))
        # Rows of the full (padded) grid that correspond to real conv outputs.
        vh = jnp.arange(Hp) < Ho
        vw = jnp.arange(Wp) < Wo
        valid = jnp.broadcast_to((vh[:, None] & vw[None, :])[None], (B, Hp, Wp))
        mask = valid.reshape(m_rows).astype(jnp.float32)
    else:
        # ---- strided conv: im2col patch-matmul fallback (single tap) ----
        patches, _ = _extract_patches(x, k, stride, pad)
        m_rows, k0 = patches.shape
        kdim = k0 if k0 < LANE else _round_up(k0, LANE)
        rows = jnp.pad(patches, ((0, 0), (0, kdim - k0)))
        offsets = [0]
        w_stack = jnp.pad(w_hwio.reshape(1, k0, cout),
                          ((0, 0), (0, kdim - k0), (0, cout_p - cout)))
        mask = jnp.ones((m_rows,), jnp.float32)

    n_taps = len(offsets)
    hb = _round_up(max(max(offsets), 1), SUBLANE)      # halo rows per tile
    tm, n_tiles, est = _pick_tiling(m_rows, kdim, cout_p, hb, n_taps, tile_m)
    rows_pad = n_tiles * tm
    vmem_limit = int(min(max(est + 8 * 2**20, 32 * 2**20), 48 * 2**20))

    # Streamed operands: bf16 rows (+ one extra zero tile so the halo slice is
    # in-bounds), a small per-tile halo side-array, and the validity mask.
    rows_b = jnp.pad(rows, ((0, rows_pad + tm - m_rows), (0, 0))).astype(jnp.bfloat16)
    halo = rows_b[tm:tm + rows_pad].reshape(n_tiles, tm, kdim)[:, :hb, :]
    mask = jnp.pad(mask, (0, rows_pad - m_rows)).reshape(rows_pad, 1)
    w_stack = w_stack.astype(jnp.bfloat16)

    x_spec = pl.BlockSpec((tm, kdim), lambda i: (i, 0))
    h_spec = pl.BlockSpec((1, hb, kdim), lambda i: (i, 0, 0))
    w_spec = pl.BlockSpec((n_taps, kdim, cout_p), lambda i: (0, 0, 0))
    vec_spec = pl.BlockSpec((1, cout_p), lambda i: (0, 0))
    mask_spec = pl.BlockSpec((tm, 1), lambda i: (i, 0))
    row_spec = pl.BlockSpec((tm, cout_p), lambda i: (i, 0))
    stat_spec = pl.BlockSpec((1, 1, cout_p), lambda i: (i, 0, 0))
    grid = (n_tiles,)
    cparams = pltpu.CompilerParams(dimension_semantics=("parallel",),
                                   vmem_limit_bytes=vmem_limit)

    if not bn:
        bias = jnp.pad(params["b"].astype(jnp.float32),
                       (0, cout_p - cout)).reshape(1, cout_p)
        out = pl.pallas_call(
            functools.partial(_conv_bias_act_kernel, offsets=offsets, tm=tm,
                              kdim=kdim, act_type=act_type),
            out_shape=jax.ShapeDtypeStruct((rows_pad, cout_p), jnp.float32),
            grid=grid,
            in_specs=[x_spec, h_spec, w_spec, vec_spec],
            out_specs=row_spec,
            compiler_params=cparams,
        )(rows_b, halo, w_stack, bias)
    else:
        # Pass 1: conv matmul + per-tile partial channel stats.
        # (Conv bias is dropped: it is exactly cancelled by training-mode BN
        #  mean subtraction; masked rows contribute 0 to the statistics.)
        conv_b16, psum, psq = pl.pallas_call(
            functools.partial(_conv_stats_kernel, offsets=offsets, tm=tm, kdim=kdim),
            out_shape=(
                jax.ShapeDtypeStruct((rows_pad, cout_p), jnp.bfloat16),
                jax.ShapeDtypeStruct((n_tiles, 1, cout_p), jnp.float32),
                jax.ShapeDtypeStruct((n_tiles, 1, cout_p), jnp.float32),
            ),
            grid=grid,
            in_specs=[x_spec, h_spec, w_spec, mask_spec],
            out_specs=(row_spec, stat_spec, stat_spec),
            compiler_params=cparams,
        )(rows_b, halo, w_stack, mask)

        # Tiny cross-tile reduction + scale/shift precompute (JAX glue).
        count = float(B * Ho * Wo)
        mean = jnp.sum(psum, axis=0) / count                    # (1, cout_p)
        # TODO(synk): E[x^2]-E[x]^2 can lose precision if |mean| >> std; a
        #             centered second pass would be more robust if needed.
        var = jnp.maximum(jnp.sum(psq, axis=0) / count - mean * mean, 0.0)
        gamma = jnp.pad(params["gamma"].astype(jnp.float32), (0, cout_p - cout))
        beta = jnp.pad(params["beta"].astype(jnp.float32), (0, cout_p - cout))
        scale = gamma.reshape(1, cout_p) * lax.rsqrt(var + BN_EPS)
        shift = beta.reshape(1, cout_p) - mean * scale

        # Pass 2: one FMA + activation per tile on the bf16 intermediate.
        out = pl.pallas_call(
            functools.partial(_scale_shift_act_kernel, act_type=act_type),
            out_shape=jax.ShapeDtypeStruct((rows_pad, cout_p), jnp.float32),
            grid=grid,
            in_specs=[row_spec, vec_spec, vec_spec],
            out_specs=row_spec,
            compiler_params=cparams,
        )(conv_b16, scale, shift)

    if stride == 1:
        out = out[:m_rows].reshape(B, H + 2 * pad, W + 2 * pad, cout_p)
        out = out[:, :Ho, :Wo, :cout]
    else:
        out = out[:m_rows].reshape(B, Ho, Wo, cout_p)[..., :cout]
    return jnp.transpose(out, (0, 3, 1, 2))                     # NHWC -> NCHW


# ----------------------------------------------------------------------------
# Pure-JAX reference, mirroring the kernel's intentional numerics choices
# (bf16 conv operands, bf16 storage of the BN-path conv intermediate).
# ----------------------------------------------------------------------------
def conv_block_reference(x_nchw, params, *, kernel, stride, pad, bn, act_type):
    x = jnp.transpose(x_nchw, (0, 2, 3, 1)).astype(jnp.float32)
    patches, (B, Ho, Wo) = _extract_patches(x, kernel, stride, pad)
    cout = params["w"].shape[3]
    wmat = params["w"].reshape(patches.shape[1], cout)
    y = jnp.dot(patches.astype(jnp.bfloat16), wmat.astype(jnp.bfloat16),
                preferred_element_type=jnp.float32)
    if bn:
        mean = jnp.mean(y, axis=0, keepdims=True)
        var = jnp.mean(jnp.square(y - mean), axis=0, keepdims=True)
        yq = y.astype(jnp.bfloat16).astype(jnp.float32)   # bf16 intermediate
        y = (yq - mean) * lax.rsqrt(var + BN_EPS)
        y = y * params["gamma"][None, :] + params["beta"][None, :]
    else:
        y = y + params["b"][None, :]
    y = _apply_act(y, act_type)
    return jnp.transpose(y.reshape(B, Ho, Wo, cout), (0, 3, 1, 2))


if __name__ == "__main__":
    key = jax.random.PRNGKey(0)
    k_x, k_w, k_b, k_g, k_be = jax.random.split(key, 5)

    B, Cin, H, W = 2, 4, 16, 16
    Cout, kern = 32, 3

    x = jax.random.normal(k_x, (B, Cin, H, W), jnp.float32)
    params = {
        "w": jax.random.normal(k_w, (kern, kern, Cin, Cout), jnp.float32) * 0.05,
        "b": jax.random.normal(k_b, (Cout,), jnp.float32) * 0.05,
        "gamma": 1.0 + 0.1 * jax.random.normal(k_g, (Cout,), jnp.float32),
        "beta": 0.1 * jax.random.normal(k_be, (Cout,), jnp.float32),
    }

    configs = [
        dict(kernel=kern, stride=1, pad=1, bn=True, act_type="relu"),
        dict(kernel=kern, stride=1, pad=1, bn=True, act_type="leakyrelu"),
        dict(kernel=kern, stride=2, pad=1, bn=False, act_type="tanh"),
        dict(kernel=kern, stride=1, pad=0, bn=False, act_type=None),
    ]
    for cfg in configs:
        fwd = jax.jit(functools.partial(conv_block_forward, **cfg))
        out = fwd(x, params)
        jax.block_until_ready(out)

        ref = conv_block_reference(x, params, **cfg)
        Ho = (H + 2 * cfg["pad"] - cfg["kernel"]) // cfg["stride"] + 1
        assert out.shape == (B, Cout, Ho, Ho), (out.shape, cfg)
        assert bool(jnp.all(jnp.isfinite(out))), cfg
        assert bool(jnp.allclose(out, ref, atol=5e-3, rtol=5e-3)), cfg

    print("KERNEL_OK")
</pallas_src>

<mosaic_0001>
module attributes {stable_mosaic.version = 11 : i64} {
  func.func @_scale_shift_act_kernel(%arg0: i32, %arg1: memref<648x128xbf16, #tpu.memory_space<vmem>>, %arg2: memref<1x128xf32, #tpu.memory_space<vmem>>, %arg3: memref<1x128xf32, #tpu.memory_space<vmem>>, %arg4: memref<648x128xf32, #tpu.memory_space<vmem>>) attributes {dimension_semantics = [#tpu.dimension_semantics<parallel>], iteration_bounds = array<i64: 1>, scalar_prefetch = 0 : i64, scratch_operands = 0 : i64, tpu.core_type = #tpu.core_type<tc>, window_params = [{transform_indices = @transform_0, window_bounds = array<i64: 648, 128>}, {pipeline_mode = #tpu.pipeline_mode<synchronous>, transform_indices = @transform_1, window_bounds = array<i64: 1, 128>}, {pipeline_mode = #tpu.pipeline_mode<synchronous>, transform_indices = @transform_2, window_bounds = array<i64: 1, 128>}, {transform_indices = @transform_3, window_bounds = array<i64: 648, 128>}]} {
    %c0 = arith.constant 0 : index
    %c0_0 = arith.constant 0 : index
    %0 = vector.load %arg1[%c0, %c0_0] : memref<648x128xbf16, #tpu.memory_space<vmem>>, vector<648x128xbf16>
    %1 = arith.extf %0 : vector<648x128xbf16> to vector<648x128xf32>
    %c0_1 = arith.constant 0 : index
    %c0_2 = arith.constant 0 : index
    %2 = vector.load %arg2[%c0_1, %c0_2] : memref<1x128xf32, #tpu.memory_space<vmem>>, vector<1x128xf32>
    %3 = vector.broadcast %2 : vector<1x128xf32> to vector<648x128xf32>
    %4 = arith.mulf %1, %3 : vector<648x128xf32>
    %c0_3 = arith.constant 0 : index
    %c0_4 = arith.constant 0 : index
    %5 = vector.load %arg3[%c0_3, %c0_4] : memref<1x128xf32, #tpu.memory_space<vmem>>, vector<1x128xf32>
    %6 = vector.broadcast %5 : vector<1x128xf32> to vector<648x128xf32>
    %7 = arith.addf %4, %6 : vector<648x128xf32>
    %cst = arith.constant 0.000000e+00 : f32
    %8 = vector.broadcast %cst : f32 to vector<648x128xf32>
    %9 = arith.maximumf %7, %8 : vector<648x128xf32>
    %c0_5 = arith.constant 0 : index
    %c0_6 = arith.constant 0 : index
    %10 = vector.load %arg4[%c0_5, %c0_6] : memref<648x128xf32, #tpu.memory_space<vmem>>, vector<648x128xf32>
    tpu.vector_store %arg4[%c0_5, %c0_6], %9 {strides = array<i32>} : memref<648x128xf32, #tpu.memory_space<vmem>>, vector<648x128xf32>,
    return
  }
  func.func @transform_0(%arg0: i32) -> (i32, i32) {
    %c0_i32 = arith.constant 0 : i32
    %c0_i32_0 = arith.constant 0 : i32
    return %arg0, %c0_i32 : i32, i32
  }
  func.func @transform_1(%arg0: i32) -> (i32, i32) {
    %c0_i32 = arith.constant 0 : i32
    %c0_i32_0 = arith.constant 0 : i32
    %c0_i32_1 = arith.constant 0 : i32
    return %c0_i32, %c0_i32_0 : i32, i32
  }
  func.func @transform_2(%arg0: i32) -> (i32, i32) {
    %c0_i32 = arith.constant 0 : i32
    %c0_i32_0 = arith.constant 0 : i32
    %c0_i32_1 = arith.constant 0 : i32
    return %c0_i32, %c0_i32_0 : i32, i32
  }
  func.func @transform_3(%arg0: i32) -> (i32, i32) {
    %c0_i32 = arith.constant 0 : i32
    %c0_i32_0 = arith.constant 0 : i32
    return %arg0, %c0_i32 : i32, i32
  }
}

module attributes {stable_mosaic.version = 11 : i64} {
  func.func @_conv_stats_kernel(%arg0: i32, %arg1: memref<648x4xbf16, #tpu.memory_space<vmem>>, %arg2: memref<1x40x4xbf16, #tpu.memory_space<vmem>>, %arg3: memref<9x4x128xbf16, #tpu.memory_space<vmem>>, %arg4: memref<648x1xf32, #tpu.memory_space<vmem>>, %arg5: memref<648x128xbf16, #tpu.memory_space<vmem>>, %arg6: memref<1x1x128xf32, #tpu.memory_space<vmem>>, %arg7: memref<1x1x128xf32, #tpu.memory_space<vmem>>) attributes {dimension_semantics = [#tpu.dimension_semantics<parallel>], iteration_bounds = array<i64: 1>, scalar_prefetch = 0 : i64, scratch_operands = 0 : i64, tpu.core_type = #tpu.core_type<tc>, window_params = [{transform_indices = @transform_0, window_bounds = array<i64: 648, 4>}, {transform_indices = @transform_1, window_bounds = array<i64: 1, 40, 4>}, {pipeline_mode = #tpu.pipeline_mode<synchronous>, transform_indices = @transform_2, window_bounds = array<i64: 9, 4, 128>}, {transform_indices = @transform_3, window_bounds = array<i64: 648, 1>}, {transform_indices = @transform_4, window_bounds = array<i64: 648, 128>}, {transform_indices = @transform_5, window_bounds = array<i64: 1, 1, 128>}, {transform_indices = @transform_6, window_bounds = array<i64: 1, 1, 128>}]} {
    %c0 = arith.constant 0 : index
    %c0_0 = arith.constant 0 : index
    %0 = vector.load %arg1[%c0, %c0_0] : memref<648x4xbf16, #tpu.memory_space<vmem>>, vector<648x4xbf16>
    %1 = arith.extf %0 : vector<648x4xbf16> to vector<648x4xf32>
    %c0_1 = arith.constant 0 : index
    %c0_2 = arith.constant 0 : index
    %c0_3 = arith.constant 0 : index
    %2 = vector.load %arg2[%c0_1, %c0_2, %c0_3] : memref<1x40x4xbf16, #tpu.memory_space<vmem>>, vector<1x40x4xbf16>
    %3 = vector.shape_cast %2 : vector<1x40x4xbf16> to vector<40x4xbf16>
    %4 = arith.extf %3 : vector<40x4xbf16> to vector<40x4xf32>
    %5 = tpu.concatenate %1, %4 in 0 : vector<648x4xf32>, vector<40x4xf32> -> vector<688x4xf32>
    %6 = vector.extract_strided_slice %5 {offsets = [0, 0], sizes = [648, 4], strides = [1, 1]} : vector<688x4xf32> to vector<648x4xf32>
    %7 = arith.truncf %6 : vector<648x4xf32> to vector<648x4xbf16>
    %c0_4 = arith.constant 0 : index
    %c0_5 = arith.constant 0 : index
    %c0_6 = arith.constant 0 : index
    %8 = vector.load %arg3[%c0_4, %c0_5, %c0_6] : memref<9x4x128xbf16, #tpu.memory_space<vmem>>, vector<1x4x128xbf16>
    %9 = vector.shape_cast %8 : vector<1x4x128xbf16> to vector<4x128xbf16>
    %cst = arith.constant dense<0.000000e+00> : vector<648x128xf32>
    %10 = tpu.matmul %7, %9, %cst {dimension_numbers = #tpu.dot_dimension_numbers<[1], [0], [0], [1], [0, 0, 1, 1], [], []>} : vector<648x4xbf16>, vector<4x128xbf16>, vector<648x128xf32> -> vector<648x128xf32>
    %11 = vector.extract_strided_slice %5 {offsets = [1, 0], sizes = [648, 4], strides = [1, 1]} : vector<688x4xf32> to vector<648x4xf32>
    %12 = arith.truncf %11 : vector<648x4xf32> to vector<648x4xbf16>
    %c1 = arith.constant 1 : index
    %c0_7 = arith.constant 0 : index
    %c0_8 = arith.constant 0 : index
    %13 = vector.load %arg3[%c1, %c0_7, %c0_8] : memref<9x4x128xbf16, #tpu.memory_space<vmem>>, vector<1x4x128xbf16>
    %14 = vector.shape_cast %13 : vector<1x4x128xbf16> to vector<4x128xbf16>
    %cst_9 = arith.constant dense<0.000000e+00> : vector<648x128xf32>
    %15 = tpu.matmul %12, %14, %cst_9 {dimension_numbers = #tpu.dot_dimension_numbers<[1], [0], [0], [1], [0, 0, 1, 1], [], []>} : vector<648x4xbf16>, vector<4x128xbf16>, vector<648x128xf32> -> vector<648x128xf32>
    %16 = arith.addf %10, %15 : vector<648x128xf32>
    %17 = vector.extract_strided_slice %5 {offsets = [2, 0], sizes = [648, 4], strides = [1, 1]} : vector<688x4xf32> to vector<648x4xf32>
    %18 = arith.truncf %17 : vector<648x4xf32> to vector<648x4xbf16>
    %c2 = arith.constant 2 : index
    %c0_10 = arith.constant 0 : index
    %c0_11 = arith.constant 0 : index
    %19 = vector.load %arg3[%c2, %c0_10, %c0_11] : memref<9x4x128xbf16, #tpu.memory_space<vmem>>, vector<1x4x128xbf16>
    %20 = vector.shape_cast %19 : vector<1x4x128xbf16> to vector<4x128xbf16>
    %cst_12 = arith.constant dense<0.000000e+00> : vector<648x128xf32>
    %21 = tpu.matmul %18, %20, %cst_12 {dimension_numbers = #tpu.dot_dimension_numbers<[1], [0], [0], [1], [0, 0, 1, 1], [], []>} : vector<648x4xbf16>, vector<4x128xbf16>, vector<648x128xf32> -> vector<648x128xf32>
    %22 = arith.addf %16, %21 : vector<648x128xf32>
    %23 = vector.extract_strided_slice %5 {offsets = [18, 0], sizes = [648, 4], strides = [1, 1]} : vector<688x4xf32> to vector<648x4xf32>
    %24 = arith.truncf %23 : vector<648x4xf32> to vector<648x4xbf16>
    %c3 = arith.constant 3 : index
    %c0_13 = arith.constant 0 : index
    %c0_14 = arith.constant 0 : index
    %25 = vector.load %arg3[%c3, %c0_13, %c0_14] : memref<9x4x128xbf16, #tpu.memory_space<vmem>>, vector<1x4x128xbf16>
    %26 = vector.shape_cast %25 : vector<1x4x128xbf16> to vector<4x128xbf16>
    %cst_15 = arith.constant dense<0.000000e+00> : vector<648x128xf32>
    %27 = tpu.matmul %24, %26, %cst_15 {dimension_numbers = #tpu.dot_dimension_numbers<[1], [0], [0], [1], [0, 0, 1, 1], [], []>} : vector<648x4xbf16>, vector<4x128xbf16>, vector<648x128xf32> -> vector<648x128xf32>
    %28 = arith.addf %22, %27 : vector<648x128xf32>
    %29 = vector.extract_strided_slice %5 {offsets = [19, 0], sizes = [648, 4], strides = [1, 1]} : vector<688x4xf32> to vector<648x4xf32>
    %30 = arith.truncf %29 : vector<648x4xf32> to vector<648x4xbf16>
    %c4 = arith.constant 4 : index
    %c0_16 = arith.constant 0 : index
    %c0_17 = arith.constant 0 : index
    %31 = vector.load %arg3[%c4, %c0_16, %c0_17] : memref<9x4x128xbf16, #tpu.memory_space<vmem>>, vector<1x4x128xbf16>
    %32 = vector.shape_cast %31 : vector<1x4x128xbf16> to vector<4x128xbf16>
    %cst_18 = arith.constant dense<0.000000e+00> : vector<648x128xf32>
    %33 = tpu.matmul %30, %32, %cst_18 {dimension_numbers = #tpu.dot_dimension_numbers<[1], [0], [0], [1], [0, 0, 1, 1], [], []>} : vector<648x4xbf16>, vector<4x128xbf16>, vector<648x128xf32> -> vector<648x128xf32>
    %34 = arith.addf %28, %33 : vector<648x128xf32>
    %35 = vector.extract_strided_slice %5 {offsets = [20, 0], sizes = [648, 4], strides = [1, 1]} : vector<688x4xf32> to vector<648x4xf32>
    %36 = arith.truncf %35 : vector<648x4xf32> to vector<648x4xbf16>
    %c5 = arith.constant 5 : index
    %c0_19 = arith.constant 0 : index
    %c0_20 = arith.constant 0 : index
    %37 = vector.load %arg3[%c5, %c0_19, %c0_20] : memref<9x4x128xbf16, #tpu.memory_space<vmem>>, vector<1x4x128xbf16>
    %38 = vector.shape_cast %37 : vector<1x4x128xbf16> to vector<4x128xbf16>
    %cst_21 = arith.constant dense<0.000000e+00> : vector<648x128xf32>
    %39 = tpu.matmul %36, %38, %cst_21 {dimension_numbers = #tpu.dot_dimension_numbers<[1], [0], [0], [1], [0, 0, 1, 1], [], []>} : vector<648x4xbf16>, vector<4x128xbf16>, vector<648x128xf32> -> vector<648x128xf32>
    %40 = arith.addf %34, %39 : vector<648x128xf32>
    %41 = vector.extract_strided_slice %5 {offsets = [36, 0], sizes = [648, 4], strides = [1, 1]} : vector<688x4xf32> to vector<648x4xf32>
    %42 = arith.truncf %41 : vector<648x4xf32> to vector<648x4xbf16>
    %c6 = arith.constant 6 : index
    %c0_22 = arith.constant 0 : index
    %c0_23 = arith.constant 0 : index
    %43 = vector.load %arg3[%c6, %c0_22, %c0_23] : memref<9x4x128xbf16, #tpu.memory_space<vmem>>, vector<1x4x128xbf16>
    %44 = vector.shape_cast %43 : vector<1x4x128xbf16> to vector<4x128xbf16>
    %cst_24 = arith.constant dense<0.000000e+00> : vector<648x128xf32>
    %45 = tpu.matmul %42, %44, %cst_24 {dimension_numbers = #tpu.dot_dimension_numbers<[1], [0], [0], [1], [0, 0, 1, 1], [], []>} : vector<648x4xbf16>, vector<4x128xbf16>, vector<648x128xf32> -> vector<648x128xf32>
    %46 = arith.addf %40, %45 : vector<648x128xf32>
    %47 = vector.extract_strided_slice %5 {offsets = [37, 0], sizes = [648, 4], strides = [1, 1]} : vector<688x4xf32> to vector<648x4xf32>
    %48 = arith.truncf %47 : vector<648x4xf32> to vector<648x4xbf16>
    %c7 = arith.constant 7 : index
    %c0_25 = arith.constant 0 : index
    %c0_26 = arith.constant 0 : index
    %49 = vector.load %arg3[%c7, %c0_25, %c0_26] : memref<9x4x128xbf16, #tpu.memory_space<vmem>>, vector<1x4x128xbf16>
    %50 = vector.shape_cast %49 : vector<1x4x128xbf16> to vector<4x128xbf16>
    %cst_27 = arith.constant dense<0.000000e+00> : vector<648x128xf32>
    %51 = tpu.matmul %48, %50, %cst_27 {dimension_numbers = #tpu.dot_dimension_numbers<[1], [0], [0], [1], [0, 0, 1, 1], [], []>} : vector<648x4xbf16>, vector<4x128xbf16>, vector<648x128xf32> -> vector<648x128xf32>
    %52 = arith.addf %46, %51 : vector<648x128xf32>
    %53 = vector.extract_strided_slice %5 {offsets = [38, 0], sizes = [648, 4], strides = [1, 1]} : vector<688x4xf32> to vector<648x4xf32>
    %54 = arith.truncf %53 : vector<648x4xf32> to vector<648x4xbf16>
    %c8 = arith.constant 8 : index
    %c0_28 = arith.constant 0 : index
    %c0_29 = arith.constant 0 : index
    %55 = vector.load %arg3[%c8, %c0_28, %c0_29] : memref<9x4x128xbf16, #tpu.memory_space<vmem>>, vector<1x4x128xbf16>
    %56 = vector.shape_cast %55 : vector<1x4x128xbf16> to vector<4x128xbf16>
    %cst_30 = arith.constant dense<0.000000e+00> : vector<648x128xf32>
    %57 = tpu.matmul %54, %56, %cst_30 {dimension_numbers = #tpu.dot_dimension_numbers<[1], [0], [0], [1], [0, 0, 1, 1], [], []>} : vector<648x4xbf16>, vector<4x128xbf16>, vector<648x128xf32> -> vector<648x128xf32>
    %58 = arith.addf %52, %57 : vector<648x128xf32>
    %59 = arith.truncf %58 : vector<648x128xf32> to vector<648x128xbf16>
    %c0_31 = arith.constant 0 : index
    %c0_32 = arith.constant 0 : index
    %60 = vector.load %arg5[%c0_31, %c0_32] : memref<648x128xbf16, #tpu.memory_space<vmem>>, vector<648x128xbf16>
    tpu.vector_store %arg5[%c0_31, %c0_32], %59 {strides = array<i32>} : memref<648x128xbf16, #tpu.memory_space<vmem>>, vector<648x128xbf16>,
    %c0_33 = arith.constant 0 : index
    %c0_34 = arith.constant 0 : index
    %61 = vector.load %arg4[%c0_33, %c0_34] : memref<648x1xf32, #tpu.memory_space<vmem>>, vector<648x1xf32>
    %62 = vector.broadcast %61 : vector<648x1xf32> to vector<648x128xf32>
    %63 = arith.mulf %58, %62 : vector<648x128xf32>
    %cst_35 = arith.constant dense<0.000000e+00> : vector<128xf32>
    %64 = vector.multi_reduction <add>, %63, %cst_35 [0] : vector<648x128xf32> to vector<128xf32>
    %65 = vector.shape_cast %64 : vector<128xf32> to vector<1x128xf32>
    %c0_36 = arith.constant 0 : index
    %c0_37 = arith.constant 0 : index
    %c0_38 = arith.constant 0 : index
    %66 = vector.load %arg6[%c0_36, %c0_37, %c0_38] : memref<1x1x128xf32, #tpu.memory_space<vmem>>, vector<1x1x128xf32>
    %67 = vector.shape_cast %66 : vector<1x1x128xf32> to vector<1x128xf32>
    %68 = vector.shape_cast %65 : vector<1x128xf32> to vector<1x1x128xf32>
    tpu.vector_store %arg6[%c0_36, %c0_37, %c0_38], %68 {strides = array<i32>} : memref<1x1x128xf32, #tpu.memory_space<vmem>>, vector<1x1x128xf32>,
    %69 = arith.mulf %58, %63 : vector<648x128xf32>
    %cst_39 = arith.constant dense<0.000000e+00> : vector<128xf32>
    %70 = vector.multi_reduction <add>, %69, %cst_39 [0] : vector<648x128xf32> to vector<128xf32>
    %71 = vector.shape_cast %70 : vector<128xf32> to vector<1x128xf32>
    %c0_40 = arith.constant 0 : index
    %c0_41 = arith.constant 0 : index
    %c0_42 = arith.constant 0 : index
    %72 = vector.load %arg7[%c0_40, %c0_41, %c0_42] : memref<1x1x128xf32, #tpu.memory_space<vmem>>, vector<1x1x128xf32>
    %73 = vector.shape_cast %72 : vector<1x1x128xf32> to vector<1x128xf32>
    %74 = vector.shape_cast %71 : vector<1x128xf32> to vector<1x1x128xf32>
    tpu.vector_store %arg7[%c0_40, %c0_41, %c0_42], %74 {strides = array<i32>} : memref<1x1x128xf32, #tpu.memory_space<vmem>>, vector<1x1x128xf32>,
    return
  }
  func.func @transform_0(%arg0: i32) -> (i32, i32) {
    %c0_i32 = arith.constant 0 : i32
    %c0_i32_0 = arith.constant 0 : i32
    return %arg0, %c0_i32 : i32, i32
  }
  func.func @transform_1(%arg0: i32) -> (i32, i32, i32) {
    %c0_i32 = arith.constant 0 : i32
    %c0_i32_0 = arith.constant 0 : i32
    %c0_i32_1 = arith.constant 0 : i32
    return %arg0, %c0_i32, %c0_i32_0 : i32, i32, i32
  }
  func.func @transform_2(%arg0: i32) -> (i32, i32, i32) {
    %c0_i32 = arith.constant 0 : i32
    %c0_i32_0 = arith.constant 0 : i32
    %c0_i32_1 = arith.constant 0 : i32
    %c0_i32_2 = arith.constant 0 : i32
    return %c0_i32, %c0_i32_0, %c0_i32_1 : i32, i32, i32
  }
  func.func @transform_3(%arg0: i32) -> (i32, i32) {
    %c0_i32 = arith.constant 0 : i32
    %c0_i32_0 = arith.constant 0 : i32
    return %arg0, %c0_i32 : i32, i32
  }
  func.func @transform_4(%arg0: i32) -> (i32, i32) {
    %c0_i32 = arith.constant 0 : i32
    %c0_i32_0 = arith.constant 0 : i32
    return %arg0, %c0_i32 : i32, i32
  }
  func.func @transform_5(%arg0: i32) -> (i32, i32, i32) {
    %c0_i32 = arith.constant 0 : i32
    %c0_i32_0 = arith.constant 0 : i32
    %c0_i32_1 = arith.constant 0 : i32
    return %arg0, %c0_i32, %c0_i32_0 : i32, i32, i32
  }
  func.func @transform_6(%arg0: i32) -> (i32, i32, i32) {
    %c0_i32 = arith.constant 0 : i32
    %c0_i32_0 = arith.constant 0 : i32
    %c0_i32_1 = arith.constant 0 : i32
    return %arg0, %c0_i32, %c0_i32_0 : i32, i32, i32
  }
}

</mosaic_0001>

<bundles_post_ra>
// kernel: conv_block_forward.3
= control target key start
LH: loop header
LB: loop body
LE: loop exit
PB: predicated region body
PF: predicated region fallthrough
CT: control target
= control target key end

     0   :  { %s1271_s0 = inlined_call_operand.vmem [shape: bf16[648,128], index: 0, kind: input, shape index: {}]   ;;  %s1272_s1 = inlined_call_operand.vmem [shape: f32[1,128], index: 1, kind: input, shape index: {}]   ;;  %s1273_s2 = inlined_call_operand.vmem [shape: f32[1,128], index: 2, kind: input, shape index: {}]   ;;  %s1274_s3 = inlined_call_operand.vmem [shape: f32[648,128], index: 3, kind: output, shape index: {}]  }
   0x1   :  { %v513_v0 = vld [vmem:[%s1271_s0] sm:$0xff]   ;;  %v672_v5 = vld [vmem:[%s1271_s0 + $0x8] sm:$0xff]   ;;  %v673_v8 = vld [vmem:[%s1271_s0 + $0x10] sm:$0xff]  }
   0x2   :  { %v739_v1 = vld [vmem:[%s1272_s1] ss:$0 sm:$0xff]  ;;  %v514_v2 = vunpack.c.l.bf16 %v513_v0  ;;  %v515_v4 = vunpack.c.h.bf16 %v513_v0  ;;  %v518_v6 = vunpack.c.l.bf16 %v672_v5  ;;  %v519_v7 = vunpack.c.h.bf16 %v672_v5  ;;  %v674_v9 = vld [vmem:[%s1271_s0 + $0x18] sm:$0xff]   ;;  %v676_v31 = vld [vmem:[%s1271_s0 + $0x28] sm:$0xff]  }
   0x3   :  { %v744_v3 = vld [vmem:[%s1273_s2] ss:$0 sm:$0xff]  ;;  %v522_v12 = vunpack.c.l.bf16 %v673_v8  ;;  %v523_v13 = vunpack.c.h.bf16 %v673_v8  ;;  %v526_v16 = vunpack.c.l.bf16 %v674_v9  ;;  %v527_v17 = vunpack.c.h.bf16 %v674_v9  ;;  %v677_v36 = vld [vmem:[%s1271_s0 + $0x30] sm:$0xff]   ;;  %v678_v41 = vld [vmem:[%s1271_s0 + $0x38] sm:$0xff]  }
   0x4   :  { %v180_v10 = vmul.f32 %v739_v1, %v514_v2  ;;  %v181_v11 = vmul.f32 %v739_v1, %v515_v4  ;;  %v182_v14 = vmul.f32 %v739_v1, %v518_v6  ;;  %v183_v15 = vmul.f32 %v739_v1, %v519_v7  ;;  %v675_v26 = vld [vmem:[%s1271_s0 + $0x20] sm:$0xff]   ;;  %v680_v5 = vld [vmem:[%s1271_s0 + $0x48] sm:$0xff]  }
   0x5   :  { %v184_v20 = vmul.f32 %v739_v1, %v522_v12  ;;  %v185_v21 = vmul.f32 %v739_v1, %v523_v13  ;;  %v186_v24 = vmul.f32 %v739_v1, %v526_v16  ;;  %v187_v25 = vmul.f32 %v739_v1, %v527_v17  ;;  %v679_v62 = vld [vmem:[%s1271_s0 + $0x40] sm:$0xff]  }
   0x6   :  { %v265_v18 = vadd.f32 %v744_v3, %v180_v10  ;;  %v266_v19 = vadd.f32 %v744_v3, %v181_v11  ;;  %v267_v22 = vadd.f32 %v744_v3, %v182_v14  ;;  %v268_v23 = vadd.f32 %v744_v3, %v183_v15  ;;  %v681_v10 = vld [vmem:[%s1271_s0 + $0x50] sm:$0xff]   ;;  %v682_v15 = vld [vmem:[%s1271_s0 + $0x58] sm:$0xff]  }
   0x7   :  { %v269_v29 = vadd.f32 %v744_v3, %v184_v20  ;;  %v270_v30 = vadd.f32 %v744_v3, %v185_v21  ;;  %v271_v34 = vadd.f32 %v744_v3, %v186_v24  ;;  %v272_v35 = vadd.f32 %v744_v3, %v187_v25 }
   0x8   :  { %v346_v27 = vmax.f32 %v265_v18, 0.0  ;;  %v347_v28 = vmax.f32 %v266_v19, 0.0  ;;  %v348_v32 = vmax.f32 %v267_v22, 0.0  ;;  %v349_v33 = vmax.f32 %v268_v23, 0.0 }
   0x9   :  { %v350_v37 = vmax.f32 %v269_v29, 0.0  ;;  %v351_v38 = vmax.f32 %v270_v30, 0.0  ;;  %v530_v39 = vunpack.c.l.bf16 %v675_v26  ;;  %v531_v40 = vunpack.c.h.bf16 %v675_v26 }
   0xa   :  { %427 = vst [vmem:[%s1274_s3] sm:$0xff] %v346_v27  ;;  %v352_v42 = vmax.f32 %v271_v34, 0.0  ;;  %v353_v43 = vmax.f32 %v272_v35, 0.0  ;;  %v534_v44 = vunpack.c.l.bf16 %v676_v31  ;;  %v535_v45 = vunpack.c.h.bf16 %v676_v31 }
   0xb   :  { %428 = vst [vmem:[%s1274_s3 + $0x8] sm:$0xff] %v347_v28  ;;  %v188_v46 = vmul.f32 %v739_v1, %v530_v39  ;;  %v189_v47 = vmul.f32 %v739_v1, %v531_v40  ;;  %v538_v48 = vunpack.c.l.bf16 %v677_v36  ;;  %v539_v49 = vunpack.c.h.bf16 %v677_v36  ;;  %v683_v36 = vld [vmem:[%s1271_s0 + $0x60] sm:$0xff]  }
   0xc   :  { %429 = vst [vmem:[%s1274_s3 + $0x10] sm:$0xff] %v348_v32  ;;  %v190_v50 = vmul.f32 %v739_v1, %v534_v44  ;;  %v191_v51 = vmul.f32 %v739_v1, %v535_v45  ;;  %v542_v52 = vunpack.c.l.bf16 %v678_v41  ;;  %v543_v53 = vunpack.c.h.bf16 %v678_v41  ;;  %v684_v41 = vld [vmem:[%s1271_s0 + $0x68] sm:$0xff]  }
   0xd   :  { %430 = vst [vmem:[%s1274_s3 + $0x18] sm:$0xff] %v349_v33  ;;  %v273_v54 = vadd.f32 %v744_v3, %v188_v46  ;;  %v274_v55 = vadd.f32 %v744_v3, %v189_v47  ;;  %v192_v56 = vmul.f32 %v739_v1, %v538_v48  ;;  %v193_v57 = vmul.f32 %v739_v1, %v539_v49  ;;  %v685_v46 = vld [vmem:[%s1271_s0 + $0x70] sm:$0xff]  }
   0xe   :  { %431 = vst [vmem:[%s1274_s3 + $0x20] sm:$0xff] %v350_v37  ;;  %v275_v58 = vadd.f32 %v744_v3, %v190_v50  ;;  %v276_v59 = vadd.f32 %v744_v3, %v191_v51  ;;  %v194_v60 = vmul.f32 %v739_v1, %v542_v52  ;;  %v195_v61 = vmul.f32 %v739_v1, %v543_v53  ;;  %v686_v51 = vld [vmem:[%s1271_s0 + $0x78] sm:$0xff]  }
   0xf   :  { %432 = vst [vmem:[%s1274_s3 + $0x28] sm:$0xff] %v351_v38  ;;  %v354_v63 = vmax.f32 %v273_v54, 0.0  ;;  %v355_v0 = vmax.f32 %v274_v55, 0.0  ;;  %v277_v2 = vadd.f32 %v744_v3, %v192_v56  ;;  %v278_v4 = vadd.f32 %v744_v3, %v193_v57 }
  0x10   :  { %433 = vst [vmem:[%s1274_s3 + $0x30] sm:$0xff] %v352_v42  ;;  %v356_v6 = vmax.f32 %v275_v58, 0.0  ;;  %v357_v7 = vmax.f32 %v276_v59, 0.0  ;;  %v279_v8 = vadd.f32 %v744_v3, %v194_v60  ;;  %v280_v9 = vadd.f32 %v744_v3, %v195_v61 }
  0x11   :  { %434 = vst [vmem:[%s1274_s3 + $0x38] sm:$0xff] %v353_v43  ;;  %v358_v11 = vmax.f32 %v277_v2, 0.0  ;;  %v359_v12 = vmax.f32 %v278_v4, 0.0  ;;  %v546_v13 = vunpack.c.l.bf16 %v679_v62  ;;  %v547_v14 = vunpack.c.h.bf16 %v679_v62 }
  0x12   :  { %435 = vst [vmem:[%s1274_s3 + $0x40] sm:$0xff] %v354_v63  ;;  %v360_v16 = vmax.f32 %v279_v8, 0.0  ;;  %v361_v17 = vmax.f32 %v280_v9, 0.0  ;;  %v550_v18 = vunpack.c.l.bf16 %v680_v5  ;;  %v551_v19 = vunpack.c.h.bf16 %v680_v5 }
  0x13   :  { %436 = vst [vmem:[%s1274_s3 + $0x48] sm:$0xff] %v355_v0  ;;  %v196_v20 = vmul.f32 %v739_v1, %v546_v13  ;;  %v197_v21 = vmul.f32 %v739_v1, %v547_v14  ;;  %v554_v22 = vunpack.c.l.bf16 %v681_v10  ;;  %v555_v23 = vunpack.c.h.bf16 %v681_v10  ;;  %v687_v10 = vld [vmem:[%s1271_s0 + $0x80] sm:$0xff]  }
  0x14   :  { %437 = vst [vmem:[%s1274_s3 + $0x50] sm:$0xff] %v356_v6  ;;  %v198_v24 = vmul.f32 %v739_v1, %v550_v18  ;;  %v199_v25 = vmul.f32 %v739_v1, %v551_v19  ;;  %v558_v26 = vunpack.c.l.bf16 %v682_v15  ;;  %v559_v27 = vunpack.c.h.bf16 %v682_v15  ;;  %v688_v15 = vld [vmem:[%s1271_s0 + $0x88] sm:$0xff]  }
  0x15   :  { %438 = vst [vmem:[%s1274_s3 + $0x58] sm:$0xff] %v357_v7  ;;  %v281_v28 = vadd.f32 %v744_v3, %v196_v20  ;;  %v282_v29 = vadd.f32 %v744_v3, %v197_v21  ;;  %v200_v30 = vmul.f32 %v739_v1, %v554_v22  ;;  %v201_v31 = vmul.f32 %v739_v1, %v555_v23  ;;  %v689_v20 = vld [vmem:[%s1271_s0 + $0x90] sm:$0xff]  }
  0x16   :  { %439 = vst [vmem:[%s1274_s3 + $0x60] sm:$0xff] %v358_v11  ;;  %v283_v32 = vadd.f32 %v744_v3, %v198_v24  ;;  %v284_v33 = vadd.f32 %v744_v3, %v199_v25  ;;  %v202_v34 = vmul.f32 %v739_v1, %v558_v26  ;;  %v203_v35 = vmul.f32 %v739_v1, %v559_v27  ;;  %v690_v25 = vld [vmem:[%s1271_s0 + $0x98] sm:$0xff]  }
  0x17   :  { %440 = vst [vmem:[%s1274_s3 + $0x68] sm:$0xff] %v359_v12  ;;  %v362_v37 = vmax.f32 %v281_v28, 0.0  ;;  %v363_v38 = vmax.f32 %v282_v29, 0.0  ;;  %v285_v39 = vadd.f32 %v744_v3, %v200_v30  ;;  %v286_v40 = vadd.f32 %v744_v3, %v201_v31 }
  0x18   :  { %441 = vst [vmem:[%s1274_s3 + $0x70] sm:$0xff] %v360_v16  ;;  %v364_v42 = vmax.f32 %v283_v32, 0.0  ;;  %v365_v43 = vmax.f32 %v284_v33, 0.0  ;;  %v287_v44 = vadd.f32 %v744_v3, %v202_v34  ;;  %v288_v45 = vadd.f32 %v744_v3, %v203_v35 }
  0x19   :  { %442 = vst [vmem:[%s1274_s3 + $0x78] sm:$0xff] %v361_v17  ;;  %v366_v47 = vmax.f32 %v285_v39, 0.0  ;;  %v367_v48 = vmax.f32 %v286_v40, 0.0  ;;  %v562_v49 = vunpack.c.l.bf16 %v683_v36  ;;  %v563_v50 = vunpack.c.h.bf16 %v683_v36 }
  0x1a   :  { %443 = vst [vmem:[%s1274_s3 + $0x80] sm:$0xff] %v362_v37  ;;  %v368_v52 = vmax.f32 %v287_v44, 0.0  ;;  %v369_v53 = vmax.f32 %v288_v45, 0.0  ;;  %v566_v54 = vunpack.c.l.bf16 %v684_v41  ;;  %v567_v55 = vunpack.c.h.bf16 %v684_v41 }
  0x1b   :  { %444 = vst [vmem:[%s1274_s3 + $0x88] sm:$0xff] %v363_v38  ;;  %v204_v56 = vmul.f32 %v739_v1, %v562_v49  ;;  %v205_v57 = vmul.f32 %v739_v1, %v563_v50  ;;  %v570_v58 = vunpack.c.l.bf16 %v685_v46  ;;  %v571_v59 = vunpack.c.h.bf16 %v685_v46  ;;  %v691_v46 = vld [vmem:[%s1271_s0 + $0xa0] sm:$0xff]  }
  0x1c   :  { %445 = vst [vmem:[%s1274_s3 + $0x90] sm:$0xff] %v364_v42  ;;  %v206_v60 = vmul.f32 %v739_v1, %v566_v54  ;;  %v207_v61 = vmul.f32 %v739_v1, %v567_v55  ;;  %v574_v62 = vunpack.c.l.bf16 %v686_v51  ;;  %v575_v63 = vunpack.c.h.bf16 %v686_v51  ;;  %v692_v51 = vld [vmem:[%s1271_s0 + $0xa8] sm:$0xff]  }
  0x1d   :  { %446 = vst [vmem:[%s1274_s3 + $0x98] sm:$0xff] %v365_v43  ;;  %v289_v0 = vadd.f32 %v744_v3, %v204_v56  ;;  %v290_v2 = vadd.f32 %v744_v3, %v205_v57  ;;  %v208_v4 = vmul.f32 %v739_v1, %v570_v58  ;;  %v209_v5 = vmul.f32 %v739_v1, %v571_v59  ;;  %v693_v56 = vld [vmem:[%s1271_s0 + $0xb0] sm:$0xff]  }
  0x1e   :  { %447 = vst [vmem:[%s1274_s3 + $0xa0] sm:$0xff] %v366_v47  ;;  %v291_v6 = vadd.f32 %v744_v3, %v206_v60  ;;  %v292_v7 = vadd.f32 %v744_v3, %v207_v61  ;;  %v210_v8 = vmul.f32 %v739_v1, %v574_v62  ;;  %v211_v9 = vmul.f32 %v739_v1, %v575_v63  ;;  %v694_v61 = vld [vmem:[%s1271_s0 + $0xb8] sm:$0xff]  }
  0x1f   :  { %448 = vst [vmem:[%s1274_s3 + $0xa8] sm:$0xff] %v367_v48  ;;  %v370_v11 = vmax.f32 %v289_v0, 0.0  ;;  %v371_v12 = vmax.f32 %v290_v2, 0.0  ;;  %v293_v13 = vadd.f32 %v744_v3, %v208_v4  ;;  %v294_v14 = vadd.f32 %v744_v3, %v209_v5 }
  0x20   :  { %449 = vst [vmem:[%s1274_s3 + $0xb0] sm:$0xff] %v368_v52  ;;  %v372_v16 = vmax.f32 %v291_v6, 0.0  ;;  %v373_v17 = vmax.f32 %v292_v7, 0.0  ;;  %v295_v18 = vadd.f32 %v744_v3, %v210_v8  ;;  %v296_v19 = vadd.f32 %v744_v3, %v211_v9 }
  0x21   :  { %450 = vst [vmem:[%s1274_s3 + $0xb8] sm:$0xff] %v369_v53  ;;  %v374_v21 = vmax.f32 %v293_v13, 0.0  ;;  %v375_v22 = vmax.f32 %v294_v14, 0.0  ;;  %v578_v23 = vunpack.c.l.bf16 %v687_v10  ;;  %v579_v24 = vunpack.c.h.bf16 %v687_v10 }
  0x22   :  { %451 = vst [vmem:[%s1274_s3 + $0xc0] sm:$0xff] %v370_v11  ;;  %v376_v26 = vmax.f32 %v295_v18, 0.0  ;;  %v377_v27 = vmax.f32 %v296_v19, 0.0  ;;  %v582_v28 = vunpack.c.l.bf16 %v688_v15  ;;  %v583_v29 = vunpack.c.h.bf16 %v688_v15 }
  0x23   :  { %452 = vst [vmem:[%s1274_s3 + $0xc8] sm:$0xff] %v371_v12  ;;  %v212_v30 = vmul.f32 %v739_v1, %v578_v23  ;;  %v213_v31 = vmul.f32 %v739_v1, %v579_v24  ;;  %v586_v32 = vunpack.c.l.bf16 %v689_v20  ;;  %v587_v33 = vunpack.c.h.bf16 %v689_v20  ;;  %v695_v20 = vld [vmem:[%s1271_s0 + $0xc0] sm:$0xff]  }
  0x24   :  { %453 = vst [vmem:[%s1274_s3 + $0xd0] sm:$0xff] %v372_v16  ;;  %v214_v34 = vmul.f32 %v739_v1, %v582_v28  ;;  %v215_v35 = vmul.f32 %v739_v1, %v583_v29  ;;  %v590_v36 = vunpack.c.l.bf16 %v690_v25  ;;  %v591_v37 = vunpack.c.h.bf16 %v690_v25  ;;  %v696_v25 = vld [vmem:[%s1271_s0 + $0xc8] sm:$0xff]  }
  0x25   :  { %454 = vst [vmem:[%s1274_s3 + $0xd8] sm:$0xff] %v373_v17  ;;  %v297_v38 = vadd.f32 %v744_v3, %v212_v30  ;;  %v298_v39 = vadd.f32 %v744_v3, %v213_v31  ;;  %v216_v40 = vmul.f32 %v739_v1, %v586_v32  ;;  %v217_v41 = vmul.f32 %v739_v1, %v587_v33  ;;  %v697_v30 = vld [vmem:[%s1271_s0 + $0xd0] sm:$0xff]  }
  0x26   :  { %455 = vst [vmem:[%s1274_s3 + $0xe0] sm:$0xff] %v374_v21  ;;  %v299_v42 = vadd.f32 %v744_v3, %v214_v34  ;;  %v300_v43 = vadd.f32 %v744_v3, %v215_v35  ;;  %v218_v44 = vmul.f32 %v739_v1, %v590_v36  ;;  %v219_v45 = vmul.f32 %v739_v1, %v591_v37  ;;  %v698_v35 = vld [vmem:[%s1271_s0 + $0xd8] sm:$0xff]  }
  0x27   :  { %456 = vst [vmem:[%s1274_s3 + $0xe8] sm:$0xff] %v375_v22  ;;  %v378_v47 = vmax.f32 %v297_v38, 0.0  ;;  %v379_v48 = vmax.f32 %v298_v39, 0.0  ;;  %v301_v49 = vadd.f32 %v744_v3, %v216_v40  ;;  %v302_v50 = vadd.f32 %v744_v3, %v217_v41 }
  0x28   :  { %457 = vst [vmem:[%s1274_s3 + $0xf0] sm:$0xff] %v376_v26  ;;  %v380_v52 = vmax.f32 %v299_v42, 0.0  ;;  %v381_v53 = vmax.f32 %v300_v43, 0.0  ;;  %v303_v54 = vadd.f32 %v744_v3, %v218_v44  ;;  %v304_v55 = vadd.f32 %v744_v3, %v219_v45 }
  0x29   :  { %458 = vst [vmem:[%s1274_s3 + $0xf8] sm:$0xff] %v377_v27  ;;  %v382_v57 = vmax.f32 %v301_v49, 0.0  ;;  %v383_v58 = vmax.f32 %v302_v50, 0.0  ;;  %v594_v59 = vunpack.c.l.bf16 %v691_v46  ;;  %v595_v60 = vunpack.c.h.bf16 %v691_v46 }
  0x2a   :  { %459 = vst [vmem:[%s1274_s3 + $0x100] sm:$0xff] %v378_v47  ;;  %v384_v62 = vmax.f32 %v303_v54, 0.0  ;;  %v385_v63 = vmax.f32 %v304_v55, 0.0  ;;  %v598_v0 = vunpack.c.l.bf16 %v692_v51  ;;  %v599_v2 = vunpack.c.h.bf16 %v692_v51 }
  0x2b   :  { %460 = vst [vmem:[%s1274_s3 + $0x108] sm:$0xff] %v379_v48  ;;  %v220_v4 = vmul.f32 %v739_v1, %v594_v59  ;;  %v221_v5 = vmul.f32 %v739_v1, %v595_v60  ;;  %v602_v6 = vunpack.c.l.bf16 %v693_v56  ;;  %v603_v7 = vunpack.c.h.bf16 %v693_v56  ;;  %v699_v56 = vld [vmem:[%s1271_s0 + $0xe0] sm:$0xff]  }
  0x2c   :  { %461 = vst [vmem:[%s1274_s3 + $0x110] sm:$0xff] %v380_v52  ;;  %v222_v8 = vmul.f32 %v739_v1, %v598_v0  ;;  %v223_v9 = vmul.f32 %v739_v1, %v599_v2  ;;  %v606_v10 = vunpack.c.l.bf16 %v694_v61  ;;  %v607_v11 = vunpack.c.h.bf16 %v694_v61  ;;  %v700_v61 = vld [vmem:[%s1271_s0 + $0xe8] sm:$0xff]  }
  0x2d   :  { %462 = vst [vmem:[%s1274_s3 + $0x118] sm:$0xff] %v381_v53  ;;  %v305_v12 = vadd.f32 %v744_v3, %v220_v4  ;;  %v306_v13 = vadd.f32 %v744_v3, %v221_v5  ;;  %v224_v14 = vmul.f32 %v739_v1, %v602_v6  ;;  %v225_v15 = vmul.f32 %v739_v1, %v603_v7  ;;  %v701_v4 = vld [vmem:[%s1271_s0 + $0xf0] sm:$0xff]  }
  0x2e   :  { %463 = vst [vmem:[%s1274_s3 + $0x120] sm:$0xff] %v382_v57  ;;  %v307_v16 = vadd.f32 %v744_v3, %v222_v8  ;;  %v308_v17 = vadd.f32 %v744_v3, %v223_v9  ;;  %v226_v18 = vmul.f32 %v739_v1, %v606_v10  ;;  %v227_v19 = vmul.f32 %v739_v1, %v607_v11  ;;  %v702_v9 = vld [vmem:[%s1271_s0 + $0xf8] sm:$0xff]  }
  0x2f   :  { %464 = vst [vmem:[%s1274_s3 + $0x128] sm:$0xff] %v383_v58  ;;  %v386_v21 = vmax.f32 %v305_v12, 0.0  ;;  %v387_v22 = vmax.f32 %v306_v13, 0.0  ;;  %v309_v23 = vadd.f32 %v744_v3, %v224_v14  ;;  %v310_v24 = vadd.f32 %v744_v3, %v225_v15 }
  0x30   :  { %465 = vst [vmem:[%s1274_s3 + $0x130] sm:$0xff] %v384_v62  ;;  %v388_v26 = vmax.f32 %v307_v16, 0.0  ;;  %v389_v27 = vmax.f32 %v308_v17, 0.0  ;;  %v311_v28 = vadd.f32 %v744_v3, %v226_v18  ;;  %v312_v29 = vadd.f32 %v744_v3, %v227_v19 }
  0x31   :  { %466 = vst [vmem:[%s1274_s3 + $0x138] sm:$0xff] %v385_v63  ;;  %v390_v31 = vmax.f32 %v309_v23, 0.0  ;;  %v391_v32 = vmax.f32 %v310_v24, 0.0  ;;  %v610_v33 = vunpack.c.l.bf16 %v695_v20  ;;  %v611_v34 = vunpack.c.h.bf16 %v695_v20 }
  0x32   :  { %467 = vst [vmem:[%s1274_s3 + $0x140] sm:$0xff] %v386_v21  ;;  %v392_v36 = vmax.f32 %v311_v28, 0.0  ;;  %v393_v37 = vmax.f32 %v312_v29, 0.0  ;;  %v614_v38 = vunpack.c.l.bf16 %v696_v25  ;;  %v615_v39 = vunpack.c.h.bf16 %v696_v25 }
  0x33   :  { %468 = vst [vmem:[%s1274_s3 + $0x148] sm:$0xff] %v387_v22  ;;  %v228_v40 = vmul.f32 %v739_v1, %v610_v33  ;;  %v229_v41 = vmul.f32 %v739_v1, %v611_v34  ;;  %v618_v42 = vunpack.c.l.bf16 %v697_v30  ;;  %v619_v43 = vunpack.c.h.bf16 %v697_v30  ;;  %v703_v30 = vld [vmem:[%s1271_s0 + $0x100] sm:$0xff]  }
  0x34   :  { %469 = vst [vmem:[%s1274_s3 + $0x150] sm:$0xff] %v388_v26  ;;  %v230_v44 = vmul.f32 %v739_v1, %v614_v38  ;;  %v231_v45 = vmul.f32 %v739_v1, %v615_v39  ;;  %v622_v46 = vunpack.c.l.bf16 %v698_v35  ;;  %v623_v47 = vunpack.c.h.bf16 %v698_v35  ;;  %v704_v35 = vld [vmem:[%s1271_s0 + $0x108] sm:$0xff]  }
  0x35   :  { %470 = vst [vmem:[%s1274_s3 + $0x158] sm:$0xff] %v389_v27  ;;  %v313_v48 = vadd.f32 %v744_v3, %v228_v40  ;;  %v314_v49 = vadd.f32 %v744_v3, %v229_v41  ;;  %v232_v50 = vmul.f32 %v739_v1, %v618_v42  ;;  %v233_v51 = vmul.f32 %v739_v1, %v619_v43  ;;  %v705_v40 = vld [vmem:[%s1271_s0 + $0x110] sm:$0xff]  }
  0x36   :  { %471 = vst [vmem:[%s1274_s3 + $0x160] sm:$0xff] %v390_v31  ;;  %v315_v52 = vadd.f32 %v744_v3, %v230_v44  ;;  %v316_v53 = vadd.f32 %v744_v3, %v231_v45  ;;  %v234_v54 = vmul.f32 %v739_v1, %v622_v46  ;;  %v235_v55 = vmul.f32 %v739_v1, %v623_v47  ;;  %v706_v45 = vld [vmem:[%s1271_s0 + $0x118] sm:$0xff]  }
  0x37   :  { %472 = vst [vmem:[%s1274_s3 + $0x168] sm:$0xff] %v391_v32  ;;  %v394_v57 = vmax.f32 %v313_v48, 0.0  ;;  %v395_v58 = vmax.f32 %v314_v49, 0.0  ;;  %v317_v59 = vadd.f32 %v744_v3, %v232_v50  ;;  %v318_v60 = vadd.f32 %v744_v3, %v233_v51 }
  0x38   :  { %473 = vst [vmem:[%s1274_s3 + $0x170] sm:$0xff] %v392_v36  ;;  %v396_v62 = vmax.f32 %v315_v52, 0.0  ;;  %v397_v63 = vmax.f32 %v316_v53, 0.0  ;;  %v319_v0 = vadd.f32 %v744_v3, %v234_v54  ;;  %v320_v2 = vadd.f32 %v744_v3, %v235_v55 }
  0x39   :  { %474 = vst [vmem:[%s1274_s3 + $0x178] sm:$0xff] %v393_v37  ;;  %v398_v5 = vmax.f32 %v317_v59, 0.0  ;;  %v399_v6 = vmax.f32 %v318_v60, 0.0  ;;  %v626_v7 = vunpack.c.l.bf16 %v699_v56  ;;  %v627_v8 = vunpack.c.h.bf16 %v699_v56 }
  0x3a   :  { %475 = vst [vmem:[%s1274_s3 + $0x180] sm:$0xff] %v394_v57  ;;  %v400_v10 = vmax.f32 %v319_v0, 0.0  ;;  %v401_v11 = vmax.f32 %v320_v2, 0.0  ;;  %v630_v12 = vunpack.c.l.bf16 %v700_v61  ;;  %v631_v13 = vunpack.c.h.bf16 %v700_v61 }
  0x3b   :  { %476 = vst [vmem:[%s1274_s3 + $0x188] sm:$0xff] %v395_v58  ;;  %v236_v14 = vmul.f32 %v739_v1, %v626_v7  ;;  %v237_v15 = vmul.f32 %v739_v1, %v627_v8  ;;  %v634_v16 = vunpack.c.l.bf16 %v701_v4  ;;  %v635_v17 = vunpack.c.h.bf16 %v701_v4  ;;  %v707_v4 = vld [vmem:[%s1271_s0 + $0x120] sm:$0xff]  }
  0x3c   :  { %477 = vst [vmem:[%s1274_s3 + $0x190] sm:$0xff] %v396_v62  ;;  %v238_v18 = vmul.f32 %v739_v1, %v630_v12  ;;  %v239_v19 = vmul.f32 %v739_v1, %v631_v13  ;;  %v638_v20 = vunpack.c.l.bf16 %v702_v9  ;;  %v639_v21 = vunpack.c.h.bf16 %v702_v9  ;;  %v708_v9 = vld [vmem:[%s1271_s0 + $0x128] sm:$0xff]  }
  0x3d   :  { %478 = vst [vmem:[%s1274_s3 + $0x198] sm:$0xff] %v397_v63  ;;  %v321_v22 = vadd.f32 %v744_v3, %v236_v14  ;;  %v322_v23 = vadd.f32 %v744_v3, %v237_v15  ;;  %v240_v24 = vmul.f32 %v739_v1, %v634_v16  ;;  %v241_v25 = vmul.f32 %v739_v1, %v635_v17  ;;  %v709_v14 = vld [vmem:[%s1271_s0 + $0x130] sm:$0xff]  }
  0x3e   :  { %479 = vst [vmem:[%s1274_s3 + $0x1a0] sm:$0xff] %v398_v5  ;;  %v323_v26 = vadd.f32 %v744_v3, %v238_v18  ;;  %v324_v27 = vadd.f32 %v744_v3, %v239_v19  ;;  %v242_v28 = vmul.f32 %v739_v1, %v638_v20  ;;  %v243_v29 = vmul.f32 %v739_v1, %v639_v21  ;;  %v710_v19 = vld [vmem:[%s1271_s0 + $0x138] sm:$0xff]  }
  0x3f   :  { %480 = vst [vmem:[%s1274_s3 + $0x1a8] sm:$0xff] %v399_v6  ;;  %v402_v31 = vmax.f32 %v321_v22, 0.0  ;;  %v403_v32 = vmax.f32 %v322_v23, 0.0  ;;  %v325_v33 = vadd.f32 %v744_v3, %v240_v24  ;;  %v326_v34 = vadd.f32 %v744_v3, %v241_v25 }
  0x40   :  { %481 = vst [vmem:[%s1274_s3 + $0x1b0] sm:$0xff] %v400_v10  ;;  %v404_v36 = vmax.f32 %v323_v26, 0.0  ;;  %v405_v37 = vmax.f32 %v324_v27, 0.0  ;;  %v327_v38 = vadd.f32 %v744_v3, %v242_v28  ;;  %v328_v39 = vadd.f32 %v744_v3, %v243_v29 }
  0x41   :  { %482 = vst [vmem:[%s1274_s3 + $0x1b8] sm:$0xff] %v401_v11  ;;  %v406_v41 = vmax.f32 %v325_v33, 0.0  ;;  %v407_v42 = vmax.f32 %v326_v34, 0.0  ;;  %v642_v43 = vunpack.c.l.bf16 %v703_v30  ;;  %v643_v44 = vunpack.c.h.bf16 %v703_v30 }
  0x42   :  { %483 = vst [vmem:[%s1274_s3 + $0x1c0] sm:$0xff] %v402_v31  ;;  %v408_v46 = vmax.f32 %v327_v38, 0.0  ;;  %v409_v47 = vmax.f32 %v328_v39, 0.0  ;;  %v646_v48 = vunpack.c.l.bf16 %v704_v35  ;;  %v647_v49 = vunpack.c.h.bf16 %v704_v35 }
  0x43   :  { %484 = vst [vmem:[%s1274_s3 + $0x1c8] sm:$0xff] %v403_v32  ;;  %v244_v50 = vmul.f32 %v739_v1, %v642_v43  ;;  %v245_v51 = vmul.f32 %v739_v1, %v643_v44  ;;  %v650_v52 = vunpack.c.l.bf16 %v705_v40  ;;  %v651_v53 = vunpack.c.h.bf16 %v705_v40  ;;  %v94_v40 = vld [vmem:[%s1271_s0 + $0x140] sm:$0xf] }
  0x44   :  { %485 = vst [vmem:[%s1274_s3 + $0x1d0] sm:$0xff] %v404_v36  ;;  %v246_v54 = vmul.f32 %v739_v1, %v646_v48  ;;  %v247_v55 = vmul.f32 %v739_v1, %v647_v49  ;;  %v654_v56 = vunpack.c.l.bf16 %v706_v45  ;;  %v655_v57 = vunpack.c.h.bf16 %v706_v45 }
  0x45   :  { %486 = vst [vmem:[%s1274_s3 + $0x1d8] sm:$0xff] %v405_v37  ;;  %v329_v58 = vadd.f32 %v744_v3, %v244_v50  ;;  %v330_v59 = vadd.f32 %v744_v3, %v245_v51  ;;  %v248_v60 = vmul.f32 %v739_v1, %v650_v52  ;;  %v249_v61 = vmul.f32 %v739_v1, %v651_v53 }
  0x46   :  { %487 = vst [vmem:[%s1274_s3 + $0x1e0] sm:$0xff] %v406_v41  ;;  %v331_v62 = vadd.f32 %v744_v3, %v246_v54  ;;  %v332_v63 = vadd.f32 %v744_v3, %v247_v55  ;;  %v250_v0 = vmul.f32 %v739_v1, %v654_v56  ;;  %v251_v2 = vmul.f32 %v739_v1, %v655_v57 }
  0x47   :  { %488 = vst [vmem:[%s1274_s3 + $0x1e8] sm:$0xff] %v407_v42  ;;  %v410_v5 = vmax.f32 %v329_v58, 0.0  ;;  %v411_v6 = vmax.f32 %v330_v59, 0.0  ;;  %v333_v7 = vadd.f32 %v744_v3, %v248_v60  ;;  %v334_v8 = vadd.f32 %v744_v3, %v249_v61 }
  0x48   :  { %489 = vst [vmem:[%s1274_s3 + $0x1f0] sm:$0xff] %v408_v46  ;;  %v412_v10 = vmax.f32 %v331_v62, 0.0  ;;  %v413_v11 = vmax.f32 %v332_v63, 0.0  ;;  %v335_v12 = vadd.f32 %v744_v3, %v250_v0  ;;  %v336_v13 = vadd.f32 %v744_v3, %v251_v2 }
  0x49   :  { %490 = vst [vmem:[%s1274_s3 + $0x1f8] sm:$0xff] %v409_v47  ;;  %v414_v15 = vmax.f32 %v333_v7, 0.0  ;;  %v415_v16 = vmax.f32 %v334_v8, 0.0  ;;  %v658_v17 = vunpack.c.l.bf16 %v707_v4  ;;  %v659_v18 = vunpack.c.h.bf16 %v707_v4 }
  0x4a   :  { %491 = vst [vmem:[%s1274_s3 + $0x200] sm:$0xff] %v410_v5  ;;  %v416_v20 = vmax.f32 %v335_v12, 0.0  ;;  %v417_v21 = vmax.f32 %v336_v13, 0.0  ;;  %v662_v22 = vunpack.c.l.bf16 %v708_v9  ;;  %v663_v23 = vunpack.c.h.bf16 %v708_v9 }
  0x4b   :  { %492 = vst [vmem:[%s1274_s3 + $0x208] sm:$0xff] %v411_v6  ;;  %v252_v24 = vmul.f32 %v739_v1, %v658_v17  ;;  %v253_v25 = vmul.f32 %v739_v1, %v659_v18  ;;  %v666_v26 = vunpack.c.l.bf16 %v709_v14  ;;  %v667_v27 = vunpack.c.h.bf16 %v709_v14 }
  0x4c   :  { %493 = vst [vmem:[%s1274_s3 + $0x210] sm:$0xff] %v412_v10  ;;  %v254_v28 = vmul.f32 %v739_v1, %v662_v22  ;;  %v255_v29 = vmul.f32 %v739_v1, %v663_v23  ;;  %v670_v30 = vunpack.c.l.bf16 %v710_v19  ;;  %v671_v31 = vunpack.c.h.bf16 %v710_v19 }
  0x4d   :  { %494 = vst [vmem:[%s1274_s3 + $0x218] sm:$0xff] %v413_v11  ;;  %v337_v32 = vadd.f32 %v744_v3, %v252_v24  ;;  %v338_v33 = vadd.f32 %v744_v3, %v253_v25  ;;  %v256_v34 = vmul.f32 %v739_v1, %v666_v26  ;;  %v257_v35 = vmul.f32 %v739_v1, %v667_v27 }
  0x4e   :  { %495 = vst [vmem:[%s1274_s3 + $0x220] sm:$0xff] %v414_v15  ;;  %v339_v36 = vadd.f32 %v744_v3, %v254_v28  ;;  %v340_v37 = vadd.f32 %v744_v3, %v255_v29  ;;  %v258_v38 = vmul.f32 %v739_v1, %v670_v30  ;;  %v259_v39 = vmul.f32 %v739_v1, %v671_v31 }
  0x4f   :  { %496 = vst [vmem:[%s1274_s3 + $0x228] sm:$0xff] %v415_v16  ;;  %v418_v41 = vmax.f32 %v337_v32, 0.0  ;;  %v419_v42 = vmax.f32 %v338_v33, 0.0  ;;  %v341_v43 = vadd.f32 %v744_v3, %v256_v34  ;;  %v342_v44 = vadd.f32 %v744_v3, %v257_v35 }
  0x50   :  { %497 = vst [vmem:[%s1274_s3 + $0x230] sm:$0xff] %v416_v20  ;;  %v420_v45 = vmax.f32 %v339_v36, 0.0  ;;  %v421_v46 = vmax.f32 %v340_v37, 0.0  ;;  %v343_v47 = vadd.f32 %v744_v3, %v258_v38  ;;  %v344_v48 = vadd.f32 %v744_v3, %v259_v39 }
  0x51   :  { %498 = vst [vmem:[%s1274_s3 + $0x238] sm:$0xff] %v417_v21  ;;  %v422_v49 = vmax.f32 %v341_v43, 0.0  ;;  %v175_v50 = vunpack.c.l.bf16 %v94_v40  ;;  %v423_v51 = vmax.f32 %v342_v44, 0.0 }
  0x52   :  { %499 = vst [vmem:[%s1274_s3 + $0x240] sm:$0xff] %v418_v41  ;;  %v424_v52 = vmax.f32 %v343_v47, 0.0  ;;  %v425_v54 = vmax.f32 %v344_v48, 0.0 }
  0x53   :  { %500 = vst [vmem:[%s1274_s3 + $0x248] sm:$0xff] %v419_v42  ;;  %v260_v53 = vmul.f32 %v739_v1, %v175_v50 }
  0x54   :  { %501 = vst [vmem:[%s1274_s3 + $0x250] sm:$0xff] %v420_v45 }
  0x55   :  { %502 = vst [vmem:[%s1274_s3 + $0x258] sm:$0xff] %v421_v46  ;;  %v345_v55 = vadd.f32 %v744_v3, %v260_v53 }
  0x56   :  { %503 = vst [vmem:[%s1274_s3 + $0x260] sm:$0xff] %v422_v49 }
  0x57   :  { %504 = vst [vmem:[%s1274_s3 + $0x268] sm:$0xff] %v423_v51  ;;  %v426_v1 = vmax.f32 %v345_v55, 0.0 }
  0x58   :  { %505 = vst [vmem:[%s1274_s3 + $0x270] sm:$0xff] %v424_v52 }
  0x59   :  { %506 = vst [vmem:[%s1274_s3 + $0x278] sm:$0xff] %v425_v54 }
  0x5a   :  { %507 = vst [vmem:[%s1274_s3 + $0x280] sm:$0xff] %v426_v1 }

// kernel: conv_block_forward.2
= control target key start
LH: loop header
LB: loop body
LE: loop exit
PB: predicated region body
PF: predicated region fallthrough
CT: control target
= control target key end

     0   :  { %vm690_vm0 = vcmask 1041408   ;;  %vm238_vm1 = vsmask.f32 7424  ;;  %vm566_vm2 = vcmask 31744   ;;  %vm1249_vm3 = vcmask 1046528   ;;  %s9728_s2 = inlined_call_operand.vmem [shape: bf16[9,4,128], index: 2, kind: input, shape index: {}]   ;;  %s9729_s0 = inlined_call_operand.vmem [shape: bf16[1296,4], index: 0, kind: input, shape index: {}]   ;;  %s9730_s1 = inlined_call_operand.vmem [shape: bf16[1,40,4], index: 1, kind: input, shape index: {}]   ;;  %s9731_s3 = inlined_call_operand.vmem [shape: f32[648,1], index: 3, kind: input, shape index: {}]   ;;  %s9732_s4 = inlined_call_operand.vmem [shape: bf16[648,128], index: 4, kind: output, shape index: {0}]   ;;  %s9733_s5 = inlined_call_operand.vmem [shape: f32[1,1,128], index: 5, kind: output, shape index: {1}]   ;;  %s9734_s6 = inlined_call_operand.vmem [shape: f32[1,1,128], index: 6, kind: output, shape index: {2}]  }
   0x1   :  { %v5715_v0 = vld [vmem:[%s9728_s2 + $0x2] sm:$0x3]  ;;  %v6499_v1 = vld [vmem:[%s9729_s0 + $0x58] sm:$0xff]  ;;  %v6122_v4 = vld [vmem:[%s9729_s0 + $0xb0] sm:$0xff]  ;;  %vm2062_vm4 = vsmask.f32 6400 }
   0x2   :  { %v6504_v2 = vld [vmem:[%s9729_s0 + $0x60] sm:$0xff]  ;;  %v692_v3 = vsel %vm690_vm0, %v5715_v0, 0  ;;  %v6123_v5 = vld [vmem:[%s9729_s0 + $0xb8] sm:$0xff]  ;;  %v6517_v7 = vshll.u32 %v6499_v1, 16  ;;  %v6520_v8 = vshrl.u32 %v6499_v1, 16  ;;  %v6534_v12 = vld [vmem:[%s9729_s0 + $0x8] sm:$0xff] }
   0x3   :  { %v5798_v6 = vld [vmem:[%s9728_s2 + $0x4] sm:$0x3]  ;;  %6381 = vmatpush.bf16.msra.mxu1 %v692_v3  ;;  %6382 = vmatpush.bf16.msra.mxu2 %v692_v3  ;;  %v6523_v9 = vshll.u32 %v6504_v2, 16  ;;  %v6536_v13 = vshll.u32 %v6122_v4, 16  ;;  %v6538_v14 = vshrl.u32 %v6122_v4, 16  ;;  %v6540_v15 = vshll.u32 %v6123_v5, 16 }
   0x4   :  { %9879 = vst [vmem:[#allocation2_spill] sm:$0xff] %v6517_v7  ;;  %v1455_v10 = vsel %vm690_vm0, %v5798_v6, 0  ;;  %v6529_v11 = vld [vmem:[%s9729_s0] sm:$0xff]  ;;  %701 = vmatpush.bf16.msra.mxu0 %v692_v3  ;;  %v9737_v17 = vrot.slane %v6517_v7, 1  ;;  %v5886_v21 = vld [vmem:[%s9728_s2 + $0x8] sm:$0x3]  ;;  %6383 = vmatpush.bf16.msra.mxu3 %v692_v3 }
   0x5   :  { %9880 = vst [vmem:[#allocation3_spill] sm:$0xff] %v6520_v8  ;;  %v234_v16 = vld [vmem:[%s9728_s2] sm:$0x3]  ;;  %v337_v18 = vrot.slane %v6523_v9, 1  ;;  %v240_v19 = vshrl.u32 %v6529_v11, 16  ;;  %v242_v20 = vshll.u32 %v6529_v11, 16 }
   0x6   :  { %9881 = vst [vmem:[#allocation4_spill] sm:$0xff] %v6536_v13  ;;  %v9739_v22 = vrot.slane %v6536_v13, 1  ;;  %v425_v23 = vrot.slane %v6540_v15, 1  ;;  %v9735_v24 = vshll.u32 %v6534_v12, 16  ;;  %v991_v25 = vsel %vm690_vm0, %v234_v16, 0  ;;  %v6573_v35 = vld [vmem:[%s9729_s0 + $0x68] sm:$0xff] }
   0x7   :  { %9882 = vst [vmem:[#allocation5_spill] sm:$0xff] %v6538_v14  ;;  %1464 = vmatpush.bf16.msrb.mxu2 %v1455_v10  ;;  %v333_v26 = vor.u32 %v6520_v8, %v9737_v17  ;;  %v244_v27 = vrot.slane %v242_v20, 1  ;;  %1000 = vmatpush.bf16.msrb.mxu1 %v991_v25  ;;  %v2355_v28 = vsel %vm690_vm0, %v5886_v21, 0  ;;  %v6124_v36 = vld [vmem:[%s9729_s0 + $0xc0] sm:$0xff]  ;;  %v6133_v37 = vld [vmem:[%s9729_s0 + $0x108] sm:$0xff]  ;;  %v6134_v38 = vld [vmem:[%s9729_s0 + $0x110] sm:$0xff] }
   0x8   :  { %9883 = vst [vmem:[#allocation6_spill] sm:$0xff] %v6540_v15  ;;  %v421_v29 = vor.u32 %v6538_v14, %v9739_v22  ;;  %v249_v30 = vrot.slane %v9735_v24, 1  ;;  %2364 = vmatpush.bf16.msrb.mxu0 %v2355_v28  ;;  %v6588_v39 = vld [vmem:[%s9729_s0 + $0x10] sm:$0xff]  ;;  %v6591_v40 = vshrl.u32 %v6504_v2, 16  ;;  %v6594_v41 = vshll.u32 %v6573_v35, 16  ;;  %v6125_v63 = vld [vmem:[%s9729_s0 + $0xc8] sm:$0xff] }
   0x9   :  { %v338_v31 = vsel %vm238_vm1, %v333_v26, %v337_v18  ;;  %v245_v32 = vor.u32 %v244_v27, %v240_v19  ;;  %v6596_v42 = vshll.u32 %v6133_v37, 16  ;;  %v6598_v43 = vshrl.u32 %v6133_v37, 16  ;;  %v6632_v62 = vld [vmem:[%s9729_s0 + $0x70] sm:$0xff]  ;;  %v5844_v0 = vld [vmem:[%s9728_s2 + $0x6] sm:$0x3]  ;;  %v6135_v3 = vld [vmem:[%s9729_s0 + $0x118] sm:$0xff] }
   0xa   :  { %5727 = vmatmul.msk.bf16.vlgmr.msra.gmra.mxu1 %vm566_vm2, %v338_v31  ;;  %v426_v33 = vsel %vm238_vm1, %v421_v29, %v425_v23  ;;  %v6600_v44 = vshrl.u32 %v6123_v5, 16  ;;  %v6602_v45 = vshll.u32 %v6124_v36, 16  ;;  %v6604_v46 = vshll.u32 %v6134_v38, 16  ;;  %v6649_v5 = vld [vmem:[%s9729_s0 + $0x18] sm:$0xff] }
   0xb   :  { %5738 = vmatmul.msk.bf16.vlgmr.msra.gmra.mxu2 %vm566_vm2, %v426_v33  ;;  %v250_v34 = vsel %vm238_vm1, %v245_v32, %v249_v30  ;;  %9884 = vst [vmem:[#allocation7_spill] sm:$0xff] %v6596_v42  ;;  %v9736_v47 = vshrl.u32 %v6534_v12, 16  ;;  %v6608_v48 = vshll.u32 %v6588_v39, 16  ;;  %v9738_v49 = vrot.slane %v6596_v42, 1 }
   0xc   :  { %5716 = vmatmul.msk.bf16.vlgmr.msra.gmra.mxu0 %vm566_vm2, %v250_v34  ;;  %9885 = vst [vmem:[#allocation8_spill] sm:$0xff] %v6598_v43  ;;  %v513_v50 = vrot.slane %v6604_v46, 1  ;;  %v341_v51 = vor.u32 %v6591_v40, %v337_v18  ;;  %v345_v52 = vrot.slane %v6594_v41, 1  ;;  %v429_v54 = vor.u32 %v6600_v44, %v425_v23 }
   0xd   :  { %9886 = vst [vmem:[#allocation9_spill] sm:$0xff] %v6600_v44  ;;  %v509_v53 = vor.u32 %v6598_v43, %v9738_v49  ;;  %v433_v55 = vrot.slane %v6602_v45, 1  ;;  %v253_v56 = vor.u32 %v9736_v47, %v249_v30  ;;  %v257_v57 = vrot.slane %v6608_v48, 1 }
   0xe   :  { %9887 = vst [vmem:[#allocation10_spill] sm:$0xff] %v6602_v45  ;;  %v346_v59 = vsel %vm238_vm1, %v341_v51, %v345_v52  ;;  %v6644_v4 = vshrl.u32 %v6134_v38, 16  ;;  %v1764_v6 = vsel %vm690_vm0, %v5844_v0, 0  ;;  %v6652_v10 = vshll.u32 %v6135_v3, 16  ;;  %v6688_v38 = vld [vmem:[%s9729_s0 + $0x78] sm:$0xff]  ;;  %v6136_v51 = vld [vmem:[%s9729_s0 + $0x120] sm:$0xff] }
   0xf   :  { %9888 = vst [vmem:[#allocation11_spill] sm:$0xff] %v6604_v46  ;;  %v514_v58 = vsel %vm238_vm1, %v509_v53, %v513_v50  ;;  %v434_v60 = vsel %vm238_vm1, %v429_v54, %v433_v55  ;;  %v258_v61 = vsel %vm238_vm1, %v253_v56, %v257_v57  ;;  %1773 = vmatpush.bf16.msrb.mxu3 %v1764_v6  ;;  %v6655_v16 = vshrl.u32 %v6573_v35, 16  ;;  %v6702_v53 = vld [vmem:[%s9729_s0 + $0x20] sm:$0xff] }
  0x10   :  { %9889 = vst [vmem:[#allocation12_spill] sm:$0xff] %v6608_v48  ;;  %5749 = vmatmul.msk.bf16.vlgmr.msra.gmra.mxu3 %vm566_vm2, %v514_v58  ;;  %v6658_v18 = vshll.u32 %v6632_v62, 16  ;;  %v517_v19 = vor.u32 %v6644_v4, %v513_v50  ;;  %v6661_v20 = vshrl.u32 %v6124_v36, 16  ;;  %v6663_v21 = vshll.u32 %v6125_v63, 16  ;;  %v6126_v50 = vld [vmem:[%s9729_s0 + $0xd0] sm:$0xff] }
  0x11   :  { %9890 = vst [vmem:[#allocation13_spill] sm:$0xff] %v6644_v4  ;;  %v521_v23 = vrot.slane %v6652_v10, 1  ;;  %v6667_v25 = vshrl.u32 %v6588_v39, 16  ;;  %v6670_v26 = vshll.u32 %v6649_v5, 16  ;;  %v349_v27 = vor.u32 %v6655_v16, %v345_v52 }
  0x12   :  { %9891 = vst [vmem:[#allocation14_spill] sm:$0xff] %v6652_v10  ;;  %v353_v28 = vrot.slane %v6658_v18, 1  ;;  %v437_v30 = vor.u32 %v6661_v20, %v433_v55  ;;  %v441_v31 = vrot.slane %v6663_v21, 1  ;;  %v6697_v52 = vshrl.u32 %v6135_v3, 16 }
  0x13   :  { %9892 = vst [vmem:[#allocation15_spill] sm:$0xff] %v6658_v18  ;;  %v522_v29 = vsel %vm238_vm1, %v517_v19, %v521_v23  ;;  %v261_v32 = vor.u32 %v6667_v25, %v257_v57  ;;  %v265_v33 = vrot.slane %v6670_v26, 1  ;;  %v6704_v54 = vshll.u32 %v6136_v51, 16 }
  0x14   :  { %9893 = vst [vmem:[#allocation16_spill] sm:$0xff] %v6661_v20  ;;  %v354_v34 = vsel %vm238_vm1, %v349_v27, %v353_v28  ;;  %v442_v36 = vsel %vm238_vm1, %v437_v30, %v441_v31  ;;  %v6707_v55 = vshrl.u32 %v6632_v62, 16  ;;  %v6710_v56 = vshll.u32 %v6688_v38, 16 }
  0x15   :  { %9894 = vst [vmem:[#allocation17_spill] sm:$0xff] %v6663_v21  ;;  %v266_v37 = vsel %vm238_vm1, %v261_v32, %v265_v33  ;;  %v525_v57 = vor.u32 %v6697_v52, %v521_v23  ;;  %v6713_v58 = vshrl.u32 %v6125_v63, 16  ;;  %v6722_v0 = vshll.u32 %v6702_v53, 16 }
  0x16   :  { %9895 = vst [vmem:[#allocation18_spill] sm:$0xff] %v6667_v25  ;;  %v357_v3 = vor.u32 %v6707_v55, %v353_v28  ;;  %v361_v6 = vrot.slane %v6710_v56, 1  ;;  %v9971_v18 = vrot.slane %v6536_v13, 1  ;;  %vm3466_vm5 = vsmask.f32 5376 }
  0x17   :  { %9896 = vst [vmem:[#allocation19_spill] sm:$0xff] %v6670_v26  ;;  %v445_v23 = vor.u32 %v6713_v58, %v441_v31  ;;  %v6740_v31 = vld [vmem:[%s9729_s0 + $0x80] sm:$0xff]  ;;  %vm2653_vm6 = vcmask 1045504   ;;  %vm4057_vm7 = vcmask 1044480  }
  0x18   :  { %9897 = vst [vmem:[#allocation20_spill] sm:$0xff] %v6697_v52  ;;  %v362_v30 = vsel %vm238_vm1, %v357_v3, %v361_v6  ;;  %v6759_v3 = vshrl.u32 %v6688_v38, 16 }
  0x19   :  { %9898 = vst [vmem:[#allocation21_spill] sm:$0xff] %v6704_v54 }
  0x1a   :  { %5728 = vmatmul.msk.bf16.gmra.mxu1 %vm566_vm2, %v346_v59  ;;  %9899 = vst [vmem:[#allocation22_spill] sm:$0xff] %v6710_v56  ;;  %v6715_v59 = vshll.u32 %v6126_v50, 16  ;;  %v365_v24 = vor.u32 %v6759_v3, %v361_v6 }
  0x1b   :  { %5739 = vmatmul.msk.bf16.gmra.mxu2 %vm566_vm2, %v434_v60  ;;  %9900 = vst [vmem:[#allocation23_spill] sm:$0xff] %v6713_v58  ;;  %v529_v60 = vrot.slane %v6704_v54, 1 }
  0x1c   :  { %5717 = vmatmul.msk.bf16.gmra.mxu0 %vm566_vm2, %v258_v61  ;;  %9901 = vst [vmem:[#allocation24_spill] sm:$0xff] %v6715_v59  ;;  %v6719_v61 = vshrl.u32 %v6649_v5, 16  ;;  %v449_v63 = vrot.slane %v6715_v59, 1 }
  0x1d   :  { %9903 = vst [vmem:[#allocation26_spill] sm:$0xff] %v6722_v0  ;;  %v530_v19 = vsel %vm238_vm1, %v525_v57, %v529_v60 }
  0x1e   :  { %9902 = vst [vmem:[#allocation25_spill] sm:$0xff] %v6719_v61  ;;  %v269_v27 = vor.u32 %v6719_v61, %v265_v33  ;;  %v450_v32 = vsel %vm238_vm1, %v445_v23, %v449_v63  ;;  %v6127_v33 = vld [vmem:[%s9729_s0 + $0xd8] sm:$0xff] }
  0x1f   :  { %9904 = vst [vmem:[#allocation27_spill] sm:$0xff] %v6740_v31 }
  0x20   :  { %5750 = vmatmul.msk.bf16.gmra.mxu3 %vm566_vm2, %v522_v29  ;;  %v273_v29 = vrot.slane %v6722_v0, 1  ;;  %9907 = vst [vmem:[#allocation30_spill] sm:$0xff] %v6759_v3 }
  0x22   :  { %v274_v28 = vsel %vm238_vm1, %v269_v27, %v273_v29  ;;  %v6765_v27 = vshrl.u32 %v6126_v50, 16 }
  0x24   :  { %9909 = vst [vmem:[#allocation32_spill] sm:$0xff] %v6765_v27 }
  0x2a   :  { %5729 = vmatmul.msk.bf16.gmra.mxu1 %vm566_vm2, %v354_v34  ;;  %v6137_v34 = vld [vmem:[%s9729_s0 + $0x128] sm:$0xff] }
  0x2b   :  { %5740 = vmatmul.msk.bf16.gmra.mxu2 %vm566_vm2, %v442_v36  ;;  %v6749_v36 = vshrl.u32 %v6136_v51, 16  ;;  %v6756_v57 = vshll.u32 %v6137_v34, 16 }
  0x2c   :  { %5718 = vmatmul.msk.bf16.gmra.mxu0 %vm566_vm2, %v266_v37  ;;  %v6754_v37 = vld [vmem:[%s9729_s0 + $0x28] sm:$0xff] }
  0x2d   :  { %9905 = vst [vmem:[#allocation28_spill] sm:$0xff] %v6749_v36  ;;  %v533_v23 = vor.u32 %v6749_v36, %v529_v60  ;;  %v537_v51 = vrot.slane %v6756_v57, 1  ;;  %v453_v60 = vor.u32 %v6765_v27, %v449_v63  ;;  %v6792_v63 = vld [vmem:[%s9729_s0 + $0x88] sm:$0xff]  ;;  %v6823_v10 = vshrl.u32 %v6754_v37, 16 }
  0x2e   :  { %9906 = vst [vmem:[#allocation29_spill] sm:$0xff] %v6756_v57 }
  0x2f   :  { %v538_v17 = vsel %vm238_vm1, %v533_v23, %v537_v51  ;;  %9913 = vst [vmem:[#allocation36_spill] sm:$0xff] %v6792_v63  ;;  %v6814_v23 = vshll.u32 %v6792_v63, 16 }
  0x30   :  { %5751 = vmatmul.msk.bf16.gmra.mxu3 %vm566_vm2, %v530_v19  ;;  %v6762_v19 = vshll.u32 %v6740_v31, 16  ;;  %9920 = vst [vmem:[#allocation43_spill] sm:$0xff] %v6823_v10 }
  0x31   :  { %9917 = vst [vmem:[#allocation40_spill] sm:$0xff] %v6814_v23  ;;  %v377_v4 = vrot.slane %v6814_v23, 1 }
  0x32   :  { %9908 = vst [vmem:[#allocation31_spill] sm:$0xff] %v6762_v19  ;;  %v369_v47 = vrot.slane %v6762_v19, 1 }
  0x34   :  { %v370_v57 = vsel %vm238_vm1, %v365_v24, %v369_v47  ;;  %v6138_v24 = vld [vmem:[%s9729_s0 + $0x130] sm:$0xff] }
  0x3a   :  { %5730 = vmatmul.msk.bf16.gmra.mxu1 %vm566_vm2, %v362_v30  ;;  %v6767_v30 = vshll.u32 %v6127_v33, 16 }
  0x3b   :  { %5741 = vmatmul.msk.bf16.gmra.mxu2 %vm566_vm2, %v450_v32  ;;  %v6771_v32 = vshrl.u32 %v6702_v53, 16 }
  0x3c   :  { %5719 = vmatmul.msk.bf16.gmra.mxu0 %vm566_vm2, %v274_v28  ;;  %9910 = vst [vmem:[#allocation33_spill] sm:$0xff] %v6767_v30  ;;  %v6774_v28 = vshll.u32 %v6754_v37, 16  ;;  %v457_v50 = vrot.slane %v6767_v30, 1 }
  0x3d   :  { %9911 = vst [vmem:[#allocation34_spill] sm:$0xff] %v6771_v32  ;;  %v277_v49 = vor.u32 %v6771_v32, %v273_v29  ;;  %v6808_v29 = vshll.u32 %v6138_v24, 16 }
  0x3e   :  { %9912 = vst [vmem:[#allocation35_spill] sm:$0xff] %v6774_v28  ;;  %v281_v22 = vrot.slane %v6774_v28, 1  ;;  %v458_v54 = vsel %vm238_vm1, %v453_v60, %v457_v50 }
  0x3f   :  { %9915 = vst [vmem:[#allocation38_spill] sm:$0xff] %v6808_v29 }
  0x40   :  { %5752 = vmatmul.msk.bf16.gmra.mxu3 %vm566_vm2, %v538_v17  ;;  %v282_v6 = vsel %vm238_vm1, %v277_v49, %v281_v22  ;;  %v6128_v17 = vld [vmem:[%s9729_s0 + $0xe0] sm:$0xff]  ;;  %v6801_v49 = vshrl.u32 %v6137_v34, 16  ;;  %v545_v34 = vrot.slane %v6808_v29, 1 }
  0x41   :  { %v6819_v36 = vshll.u32 %v6128_v17, 16 }
  0x42   :  { %9914 = vst [vmem:[#allocation37_spill] sm:$0xff] %v6801_v49  ;;  %v541_v60 = vor.u32 %v6801_v49, %v537_v51  ;;  %v285_v49 = vor.u32 %v6823_v10, %v281_v22  ;;  %v6129_v22 = vld [vmem:[%s9729_s0 + $0xe8] sm:$0xff] }
  0x43   :  { %9919 = vst [vmem:[#allocation42_spill] sm:$0xff] %v6819_v36 }
  0x44   :  { %v546_v43 = vsel %vm238_vm1, %v541_v60, %v545_v34 }
  0x4a   :  { %5731 = vmatmul.msk.bf16.gmra.mxu1 %vm566_vm2, %v370_v57  ;;  %v6811_v57 = vshrl.u32 %v6740_v31, 16 }
  0x4b   :  { %5742 = vmatmul.msk.bf16.gmra.mxu2 %vm566_vm2, %v458_v54  ;;  %v6806_v54 = vld [vmem:[%s9729_s0 + $0x30] sm:$0xff] }
  0x4c   :  { %5720 = vmatmul.msk.bf16.gmra.mxu0 %vm566_vm2, %v282_v6  ;;  %9916 = vst [vmem:[#allocation39_spill] sm:$0xff] %v6811_v57  ;;  %v6817_v6 = vshrl.u32 %v6127_v33, 16  ;;  %v6826_v52 = vshll.u32 %v6806_v54, 16  ;;  %v373_v46 = vor.u32 %v6811_v57, %v369_v47  ;;  %v465_v33 = vrot.slane %v6819_v36, 1 }
  0x4d   :  { %v6871_v36 = vshll.u32 %v6129_v22, 16 }
  0x4e   :  { %9918 = vst [vmem:[#allocation41_spill] sm:$0xff] %v6817_v6  ;;  %v461_v51 = vor.u32 %v6817_v6, %v457_v50  ;;  %v289_v29 = vrot.slane %v6826_v52, 1  ;;  %v378_v30 = vsel %vm238_vm1, %v373_v46, %v377_v4  ;;  %v6844_v50 = vld [vmem:[%s9729_s0 + $0x90] sm:$0xff]  ;;  %v6853_v46 = vshrl.u32 %v6138_v24, 16 }
  0x4f   :  { %9921 = vst [vmem:[#allocation44_spill] sm:$0xff] %v6826_v52  ;;  %v6866_v60 = vshll.u32 %v6844_v50, 16  ;;  %v6875_v6 = vshrl.u32 %v6806_v54, 16 }
  0x50   :  { %5753 = vmatmul.msk.bf16.gmra.mxu3 %vm566_vm2, %v546_v43  ;;  %v466_v59 = vsel %vm238_vm1, %v461_v51, %v465_v33  ;;  %v290_v47 = vsel %vm238_vm1, %v285_v49, %v289_v29  ;;  %9922 = vst [vmem:[#allocation45_spill] sm:$0xff] %v6844_v50  ;;  %v6139_v43 = vld [vmem:[%s9729_s0 + $0x138] sm:$0xff]  ;;  %v6863_v49 = vshrl.u32 %v6792_v63, 16  ;;  %v549_v51 = vor.u32 %v6853_v46, %v545_v34 }
  0x51   :  { %9923 = vst [vmem:[#allocation46_spill] sm:$0xff] %v6853_v46  ;;  %v385_v58 = vrot.slane %v6866_v60, 1  ;;  %v293_v46 = vor.u32 %v6875_v6, %v289_v29  ;;  %v101_v29 = vld [vmem:[%s9729_s0 + $0x140] sm:$0xf] }
  0x52   :  { %9925 = vst [vmem:[#allocation48_spill] sm:$0xff] %v6863_v49  ;;  %v381_v21 = vor.u32 %v6863_v49, %v377_v4 }
  0x53   :  { %9926 = vst [vmem:[#allocation49_spill] sm:$0xff] %v6866_v60 }
  0x54   :  { %9928 = vst [vmem:[#allocation51_spill] sm:$0xff] %v6871_v36  ;;  %v386_v20 = vsel %vm238_vm1, %v381_v21, %v385_v58 }
  0x55   :  { %9929 = vst [vmem:[#allocation52_spill] sm:$0xff] %v6875_v6 }
  0x5a   :  { %5732 = vmatmul.msk.bf16.gmra.mxu1 %vm566_vm2, %v378_v30  ;;  %v6860_v30 = vshll.u32 %v6139_v43, 16 }
  0x5b   :  { %5743 = vmatmul.msk.bf16.gmra.mxu2 %vm566_vm2, %v466_v59  ;;  %v6858_v59 = vld [vmem:[%s9729_s0 + $0x38] sm:$0xff] }
  0x5c   :  { %5721 = vmatmul.msk.bf16.gmra.mxu0 %vm566_vm2, %v290_v47  ;;  %9924 = vst [vmem:[#allocation47_spill] sm:$0xff] %v6860_v30  ;;  %v6869_v47 = vshrl.u32 %v6128_v17, 16  ;;  %v553_v24 = vrot.slane %v6860_v30, 1  ;;  %v6878_v27 = vshll.u32 %v6858_v59, 16  ;;  %v473_v17 = vrot.slane %v6871_v36, 1 }
  0x5d   :  { %v6924_v36 = vshrl.u32 %v6129_v22, 16  ;;  %v6934_v44 = vshrl.u32 %v6858_v59, 16 }
  0x5e   :  { %9927 = vst [vmem:[#allocation50_spill] sm:$0xff] %v6869_v47  ;;  %v554_v45 = vsel %vm238_vm1, %v549_v51, %v553_v24  ;;  %v469_v34 = vor.u32 %v6869_v47, %v465_v33  ;;  %v297_v30 = vrot.slane %v6878_v27, 1  ;;  %v6896_v33 = vld [vmem:[%s9729_s0 + $0x98] sm:$0xff] }
  0x5f   :  { %9930 = vst [vmem:[#allocation53_spill] sm:$0xff] %v6878_v27 }
  0x60   :  { %5754 = vmatmul.msk.bf16.gmra.mxu3 %vm566_vm2, %v554_v45  ;;  %v474_v15 = vsel %vm238_vm1, %v469_v34, %v473_v17  ;;  %v298_v4 = vsel %vm238_vm1, %v293_v46, %v297_v30  ;;  %9931 = vst [vmem:[#allocation54_spill] sm:$0xff] %v6896_v33  ;;  %v183_v45 = vld [vmem:[%s9730_s1] sm:$0xf]  ;;  %v6919_v34 = vshrl.u32 %v6844_v50, 16  ;;  %v301_v50 = vor.u32 %v6934_v44, %v297_v30  ;;  %v6131_v30 = vld [vmem:[%s9729_s0 + $0xf8] sm:$0xff] }
  0x61   :  { %v188_v21 = vunpack.c.l.bf16 %v183_v45  ;;  %v6913_v46 = vld [vmem:[%s9729_s0 + $0x40] sm:$0xff]  ;;  %9936 = vst [vmem:[#allocation59_spill] sm:$0xff] %v6924_v36 }
  0x62   :  { %9934 = vst [vmem:[#allocation57_spill] sm:$0xff] %v6919_v34  ;;  %v389_v22 = vor.u32 %v6919_v34, %v385_v58 }
  0x63   :  { %9940 = vst [vmem:[#allocation63_spill] sm:$0xff] %v6934_v44 }
  0x6a   :  { %5733 = vmatmul.msk.bf16.gmra.mxu1 %vm566_vm2, %v386_v20  ;;  %v6130_v20 = vld [vmem:[%s9729_s0 + $0xf0] sm:$0xff] }
  0x6b   :  { %5744 = vmatmul.msk.bf16.gmra.mxu2 %vm566_vm2, %v474_v15  ;;  %v6908_v15 = vunpack.c.l.bf16 %v101_v29  ;;  %v6926_v47 = vshll.u32 %v6130_v20, 16  ;;  %v6928_v29 = vshrl.u32 %v6139_v43, 16  ;;  %v477_v43 = vor.u32 %v6924_v36, %v473_v17  ;;  %v6957_v17 = vld [vmem:[%s9729_s0 + $0xa0] sm:$0xff] }
  0x6c   :  { %5722 = vmatmul.msk.bf16.gmra.mxu0 %vm566_vm2, %v298_v4  ;;  %v6922_v4 = vshll.u32 %v6896_v33, 16  ;;  %9942 = vst [vmem:[#allocation65_spill] sm:$0xff] %v6957_v17 }
  0x6d   :  { %9932 = vst [vmem:[#allocation55_spill] sm:$0xff] %v6908_v15  ;;  %v6916_v51 = vpack.c.bf16 %v188_v21, %v6908_v15  ;;  %v6937_v21 = vshll.u32 %v6913_v46, 16  ;;  %v557_v15 = vor.u32 %v6928_v29, %v553_v24  ;;  %v481_v23 = vrot.slane %v6926_v47, 1 }
  0x6e   :  { %9935 = vst [vmem:[#allocation58_spill] sm:$0xff] %v6922_v4  ;;  %v393_v60 = vrot.slane %v6922_v4, 1 }
  0x6f   :  { %9933 = vst [vmem:[#allocation56_spill] sm:$0xff] %v6916_v51  ;;  %v6931_v45 = vshll.u32 %v6916_v51, 16  ;;  %v305_v19 = vrot.slane %v6937_v21, 1 }
  0x70   :  { %9937 = vst [vmem:[#allocation60_spill] sm:$0xff] %v6926_v47  ;;  %v394_v24 = vsel %vm238_vm1, %v389_v22, %v393_v60  ;;  %v6976_v22 = vshll.u32 %v6131_v30, 16 }
  0x71   :  { %9938 = vst [vmem:[#allocation61_spill] sm:$0xff] %v6928_v29  ;;  %v561_v14 = vrot.slane %v6931_v45, 1  ;;  %v306_v58 = vsel %vm238_vm1, %v301_v50, %v305_v19  ;;  %v6969_v50 = vshrl.u32 %v6896_v33, 16 }
  0x72   :  { %9939 = vst [vmem:[#allocation62_spill] sm:$0xff] %v6931_v45  ;;  %v482_v45 = vsel %vm238_vm1, %v477_v43, %v481_v23  ;;  %v6979_v43 = vshrl.u32 %v6913_v46, 16  ;;  %v489_v4 = vrot.slane %v6976_v22, 1 }
  0x73   :  { %9941 = vst [vmem:[#allocation64_spill] sm:$0xff] %v6937_v21  ;;  %v562_v49 = vsel %vm238_vm1, %v557_v15, %v561_v14  ;;  %v6972_v15 = vshll.u32 %v6957_v17, 16  ;;  %v397_v29 = vor.u32 %v6969_v50, %v393_v60 }
  0x74   :  { %5755 = vmatmul.msk.bf16.gmra.mxu3 %vm566_vm2, %v562_v49  ;;  %v6966_v49 = vld [vmem:[%s9729_s0 + $0x48] sm:$0xff]  ;;  %9943 = vst [vmem:[#allocation66_spill] sm:$0xff] %v6969_v50  ;;  %v309_v34 = vor.u32 %v6979_v43, %v305_v19 }
  0x75   :  { %9944 = vst [vmem:[#allocation67_spill] sm:$0xff] %v6972_v15  ;;  %v401_v47 = vrot.slane %v6972_v15, 1  ;;  %v7007_v19 = vld [vmem:[%s9729_s0 + $0xa8] sm:$0xff] }
  0x76   :  { %9946 = vst [vmem:[#allocation69_spill] sm:$0xff] %v6976_v22 }
  0x77   :  { %9947 = vst [vmem:[#allocation70_spill] sm:$0xff] %v6979_v43 }
  0x78   :  { %9951 = vst [vmem:[#allocation74_spill] sm:$0xff] %v7007_v19 }
  0x7a   :  { %5734 = vmatmul.msk.bf16.gmra.mxu1 %vm566_vm2, %v394_v24  ;;  %v6982_v24 = vshll.u32 %v6966_v49, 16 }
  0x7b   :  { %5745 = vmatmul.msk.bf16.gmra.mxu2 %vm566_vm2, %v482_v45  ;;  %v6974_v45 = vshrl.u32 %v6130_v20, 16 }
  0x7c   :  { %5723 = vmatmul.msk.bf16.gmra.mxu0 %vm566_vm2, %v306_v58  ;;  %9948 = vst [vmem:[#allocation71_spill] sm:$0xff] %v6982_v24  ;;  %v6985_v58 = vshrl.u32 %v6916_v51, 16  ;;  %v313_v33 = vrot.slane %v6982_v24, 1  ;;  %v402_v51 = vsel %vm238_vm1, %v397_v29, %v401_v47  ;;  %v7023_v29 = vshrl.u32 %v6957_v17, 16 }
  0x7d   :  { %9945 = vst [vmem:[#allocation68_spill] sm:$0xff] %v6974_v45  ;;  %v485_v20 = vor.u32 %v6974_v45, %v481_v23  ;;  %v7016_v23 = vld [vmem:[%s9729_s0 + $0x50] sm:$0xff] }
  0x7e   :  { %9949 = vst [vmem:[#allocation72_spill] sm:$0xff] %v6985_v58  ;;  %v565_v36 = vor.u32 %v6985_v58, %v561_v14  ;;  %v314_v14 = vsel %vm238_vm1, %v309_v34, %v313_v33  ;;  %v7033_v58 = vshrl.u32 %v6966_v49, 16  ;;  %v7038_v45 = vshll.u32 %v7016_v23, 16 }
  0x7f   :  { %v490_v60 = vsel %vm238_vm1, %v485_v20, %v489_v4  ;;  %9954 = vst [vmem:[#allocation77_spill] sm:$0xff] %v7023_v29  ;;  %v7026_v20 = vshll.u32 %v7007_v19, 16 }
  0x80   :  { %9958 = vst [vmem:[#allocation81_spill] sm:$0xff] %v7033_v58  ;;  %v317_v56 = vor.u32 %v7033_v58, %v313_v33  ;;  %v321_v3 = vrot.slane %v7038_v45, 1  ;;  %v5974_v33 = vld [vmem:[%s9728_s2 + $0xc] sm:$0x3] }
  0x81   :  { %9955 = vst [vmem:[#allocation78_spill] sm:$0xff] %v7026_v20 }
  0x82   :  { %9959 = vst [vmem:[#allocation82_spill] sm:$0xff] %v7038_v45 }
  0x84   :  { %5756 = vmatmul.msk.bf16.gmra.mxu3 %vm566_vm2, %v565_v36  ;;  %v6132_v36 = vld [vmem:[%s9729_s0 + $0x100] sm:$0xff] }
  0x87   :  { %v6995_v57 = vpop.f32.mrf.mxu1 }
  0x88   :  { %9950 = vst [vmem:[#allocation73_spill] sm:$0xff] %v6995_v57  ;;  %v405_v57 = vor.u32 %v7023_v29, %v401_v47 }
  0x89   :  { %v6999_v50 = vpop.f32.mrf.mxu0 }
  0x8a   :  { %5735 = vmatmul.msk.bf16.gmra.mxu1 %vm566_vm2, %v402_v51 }
  0x8b   :  { %5746 = vmatmul.msk.bf16.gmra.mxu2 %vm566_vm2, %v490_v60  ;;  %v7028_v60 = vshrl.u32 %v6131_v30, 16  ;;  %v409_v30 = vrot.slane %v7026_v20, 1 }
  0x8c   :  { %5724 = vmatmul.msk.bf16.gmra.mxu0 %vm566_vm2, %v314_v14  ;;  %v7030_v14 = vshll.u32 %v6132_v36, 16 }
  0x8d   :  { %9956 = vst [vmem:[#allocation79_spill] sm:$0xff] %v7028_v60  ;;  %v493_v17 = vor.u32 %v7028_v60, %v489_v4  ;;  %v410_v20 = vsel %vm238_vm1, %v405_v57, %v409_v30  ;;  %v322_v4 = vsel %vm238_vm1, %v317_v56, %v321_v3  ;;  %v3168_v57 = vsel %vm690_vm0, %v5974_v33, 0  ;;  %v6058_v60 = vld [vmem:[%s9728_s2 + $0x10] sm:$0x3] }
  0x8e   :  { %v7018_v34 = vpop.f32.mrf.mxu2  ;;  %9957 = vst [vmem:[#allocation80_spill] sm:$0xff] %v7030_v14  ;;  %v497_v63 = vrot.slane %v7030_v14, 1  ;;  %3177 = vmatpush.bf16.msra.mxu2 %v3168_v57 }
  0x8f   :  { %9952 = vst [vmem:[#allocation75_spill] sm:$0xff] %v7018_v34  ;;  %v7020_v51 = vpop.f32.mrf.mxu1  ;;  %v9838_v34 = vrot.slane %v6534_v12, 1 }
  0x90   :  { %9953 = vst [vmem:[#allocation76_spill] sm:$0xff] %v7020_v51  ;;  %v1253_v51 = vrot.slane %v6588_v39, 1 }
  0x91   :  { %v7035_v22 = vpop.f32.mrf.mxu0 }
  0x92   :  { %v7047_v15 = vsel %vm1249_vm3, %v9838_v34, %v1253_v51  ;;  %v498_v34 = vsel %vm238_vm1, %v493_v17, %v497_v63  ;;  %v6016_v17 = vld [vmem:[%s9728_s2 + $0xe] sm:$0x3] }
  0x93   :  { %v7064_v14 = vpop.f32.mrf.mxu3  ;;  %v3759_v56 = vsel %vm690_vm0, %v6016_v17, 0  ;;  %v7093_v17 = vshrl.u32 %v7016_v23, 16 }
  0x94   :  { %5845 = vmatmul.msk.bf16.vlgmr.msrb.gmra.mxu3 %vm566_vm2, %v7047_v15  ;;  %9962 = vst [vmem:[#allocation85_spill] sm:$0xff] %v7064_v14 }
  0x95   :  { %3768 = vmatpush.bf16.msra.mxu3 %v3759_v56  ;;  %9967 = vst [vmem:[#allocation90_spill] sm:$0xff] %v7093_v17 }
  0x96   :  { %v7053_v31 = vpop.f32.mrf.mxu2 }
  0x97   :  { %9960 = vst [vmem:[#allocation83_spill] sm:$0xff] %v7053_v31  ;;  %v7057_v47 = vpop.f32.mrf.mxu1  ;;  %v7088_v31 = vshrl.u32 %v6132_v36, 16 }
  0x98   :  { %9961 = vst [vmem:[#allocation84_spill] sm:$0xff] %v7057_v47  ;;  %v325_v47 = vor.u32 %v7093_v17, %v321_v3 }
  0x99   :  { %v7061_v29 = vpop.f32.mrf.mxu0  ;;  %9966 = vst [vmem:[#allocation89_spill] sm:$0xff] %v7088_v31 }
  0x9a   :  { %5736 = vmatmul.msk.bf16.gmra.mxu1 %vm566_vm2, %v410_v20 }
  0x9b   :  { %5747 = vmatmul.msk.bf16.gmra.mxu2 %vm566_vm2, %v498_v34  ;;  %v5928_v34 = vld [vmem:[%s9728_s2 + $0xa] sm:$0x3]  ;;  %v7095_v56 = vpop.f32.mrf.mxu3 }
  0x9c   :  { %5725 = vmatmul.msk.bf16.gmra.mxu0 %vm566_vm2, %v322_v4  ;;  %v7085_v4 = vshrl.u32 %v7007_v19, 16  ;;  %v2859_v33 = vsel %vm690_vm0, %v5928_v34, 0  ;;  %9968 = vst [vmem:[#allocation91_spill] sm:$0xff] %v7095_v56 }
  0x9d   :  { %2868 = vmatpush.bf16.msra.mxu1 %v2859_v33  ;;  %v501_v33 = vor.u32 %v7088_v31, %v497_v63  ;;  %v9973_v63 = vrot.slane %v6517_v7, 1 }
  0x9e   :  { %v7077_v14 = vpop.f32.mrf.mxu2  ;;  %9965 = vst [vmem:[#allocation88_spill] sm:$0xff] %v7085_v4  ;;  %v413_v34 = vor.u32 %v7085_v4, %v409_v30  ;;  %v9972_v30 = vrot.slane %v6596_v42, 1  ;;  %v9978_v42 = vshll.u32 %v6534_v12, 16 }
  0x9f   :  { %9963 = vst [vmem:[#allocation86_spill] sm:$0xff] %v7077_v14  ;;  %v7082_v20 = vpop.f32.mrf.mxu1  ;;  %v1255_v14 = vrot.slane %v6649_v5, 1  ;;  %v330_v3 = vsel %vm238_vm1, %v325_v47, %v9973_v63  ;;  %v2066_v63 = vrot.slane %v6667_v25, 1 }
  0xa0   :  { %9964 = vst [vmem:[#allocation87_spill] sm:$0xff] %v7082_v20  ;;  %v4263_v20 = vsel %vm690_vm0, %v6058_v60, 0  ;;  %v418_v60 = vsel %vm238_vm1, %v413_v34, %v9971_v18  ;;  %v9977_v34 = vshrl.u32 %v6534_v12, 16  ;;  %v2064_v47 = vrot.slane %v9978_v42, 2 }
  0xa1   :  { %v7090_v57 = vpop.f32.mrf.mxu0  ;;  %v7104_v36 = vsel %vm1249_vm3, %v1253_v51, %v1255_v14  ;;  %4272 = vmatpush.bf16.msra.mxu0 %v4263_v20  ;;  %v506_v51 = vsel %vm238_vm1, %v501_v33, %v9972_v30 }
  0xa2   :  { %v2063_v33 = vrot.slane %v9977_v34, 1 }
  0xa4   :  { %5846 = vmatmul.msk.bf16.gmra.mxu3 %vm566_vm2, %v7104_v36 }
  0xa6   :  { %v7108_v19 = vpop.f32.mrf.mxu2 }
  0xa7   :  { %9969 = vst [vmem:[#allocation92_spill] sm:$0xff] %v7108_v19  ;;  %v7112_v56 = vpop.f32.mrf.mxu1  ;;  %v7125_v19 = vpop.f32.mrf.mxu3 }
  0xa8   :  { %9970 = vst [vmem:[#allocation93_spill] sm:$0xff] %v7112_v56 }
  0xa9   :  { %v7120_v20 = vpop.f32.mrf.mxu0  ;;  %9974 = vst [vmem:[#allocation94_spill] sm:$0xff] %v7125_v19 }
  0xaa   :  { %5737 = vmatmul.msk.bf16.gmra.mxu1 %vm566_vm2, %v418_v60  ;;  %v2067_v60 = vrot.slane %v6608_v48, 2  ;;  %v9981_v48 = vrot.slane %v6534_v12, 1 }
  0xab   :  { %5748 = vmatmul.msk.bf16.gmra.mxu2 %vm566_vm2, %v506_v51  ;;  %v1257_v51 = vrot.slane %v6702_v53, 1 }
  0xac   :  { %5726 = vmatmul.msk.bf16.gmra.mxu0 %vm566_vm2, %v330_v3  ;;  %v2068_v34 = vor.u32 %v2067_v60, %v2066_v63  ;;  %v1259_v60 = vrot.slane %v6754_v37, 1 }
  0xad   :  { %v7146_v3 = vsel %vm1249_vm3, %v1255_v14, %v1257_v51 }
  0xae   :  { %v7130_v31 = vpop.f32.mrf.mxu2 }
  0xaf   :  { %9975 = vst [vmem:[#allocation95_spill] sm:$0xff] %v7130_v31  ;;  %v7132_v18 = vpop.f32.mrf.mxu1  ;;  %v7142_v19 = vpop.f32.mrf.mxu3  ;;  %v1250_v31 = vrot.slane %v6529_v11, 1 }
  0xb0   :  { %9976 = vst [vmem:[#allocation96_spill] sm:$0xff] %v7132_v18  ;;  %v2065_v18 = vor.u32 %v2064_v47, %v2063_v33 }
  0xb1   :  { %v7136_v30 = vpop.f32.mrf.mxu0  ;;  %9979 = vst [vmem:[#allocation97_spill] sm:$0xff] %v7142_v19  ;;  %v1252_v19 = vsel %vm1249_vm3, %v1250_v31, %v9981_v48  ;;  %v2070_v48 = vrot.slane %v6719_v61, 1  ;;  %v2071_v31 = vrot.slane %v6670_v26, 2 }
  0xb2   :  { %v2069_v14 = vsel %vm2062_vm4, %v2065_v18, %v2068_v34 }
  0xb4   :  { %5847 = vmatmul.msk.bf16.gmra.mxu3 %vm566_vm2, %v7146_v3 }
  0xb6   :  { %v7149_v56 = vpop.f32.mrf.mxu2 }
  0xb7   :  { %9980 = vst [vmem:[#allocation98_spill] sm:$0xff] %v7149_v56  ;;  %v7153_v42 = vpop.f32.mrf.mxu1  ;;  %v7161_v13 = vpop.f32.mrf.mxu3 }
  0xb8   :  { %9982 = vst [vmem:[#allocation99_spill] sm:$0xff] %v7161_v13 }
  0xb9   :  { %v7158_v25 = vpop.f32.mrf.mxu0 }
  0xba   :  { %5757 = vmatmul.msk.bf16.vlgmr.msrb.gmra.mxu1 %vm566_vm2, %v6529_v11  ;;  %v7179_v11 = vsel %vm1249_vm3, %v1257_v51, %v1259_v60 }
  0xbb   :  { %5799 = vmatmul.msk.bf16.vlgmr.msrb.gmra.mxu2 %vm566_vm2, %v1252_v19  ;;  %v2072_v19 = vor.u32 %v2071_v31, %v2070_v48 }
  0xbc   :  { %5887 = vmatmul.msk.bf16.vlgmr.msrb.gmra.mxu0 %vm566_vm2, %v2069_v14 }
  0xbd   :  { %v2073_v61 = vsel %vm2062_vm4, %v2068_v34, %v2072_v19  ;;  %v2075_v34 = vrot.slane %v6722_v0, 2 }
  0xbe   :  { %v7167_v33 = vpop.f32.mrf.mxu2 }
  0xbf   :  { %9983 = vst [vmem:[#allocation100_spill] sm:$0xff] %v7167_v33  ;;  %v7169_v47 = vpop.f32.mrf.mxu1  ;;  %v7175_v18 = vpop.f32.mrf.mxu3 }
  0xc0   :  { %9984 = vst [vmem:[#allocation101_spill] sm:$0xff] %v7175_v18  ;;  %v2074_v18 = vrot.slane %v6771_v32, 1 }
  0xc1   :  { %v7171_v63 = vpop.f32.mrf.mxu0 }
  0xc4   :  { %5848 = vmatmul.msk.bf16.gmra.mxu3 %vm566_vm2, %v7179_v11 }
  0xc6   :  { %v7181_v13 = vpop.f32.mrf.mxu2 }
  0xc7   :  { %9985 = vst [vmem:[#allocation102_spill] sm:$0xff] %v7181_v13  ;;  %v7185_v14 = vpop.f32.mrf.mxu1  ;;  %v7190_v26 = vpop.f32.mrf.mxu3 }
  0xc8   :  { %9986 = vst [vmem:[#allocation103_spill] sm:$0xff] %v7190_v26  ;;  %v1261_v26 = vrot.slane %v6806_v54, 1 }
  0xc9   :  { %v7187_v33 = vpop.f32.mrf.mxu0 }
  0xca   :  { %5758 = vmatmul.msk.bf16.gmra.mxu1 %vm566_vm2, %v6534_v12  ;;  %v7209_v12 = vsel %vm1249_vm3, %v1259_v60, %v1261_v26 }
  0xcb   :  { %5800 = vmatmul.msk.bf16.gmra.mxu2 %vm566_vm2, %v7047_v15  ;;  %v2076_v15 = vor.u32 %v2075_v34, %v2074_v18 }
  0xcc   :  { %5888 = vmatmul.msk.bf16.gmra.mxu0 %vm566_vm2, %v2073_v61 }
  0xcd   :  { %v2077_v32 = vsel %vm2062_vm4, %v2072_v19, %v2076_v15  ;;  %v2079_v19 = vrot.slane %v6774_v28, 2 }
  0xce   :  { %v7197_v51 = vpop.f32.mrf.mxu2 }
  0xcf   :  { %9987 = vst [vmem:[#allocation104_spill] sm:$0xff] %v7197_v51  ;;  %v7199_v48 = vpop.f32.mrf.mxu1  ;;  %v7205_v13 = vpop.f32.mrf.mxu3 }
  0xd0   :  { %9988 = vst [vmem:[#allocation105_spill] sm:$0xff] %v7205_v13  ;;  %v2078_v13 = vrot.slane %v6823_v10, 1 }
  0xd1   :  { %v7201_v31 = vpop.f32.mrf.mxu0 }
  0xd4   :  { %5849 = vmatmul.msk.bf16.gmra.mxu3 %vm566_vm2, %v7209_v12 }
  0xd6   :  { %v7211_v56 = vpop.f32.mrf.mxu2 }
  0xd7   :  { %9989 = vst [vmem:[#allocation106_spill] sm:$0xff] %v7211_v56  ;;  %v7215_v61 = vpop.f32.mrf.mxu1  ;;  %v7220_v0 = vpop.f32.mrf.mxu3 }
  0xd8   :  { %9990 = vst [vmem:[#allocation107_spill] sm:$0xff] %v7215_v61 }
  0xd9   :  { %v7217_v51 = vpop.f32.mrf.mxu0  ;;  %9991 = vst [vmem:[#allocation108_spill] sm:$0xff] %v7220_v0  ;;  %v1263_v0 = vrot.slane %v6858_v59, 1 }
  0xda   :  { %5759 = vmatmul.msk.bf16.gmra.mxu1 %vm566_vm2, %v6588_v39 }
  0xdb   :  { %5801 = vmatmul.msk.bf16.gmra.mxu2 %vm566_vm2, %v7104_v36  ;;  %v7239_v39 = vsel %vm1249_vm3, %v1261_v26, %v1263_v0  ;;  %v2080_v36 = vor.u32 %v2079_v19, %v2078_v13 }
  0xdc   :  { %5889 = vmatmul.msk.bf16.gmra.mxu0 %vm566_vm2, %v2077_v32 }
  0xdd   :  { %v2081_v10 = vsel %vm2062_vm4, %v2076_v15, %v2080_v36  ;;  %v2083_v15 = vrot.slane %v6826_v52, 2 }
  0xde   :  { %v7227_v18 = vpop.f32.mrf.mxu2 }
  0xdf   :  { %9992 = vst [vmem:[#allocation109_spill] sm:$0xff] %v7227_v18  ;;  %v7229_v60 = vpop.f32.mrf.mxu1  ;;  %v7235_v56 = vpop.f32.mrf.mxu3 }
  0xe0   :  { %9993 = vst [vmem:[#allocation110_spill] sm:$0xff] %v7229_v60  ;;  %v1275_v60 = vrot.slane %v6573_v35, 1 }
  0xe1   :  { %v7231_v34 = vpop.f32.mrf.mxu0  ;;  %9994 = vst [vmem:[#allocation111_spill] sm:$0xff] %v7235_v56  ;;  %v2082_v56 = vrot.slane %v6875_v6, 1 }
  0xe4   :  { %5850 = vmatmul.msk.bf16.gmra.mxu3 %vm566_vm2, %v7239_v39 }
  0xe6   :  { %v7241_v61 = vpop.f32.mrf.mxu2 }
  0xe7   :  { %9995 = vst [vmem:[#allocation112_spill] sm:$0xff] %v7241_v61  ;;  %v7245_v32 = vpop.f32.mrf.mxu1  ;;  %v7250_v28 = vpop.f32.mrf.mxu3 }
  0xe8   :  { %9996 = vst [vmem:[#allocation113_spill] sm:$0xff] %v7245_v32 }
  0xe9   :  { %v7247_v18 = vpop.f32.mrf.mxu0  ;;  %9997 = vst [vmem:[#allocation114_spill] sm:$0xff] %v7250_v28  ;;  %v1265_v28 = vrot.slane %v6913_v46, 1 }
  0xea   :  { %5760 = vmatmul.msk.bf16.gmra.mxu1 %vm566_vm2, %v6649_v5 }
  0xeb   :  { %5802 = vmatmul.msk.bf16.gmra.mxu2 %vm566_vm2, %v7146_v3  ;;  %v7269_v5 = vsel %vm1249_vm3, %v1263_v0, %v1265_v28  ;;  %v2084_v3 = vor.u32 %v2083_v15, %v2082_v56 }
  0xec   :  { %5890 = vmatmul.msk.bf16.gmra.mxu0 %vm566_vm2, %v2081_v10 }
  0xed   :  { %v2085_v6 = vsel %vm2062_vm4, %v2080_v36, %v2084_v3  ;;  %v2087_v36 = vrot.slane %v6878_v27, 2 }
  0xee   :  { %v7257_v13 = vpop.f32.mrf.mxu2 }
  0xef   :  { %9998 = vst [vmem:[#allocation115_spill] sm:$0xff] %v7257_v13  ;;  %v7259_v26 = vpop.f32.mrf.mxu1  ;;  %v7265_v61 = vpop.f32.mrf.mxu3 }
  0xf0   :  { %9999 = vst [vmem:[#allocation116_spill] sm:$0xff] %v7259_v26 }
  0xf1   :  { %v7261_v19 = vpop.f32.mrf.mxu0  ;;  %10000 = vst [vmem:[#allocation117_spill] sm:$0xff] %v7265_v61  ;;  %v2086_v61 = vrot.slane %v6934_v44, 1 }
  0xf4   :  { %5851 = vmatmul.msk.bf16.gmra.mxu3 %vm566_vm2, %v7269_v5 }
  0xf6   :  { %v7271_v32 = vpop.f32.mrf.mxu2 }
  0xf7   :  { %10001 = vst [vmem:[#allocation118_spill] sm:$0xff] %v7271_v32  ;;  %v7275_v10 = vpop.f32.mrf.mxu1  ;;  %v7280_v52 = vpop.f32.mrf.mxu3 }
  0xf8   :  { %10002 = vst [vmem:[#allocation119_spill] sm:$0xff] %v7275_v10 }
  0xf9   :  { %v7277_v13 = vpop.f32.mrf.mxu0  ;;  %10003 = vst [vmem:[#allocation120_spill] sm:$0xff] %v7280_v52  ;;  %v1267_v52 = vrot.slane %v6966_v49, 1 }
  0xfa   :  { %5761 = vmatmul.msk.bf16.gmra.mxu1 %vm566_vm2, %v6702_v53 }
  0xfb   :  { %5803 = vmatmul.msk.bf16.gmra.mxu2 %vm566_vm2, %v7179_v11  ;;  %v7299_v53 = vsel %vm1249_vm3, %v1265_v28, %v1267_v52  ;;  %v2088_v11 = vor.u32 %v2087_v36, %v2086_v61 }
  0xfc   :  { %5891 = vmatmul.msk.bf16.gmra.mxu0 %vm566_vm2, %v2085_v6 }
  0xfd   :  { %v2089_v44 = vsel %vm2062_vm4, %v2084_v3, %v2088_v11  ;;  %v2091_v3 = vrot.slane %v6937_v21, 2  ;;  %v2095_v21 = vrot.slane %v6982_v24, 2  ;;  %v2099_v24 = vrot.slane %v7038_v45, 2 }
  0xfe   :  { %v7287_v0 = vpop.f32.mrf.mxu2 }
  0xff   :  { %10004 = vst [vmem:[#allocation121_spill] sm:$0xff] %v7287_v0  ;;  %v7289_v56 = vpop.f32.mrf.mxu1  ;;  %v7295_v32 = vpop.f32.mrf.mxu3 }
 0x100   :  { %10005 = vst [vmem:[#allocation122_spill] sm:$0xff] %v7289_v56 }
 0x101   :  { %v7291_v15 = vpop.f32.mrf.mxu0  ;;  %10006 = vst [vmem:[#allocation123_spill] sm:$0xff] %v7295_v32  ;;  %v2090_v32 = vrot.slane %v6979_v43, 1 }
 0x104   :  { %5852 = vmatmul.msk.bf16.gmra.mxu3 %vm566_vm2, %v7299_v53 }
 0x106   :  { %v7301_v10 = vpop.f32.mrf.mxu2 }
 0x107   :  { %10007 = vst [vmem:[#allocation124_spill] sm:$0xff] %v7301_v10  ;;  %v7305_v6 = vpop.f32.mrf.mxu1  ;;  %v7310_v27 = vpop.f32.mrf.mxu3 }
 0x108   :  { %10008 = vst [vmem:[#allocation125_spill] sm:$0xff] %v7305_v6  ;;  %v2092_v6 = vor.u32 %v2091_v3, %v2090_v32  ;;  %v2094_v3 = vrot.slane %v7033_v58, 1 }
 0x109   :  { %v7307_v0 = vpop.f32.mrf.mxu0  ;;  %10009 = vst [vmem:[#allocation126_spill] sm:$0xff] %v7310_v27  ;;  %v1269_v27 = vrot.slane %v7016_v23, 1 }
 0x10a   :  { %5762 = vmatmul.msk.bf16.gmra.mxu1 %vm566_vm2, %v6754_v37  ;;  %v2093_v43 = vsel %vm2062_vm4, %v2088_v11, %v2092_v6 }
 0x10b   :  { %5804 = vmatmul.msk.bf16.gmra.mxu2 %vm566_vm2, %v7209_v12  ;;  %v7327_v37 = vsel %vm1249_vm3, %v1267_v52, %v1269_v27 }
 0x10c   :  { %5892 = vmatmul.msk.bf16.gmra.mxu0 %vm566_vm2, %v2089_v44 }
 0x10e   :  { %v7317_v28 = vpop.f32.mrf.mxu2 }
 0x10f   :  { %10010 = vst [vmem:[#allocation127_spill] sm:$0xff] %v7317_v28  ;;  %v7319_v61 = vpop.f32.mrf.mxu1  ;;  %v905_v10 = vpop.f32.mrf.mxu3 }
 0x110   :  { %10011 = vst [vmem:[#allocation128_spill] sm:$0xff] %v7319_v61 }
 0x111   :  { %v7321_v36 = vpop.f32.mrf.mxu0 }
 0x114   :  { %5853 = vmatmul.msk.bf16.gmra.mxu3 %vm566_vm2, %v7327_v37 }
 0x116   :  { %v7329_v12 = vpop.f32.mrf.mxu2 }
 0x117   :  { %10012 = vst [vmem:[#allocation129_spill] sm:$0xff] %v7329_v12  ;;  %v7333_v44 = vpop.f32.mrf.mxu1  ;;  %v1775_v61 = vpop.f32.mrf.mxu3  ;;  %v1271_v12 = vrot.slane %v6499_v1, 1 }
 0x118   :  { %10013 = vst [vmem:[#allocation130_spill] sm:$0xff] %v7333_v44  ;;  %v2096_v44 = vor.u32 %v2095_v21, %v2094_v3  ;;  %v2098_v3 = vrot.slane %v7093_v17, 1 }
 0x119   :  { %v7335_v28 = vpop.f32.mrf.mxu0 }
 0x11a   :  { %5763 = vmatmul.msk.bf16.gmra.mxu1 %vm566_vm2, %v6806_v54  ;;  %v7353_v54 = vsel %vm1249_vm3, %v1269_v27, %v1271_v12  ;;  %v2097_v58 = vsel %vm2062_vm4, %v2092_v6, %v2096_v44 }
 0x11b   :  { %5805 = vmatmul.msk.bf16.gmra.mxu2 %vm566_vm2, %v7239_v39 }
 0x11c   :  { %5893 = vmatmul.msk.bf16.gmra.mxu0 %vm566_vm2, %v2093_v43 }
 0x11e   :  { %v7343_v52 = vpop.f32.mrf.mxu2 }
 0x11f   :  { %10014 = vst [vmem:[#allocation131_spill] sm:$0xff] %v7343_v52  ;;  %v7345_v32 = vpop.f32.mrf.mxu1  ;;  %v1777_v11 = vpop.f32.mrf.mxu3 }
 0x120   :  { %10015 = vst [vmem:[#allocation132_spill] sm:$0xff] %v7345_v32 }
 0x121   :  { %v7347_v10 = vpop.f32.mrf.mxu0 }
 0x124   :  { %5854 = vmatmul.msk.bf16.gmra.mxu3 %vm566_vm2, %v7353_v54 }
 0x126   :  { %v7355_v39 = vpop.f32.mrf.mxu2 }
 0x127   :  { %10016 = vst [vmem:[#allocation133_spill] sm:$0xff] %v7355_v39  ;;  %v7359_v43 = vpop.f32.mrf.mxu1  ;;  %v1780_v32 = vpop.f32.mrf.mxu3  ;;  %v1273_v39 = vrot.slane %v6504_v2, 1 }
 0x128   :  { %10017 = vst [vmem:[#allocation134_spill] sm:$0xff] %v7359_v43  ;;  %v2100_v43 = vor.u32 %v2099_v24, %v2098_v3 }
 0x129   :  { %v7361_v52 = vpop.f32.mrf.mxu0 }
 0x12a   :  { %5764 = vmatmul.msk.bf16.gmra.mxu1 %vm566_vm2, %v6858_v59  ;;  %v7379_v59 = vsel %vm1249_vm3, %v1271_v12, %v1273_v39 }
 0x12b   :  { %5806 = vmatmul.msk.bf16.gmra.mxu2 %vm566_vm2, %v7269_v5 }
 0x12c   :  { %5894 = vmatmul.msk.bf16.gmra.mxu0 %vm566_vm2, %v2097_v58 }
 0x12e   :  { %v7369_v1 = vpop.f32.mrf.mxu2 }
 0x12f   :  { %10018 = vst [vmem:[#allocation135_spill] sm:$0xff] %v7369_v1  ;;  %v7371_v27 = vpop.f32.mrf.mxu1  ;;  %v1782_v6 = vpop.f32.mrf.mxu3 }
 0x130   :  { %10019 = vst [vmem:[#allocation136_spill] sm:$0xff] %v7371_v27  ;;  %v2101_v27 = vsel %vm2062_vm4, %v2096_v44, %v2100_v43  ;;  %v2103_v44 = vrot.slane %v6517_v7, 2 }
 0x131   :  { %v7373_v21 = vpop.f32.mrf.mxu0 }
 0x134   :  { %5855 = vmatmul.msk.bf16.gmra.mxu3 %vm566_vm2, %v7379_v59 }
 0x136   :  { %v7381_v5 = vpop.f32.mrf.mxu2 }
 0x137   :  { %10020 = vst [vmem:[#allocation137_spill] sm:$0xff] %v7381_v5  ;;  %v1002_v58 = vpop.f32.mrf.mxu1  ;;  %v1785_v56 = vpop.f32.mrf.mxu3  ;;  %v2102_v5 = vrot.slane %v6520_v8, 1 }
 0x138   :  { %v1003_v2 = vadd.f32 %v1002_v58, %v6999_v50 }
 0x139   :  { %v2366_v1 = vpop.f32.mrf.mxu0  ;;  %v2104_v50 = vor.u32 %v2103_v44, %v2102_v5 }
 0x13a   :  { %5765 = vmatmul.msk.bf16.gmra.mxu1 %vm566_vm2, %v6913_v46  ;;  %v7396_v46 = vsel %vm1249_vm3, %v1273_v39, %v1275_v60 }
 0x13b   :  { %5807 = vmatmul.msk.bf16.gmra.mxu2 %vm566_vm2, %v7299_v53  ;;  %v2105_v7 = vsel %vm2062_vm4, %v2100_v43, %v2104_v50  ;;  %v2106_v43 = vrot.slane %v6591_v40, 1 }
 0x13c   :  { %5895 = vmatmul.msk.bf16.gmra.mxu0 %vm566_vm2, %v2101_v27 }
 0x13e   :  { %v1466_v24 = vpop.f32.mrf.mxu2 }
 0x13f   :  { %v1670_v12 = vadd.f32 %v1466_v24, %v1003_v2  ;;  %v1004_v3 = vpop.f32.mrf.mxu1  ;;  %v1787_v26 = vpop.f32.mrf.mxu3 }
 0x140   :  { %v1005_v27 = vadd.f32 %v1004_v3, %v7035_v22  ;;  %v2107_v3 = vrot.slane %v6523_v9, 2 }
 0x141   :  { %v1979_v45 = vadd.f32 %v1775_v61, %v1670_v12  ;;  %v2368_v17 = vpop.f32.mrf.mxu0 }
 0x143   :  { %v7398_v53 = vadd.f32 %v2366_v1, %v1979_v45 }
 0x144   :  { %5856 = vmatmul.msk.bf16.gmra.mxu3 %vm566_vm2, %v7396_v46 }
 0x146   :  { %v1468_v58 = vpop.f32.mrf.mxu2 }
 0x147   :  { %v1671_v61 = vadd.f32 %v1468_v58, %v1005_v27  ;;  %v1007_v2 = vpop.f32.mrf.mxu1  ;;  %v1790_v8 = vpop.f32.mrf.mxu3 }
 0x148   :  { %v1008_v45 = vadd.f32 %v1007_v2, %v7061_v29  ;;  %v2108_v29 = vor.u32 %v2107_v3, %v2106_v43 }
 0x149   :  { %v1980_v24 = vadd.f32 %v1777_v11, %v1671_v61  ;;  %v2371_v12 = vpop.f32.mrf.mxu0 }
 0x14a   :  { %5766 = vmatmul.msk.bf16.gmra.mxu1 %vm566_vm2, %v6966_v49  ;;  %v1277_v49 = vrot.slane %v6632_v62, 1 }
 0x14b   :  { %5808 = vmatmul.msk.bf16.gmra.mxu2 %vm566_vm2, %v7327_v37  ;;  %v7408_v35 = vadd.f32 %v2368_v17, %v1980_v24  ;;  %v2109_v24 = vsel %vm2062_vm4, %v2104_v50, %v2108_v29  ;;  %v2110_v50 = vrot.slane %v6655_v16, 1 }
 0x14c   :  { %5896 = vmatmul.msk.bf16.gmra.mxu0 %vm566_vm2, %v2105_v7  ;;  %v7418_v17 = vsel %vm1249_vm3, %v1275_v60, %v1277_v49 }
 0x14e   :  { %v1471_v22 = vpop.f32.mrf.mxu2 }
 0x14f   :  { %v1672_v39 = vadd.f32 %v1471_v22, %v1008_v45  ;;  %v1009_v1 = vpop.f32.mrf.mxu1  ;;  %v7414_v44 = vpop.f32.mrf.mxu3 }
 0x150   :  { %v1010_v7 = vadd.f32 %v1009_v1, %v7090_v57  ;;  %v2111_v1 = vrot.slane %v6594_v41, 2 }
 0x151   :  { %v1981_v11 = vadd.f32 %v1780_v32, %v1672_v39  ;;  %v2373_v5 = vpop.f32.mrf.mxu0 }
 0x152   :  { %v2112_v43 = vor.u32 %v2111_v1, %v2110_v50  ;;  %v10022_v50 = vld [vmem:[#allocation27_spill] sm:$0xff] }
 0x153   :  { %v7420_v37 = vadd.f32 %v2371_v12, %v1981_v11  ;;  %v1281_v1 = vrot.slane %v10022_v50, 1 }
 0x154   :  { %5857 = vmatmul.msk.bf16.gmra.mxu3 %vm566_vm2, %v7418_v17 }
 0x156   :  { %v1473_v27 = vpop.f32.mrf.mxu2 }
 0x157   :  { %v1673_v32 = vadd.f32 %v1473_v27, %v1010_v7  ;;  %v1012_v58 = vpop.f32.mrf.mxu1  ;;  %v7426_v45 = vpop.f32.mrf.mxu3 }
 0x158   :  { %v1013_v57 = vadd.f32 %v1012_v58, %v7120_v20  ;;  %v2113_v58 = vsel %vm2062_vm4, %v2108_v29, %v2112_v43 }
 0x159   :  { %v1982_v61 = vadd.f32 %v1782_v6, %v1673_v32  ;;  %v2376_v2 = vpop.f32.mrf.mxu0 }
 0x15a   :  { %5767 = vmatmul.msk.bf16.gmra.mxu1 %vm566_vm2, %v7016_v23  ;;  %v1279_v23 = vrot.slane %v6688_v38, 1  ;;  %v6388_v38 = vld [vmem:[%s9729_s0 + $0x58] sm:$0xff] }
 0x15b   :  { %5809 = vmatmul.msk.bf16.gmra.mxu2 %vm566_vm2, %v7353_v54  ;;  %v7432_v62 = vadd.f32 %v2373_v5, %v1982_v61 }
 0x15c   :  { %5897 = vmatmul.msk.bf16.gmra.mxu0 %vm566_vm2, %v2109_v24  ;;  %v7442_v54 = vsel %vm1249_vm3, %v1277_v49, %v1279_v23 }
 0x15e   :  { %v1476_v60 = vpop.f32.mrf.mxu2 }
 0x15f   :  { %v1674_v12 = vadd.f32 %v1476_v60, %v1013_v57  ;;  %v1014_v6 = vpop.f32.mrf.mxu1  ;;  %v7438_v11 = vpop.f32.mrf.mxu3  ;;  %v2114_v60 = vrot.slane %v6707_v55, 1 }
 0x160   :  { %v1015_v20 = vadd.f32 %v1014_v6, %v7136_v30 }
 0x161   :  { %v1983_v22 = vadd.f32 %v1785_v56, %v1674_v12  ;;  %v2378_v39 = vpop.f32.mrf.mxu0  ;;  %v10021_v12 = vld [vmem:[#allocation15_spill] sm:$0xff] }
 0x162   :  { %v2115_v6 = vrot.slane %v10021_v12, 2 }
 0x163   :  { %v7444_v5 = vadd.f32 %v2376_v2, %v1983_v22 }
 0x164   :  { %5858 = vmatmul.msk.bf16.gmra.mxu3 %vm566_vm2, %v7442_v54 }
 0x166   :  { %v1478_v3 = vpop.f32.mrf.mxu2 }
 0x167   :  { %v1675_v56 = vadd.f32 %v1478_v3, %v1015_v20  ;;  %v1017_v7 = vpop.f32.mrf.mxu1  ;;  %v7450_v61 = vpop.f32.mrf.mxu3  ;;  %v2116_v20 = vor.u32 %v2115_v6, %v2114_v60  ;;  %v10024_v60 = vld [vmem:[#allocation22_spill] sm:$0xff] }
 0x168   :  { %v2119_v6 = vrot.slane %v10024_v60, 2 }
 0x169   :  { %v1984_v27 = vadd.f32 %v1787_v26, %v1675_v56  ;;  %v2381_v32 = vpop.f32.mrf.mxu0  ;;  %v1018_v26 = vadd.f32 %v1017_v7, %v7158_v25 }
 0x16a   :  { %5768 = vmatmul.msk.bf16.gmra.mxu1 %vm566_vm2, %v6388_v38 }
 0x16b   :  { %5810 = vmatmul.msk.bf16.gmra.mxu2 %vm566_vm2, %v7379_v59  ;;  %v7458_v30 = vadd.f32 %v2378_v39, %v1984_v27  ;;  %v7468_v59 = vsel %vm1249_vm3, %v1279_v23, %v1281_v1  ;;  %v6389_v23 = vld [vmem:[%s9729_s0 + $0x60] sm:$0xff] }
 0x16c   :  { %5898 = vmatmul.msk.bf16.gmra.mxu0 %vm566_vm2, %v2113_v58  ;;  %v2117_v58 = vsel %vm2062_vm4, %v2112_v43, %v2116_v20 }
 0x16e   :  { %v1481_v49 = vpop.f32.mrf.mxu2 }
 0x16f   :  { %v1676_v2 = vadd.f32 %v1481_v49, %v1018_v26  ;;  %v1019_v29 = vpop.f32.mrf.mxu1  ;;  %v7464_v22 = vpop.f32.mrf.mxu3 }
 0x170   :  { %v1020_v25 = vadd.f32 %v1019_v29, %v7171_v63  ;;  %v10023_v29 = vld [vmem:[#allocation30_spill] sm:$0xff] }
 0x171   :  { %v1985_v24 = vadd.f32 %v1790_v8, %v1676_v2  ;;  %v2383_v57 = vpop.f32.mrf.mxu0 }
 0x173   :  { %v7470_v39 = vadd.f32 %v2381_v32, %v1985_v24  ;;  %v2118_v24 = vrot.slane %v10023_v29, 1 }
 0x174   :  { %5859 = vmatmul.msk.bf16.gmra.mxu3 %vm566_vm2, %v7468_v59 }
 0x176   :  { %v1483_v3 = vpop.f32.mrf.mxu2 }
 0x177   :  { %v1677_v8 = vadd.f32 %v1483_v3, %v1020_v25  ;;  %v1022_v56 = vpop.f32.mrf.mxu1  ;;  %v7477_v38 = vpop.f32.mrf.mxu3  ;;  %v10025_v25 = vld [vmem:[#allocation36_spill] sm:$0xff] }
 0x179   :  { %v1986_v7 = vadd.f32 %v7414_v44, %v1677_v8  ;;  %v2386_v27 = vpop.f32.mrf.mxu0  ;;  %v1023_v44 = vadd.f32 %v1022_v56, %v7187_v33  ;;  %v2120_v8 = vor.u32 %v2119_v6, %v2118_v24  ;;  %v10026_v24 = vld [vmem:[#allocation39_spill] sm:$0xff] }
 0x17a   :  { %5769 = vmatmul.msk.bf16.gmra.mxu1 %vm566_vm2, %v6389_v23  ;;  %v2122_v6 = vrot.slane %v10026_v24, 1 }
 0x17b   :  { %5811 = vmatmul.msk.bf16.gmra.mxu2 %vm566_vm2, %v7396_v46  ;;  %v7485_v63 = vadd.f32 %v2383_v57, %v1986_v7  ;;  %v1283_v46 = vrot.slane %v10025_v25, 1  ;;  %v10027_v25 = vld [vmem:[#allocation31_spill] sm:$0xff] }
 0x17c   :  { %5899 = vmatmul.msk.bf16.gmra.mxu0 %vm566_vm2, %v2117_v58 }
 0x17d   :  { %v7496_v57 = vsel %vm1249_vm3, %v1281_v1, %v1283_v46  ;;  %v6390_v1 = vld [vmem:[%s9729_s0 + $0x68] sm:$0xff] }
 0x17e   :  { %v1486_v32 = vpop.f32.mrf.mxu2 }
 0x17f   :  { %v1678_v26 = vadd.f32 %v1486_v32, %v1023_v44  ;;  %v1024_v43 = vpop.f32.mrf.mxu1  ;;  %v7492_v50 = vpop.f32.mrf.mxu3  ;;  %v2121_v44 = vsel %vm2062_vm4, %v2116_v20, %v2120_v8 }
 0x180   :  { %v1025_v33 = vadd.f32 %v1024_v43, %v7201_v31 }
 0x181   :  { %v1987_v49 = vadd.f32 %v7426_v45, %v1678_v26  ;;  %v2388_v2 = vpop.f32.mrf.mxu0 }
 0x183   :  { %v7498_v3 = vadd.f32 %v2386_v27, %v1987_v49 }
 0x184   :  { %5860 = vmatmul.msk.bf16.gmra.mxu3 %vm566_vm2, %v7496_v57 }
 0x186   :  { %v1488_v56 = vpop.f32.mrf.mxu2 }
 0x187   :  { %v1679_v45 = vadd.f32 %v1488_v56, %v1025_v33  ;;  %v1027_v7 = vpop.f32.mrf.mxu1  ;;  %v7505_v32 = vpop.f32.mrf.mxu3  ;;  %v2123_v33 = vrot.slane %v10027_v25, 2 }
 0x189   :  { %v1988_v58 = vadd.f32 %v7438_v11, %v1679_v45  ;;  %v2391_v23 = vpop.f32.mrf.mxu0  ;;  %v1028_v11 = vadd.f32 %v1027_v7, %v7217_v51  ;;  %v10028_v45 = vld [vmem:[#allocation45_spill] sm:$0xff]  ;;  %v2124_v7 = vor.u32 %v2123_v33, %v2122_v6  ;;  %v10031_v33 = vld [vmem:[#allocation48_spill] sm:$0xff] }
 0x18a   :  { %5770 = vmatmul.msk.bf16.gmra.mxu1 %vm566_vm2, %v6390_v1 }
 0x18b   :  { %5812 = vmatmul.msk.bf16.gmra.mxu2 %vm566_vm2, %v7418_v17  ;;  %v7513_v31 = vadd.f32 %v2388_v2, %v1988_v58  ;;  %v1285_v17 = vrot.slane %v10028_v45, 1 }
 0x18c   :  { %5900 = vmatmul.msk.bf16.gmra.mxu0 %vm566_vm2, %v2121_v44 }
 0x18d   :  { %v7524_v2 = vsel %vm1249_vm3, %v1283_v46, %v1285_v17  ;;  %v6391_v46 = vld [vmem:[%s9729_s0 + $0x70] sm:$0xff] }
 0x18e   :  { %v1491_v27 = vpop.f32.mrf.mxu2 }
 0x18f   :  { %v1680_v26 = vadd.f32 %v1491_v27, %v1028_v11  ;;  %v1029_v20 = vpop.f32.mrf.mxu1  ;;  %v7520_v56 = vpop.f32.mrf.mxu3 }
 0x190   :  { %v1030_v51 = vadd.f32 %v1029_v20, %v7231_v34 }
 0x191   :  { %v1989_v43 = vadd.f32 %v7450_v61, %v1680_v26  ;;  %v2393_v49 = vpop.f32.mrf.mxu0  ;;  %v2125_v26 = vsel %vm2062_vm4, %v2120_v8, %v2124_v7 }
 0x193   :  { %v7526_v58 = vadd.f32 %v2391_v23, %v1989_v43 }
 0x194   :  { %5861 = vmatmul.msk.bf16.gmra.mxu3 %vm566_vm2, %v7524_v2 }
 0x195   :  { %10029 = vst [vmem:[#allocation15_spill] sm:$0xff] %v7526_v58  ;;  %v10033_v58 = vld [vmem:[#allocation54_spill] sm:$0xff] }
 0x196   :  { %v1493_v44 = vpop.f32.mrf.mxu2 }
 0x197   :  { %v1681_v61 = vadd.f32 %v1493_v44, %v1030_v51  ;;  %v1032_v1 = vpop.f32.mrf.mxu1  ;;  %v7533_v45 = vpop.f32.mrf.mxu3  ;;  %v2126_v51 = vrot.slane %v10031_v33, 1  ;;  %v10032_v44 = vld [vmem:[#allocation40_spill] sm:$0xff] }
 0x199   :  { %v1990_v11 = vadd.f32 %v7464_v22, %v1681_v61  ;;  %v2396_v27 = vpop.f32.mrf.mxu0  ;;  %v1033_v22 = vadd.f32 %v1032_v1, %v7247_v18  ;;  %v2127_v61 = vrot.slane %v10032_v44, 2 }
 0x19a   :  { %5771 = vmatmul.msk.bf16.gmra.mxu1 %vm566_vm2, %v6391_v46 }
 0x19b   :  { %5813 = vmatmul.msk.bf16.gmra.mxu2 %vm566_vm2, %v7442_v54  ;;  %v7541_v34 = vadd.f32 %v2393_v49, %v1990_v11  ;;  %v1287_v54 = vrot.slane %v10033_v58, 1  ;;  %v2128_v1 = vor.u32 %v2127_v61, %v2126_v51  ;;  %v10036_v61 = vld [vmem:[#allocation57_spill] sm:$0xff] }
 0x19c   :  { %5901 = vmatmul.msk.bf16.gmra.mxu0 %vm566_vm2, %v2125_v26 }
 0x19d   :  { %10030 = vst [vmem:[#allocation27_spill] sm:$0xff] %v7541_v34  ;;  %v7552_v49 = vsel %vm1249_vm3, %v1285_v17, %v1287_v54  ;;  %v2129_v34 = vsel %vm2062_vm4, %v2124_v7, %v2128_v1  ;;  %v6392_v17 = vld [vmem:[%s9729_s0 + $0x78] sm:$0xff] }
 0x19e   :  { %v1496_v23 = vpop.f32.mrf.mxu2 }
 0x19f   :  { %v1682_v20 = vadd.f32 %v1496_v23, %v1033_v22  ;;  %v1034_v8 = vpop.f32.mrf.mxu1  ;;  %v7548_v46 = vpop.f32.mrf.mxu3 }
 0x1a0   :  { %v1035_v18 = vadd.f32 %v1034_v8, %v7261_v19 }
 0x1a1   :  { %v1991_v43 = vadd.f32 %v7477_v38, %v1682_v20  ;;  %v2398_v6 = vpop.f32.mrf.mxu0 }
 0x1a3   :  { %v7554_v11 = vadd.f32 %v2396_v27, %v1991_v43 }
 0x1a4   :  { %5862 = vmatmul.msk.bf16.gmra.mxu3 %vm566_vm2, %v7552_v49 }
 0x1a5   :  { %10034 = vst [vmem:[#allocation30_spill] sm:$0xff] %v7554_v11  ;;  %v10038_v11 = vld [vmem:[#allocation65_spill] sm:$0xff] }
 0x1a6   :  { %v1498_v26 = vpop.f32.mrf.mxu2 }
 0x1a7   :  { %v1683_v38 = vadd.f32 %v1498_v26, %v1035_v18  ;;  %v1037_v22 = vpop.f32.mrf.mxu1  ;;  %v7561_v58 = vpop.f32.mrf.mxu3  ;;  %v2130_v18 = vrot.slane %v10036_v61, 1  ;;  %v10037_v26 = vld [vmem:[#allocation49_spill] sm:$0xff] }
 0x1a9   :  { %v1992_v23 = vadd.f32 %v7492_v50, %v1683_v38  ;;  %v2401_v20 = vpop.f32.mrf.mxu0  ;;  %v1038_v50 = vadd.f32 %v1037_v22, %v7277_v13  ;;  %v2131_v38 = vrot.slane %v10037_v26, 2 }
 0x1aa   :  { %5772 = vmatmul.msk.bf16.gmra.mxu1 %vm566_vm2, %v6392_v17 }
 0x1ab   :  { %5814 = vmatmul.msk.bf16.gmra.mxu2 %vm566_vm2, %v7468_v59  ;;  %v7569_v19 = vadd.f32 %v2398_v6, %v1992_v23  ;;  %v1289_v59 = vrot.slane %v10038_v11, 1  ;;  %v2132_v22 = vor.u32 %v2131_v38, %v2130_v18  ;;  %v10041_v38 = vld [vmem:[#allocation66_spill] sm:$0xff] }
 0x1ac   :  { %5902 = vmatmul.msk.bf16.gmra.mxu0 %vm566_vm2, %v2129_v34 }
 0x1ad   :  { %10035 = vst [vmem:[#allocation22_spill] sm:$0xff] %v7569_v19  ;;  %v7580_v6 = vsel %vm1249_vm3, %v1287_v54, %v1289_v59  ;;  %v2133_v19 = vsel %vm2062_vm4, %v2128_v1, %v2132_v22  ;;  %v6393_v54 = vld [vmem:[%s9729_s0 + $0x80] sm:$0xff] }
 0x1ae   :  { %v1501_v27 = vpop.f32.mrf.mxu2 }
 0x1af   :  { %v1684_v8 = vadd.f32 %v1501_v27, %v1038_v50  ;;  %v1039_v7 = vpop.f32.mrf.mxu1  ;;  %v7576_v17 = vpop.f32.mrf.mxu3 }
 0x1b0   :  { %v1040_v13 = vadd.f32 %v1039_v7, %v7291_v15 }
 0x1b1   :  { %v1993_v43 = vadd.f32 %v7505_v32, %v1684_v8  ;;  %v2403_v51 = vpop.f32.mrf.mxu0 }
 0x1b3   :  { %v7582_v34 = vadd.f32 %v2401_v20, %v1993_v43 }
 0x1b4   :  { %5863 = vmatmul.msk.bf16.gmra.mxu3 %vm566_vm2, %v7580_v6 }
 0x1b5   :  { %10039 = vst [vmem:[#allocation36_spill] sm:$0xff] %v7582_v34  ;;  %v10043_v34 = vld [vmem:[#allocation74_spill] sm:$0xff] }
 0x1b6   :  { %v1503_v23 = vpop.f32.mrf.mxu2 }
 0x1b7   :  { %v1685_v32 = vadd.f32 %v1503_v23, %v1040_v13  ;;  %v1042_v50 = vpop.f32.mrf.mxu1  ;;  %v7589_v11 = vpop.f32.mrf.mxu3  ;;  %v2134_v13 = vrot.slane %v10041_v38, 1  ;;  %v10042_v23 = vld [vmem:[#allocation58_spill] sm:$0xff] }
 0x1b9   :  { %v1994_v27 = vadd.f32 %v7520_v56, %v1685_v32  ;;  %v2406_v8 = vpop.f32.mrf.mxu0  ;;  %v1043_v56 = vadd.f32 %v1042_v50, %v7307_v0  ;;  %v2135_v32 = vrot.slane %v10042_v23, 2 }
 0x1ba   :  { %5773 = vmatmul.msk.bf16.gmra.mxu1 %vm566_vm2, %v6393_v54 }
 0x1bb   :  { %5815 = vmatmul.msk.bf16.gmra.mxu2 %vm566_vm2, %v7496_v57  ;;  %v7597_v15 = vadd.f32 %v2403_v51, %v1994_v27  ;;  %v1291_v57 = vrot.slane %v10043_v34, 1  ;;  %v2136_v50 = vor.u32 %v2135_v32, %v2134_v13  ;;  %v10046_v32 = vld [vmem:[#allocation77_spill] sm:$0xff] }
 0x1bc   :  { %5903 = vmatmul.msk.bf16.gmra.mxu0 %vm566_vm2, %v2133_v19 }
 0x1bd   :  { %10040 = vst [vmem:[#allocation39_spill] sm:$0xff] %v7597_v15  ;;  %v7608_v51 = vsel %vm1249_vm3, %v1289_v59, %v1291_v57  ;;  %v2137_v15 = vsel %vm2062_vm4, %v2132_v22, %v2136_v50  ;;  %v6394_v59 = vld [vmem:[%s9729_s0 + $0x88] sm:$0xff] }
 0x1be   :  { %v1506_v20 = vpop.f32.mrf.mxu2 }
 0x1bf   :  { %v1686_v7 = vadd.f32 %v1506_v20, %v1043_v56  ;;  %v1044_v1 = vpop.f32.mrf.mxu1  ;;  %v7604_v54 = vpop.f32.mrf.mxu3 }
 0x1c0   :  { %v1045_v0 = vadd.f32 %v1044_v1, %v7321_v36 }
 0x1c1   :  { %v1995_v43 = vadd.f32 %v7533_v45, %v1686_v7  ;;  %v2408_v18 = vpop.f32.mrf.mxu0 }
 0x1c3   :  { %v7610_v19 = vadd.f32 %v2406_v8, %v1995_v43 }
 0x1c4   :  { %5864 = vmatmul.msk.bf16.gmra.mxu3 %vm566_vm2, %v7608_v51 }
 0x1c5   :  { %10044 = vst [vmem:[#allocation31_spill] sm:$0xff] %v7610_v19 }
 0x1c6   :  { %v1508_v27 = vpop.f32.mrf.mxu2 }
 0x1c7   :  { %v1687_v45 = vadd.f32 %v1508_v27, %v1045_v0  ;;  %v1047_v56 = vpop.f32.mrf.mxu1  ;;  %v7617_v34 = vpop.f32.mrf.mxu3  ;;  %v2138_v0 = vrot.slane %v10046_v32, 1  ;;  %v10047_v27 = vld [vmem:[#allocation67_spill] sm:$0xff] }
 0x1c9   :  { %v1996_v20 = vadd.f32 %v7548_v46, %v1687_v45  ;;  %v2411_v7 = vpop.f32.mrf.mxu0  ;;  %v1048_v46 = vadd.f32 %v1047_v56, %v7335_v28  ;;  %v2139_v45 = vrot.slane %v10047_v27, 2 }
 0x1ca   :  { %5774 = vmatmul.msk.bf16.gmra.mxu1 %vm566_vm2, %v6394_v59 }
 0x1cb   :  { %5816 = vmatmul.msk.bf16.gmra.mxu2 %vm566_vm2, %v7524_v2  ;;  %v7625_v36 = vadd.f32 %v2408_v18, %v1996_v20  ;;  %v7637_v2 = vld [vmem:[%s9729_s0 + $0xb0] sm:$0xff]  ;;  %v2140_v56 = vor.u32 %v2139_v45, %v2138_v0  ;;  %v2142_v45 = vrot.slane %v7085_v4, 1 }
 0x1cc   :  { %5904 = vmatmul.msk.bf16.gmra.mxu0 %vm566_vm2, %v2137_v15  ;;  %v1293_v15 = vrot.slane %v7637_v2, 1 }
 0x1cd   :  { %10045 = vst [vmem:[#allocation45_spill] sm:$0xff] %v7625_v36  ;;  %v2141_v19 = vsel %vm2062_vm4, %v2136_v50, %v2140_v56 }
 0x1ce   :  { %v1511_v8 = vpop.f32.mrf.mxu2  ;;  %v7641_v28 = vsel %vm1249_vm3, %v1291_v57, %v1293_v15  ;;  %v6396_v57 = vld [vmem:[%s9729_s0 + $0x90] sm:$0xff] }
 0x1cf   :  { %v1688_v1 = vadd.f32 %v1511_v8, %v1048_v46  ;;  %v1049_v22 = vpop.f32.mrf.mxu1  ;;  %v7632_v59 = vpop.f32.mrf.mxu3 }
 0x1d1   :  { %v1997_v43 = vadd.f32 %v7561_v58, %v1688_v1  ;;  %v2413_v13 = vpop.f32.mrf.mxu0  ;;  %v1050_v58 = vadd.f32 %v1049_v22, %v7347_v10 }
 0x1d3   :  { %v7643_v18 = vadd.f32 %v2411_v7, %v1997_v43 }
 0x1d4   :  { %5865 = vmatmul.msk.bf16.gmra.mxu3 %vm566_vm2, %v7641_v28 }
 0x1d5   :  { %10048 = vst [vmem:[#allocation48_spill] sm:$0xff] %v7643_v18 }
 0x1d6   :  { %v1513_v20 = vpop.f32.mrf.mxu2 }
 0x1d7   :  { %v1689_v46 = vadd.f32 %v1513_v20, %v1050_v58  ;;  %v1052_v8 = vpop.f32.mrf.mxu1  ;;  %v7650_v27 = vpop.f32.mrf.mxu3  ;;  %v10050_v58 = vld [vmem:[#allocation78_spill] sm:$0xff] }
 0x1d8   :  { %v2143_v20 = vrot.slane %v10050_v58, 2 }
 0x1d9   :  { %v1998_v1 = vadd.f32 %v7576_v17, %v1689_v46  ;;  %v2416_v36 = vpop.f32.mrf.mxu0  ;;  %v1053_v17 = vadd.f32 %v1052_v8, %v7361_v52 }
 0x1da   :  { %5775 = vmatmul.msk.bf16.gmra.mxu1 %vm566_vm2, %v6396_v57  ;;  %v2144_v8 = vor.u32 %v2143_v20, %v2142_v45 }
 0x1db   :  { %5817 = vmatmul.msk.bf16.gmra.mxu2 %vm566_vm2, %v7552_v49  ;;  %v7658_v10 = vadd.f32 %v2413_v13, %v1998_v1  ;;  %v7670_v49 = vld [vmem:[%s9729_s0 + $0xb8] sm:$0xff] }
 0x1dc   :  { %5905 = vmatmul.msk.bf16.gmra.mxu0 %vm566_vm2, %v2141_v19  ;;  %v1295_v19 = vrot.slane %v7670_v49, 1 }
 0x1dd   :  { %10049 = vst [vmem:[#allocation40_spill] sm:$0xff] %v7658_v10  ;;  %v2145_v10 = vsel %vm2062_vm4, %v2140_v56, %v2144_v8 }
 0x1de   :  { %v1516_v7 = vpop.f32.mrf.mxu2  ;;  %v7674_v52 = vsel %vm1249_vm3, %v1293_v15, %v1295_v19  ;;  %v10053_v15 = vld [vmem:[#allocation73_spill] sm:$0xff] }
 0x1df   :  { %v1690_v22 = vadd.f32 %v1516_v7, %v1053_v17  ;;  %v1054_v50 = vpop.f32.mrf.mxu1  ;;  %v7665_v46 = vpop.f32.mrf.mxu3 }
 0x1e1   :  { %v1999_v43 = vadd.f32 %v7589_v11, %v1690_v22  ;;  %v2418_v0 = vpop.f32.mrf.mxu0  ;;  %v1055_v11 = vadd.f32 %v1054_v50, %v7373_v21 }
 0x1e3   :  { %v7676_v13 = vadd.f32 %v2416_v36, %v1999_v43  ;;  %v6398_v36 = vld [vmem:[%s9729_s0 + $0x98] sm:$0xff] }
 0x1e4   :  { %5866 = vmatmul.msk.bf16.gmra.mxu3 %vm566_vm2, %v7674_v52 }
 0x1e5   :  { %10051 = vst [vmem:[#allocation54_spill] sm:$0xff] %v7676_v13 }
 0x1e6   :  { %v1518_v1 = vpop.f32.mrf.mxu2 }
 0x1e7   :  { %v1691_v57 = vadd.f32 %v1518_v1, %v1055_v11  ;;  %v1057_v17 = vpop.f32.mrf.mxu1  ;;  %v7683_v18 = vpop.f32.mrf.mxu3  ;;  %v10054_v11 = vld [vmem:[#allocation5_spill] sm:$0xff] }
 0x1e8   :  { %v2146_v1 = vrot.slane %v10054_v11, 1 }
 0x1e9   :  { %v2000_v7 = vadd.f32 %v7604_v54, %v1691_v57  ;;  %v2421_v22 = vpop.f32.mrf.mxu0  ;;  %v1058_v54 = vadd.f32 %v1057_v17, %v10053_v15  ;;  %v10055_v57 = vld [vmem:[#allocation4_spill] sm:$0xff] }
 0x1ea   :  { %5776 = vmatmul.msk.bf16.gmra.mxu1 %vm566_vm2, %v6398_v36  ;;  %v2147_v13 = vrot.slane %v10055_v57, 2 }
 0x1eb   :  { %5818 = vmatmul.msk.bf16.gmra.mxu2 %vm566_vm2, %v7580_v6  ;;  %v7691_v21 = vadd.f32 %v2418_v0, %v2000_v7  ;;  %v7703_v6 = vld [vmem:[%s9729_s0 + $0xc0] sm:$0xff] }
 0x1ec   :  { %5906 = vmatmul.msk.bf16.gmra.mxu0 %vm566_vm2, %v2145_v10  ;;  %v1297_v10 = vrot.slane %v7703_v6, 1  ;;  %v2148_v15 = vor.u32 %v2147_v13, %v2146_v1 }
 0x1ed   :  { %10052 = vst [vmem:[#allocation57_spill] sm:$0xff] %v7691_v21 }
 0x1ee   :  { %v1521_v50 = vpop.f32.mrf.mxu2  ;;  %v7707_v0 = vsel %vm1249_vm3, %v1295_v19, %v1297_v10  ;;  %v2149_v11 = vsel %vm2062_vm4, %v2144_v8, %v2148_v15  ;;  %v6400_v19 = vld [vmem:[%s9729_s0 + $0xa0] sm:$0xff] }
 0x1ef   :  { %v1692_v43 = vadd.f32 %v1521_v50, %v1058_v54  ;;  %v1059_v56 = vpop.f32.mrf.mxu1  ;;  %v7698_v36 = vpop.f32.mrf.mxu3 }
 0x1f1   :  { %v2001_v45 = vadd.f32 %v7617_v34, %v1692_v43  ;;  %v2423_v20 = vpop.f32.mrf.mxu0  ;;  %v10057_v34 = vld [vmem:[#allocation76_spill] sm:$0xff] }
 0x1f2   :  { %v1060_v7 = vadd.f32 %v1059_v56, %v10057_v34 }
 0x1f3   :  { %v7709_v17 = vadd.f32 %v2421_v22, %v2001_v45  ;;  %v10059_v22 = vld [vmem:[#allocation84_spill] sm:$0xff] }
 0x1f4   :  { %5867 = vmatmul.msk.bf16.gmra.mxu3 %vm566_vm2, %v7707_v0 }
 0x1f5   :  { %10056 = vst [vmem:[#allocation49_spill] sm:$0xff] %v7709_v17 }
 0x1f6   :  { %v1523_v54 = vpop.f32.mrf.mxu2 }
 0x1f7   :  { %v1693_v50 = vadd.f32 %v1523_v54, %v1060_v7  ;;  %v1062_v43 = vpop.f32.mrf.mxu1  ;;  %v7716_v58 = vpop.f32.mrf.mxu3  ;;  %v10060_v7 = vld [vmem:[#allocation9_spill] sm:$0xff] }
 0x1f8   :  { %v2150_v54 = vrot.slane %v10060_v7, 1 }
 0x1f9   :  { %v2002_v21 = vadd.f32 %v7632_v59, %v1693_v50  ;;  %v2426_v57 = vpop.f32.mrf.mxu0  ;;  %v1063_v59 = vadd.f32 %v1062_v43, %v10059_v22  ;;  %v10061_v50 = vld [vmem:[#allocation6_spill] sm:$0xff] }
 0x1fa   :  { %5777 = vmatmul.msk.bf16.gmra.mxu1 %vm566_vm2, %v6400_v19  ;;  %v2151_v17 = vrot.slane %v10061_v50, 2 }
 0x1fb   :  { %5819 = vmatmul.msk.bf16.gmra.mxu2 %vm566_vm2, %v7608_v51  ;;  %v7724_v13 = vadd.f32 %v2423_v20, %v2002_v21  ;;  %v7736_v51 = vld [vmem:[%s9729_s0 + $0xc8] sm:$0xff] }
 0x1fc   :  { %5907 = vmatmul.msk.bf16.gmra.mxu0 %vm566_vm2, %v2149_v11  ;;  %v1299_v21 = vrot.slane %v7736_v51, 1  ;;  %v2152_v22 = vor.u32 %v2151_v17, %v2150_v54  ;;  %v10065_v17 = vld [vmem:[#allocation93_spill] sm:$0xff] }
 0x1fd   :  { %10058 = vst [vmem:[#allocation65_spill] sm:$0xff] %v7724_v13 }
 0x1fe   :  { %v1526_v56 = vpop.f32.mrf.mxu2  ;;  %v7740_v20 = vsel %vm1249_vm3, %v1297_v10, %v1299_v21  ;;  %v2153_v7 = vsel %vm2062_vm4, %v2148_v15, %v2152_v22 }
 0x1ff   :  { %v1694_v45 = vadd.f32 %v1526_v56, %v1063_v59  ;;  %v1064_v8 = vpop.f32.mrf.mxu1  ;;  %v7731_v19 = vpop.f32.mrf.mxu3 }
 0x201   :  { %v2003_v1 = vadd.f32 %v7650_v27, %v1694_v45  ;;  %v2428_v34 = vpop.f32.mrf.mxu0  ;;  %v10063_v27 = vld [vmem:[#allocation87_spill] sm:$0xff] }
 0x202   :  { %v1065_v43 = vadd.f32 %v1064_v8, %v10063_v27 }
 0x203   :  { %v7742_v11 = vadd.f32 %v2426_v57, %v2003_v1  ;;  %v6402_v57 = vld [vmem:[%s9729_s0 + $0xa8] sm:$0xff] }
 0x204   :  { %5868 = vmatmul.msk.bf16.gmra.mxu3 %vm566_vm2, %v7740_v20 }
 0x205   :  { %10062 = vst [vmem:[#allocation66_spill] sm:$0xff] %v7742_v11 }
 0x206   :  { %v1528_v59 = vpop.f32.mrf.mxu2 }
 0x207   :  { %v1695_v56 = vadd.f32 %v1528_v59, %v1065_v43  ;;  %v1067_v45 = vpop.f32.mrf.mxu1  ;;  %v7749_v4 = vpop.f32.mrf.mxu3  ;;  %v10066_v43 = vld [vmem:[#allocation16_spill] sm:$0xff] }
 0x208   :  { %v2154_v59 = vrot.slane %v10066_v43, 1 }
 0x209   :  { %v2004_v13 = vadd.f32 %v7665_v46, %v1695_v56  ;;  %v2431_v50 = vpop.f32.mrf.mxu0  ;;  %v1068_v46 = vadd.f32 %v1067_v45, %v10065_v17  ;;  %v10067_v56 = vld [vmem:[#allocation10_spill] sm:$0xff] }
 0x20a   :  { %5778 = vmatmul.msk.bf16.gmra.mxu1 %vm566_vm2, %v6402_v57  ;;  %v2155_v11 = vrot.slane %v10067_v56, 2 }
 0x20b   :  { %5820 = vmatmul.msk.bf16.gmra.mxu2 %vm566_vm2, %v7641_v28  ;;  %v7757_v10 = vadd.f32 %v2428_v34, %v2004_v13  ;;  %v7769_v28 = vld [vmem:[%s9729_s0 + $0xd0] sm:$0xff] }
 0x20c   :  { %5908 = vmatmul.msk.bf16.gmra.mxu0 %vm566_vm2, %v2153_v7  ;;  %v1301_v13 = vrot.slane %v7769_v28, 1  ;;  %v2156_v17 = vor.u32 %v2155_v11, %v2154_v59  ;;  %v10071_v59 = vld [vmem:[#allocation23_spill] sm:$0xff] }
 0x20d   :  { %10064 = vst [vmem:[#allocation58_spill] sm:$0xff] %v7757_v10 }
 0x20e   :  { %v1531_v8 = vpop.f32.mrf.mxu2  ;;  %v7773_v34 = vsel %vm1249_vm3, %v1299_v21, %v1301_v13  ;;  %v2157_v43 = vsel %vm2062_vm4, %v2152_v22, %v2156_v17 }
 0x20f   :  { %v1696_v1 = vadd.f32 %v1531_v8, %v1068_v46  ;;  %v1069_v15 = vpop.f32.mrf.mxu1  ;;  %v7764_v57 = vpop.f32.mrf.mxu3 }
 0x211   :  { %v2005_v54 = vadd.f32 %v7683_v18, %v1696_v1  ;;  %v2433_v27 = vpop.f32.mrf.mxu0  ;;  %v10069_v18 = vld [vmem:[#allocation96_spill] sm:$0xff] }
 0x212   :  { %v1070_v45 = vadd.f32 %v1069_v15, %v10069_v18  ;;  %v2158_v18 = vrot.slane %v10071_v59, 1 }
 0x213   :  { %v7775_v7 = vadd.f32 %v2431_v50, %v2005_v54 }
 0x214   :  { %5869 = vmatmul.msk.bf16.gmra.mxu3 %vm566_vm2, %v7773_v34 }
 0x215   :  { %10068 = vst [vmem:[#allocation74_spill] sm:$0xff] %v7775_v7 }
 0x216   :  { %v1533_v46 = vpop.f32.mrf.mxu2 }
 0x217   :  { %v1697_v8 = vadd.f32 %v1533_v46, %v1070_v45  ;;  %v1072_v1 = vpop.f32.mrf.mxu1  ;;  %v7782_v32 = vpop.f32.mrf.mxu3  ;;  %v10072_v45 = vld [vmem:[#allocation17_spill] sm:$0xff] }
 0x218   :  { %v1073_v21 = vadd.f32 %v1072_v1, %v7153_v42  ;;  %v2159_v46 = vrot.slane %v10072_v45, 2 }
 0x219   :  { %v2006_v10 = vadd.f32 %v7698_v36, %v1697_v8  ;;  %v2436_v56 = vpop.f32.mrf.mxu0 }
 0x21a   :  { %5779 = vmatmul.msk.bf16.gmra.mxu1 %vm566_vm2, %v7637_v2 }
 0x21b   :  { %5821 = vmatmul.msk.bf16.gmra.mxu2 %vm566_vm2, %v7674_v52  ;;  %v7788_v50 = vadd.f32 %v2433_v27, %v2006_v10  ;;  %v7800_v52 = vld [vmem:[%s9729_s0 + $0xd8] sm:$0xff] }
 0x21c   :  { %5909 = vmatmul.msk.bf16.gmra.mxu0 %vm566_vm2, %v2157_v43  ;;  %v1303_v10 = vrot.slane %v7800_v52, 1  ;;  %v2160_v43 = vor.u32 %v2159_v46, %v2158_v18  ;;  %v10075_v18 = vld [vmem:[#allocation32_spill] sm:$0xff] }
 0x21d   :  { %10070 = vst [vmem:[#allocation73_spill] sm:$0xff] %v7788_v50  ;;  %v2162_v46 = vrot.slane %v10075_v18, 1 }
 0x21e   :  { %v1536_v11 = vpop.f32.mrf.mxu2  ;;  %v7804_v42 = vsel %vm1249_vm3, %v1301_v13, %v1303_v10  ;;  %v2161_v50 = vsel %vm2062_vm4, %v2156_v17, %v2160_v43 }
 0x21f   :  { %v1698_v15 = vadd.f32 %v1536_v11, %v1073_v21  ;;  %v1074_v36 = vpop.f32.mrf.mxu1  ;;  %v7795_v2 = vpop.f32.mrf.mxu3 }
 0x221   :  { %v2007_v54 = vadd.f32 %v7716_v58, %v1698_v15  ;;  %v2438_v22 = vpop.f32.mrf.mxu0  ;;  %v1075_v58 = vadd.f32 %v1074_v36, %v7169_v47 }
 0x223   :  { %v7806_v27 = vadd.f32 %v2436_v56, %v2007_v54 }
 0x224   :  { %5870 = vmatmul.msk.bf16.gmra.mxu3 %vm566_vm2, %v7804_v42 }
 0x225   :  { %10073 = vst [vmem:[#allocation76_spill] sm:$0xff] %v7806_v27 }
 0x226   :  { %v1538_v8 = vpop.f32.mrf.mxu2 }
 0x227   :  { %v1699_v1 = vadd.f32 %v1538_v8, %v1075_v58  ;;  %v1077_v21 = vpop.f32.mrf.mxu1  ;;  %v7813_v7 = vpop.f32.mrf.mxu3  ;;  %v10076_v58 = vld [vmem:[#allocation24_spill] sm:$0xff] }
 0x228   :  { %v1078_v56 = vadd.f32 %v1077_v21, %v7185_v14  ;;  %v2163_v8 = vrot.slane %v10076_v58, 2 }
 0x229   :  { %v2008_v11 = vadd.f32 %v7731_v19, %v1699_v1  ;;  %v2441_v15 = vpop.f32.mrf.mxu0 }
 0x22a   :  { %5780 = vmatmul.msk.bf16.gmra.mxu1 %vm566_vm2, %v7670_v49  ;;  %v2164_v1 = vor.u32 %v2163_v8, %v2162_v46  ;;  %v10080_v8 = vld [vmem:[#allocation41_spill] sm:$0xff] }
 0x22b   :  { %5822 = vmatmul.msk.bf16.gmra.mxu2 %vm566_vm2, %v7707_v0  ;;  %v7819_v47 = vadd.f32 %v2438_v22, %v2008_v11  ;;  %v7831_v0 = vld [vmem:[%s9729_s0 + $0xe0] sm:$0xff] }
 0x22c   :  { %5910 = vmatmul.msk.bf16.gmra.mxu0 %vm566_vm2, %v2161_v50  ;;  %v1305_v50 = vrot.slane %v7831_v0, 1 }
 0x22d   :  { %10074 = vst [vmem:[#allocation84_spill] sm:$0xff] %v7819_v47  ;;  %v2165_v47 = vsel %vm2062_vm4, %v2160_v43, %v2164_v1 }
 0x22e   :  { %v1541_v13 = vpop.f32.mrf.mxu2  ;;  %v7835_v14 = vsel %vm1249_vm3, %v1303_v10, %v1305_v50  ;;  %v10079_v10 = vld [vmem:[#allocation107_spill] sm:$0xff] }
 0x22f   :  { %v1700_v36 = vadd.f32 %v1541_v13, %v1078_v56  ;;  %v1079_v19 = vpop.f32.mrf.mxu1  ;;  %v7826_v49 = vpop.f32.mrf.mxu3 }
 0x231   :  { %v2009_v54 = vadd.f32 %v7749_v4, %v1700_v36  ;;  %v2443_v17 = vpop.f32.mrf.mxu0  ;;  %v1080_v4 = vadd.f32 %v1079_v19, %v7199_v48 }
 0x233   :  { %v7837_v22 = vadd.f32 %v2441_v15, %v2009_v54 }
 0x234   :  { %5871 = vmatmul.msk.bf16.gmra.mxu3 %vm566_vm2, %v7835_v14 }
 0x235   :  { %10077 = vst [vmem:[#allocation87_spill] sm:$0xff] %v7837_v22 }
 0x236   :  { %v1543_v21 = vpop.f32.mrf.mxu2 }
 0x237   :  { %v1701_v11 = vadd.f32 %v1543_v21, %v1080_v4  ;;  %v1082_v56 = vpop.f32.mrf.mxu1  ;;  %v7844_v27 = vpop.f32.mrf.mxu3  ;;  %v2166_v4 = vrot.slane %v10080_v8, 1  ;;  %v10081_v21 = vld [vmem:[#allocation33_spill] sm:$0xff] }
 0x238   :  { %v1083_v15 = vadd.f32 %v1082_v56, %v10079_v10 }
 0x239   :  { %v2010_v13 = vadd.f32 %v7764_v57, %v1701_v11  ;;  %v2446_v36 = vpop.f32.mrf.mxu0  ;;  %v2167_v11 = vrot.slane %v10081_v21, 2 }
 0x23a   :  { %5781 = vmatmul.msk.bf16.gmra.mxu1 %vm566_vm2, %v7703_v6 }
 0x23b   :  { %5823 = vmatmul.msk.bf16.gmra.mxu2 %vm566_vm2, %v7740_v20  ;;  %v7850_v48 = vadd.f32 %v2443_v17, %v2010_v13  ;;  %v7862_v20 = vld [vmem:[%s9729_s0 + $0xe8] sm:$0xff]  ;;  %v2168_v10 = vor.u32 %v2167_v11, %v2166_v4 }
 0x23c   :  { %5911 = vmatmul.msk.bf16.gmra.mxu0 %vm566_vm2, %v2165_v47  ;;  %v1307_v47 = vrot.slane %v7862_v20, 1 }
 0x23d   :  { %10078 = vst [vmem:[#allocation93_spill] sm:$0xff] %v7850_v48  ;;  %v2169_v21 = vsel %vm2062_vm4, %v2164_v1, %v2168_v10 }
 0x23e   :  { %v1546_v19 = vpop.f32.mrf.mxu2  ;;  %v7866_v17 = vsel %vm1249_vm3, %v1305_v50, %v1307_v47 }
 0x23f   :  { %v1702_v54 = vadd.f32 %v1546_v19, %v1083_v15  ;;  %v1084_v57 = vpop.f32.mrf.mxu1  ;;  %v7857_v6 = vpop.f32.mrf.mxu3 }
 0x241   :  { %v2011_v46 = vadd.f32 %v7782_v32, %v1702_v54  ;;  %v2448_v43 = vpop.f32.mrf.mxu0  ;;  %v10083_v32 = vld [vmem:[#allocation110_spill] sm:$0xff] }
 0x242   :  { %v1085_v13 = vadd.f32 %v1084_v57, %v10083_v32  ;;  %v10086_v32 = vld [vmem:[#allocation50_spill] sm:$0xff] }
 0x243   :  { %v7868_v56 = vadd.f32 %v2446_v36, %v2011_v46  ;;  %v10085_v36 = vld [vmem:[#allocation113_spill] sm:$0xff] }
 0x244   :  { %5872 = vmatmul.msk.bf16.gmra.mxu3 %vm566_vm2, %v7866_v17 }
 0x245   :  { %10082 = vst [vmem:[#allocation96_spill] sm:$0xff] %v7868_v56 }
 0x246   :  { %v1548_v15 = vpop.f32.mrf.mxu2 }
 0x247   :  { %v1703_v19 = vadd.f32 %v1548_v15, %v1085_v13  ;;  %v1087_v54 = vpop.f32.mrf.mxu1  ;;  %v7875_v8 = vpop.f32.mrf.mxu3  ;;  %v2170_v13 = vrot.slane %v10086_v32, 1  ;;  %v10087_v15 = vld [vmem:[#allocation42_spill] sm:$0xff] }
 0x248   :  { %v1088_v57 = vadd.f32 %v1087_v54, %v10085_v36 }
 0x249   :  { %v2012_v48 = vadd.f32 %v7795_v2, %v1703_v19  ;;  %v2451_v22 = vpop.f32.mrf.mxu0  ;;  %v2171_v19 = vrot.slane %v10087_v15, 2 }
 0x24a   :  { %5782 = vmatmul.msk.bf16.gmra.mxu1 %vm566_vm2, %v7736_v51 }
 0x24b   :  { %5824 = vmatmul.msk.bf16.gmra.mxu2 %vm566_vm2, %v7773_v34  ;;  %v7881_v50 = vadd.f32 %v2448_v43, %v2012_v48  ;;  %v7893_v34 = vld [vmem:[%s9729_s0 + $0xf0] sm:$0xff]  ;;  %v2172_v36 = vor.u32 %v2171_v19, %v2170_v13 }
 0x24c   :  { %5912 = vmatmul.msk.bf16.gmra.mxu0 %vm566_vm2, %v2169_v21  ;;  %v1309_v48 = vrot.slane %v7893_v34, 1 }
 0x24d   :  { %10084 = vst [vmem:[#allocation23_spill] sm:$0xff] %v7881_v50  ;;  %v2173_v15 = vsel %vm2062_vm4, %v2168_v10, %v2172_v36 }
 0x24e   :  { %v1551_v46 = vpop.f32.mrf.mxu2  ;;  %v7897_v43 = vsel %vm1249_vm3, %v1307_v47, %v1309_v48  ;;  %v10091_v47 = vld [vmem:[#allocation119_spill] sm:$0xff] }
 0x24f   :  { %v1704_v4 = vadd.f32 %v1551_v46, %v1088_v57  ;;  %v1089_v2 = vpop.f32.mrf.mxu1  ;;  %v7888_v51 = vpop.f32.mrf.mxu3 }
 0x251   :  { %v2013_v11 = vadd.f32 %v7813_v7, %v1704_v4  ;;  %v2453_v1 = vpop.f32.mrf.mxu0  ;;  %v10089_v7 = vld [vmem:[#allocation116_spill] sm:$0xff] }
 0x252   :  { %v1090_v54 = vadd.f32 %v1089_v2, %v10089_v7  ;;  %v10092_v7 = vld [vmem:[#allocation59_spill] sm:$0xff] }
 0x253   :  { %v7899_v21 = vadd.f32 %v2451_v22, %v2013_v11 }
 0x254   :  { %5873 = vmatmul.msk.bf16.gmra.mxu3 %vm566_vm2, %v7897_v43 }
 0x255   :  { %10088 = vst [vmem:[#allocation17_spill] sm:$0xff] %v7899_v21 }
 0x256   :  { %v1553_v57 = vpop.f32.mrf.mxu2 }
 0x257   :  { %v1705_v46 = vadd.f32 %v1553_v57, %v1090_v54  ;;  %v1092_v4 = vpop.f32.mrf.mxu1  ;;  %v7906_v32 = vpop.f32.mrf.mxu3  ;;  %v2174_v54 = vrot.slane %v10092_v7, 1  ;;  %v10093_v57 = vld [vmem:[#allocation51_spill] sm:$0xff] }
 0x258   :  { %v1093_v2 = vadd.f32 %v1092_v4, %v10091_v47 }
 0x259   :  { %v2014_v50 = vadd.f32 %v7826_v49, %v1705_v46  ;;  %v2456_v56 = vpop.f32.mrf.mxu0  ;;  %v2175_v46 = vrot.slane %v10093_v57, 2 }
 0x25a   :  { %5783 = vmatmul.msk.bf16.gmra.mxu1 %vm566_vm2, %v7769_v28 }
 0x25b   :  { %5825 = vmatmul.msk.bf16.gmra.mxu2 %vm566_vm2, %v7804_v42  ;;  %v7912_v22 = vadd.f32 %v2453_v1, %v2014_v50  ;;  %v7924_v42 = vld [vmem:[%s9729_s0 + $0xf8] sm:$0xff]  ;;  %v2176_v47 = vor.u32 %v2175_v46, %v2174_v54 }
 0x25c   :  { %5913 = vmatmul.msk.bf16.gmra.mxu0 %vm566_vm2, %v2173_v15  ;;  %v1311_v50 = vrot.slane %v7924_v42, 1 }
 0x25d   :  { %10090 = vst [vmem:[#allocation32_spill] sm:$0xff] %v7912_v22  ;;  %v2177_v57 = vsel %vm2062_vm4, %v2172_v36, %v2176_v47 }
 0x25e   :  { %v1556_v11 = vpop.f32.mrf.mxu2  ;;  %v7928_v1 = vsel %vm1249_vm3, %v1309_v48, %v1311_v50  ;;  %v10097_v48 = vld [vmem:[#allocation125_spill] sm:$0xff] }
 0x25f   :  { %v1706_v13 = vadd.f32 %v1556_v11, %v1093_v2  ;;  %v1094_v49 = vpop.f32.mrf.mxu1  ;;  %v7919_v28 = vpop.f32.mrf.mxu3 }
 0x261   :  { %v2015_v19 = vadd.f32 %v7844_v27, %v1706_v13  ;;  %v2458_v10 = vpop.f32.mrf.mxu0  ;;  %v10095_v27 = vld [vmem:[#allocation122_spill] sm:$0xff] }
 0x262   :  { %v1095_v4 = vadd.f32 %v1094_v49, %v10095_v27  ;;  %v10098_v27 = vld [vmem:[#allocation68_spill] sm:$0xff] }
 0x263   :  { %v7930_v15 = vadd.f32 %v2456_v56, %v2015_v19 }
 0x264   :  { %5874 = vmatmul.msk.bf16.gmra.mxu3 %vm566_vm2, %v7928_v1 }
 0x265   :  { %10094 = vst [vmem:[#allocation107_spill] sm:$0xff] %v7930_v15 }
 0x266   :  { %v1558_v2 = vpop.f32.mrf.mxu2 }
 0x267   :  { %v1707_v11 = vadd.f32 %v1558_v2, %v1095_v4  ;;  %v1097_v13 = vpop.f32.mrf.mxu1  ;;  %v7937_v7 = vpop.f32.mrf.mxu3  ;;  %v2178_v4 = vrot.slane %v10098_v27, 1  ;;  %v10099_v2 = vld [vmem:[#allocation60_spill] sm:$0xff] }
 0x268   :  { %v1098_v49 = vadd.f32 %v1097_v13, %v10097_v48 }
 0x269   :  { %v2016_v22 = vadd.f32 %v7857_v6, %v1707_v11  ;;  %v2461_v21 = vpop.f32.mrf.mxu0  ;;  %v2179_v11 = vrot.slane %v10099_v2, 2 }
 0x26a   :  { %5784 = vmatmul.msk.bf16.gmra.mxu1 %vm566_vm2, %v7800_v52 }
 0x26b   :  { %5826 = vmatmul.msk.bf16.gmra.mxu2 %vm566_vm2, %v7835_v14  ;;  %v7943_v56 = vadd.f32 %v2458_v10, %v2016_v22  ;;  %v7955_v14 = vld [vmem:[%s9729_s0 + $0x100] sm:$0xff]  ;;  %v2180_v48 = vor.u32 %v2179_v11, %v2178_v4 }
 0x26c   :  { %5914 = vmatmul.msk.bf16.gmra.mxu0 %vm566_vm2, %v2177_v57  ;;  %v1313_v22 = vrot.slane %v7955_v14, 1 }
 0x26d   :  { %10096 = vst [vmem:[#allocation110_spill] sm:$0xff] %v7943_v56  ;;  %v2181_v2 = vsel %vm2062_vm4, %v2176_v47, %v2180_v48 }
 0x26e   :  { %v1561_v19 = vpop.f32.mrf.mxu2  ;;  %v7959_v10 = vsel %vm1249_vm3, %v1311_v50, %v1313_v22  ;;  %v10103_v50 = vld [vmem:[#allocation130_spill] sm:$0xff] }
 0x26f   :  { %v1708_v54 = vadd.f32 %v1561_v19, %v1098_v49  ;;  %v1099_v6 = vpop.f32.mrf.mxu1  ;;  %v7950_v52 = vpop.f32.mrf.mxu3 }
 0x271   :  { %v2017_v46 = vadd.f32 %v7875_v8, %v1708_v54  ;;  %v2463_v36 = vpop.f32.mrf.mxu0  ;;  %v10101_v8 = vld [vmem:[#allocation128_spill] sm:$0xff] }
 0x272   :  { %v1100_v13 = vadd.f32 %v1099_v6, %v10101_v8  ;;  %v10104_v8 = vld [vmem:[#allocation79_spill] sm:$0xff] }
 0x273   :  { %v7961_v57 = vadd.f32 %v2461_v21, %v2017_v46 }
 0x274   :  { %5875 = vmatmul.msk.bf16.gmra.mxu3 %vm566_vm2, %v7959_v10 }
 0x275   :  { %10100 = vst [vmem:[#allocation113_spill] sm:$0xff] %v7961_v57 }
 0x276   :  { %v1563_v49 = vpop.f32.mrf.mxu2 }
 0x277   :  { %v1709_v19 = vadd.f32 %v1563_v49, %v1100_v13  ;;  %v1102_v54 = vpop.f32.mrf.mxu1  ;;  %v7968_v27 = vpop.f32.mrf.mxu3  ;;  %v2182_v13 = vrot.slane %v10104_v8, 1  ;;  %v10105_v49 = vld [vmem:[#allocation69_spill] sm:$0xff] }
 0x278   :  { %v1103_v6 = vadd.f32 %v1102_v54, %v10103_v50 }
 0x279   :  { %v2018_v56 = vadd.f32 %v7888_v51, %v1709_v19  ;;  %v2466_v15 = vpop.f32.mrf.mxu0  ;;  %v2183_v19 = vrot.slane %v10105_v49, 2 }
 0x27a   :  { %5785 = vmatmul.msk.bf16.gmra.mxu1 %vm566_vm2, %v7831_v0 }
 0x27b   :  { %5827 = vmatmul.msk.bf16.gmra.mxu2 %vm566_vm2, %v7866_v17  ;;  %v7974_v21 = vadd.f32 %v2463_v36, %v2018_v56  ;;  %v7986_v17 = vld [vmem:[%s9729_s0 + $0x108] sm:$0xff]  ;;  %v2184_v50 = vor.u32 %v2183_v19, %v2182_v13 }
 0x27c   :  { %5915 = vmatmul.msk.bf16.gmra.mxu0 %vm566_vm2, %v2181_v2  ;;  %v1315_v56 = vrot.slane %v7986_v17, 1 }
 0x27d   :  { %10102 = vst [vmem:[#allocation116_spill] sm:$0xff] %v7974_v21  ;;  %v2185_v49 = vsel %vm2062_vm4, %v2180_v48, %v2184_v50 }
 0x27e   :  { %v1566_v46 = vpop.f32.mrf.mxu2  ;;  %v7990_v36 = vsel %vm1249_vm3, %v1313_v22, %v1315_v56  ;;  %v10109_v22 = vld [vmem:[#allocation134_spill] sm:$0xff] }
 0x27f   :  { %v1710_v4 = vadd.f32 %v1566_v46, %v1103_v6  ;;  %v1104_v51 = vpop.f32.mrf.mxu1  ;;  %v7981_v0 = vpop.f32.mrf.mxu3 }
 0x281   :  { %v2019_v11 = vadd.f32 %v7906_v32, %v1710_v4  ;;  %v2468_v47 = vpop.f32.mrf.mxu0  ;;  %v10107_v32 = vld [vmem:[#allocation132_spill] sm:$0xff] }
 0x282   :  { %v1105_v54 = vadd.f32 %v1104_v51, %v10107_v32  ;;  %v10110_v32 = vld [vmem:[#allocation89_spill] sm:$0xff] }
 0x283   :  { %v7992_v2 = vadd.f32 %v2466_v15, %v2019_v11 }
 0x284   :  { %5876 = vmatmul.msk.bf16.gmra.mxu3 %vm566_vm2, %v7990_v36 }
 0x285   :  { %10106 = vst [vmem:[#allocation119_spill] sm:$0xff] %v7992_v2 }
 0x286   :  { %v1568_v6 = vpop.f32.mrf.mxu2 }
 0x287   :  { %v1711_v46 = vadd.f32 %v1568_v6, %v1105_v54  ;;  %v1107_v4 = vpop.f32.mrf.mxu1  ;;  %v7999_v8 = vpop.f32.mrf.mxu3  ;;  %v2186_v54 = vrot.slane %v10110_v32, 1  ;;  %v10111_v6 = vld [vmem:[#allocation80_spill] sm:$0xff] }
 0x288   :  { %v1108_v51 = vadd.f32 %v1107_v4, %v10109_v22 }
 0x289   :  { %v2020_v21 = vadd.f32 %v7919_v28, %v1711_v46  ;;  %v2471_v57 = vpop.f32.mrf.mxu0  ;;  %v2187_v46 = vrot.slane %v10111_v6, 2 }
 0x28a   :  { %5786 = vmatmul.msk.bf16.gmra.mxu1 %vm566_vm2, %v7862_v20 }
 0x28b   :  { %5828 = vmatmul.msk.bf16.gmra.mxu2 %vm566_vm2, %v7897_v43  ;;  %v8005_v15 = vadd.f32 %v2468_v47, %v2020_v21  ;;  %v8017_v43 = vld [vmem:[%s9729_s0 + $0x110] sm:$0xff]  ;;  %v2188_v22 = vor.u32 %v2187_v46, %v2186_v54 }
 0x28c   :  { %5916 = vmatmul.msk.bf16.gmra.mxu0 %vm566_vm2, %v2185_v49  ;;  %v1317_v21 = vrot.slane %v8017_v43, 1 }
 0x28d   :  { %10108 = vst [vmem:[#allocation122_spill] sm:$0xff] %v8005_v15  ;;  %v2189_v6 = vsel %vm2062_vm4, %v2184_v50, %v2188_v22 }
 0x28e   :  { %v1571_v11 = vpop.f32.mrf.mxu2  ;;  %v8021_v47 = vsel %vm1249_vm3, %v1315_v56, %v1317_v21  ;;  %v10115_v56 = vld [vmem:[#allocation75_spill] sm:$0xff] }
 0x28f   :  { %v1712_v13 = vadd.f32 %v1571_v11, %v1108_v51  ;;  %v1109_v28 = vpop.f32.mrf.mxu1  ;;  %v8012_v20 = vpop.f32.mrf.mxu3 }
 0x291   :  { %v2021_v19 = vadd.f32 %v7937_v7, %v1712_v13  ;;  %v2473_v48 = vpop.f32.mrf.mxu0  ;;  %v10113_v7 = vld [vmem:[#allocation136_spill] sm:$0xff] }
 0x292   :  { %v1110_v4 = vadd.f32 %v1109_v28, %v10113_v7  ;;  %v10116_v7 = vld [vmem:[#allocation8_spill] sm:$0xff] }
 0x293   :  { %v8023_v49 = vadd.f32 %v2471_v57, %v2021_v19 }
 0x294   :  { %5877 = vmatmul.msk.bf16.gmra.mxu3 %vm566_vm2, %v8021_v47 }
 0x295   :  { %10112 = vst [vmem:[#allocation125_spill] sm:$0xff] %v8023_v49 }
 0x296   :  { %v1573_v51 = vpop.f32.mrf.mxu2 }
 0x297   :  { %v1713_v11 = vadd.f32 %v1573_v51, %v1110_v4  ;;  %v1112_v13 = vpop.f32.mrf.mxu1  ;;  %v8030_v32 = vpop.f32.mrf.mxu3  ;;  %v2190_v4 = vrot.slane %v10116_v7, 1  ;;  %v10117_v51 = vld [vmem:[#allocation7_spill] sm:$0xff] }
 0x298   :  { %v1113_v28 = vadd.f32 %v1112_v13, %v10115_v56 }
 0x299   :  { %v2022_v15 = vadd.f32 %v7950_v52, %v1713_v11  ;;  %v2476_v2 = vpop.f32.mrf.mxu0  ;;  %v2191_v11 = vrot.slane %v10117_v51, 2 }
 0x29a   :  { %5787 = vmatmul.msk.bf16.gmra.mxu1 %vm566_vm2, %v7893_v34 }
 0x29b   :  { %5829 = vmatmul.msk.bf16.gmra.mxu2 %vm566_vm2, %v7928_v1  ;;  %v8036_v57 = vadd.f32 %v2473_v48, %v2022_v15  ;;  %v8048_v1 = vld [vmem:[%s9729_s0 + $0x118] sm:$0xff]  ;;  %v2192_v56 = vor.u32 %v2191_v11, %v2190_v4 }
 0x29c   :  { %5917 = vmatmul.msk.bf16.gmra.mxu0 %vm566_vm2, %v2189_v6  ;;  %v1319_v15 = vrot.slane %v8048_v1, 1 }
 0x29d   :  { %10114 = vst [vmem:[#allocation128_spill] sm:$0xff] %v8036_v57  ;;  %v2193_v51 = vsel %vm2062_vm4, %v2188_v22, %v2192_v56 }
 0x29e   :  { %v1576_v19 = vpop.f32.mrf.mxu2  ;;  %v8052_v48 = vsel %vm1249_vm3, %v1317_v21, %v1319_v15  ;;  %v10121_v21 = vld [vmem:[#allocation86_spill] sm:$0xff] }
 0x29f   :  { %v1714_v54 = vadd.f32 %v1576_v19, %v1113_v28  ;;  %v1114_v52 = vpop.f32.mrf.mxu1  ;;  %v8043_v34 = vpop.f32.mrf.mxu3 }
 0x2a1   :  { %v2023_v46 = vadd.f32 %v7968_v27, %v1714_v54  ;;  %v2478_v50 = vpop.f32.mrf.mxu0  ;;  %v10119_v27 = vld [vmem:[#allocation83_spill] sm:$0xff] }
 0x2a2   :  { %v1115_v13 = vadd.f32 %v1114_v52, %v10119_v27  ;;  %v10122_v27 = vld [vmem:[#allocation13_spill] sm:$0xff] }
 0x2a3   :  { %v8054_v6 = vadd.f32 %v2476_v2, %v2023_v46 }
 0x2a4   :  { %5878 = vmatmul.msk.bf16.gmra.mxu3 %vm566_vm2, %v8052_v48 }
 0x2a5   :  { %10118 = vst [vmem:[#allocation130_spill] sm:$0xff] %v8054_v6 }
 0x2a6   :  { %v1578_v28 = vpop.f32.mrf.mxu2 }
 0x2a7   :  { %v1715_v19 = vadd.f32 %v1578_v28, %v1115_v13  ;;  %v1117_v54 = vpop.f32.mrf.mxu1  ;;  %v8061_v7 = vpop.f32.mrf.mxu3  ;;  %v2194_v13 = vrot.slane %v10122_v27, 1  ;;  %v10123_v28 = vld [vmem:[#allocation11_spill] sm:$0xff] }
 0x2a8   :  { %v1118_v52 = vadd.f32 %v1117_v54, %v10121_v21 }
 0x2a9   :  { %v2024_v57 = vadd.f32 %v7981_v0, %v1715_v19  ;;  %v2481_v49 = vpop.f32.mrf.mxu0  ;;  %v2195_v19 = vrot.slane %v10123_v28, 2 }
 0x2aa   :  { %5788 = vmatmul.msk.bf16.gmra.mxu1 %vm566_vm2, %v7924_v42 }
 0x2ab   :  { %5830 = vmatmul.msk.bf16.gmra.mxu2 %vm566_vm2, %v7959_v10  ;;  %v8067_v2 = vadd.f32 %v2478_v50, %v2024_v57  ;;  %v8079_v10 = vld [vmem:[%s9729_s0 + $0x120] sm:$0xff]  ;;  %v2196_v21 = vor.u32 %v2195_v19, %v2194_v13 }
 0x2ac   :  { %5918 = vmatmul.msk.bf16.gmra.mxu0 %vm566_vm2, %v2193_v51  ;;  %v1321_v57 = vrot.slane %v8079_v10, 1 }
 0x2ad   :  { %10120 = vst [vmem:[#allocation132_spill] sm:$0xff] %v8067_v2  ;;  %v2197_v28 = vsel %vm2062_vm4, %v2192_v56, %v2196_v21 }
 0x2ae   :  { %v1581_v46 = vpop.f32.mrf.mxu2  ;;  %v8083_v50 = vsel %vm1249_vm3, %v1319_v15, %v1321_v57  ;;  %v10127_v15 = vld [vmem:[#allocation95_spill] sm:$0xff] }
 0x2af   :  { %v1716_v4 = vadd.f32 %v1581_v46, %v1118_v52  ;;  %v1119_v0 = vpop.f32.mrf.mxu1  ;;  %v8074_v42 = vpop.f32.mrf.mxu3 }
 0x2b1   :  { %v2025_v11 = vadd.f32 %v7999_v8, %v1716_v4  ;;  %v2483_v22 = vpop.f32.mrf.mxu0  ;;  %v10125_v8 = vld [vmem:[#allocation92_spill] sm:$0xff] }
 0x2b2   :  { %v1120_v54 = vadd.f32 %v1119_v0, %v10125_v8  ;;  %v10128_v8 = vld [vmem:[#allocation20_spill] sm:$0xff] }
 0x2b3   :  { %v8085_v51 = vadd.f32 %v2481_v49, %v2025_v11 }
 0x2b4   :  { %5879 = vmatmul.msk.bf16.gmra.mxu3 %vm566_vm2, %v8083_v50 }
 0x2b5   :  { %10124 = vst [vmem:[#allocation134_spill] sm:$0xff] %v8085_v51 }
 0x2b6   :  { %v1583_v52 = vpop.f32.mrf.mxu2 }
 0x2b7   :  { %v1717_v46 = vadd.f32 %v1583_v52, %v1120_v54  ;;  %v1122_v4 = vpop.f32.mrf.mxu1  ;;  %v8092_v27 = vpop.f32.mrf.mxu3  ;;  %v2198_v54 = vrot.slane %v10128_v8, 1  ;;  %v10129_v52 = vld [vmem:[#allocation14_spill] sm:$0xff] }
 0x2b8   :  { %v1123_v0 = vadd.f32 %v1122_v4, %v10127_v15 }
 0x2b9   :  { %v2026_v2 = vadd.f32 %v8012_v20, %v1717_v46  ;;  %v2486_v6 = vpop.f32.mrf.mxu0  ;;  %v2199_v46 = vrot.slane %v10129_v52, 2 }
 0x2ba   :  { %5789 = vmatmul.msk.bf16.gmra.mxu1 %vm566_vm2, %v7955_v14 }
 0x2bb   :  { %5831 = vmatmul.msk.bf16.gmra.mxu2 %vm566_vm2, %v7990_v36  ;;  %v8098_v49 = vadd.f32 %v2483_v22, %v2026_v2  ;;  %v8110_v36 = vld [vmem:[%s9729_s0 + $0x128] sm:$0xff]  ;;  %v2200_v15 = vor.u32 %v2199_v46, %v2198_v54 }
 0x2bc   :  { %5919 = vmatmul.msk.bf16.gmra.mxu0 %vm566_vm2, %v2197_v28  ;;  %v1323_v2 = vrot.slane %v8110_v36, 1 }
 0x2bd   :  { %10126 = vst [vmem:[#allocation136_spill] sm:$0xff] %v8098_v49  ;;  %v2201_v52 = vsel %vm2062_vm4, %v2196_v21, %v2200_v15 }
 0x2be   :  { %v1586_v11 = vpop.f32.mrf.mxu2  ;;  %v8114_v22 = vsel %vm1249_vm3, %v1321_v57, %v1323_v2  ;;  %v10133_v57 = vld [vmem:[#allocation100_spill] sm:$0xff] }
 0x2bf   :  { %v1718_v13 = vadd.f32 %v1586_v11, %v1123_v0  ;;  %v1124_v20 = vpop.f32.mrf.mxu1  ;;  %v8105_v14 = vpop.f32.mrf.mxu3 }
 0x2c1   :  { %v2027_v19 = vadd.f32 %v8030_v32, %v1718_v13  ;;  %v2488_v56 = vpop.f32.mrf.mxu0  ;;  %v10131_v32 = vld [vmem:[#allocation98_spill] sm:$0xff] }
 0x2c2   :  { %v1125_v4 = vadd.f32 %v1124_v20, %v10131_v32  ;;  %v10134_v32 = vld [vmem:[#allocation28_spill] sm:$0xff] }
 0x2c3   :  { %v8116_v28 = vadd.f32 %v2486_v6, %v2027_v19 }
 0x2c4   :  { %5880 = vmatmul.msk.bf16.gmra.mxu3 %vm566_vm2, %v8114_v22 }
 0x2c5   :  { %10130 = vst [vmem:[#allocation75_spill] sm:$0xff] %v8116_v28 }
 0x2c6   :  { %v1588_v0 = vpop.f32.mrf.mxu2 }
 0x2c7   :  { %v1719_v11 = vadd.f32 %v1588_v0, %v1125_v4  ;;  %v1127_v13 = vpop.f32.mrf.mxu1  ;;  %v8123_v8 = vpop.f32.mrf.mxu3  ;;  %v2202_v4 = vrot.slane %v10134_v32, 1  ;;  %v10135_v0 = vld [vmem:[#allocation21_spill] sm:$0xff] }
 0x2c8   :  { %v1128_v20 = vadd.f32 %v1127_v13, %v10133_v57 }
 0x2c9   :  { %v2028_v49 = vadd.f32 %v8043_v34, %v1719_v11  ;;  %v2491_v51 = vpop.f32.mrf.mxu0  ;;  %v2203_v11 = vrot.slane %v10135_v0, 2 }
 0x2ca   :  { %5790 = vmatmul.msk.bf16.gmra.mxu1 %vm566_vm2, %v7986_v17 }
 0x2cb   :  { %5832 = vmatmul.msk.bf16.gmra.mxu2 %vm566_vm2, %v8021_v47  ;;  %v8129_v6 = vadd.f32 %v2488_v56, %v2028_v49  ;;  %v8141_v47 = vld [vmem:[%s9729_s0 + $0x130] sm:$0xff]  ;;  %v2204_v57 = vor.u32 %v2203_v11, %v2202_v4 }
 0x2cc   :  { %5920 = vmatmul.msk.bf16.gmra.mxu0 %vm566_vm2, %v2201_v52  ;;  %v1325_v49 = vrot.slane %v8141_v47, 1 }
 0x2cd   :  { %10132 = vst [vmem:[#allocation83_spill] sm:$0xff] %v8129_v6  ;;  %v2205_v0 = vsel %vm2062_vm4, %v2200_v15, %v2204_v57 }
 0x2ce   :  { %v1591_v19 = vpop.f32.mrf.mxu2  ;;  %v8145_v56 = vsel %vm1249_vm3, %v1323_v2, %v1325_v49  ;;  %v10139_v2 = vld [vmem:[#allocation104_spill] sm:$0xff] }
 0x2cf   :  { %v1720_v54 = vadd.f32 %v1591_v19, %v1128_v20  ;;  %v1129_v34 = vpop.f32.mrf.mxu1  ;;  %v8136_v17 = vpop.f32.mrf.mxu3 }
 0x2d1   :  { %v2029_v46 = vadd.f32 %v8061_v7, %v1720_v54  ;;  %v2493_v21 = vpop.f32.mrf.mxu0  ;;  %v10137_v7 = vld [vmem:[#allocation102_spill] sm:$0xff] }
 0x2d2   :  { %v1130_v13 = vadd.f32 %v1129_v34, %v10137_v7  ;;  %v10140_v7 = vld [vmem:[#allocation37_spill] sm:$0xff] }
 0x2d3   :  { %v8147_v52 = vadd.f32 %v2491_v51, %v2029_v46 }
 0x2d4   :  { %5881 = vmatmul.msk.bf16.gmra.mxu3 %vm566_vm2, %v8145_v56 }
 0x2d5   :  { %10136 = vst [vmem:[#allocation86_spill] sm:$0xff] %v8147_v52 }
 0x2d6   :  { %v1593_v20 = vpop.f32.mrf.mxu2 }
 0x2d7   :  { %v1721_v19 = vadd.f32 %v1593_v20, %v1130_v13  ;;  %v1132_v54 = vpop.f32.mrf.mxu1  ;;  %v8154_v32 = vpop.f32.mrf.mxu3  ;;  %v2206_v13 = vrot.slane %v10140_v7, 1  ;;  %v10141_v20 = vld [vmem:[#allocation29_spill] sm:$0xff] }
 0x2d8   :  { %v1133_v34 = vadd.f32 %v1132_v54, %v10139_v2 }
 0x2d9   :  { %v2030_v6 = vadd.f32 %v8074_v42, %v1721_v19  ;;  %v2496_v28 = vpop.f32.mrf.mxu0  ;;  %v2207_v19 = vrot.slane %v10141_v20, 2 }
 0x2da   :  { %5791 = vmatmul.msk.bf16.gmra.mxu1 %vm566_vm2, %v8017_v43 }
 0x2db   :  { %5833 = vmatmul.msk.bf16.gmra.mxu2 %vm566_vm2, %v8052_v48  ;;  %v8160_v51 = vadd.f32 %v2493_v21, %v2030_v6  ;;  %v8172_v48 = vld [vmem:[%s9729_s0 + $0x138] sm:$0xff]  ;;  %v2208_v2 = vor.u32 %v2207_v19, %v2206_v13 }
 0x2dc   :  { %5921 = vmatmul.msk.bf16.gmra.mxu0 %vm566_vm2, %v2205_v0  ;;  %v1327_v6 = vrot.slane %v8172_v48, 1 }
 0x2dd   :  { %10138 = vst [vmem:[#allocation92_spill] sm:$0xff] %v8160_v51  ;;  %v2209_v20 = vsel %vm2062_vm4, %v2204_v57, %v2208_v2  ;;  %v10146_v57 = vld [vmem:[#allocation46_spill] sm:$0xff] }
 0x2de   :  { %v1596_v46 = vpop.f32.mrf.mxu2  ;;  %v8176_v21 = vsel %vm1249_vm3, %v1325_v49, %v1327_v6  ;;  %v10145_v49 = vld [vmem:[#allocation109_spill] sm:$0xff] }
 0x2df   :  { %v1722_v4 = vadd.f32 %v1596_v46, %v1133_v34  ;;  %v1134_v42 = vpop.f32.mrf.mxu1  ;;  %v8167_v43 = vpop.f32.mrf.mxu3 }
 0x2e1   :  { %v2031_v11 = vadd.f32 %v8092_v27, %v1722_v4  ;;  %v2498_v15 = vpop.f32.mrf.mxu0  ;;  %v10143_v27 = vld [vmem:[#allocation106_spill] sm:$0xff] }
 0x2e2   :  { %v1135_v54 = vadd.f32 %v1134_v42, %v10143_v27 }
 0x2e3   :  { %v8178_v0 = vadd.f32 %v2496_v28, %v2031_v11 }
 0x2e4   :  { %5882 = vmatmul.msk.bf16.gmra.mxu3 %vm566_vm2, %v8176_v21 }
 0x2e5   :  { %10142 = vst [vmem:[#allocation95_spill] sm:$0xff] %v8178_v0  ;;  %v10148_v0 = vld [vmem:[#allocation56_spill] sm:$0xff] }
 0x2e6   :  { %v1598_v34 = vpop.f32.mrf.mxu2  ;;  %v8197_v58 = vrot.slane %v10148_v0, 1 }
 0x2e7   :  { %v1723_v46 = vadd.f32 %v1598_v34, %v1135_v54  ;;  %v1137_v4 = vpop.f32.mrf.mxu1  ;;  %v1920_v7 = vpop.f32.mrf.mxu3  ;;  %v2210_v54 = vrot.slane %v10146_v57, 1  ;;  %v10147_v34 = vld [vmem:[#allocation38_spill] sm:$0xff] }
 0x2e8   :  { %v1138_v42 = vadd.f32 %v1137_v4, %v10145_v49 }
 0x2e9   :  { %v2032_v51 = vadd.f32 %v8105_v14, %v1723_v46  ;;  %v2501_v52 = vpop.f32.mrf.mxu0  ;;  %v2211_v46 = vrot.slane %v10147_v34, 2 }
 0x2ea   :  { %5792 = vmatmul.msk.bf16.gmra.mxu1 %vm566_vm2, %v8048_v1 }
 0x2eb   :  { %5834 = vmatmul.msk.bf16.gmra.mxu2 %vm566_vm2, %v8083_v50  ;;  %v8189_v28 = vadd.f32 %v2498_v15, %v2032_v51  ;;  %v8201_v50 = vsel %vm1249_vm3, %v1327_v6, %v8197_v58  ;;  %v10150_v15 = vld [vmem:[#allocation112_spill] sm:$0xff]  ;;  %v2212_v4 = vor.u32 %v2211_v46, %v2210_v54  ;;  %v10152_v6 = vld [vmem:[#allocation115_spill] sm:$0xff] }
 0x2ec   :  { %5922 = vmatmul.msk.bf16.gmra.mxu0 %vm566_vm2, %v2209_v20 }
 0x2ed   :  { %10144 = vst [vmem:[#allocation98_spill] sm:$0xff] %v8189_v28  ;;  %v2213_v0 = vsel %vm2062_vm4, %v2208_v2, %v2212_v4  ;;  %v8223_v2 = vld [vmem:[%s9730_s1 + $0x4] sm:$0xff] }
 0x2ee   :  { %v1601_v11 = vpop.f32.mrf.mxu2  ;;  %10153 = vst [vmem:[#allocation104_spill] sm:$0xff] %v8223_v2 }
 0x2ef   :  { %v1724_v13 = vadd.f32 %v1601_v11, %v1138_v42  ;;  %v1139_v19 = vpop.f32.mrf.mxu1  ;;  %v1922_v1 = vpop.f32.mrf.mxu3 }
 0x2f0   :  { %v1140_v20 = vadd.f32 %v1139_v19, %v10150_v15  ;;  %v10154_v15 = vld [vmem:[#allocation61_spill] sm:$0xff] }
 0x2f1   :  { %v2033_v14 = vadd.f32 %v8123_v8, %v1724_v13  ;;  %v2503_v27 = vpop.f32.mrf.mxu0 }
 0x2f3   :  { %v8203_v51 = vadd.f32 %v2501_v52, %v2033_v14 }
 0x2f4   :  { %5883 = vmatmul.msk.bf16.gmra.mxu3 %vm566_vm2, %v8201_v50 }
 0x2f5   :  { %10149 = vst [vmem:[#allocation100_spill] sm:$0xff] %v8203_v51 }
 0x2f6   :  { %v1603_v49 = vpop.f32.mrf.mxu2 }
 0x2f7   :  { %v1725_v8 = vadd.f32 %v1603_v49, %v1140_v20  ;;  %v1142_v42 = vpop.f32.mrf.mxu1  ;;  %v8210_v28 = vpop.f32.mrf.mxu3  ;;  %v2214_v20 = vrot.slane %v10154_v15, 1 }
 0x2f8   :  { %v1143_v19 = vadd.f32 %v1142_v42, %v10152_v6 }
 0x2f9   :  { %v2034_v11 = vadd.f32 %v8136_v17, %v1725_v8  ;;  %v2506_v13 = vpop.f32.mrf.mxu0 }
 0x2fa   :  { %5793 = vmatmul.msk.bf16.gmra.mxu1 %vm566_vm2, %v8079_v10 }
 0x2fb   :  { %5835 = vmatmul.msk.bf16.gmra.mxu2 %vm566_vm2, %v8114_v22  ;;  %v8216_v52 = vadd.f32 %v2503_v27, %v2034_v11  ;;  %v10155_v22 = vld [vmem:[#allocation47_spill] sm:$0xff]  ;;  %v10157_v11 = vld [vmem:[#allocation118_spill] sm:$0xff] }
 0x2fc   :  { %5923 = vmatmul.msk.bf16.gmra.mxu0 %vm566_vm2, %v2213_v0  ;;  %v2215_v27 = vrot.slane %v10155_v22, 2  ;;  %v1755_v0 = vrot.slane %v8223_v2, 1 }
 0x2fd   :  { %10151 = vst [vmem:[#allocation102_spill] sm:$0xff] %v8216_v52 }
 0x2fe   :  { %v1606_v14 = vpop.f32.mrf.mxu2  ;;  %v1756_v42 = vsel %vm1249_vm3, %v8197_v58, %v1755_v0 }
 0x2ff   :  { %v1726_v54 = vadd.f32 %v1606_v14, %v1143_v19  ;;  %v1144_v17 = vpop.f32.mrf.mxu1  ;;  %v8228_v49 = vpop.f32.mrf.mxu3  ;;  %v2216_v19 = vor.u32 %v2215_v27, %v2214_v20 }
 0x300   :  { %v1145_v6 = vadd.f32 %v1144_v17, %v10157_v11  ;;  %v10159_v17 = vld [vmem:[#allocation121_spill] sm:$0xff] }
 0x301   :  { %v2035_v46 = vadd.f32 %v8154_v32, %v1726_v54  ;;  %v2508_v10 = vpop.f32.mrf.mxu0  ;;  %v2217_v22 = vsel %vm2062_vm4, %v2212_v4, %v2216_v19  ;;  %v10160_v4 = vld [vmem:[#allocation72_spill] sm:$0xff] }
 0x303   :  { %v8231_v8 = vadd.f32 %v2506_v13, %v2035_v46 }
 0x304   :  { %5884 = vmatmul.msk.bf16.gmra.mxu3 %vm566_vm2, %v1756_v42 }
 0x305   :  { %10156 = vst [vmem:[#allocation106_spill] sm:$0xff] %v8231_v8 }
 0x306   :  { %v1608_v14 = vpop.f32.mrf.mxu2 }
 0x307   :  { %v1727_v32 = vadd.f32 %v1608_v14, %v1145_v6  ;;  %v1147_v54 = vpop.f32.mrf.mxu1  ;;  %v8239_v15 = vpop.f32.mrf.mxu3  ;;  %v2218_v6 = vrot.slane %v10160_v4, 1  ;;  %v10161_v14 = vld [vmem:[#allocation62_spill] sm:$0xff] }
 0x308   :  { %v1148_v46 = vadd.f32 %v1147_v54, %v10159_v17 }
 0x309   :  { %v2036_v52 = vadd.f32 %v8167_v43, %v1727_v32  ;;  %v2511_v51 = vpop.f32.mrf.mxu0  ;;  %v2219_v32 = vrot.slane %v10161_v14, 2 }
 0x30a   :  { %5794 = vmatmul.msk.bf16.gmra.mxu1 %vm566_vm2, %v8110_v36 }
 0x30b   :  { %5836 = vmatmul.msk.bf16.gmra.mxu2 %vm566_vm2, %v8145_v56  ;;  %v8245_v13 = vadd.f32 %v2508_v10, %v2036_v52  ;;  %v10163_v56 = vld [vmem:[#allocation124_spill] sm:$0xff]  ;;  %v2220_v10 = vor.u32 %v2219_v32, %v2218_v6  ;;  %v10166_v6 = vld [vmem:[#allocation18_spill] sm:$0xff] }
 0x30c   :  { %5924 = vmatmul.msk.bf16.gmra.mxu0 %vm566_vm2, %v2217_v22  ;;  %v3467_v32 = vrot.slane %v10166_v6, 2 }
 0x30d   :  { %10158 = vst [vmem:[#allocation109_spill] sm:$0xff] %v8245_v13 }
 0x30e   :  { %v1611_v20 = vpop.f32.mrf.mxu2 }
 0x30f   :  { %v1728_v27 = vadd.f32 %v1611_v20, %v1148_v46  ;;  %v1149_v43 = vpop.f32.mrf.mxu1  ;;  %v8251_v8 = vpop.f32.mrf.mxu3 }
 0x310   :  { %v1150_v52 = vadd.f32 %v1149_v43, %v10163_v56  ;;  %v10167_v56 = vld [vmem:[#allocation12_spill] sm:$0xff] }
 0x311   :  { %v2037_v42 = vadd.f32 %v1920_v7, %v1728_v27  ;;  %v2513_v11 = vpop.f32.mrf.mxu0  ;;  %v2221_v7 = vsel %vm2062_vm4, %v2216_v19, %v2220_v10  ;;  %v10165_v27 = vld [vmem:[#allocation127_spill] sm:$0xff] }
 0x313   :  { %v8253_v36 = vadd.f32 %v2511_v51, %v2037_v42 }
 0x314   :  { %5885 = vmatmul.msk.bf16.gmra.mxu3 %vm566_vm2, %v1755_v0 }
 0x315   :  { %10162 = vst [vmem:[#allocation46_spill] sm:$0xff] %v8253_v36 }
 0x316   :  { %v1613_v13 = vpop.f32.mrf.mxu2 }
 0x317   :  { %v1729_v22 = vadd.f32 %v1613_v13, %v1150_v52  ;;  %v1152_v54 = vpop.f32.mrf.mxu1  ;;  %v8258_v20 = vpop.f32.mrf.mxu3  ;;  %v9875_v13 = vshrl.u32 %v8223_v2, 16  ;;  %v10168_v52 = vld [vmem:[#allocation25_spill] sm:$0xff] }
 0x318   :  { %v1153_v0 = vadd.f32 %v1152_v54, %v10165_v27  ;;  %v10169_v27 = vld [vmem:[#allocation19_spill] sm:$0xff] }
 0x319   :  { %v2038_v17 = vadd.f32 %v1922_v1, %v1729_v22  ;;  %v2516_v46 = vpop.f32.mrf.mxu0  ;;  %v9878_v1 = vshll.u32 %v8223_v2, 16  ;;  %v3470_v22 = vrot.slane %v10168_v52, 2 }
 0x31a   :  { %5795 = vmatmul.msk.bf16.gmra.mxu1 %vm566_vm2, %v8141_v47  ;;  %v3468_v47 = vrot.slane %v10167_v56, 3  ;;  %v10170_v56 = vld [vmem:[#allocation129_spill] sm:$0xff] }
 0x31b   :  { %5837 = vmatmul.msk.bf16.gmra.mxu2 %vm566_vm2, %v8176_v21  ;;  %v8264_v51 = vadd.f32 %v2513_v11, %v2038_v17  ;;  %v2225_v17 = vrot.slane %v9875_v13, 1  ;;  %v2228_v54 = vrot.slane %v9878_v1, 2 }
 0x31c   :  { %5925 = vmatmul.msk.bf16.gmra.mxu0 %vm566_vm2, %v2221_v7 }
 0x31d   :  { %10164 = vst [vmem:[#allocation38_spill] sm:$0xff] %v8264_v51  ;;  %v2229_v36 = vor.u32 %v2228_v54, %v2225_v17 }
 0x31e   :  { %v1616_v43 = vpop.f32.mrf.mxu2 }
 0x31f   :  { %v1730_v19 = vadd.f32 %v1616_v43, %v1153_v0  ;;  %v1154_v42 = vpop.f32.mrf.mxu1  ;;  %v8278_v7 = vpop.f32.mrf.mxu3  ;;  %v3471_v0 = vrot.slane %v10169_v27, 3  ;;  %v3469_v43 = vor.u32 %v3468_v47, %v3467_v32  ;;  %v2230_v27 = vsel %vm2062_vm4, %v2220_v10, %v2229_v36  ;;  %v10173_v10 = vld [vmem:[#allocation26_spill] sm:$0xff] }
 0x320   :  { %v1155_v52 = vadd.f32 %v1154_v42, %v10170_v56  ;;  %v10171_v42 = vld [vmem:[#allocation131_spill] sm:$0xff]  ;;  %v3475_v17 = vrot.slane %v10173_v10, 3 }
 0x321   :  { %v2039_v21 = vadd.f32 %v8210_v28, %v1730_v19  ;;  %v2518_v11 = vpop.f32.mrf.mxu0  ;;  %v3472_v6 = vor.u32 %v3471_v0, %v3470_v22 }
 0x323   :  { %v8281_v51 = vadd.f32 %v2516_v46, %v2039_v21  ;;  %v3473_v28 = vsel %vm3466_vm5, %v3469_v43, %v3472_v6 }
 0x324   :  { %6017 = vmatmul.msk.bf16.vlgmr.msra.gmra.mxu3 %vm566_vm2, %v3473_v28 }
 0x326   :  { %v1618_v19 = vpop.f32.mrf.mxu2 }
 0x327   :  { %v1731_v13 = vadd.f32 %v1618_v19, %v1155_v52  ;;  %v1157_v2 = vpop.f32.mrf.mxu1  ;;  %v8288_v4 = vpop.f32.mrf.mxu3  ;;  %v10175_v52 = vld [vmem:[#allocation55_spill] sm:$0xff] }
 0x328   :  { %v1158_v32 = vadd.f32 %v1157_v2, %v10171_v42  ;;  %v233_v28 = vpack.c.bf16 %v10175_v52, %v10175_v52 }
 0x329   :  { %v2040_v1 = vadd.f32 %v8228_v49, %v1731_v13  ;;  %v2521_v14 = vpop.f32.mrf.mxu0  ;;  %v10172_v13 = vld [vmem:[#allocation34_spill] sm:$0xff] }
 0x32a   :  { %5796 = vmatmul.msk.bf16.gmra.mxu1 %vm566_vm2, %v8172_v48  ;;  %v3474_v21 = vrot.slane %v10172_v13, 2 }
 0x32b   :  { %5838 = vmatmul.msk.bf16.gmra.mxu2 %vm566_vm2, %v8201_v50  ;;  %v8294_v46 = vadd.f32 %v2518_v11, %v2040_v1  ;;  %v10174_v11 = vld [vmem:[#allocation133_spill] sm:$0xff] }
 0x32c   :  { %5926 = vmatmul.msk.bf16.gmra.mxu0 %vm566_vm2, %v2230_v27  ;;  %v3476_v43 = vor.u32 %v3475_v17, %v3474_v21  ;;  %v10177_v21 = vld [vmem:[#allocation43_spill] sm:$0xff] }
 0x32d   :  { %v3478_v10 = vrot.slane %v10177_v21, 2 }
 0x32e   :  { %v1621_v47 = vpop.f32.mrf.mxu2  ;;  %v3477_v1 = vsel %vm3466_vm5, %v3472_v6, %v3476_v43  ;;  %v10176_v6 = vld [vmem:[#allocation135_spill] sm:$0xff] }
 0x32f   :  { %v1732_v22 = vadd.f32 %v1621_v47, %v1158_v32  ;;  %v1159_v49 = vpop.f32.mrf.mxu1  ;;  %v8301_v48 = vpop.f32.mrf.mxu3 }
 0x330   :  { %v1160_v56 = vadd.f32 %v1159_v49, %v10174_v11 }
 0x331   :  { %v2041_v54 = vadd.f32 %v8239_v15, %v1732_v22  ;;  %v2523_v0 = vpop.f32.mrf.mxu0 }
 0x333   :  { %v8303_v50 = vadd.f32 %v2521_v14, %v2041_v54 }
 0x334   :  { %6018 = vmatmul.msk.bf16.gmra.mxu3 %vm566_vm2, %v3477_v1 }
 0x336   :  { %v1623_v2 = vpop.f32.mrf.mxu2 }
 0x337   :  { %v1733_v19 = vadd.f32 %v1623_v2, %v1160_v56  ;;  %v1162_v27 = vpop.f32.mrf.mxu1  ;;  %v8311_v32 = vpop.f32.mrf.mxu3  ;;  %v6457_v56 = vmov 0  }
 0x338   :  { %v1163_v47 = vadd.f32 %v1162_v27, %v10176_v6  ;;  %6385 = vset.pattern.permute.xlu0 %v6457_v56  ;;  %6386 = vset.pattern.permute.xlu1 %v6457_v56  ;;  %v10180_v6 = vld [vmem:[#allocation137_spill] sm:$0xff] }
 0x339   :  { %v2042_v15 = vadd.f32 %v8251_v8, %v1733_v19  ;;  %v2526_v42 = vpop.f32.mrf.mxu0  ;;  %v10178_v8 = vld [vmem:[#allocation35_spill] sm:$0xff]  ;;  %6387 = vset.pattern.permute.xlu2 %v6457_v56  ;;  %v6419_v19 = vld [vmem:[%s9729_s0 + $0x18] sm:$0xff] }
 0x33a   :  { %5797 = vmatmul.msk.bf16.gmra.mxu1 %vm566_vm2, %v233_v28  ;;  %v3479_v17 = vrot.slane %v10178_v8, 3  ;;  %v2657_v27 = vrot.slane %v6419_v19, 2 }
 0x33b   :  { %5839 = vmatmul.msk.bf16.gmra.mxu2 %vm566_vm2, %v8197_v58  ;;  %v8316_v14 = vadd.f32 %v2523_v0, %v2042_v15  ;;  %v4721_v58 = vld [vmem:[%s9731_s3] sm:$0xff]  ;;  %v6417_v0 = vld [vmem:[%s9729_s0 + $0x8] sm:$0xff] }
 0x33c   :  { %5927 = vmatmul.msk.bf16.gmra.mxu0 %vm566_vm2, %v2229_v36  ;;  %4804 = vperm.xlu0 %6385, %v4721_v58   ;;  %v3480_v36 = vor.u32 %v3479_v17, %v3478_v10  ;;  %v2654_v2 = vrot.slane %v6417_v0, 2 }
 0x33e   :  { %v1626_v22 = vpop.f32.mrf.mxu2  ;;  %v3481_v15 = vsel %vm3466_vm5, %v3476_v43, %v3480_v36 }
 0x33f   :  { %v1734_v49 = vadd.f32 %v1626_v22, %v1163_v47  ;;  %v1164_v13 = vpop.f32.mrf.mxu1  ;;  %v8323_v11 = vpop.f32.mrf.mxu3 }
 0x340   :  { %v1165_v47 = vadd.f32 %v1164_v13, %v10180_v6  ;;  %v4722_v13 = vld [vmem:[%s9731_s3 + $0x8] sm:$0xff] }
 0x341   :  { %v2043_v54 = vadd.f32 %v8258_v20, %v1734_v49  ;;  %v2528_v1 = vpop.f32.mrf.mxu0  ;;  %v6418_v20 = vld [vmem:[%s9729_s0 + $0x10] sm:$0xff]  ;;  %v4059_v49 = vrot.slane %v6419_v19, 3 }
 0x342   :  { %v2655_v52 = vrot.slane %v6418_v20, 2  ;;  %v4058_v22 = vrot.slane %v6418_v20, 3 }
 0x343   :  { %v8334_v28 = vadd.f32 %v2526_v42, %v2043_v54 }
 0x344   :  { %6019 = vmatmul.msk.bf16.gmra.mxu3 %vm566_vm2, %v3481_v15  ;;  %v2656_v42 = vsel %vm2653_vm6, %v2654_v2, %v2655_v52  ;;  %v2658_v17 = vsel %vm2653_vm6, %v2655_v52, %v2657_v27  ;;  %v4060_v58 = vsel %vm4057_vm7, %v4058_v22, %v4059_v49  ;;  %4809 = vperm.xlu0 %6385, %v4722_v13   ;;  %v10182_v2 = vld [vmem:[#allocation85_spill] sm:$0xff]  ;;  %v10183_v15 = vld [vmem:[#allocation52_spill] sm:$0xff] }
 0x345   :  { %10179 = vst [vmem:[#allocation112_spill] sm:$0xff] %v8334_v28  ;;  %v3482_v6 = vrot.slane %v10183_v15, 2 }
 0x346   :  { %v1628_v21 = vpop.f32.mrf.mxu2 }
 0x347   :  { %v1735_v10 = vadd.f32 %v1628_v21, %v1165_v47  ;;  %v1167_v8 = vpop.f32.mrf.mxu1  ;;  %v8346_v43 = vpop.f32.mrf.mxu3  ;;  %v10184_v47 = vld [vmem:[#allocation44_spill] sm:$0xff] }
 0x348   :  { %v3483_v22 = vrot.slane %v10184_v47, 3 }
 0x349   :  { %v2044_v54 = vadd.f32 %v8278_v7, %v1735_v10  ;;  %v2531_v56 = vpop.f32.mrf.mxu0  ;;  %v1168_v7 = vadd.f32 %v1167_v8, %v10182_v2  ;;  %v6420_v8 = vld [vmem:[%s9729_s0 + $0x20] sm:$0xff] }
 0x34a   :  { %5929 = vmatmul.msk.bf16.vlgmr.msra.gmra.mxu1 %vm566_vm2, %v2656_v42  ;;  %v2659_v13 = vrot.slane %v6420_v8, 2 }
 0x34b   :  { %5975 = vmatmul.msk.bf16.vlgmr.msra.gmra.mxu2 %vm566_vm2, %v2658_v17  ;;  %v8353_v0 = vadd.f32 %v2528_v1, %v2044_v54  ;;  %v4723_v1 = vld [vmem:[%s9731_s3 + $0x10] sm:$0xff]  ;;  %v3484_v54 = vor.u32 %v3483_v22, %v3482_v6 }
 0x34c   :  { %6059 = vmatmul.msk.bf16.vlgmr.msra.gmra.mxu0 %vm566_vm2, %v4060_v58  ;;  %4814 = vperm.xlu1 %6386, %v4723_v1   ;;  %v2660_v1 = vsel %vm2653_vm6, %v2657_v27, %v2659_v13  ;;  %v10187_v27 = vld [vmem:[#allocation94_spill] sm:$0xff] }
 0x34d   :  { %10181 = vst [vmem:[#allocation115_spill] sm:$0xff] %v8353_v0  ;;  %v3485_v2 = vsel %vm3466_vm5, %v3480_v36, %v3484_v54  ;;  %v4724_v36 = vld [vmem:[%s9731_s3 + $0x18] sm:$0xff] }
 0x34e   :  { %v1631_v20 = vpop.f32.mrf.mxu2 }
 0x34f   :  { %v1736_v52 = vadd.f32 %v1631_v20, %v1168_v7  ;;  %v1169_v19 = vpop.f32.mrf.mxu1  ;;  %v8360_v42 = vpop.f32.mrf.mxu3  ;;  %v10186_v7 = vld [vmem:[#allocation91_spill] sm:$0xff]  ;;  %v4061_v20 = vrot.slane %v6420_v8, 3 }
 0x351   :  { %v2045_v21 = vadd.f32 %v8288_v4, %v1736_v52  ;;  %v2533_v10 = vpop.f32.mrf.mxu0  ;;  %v1170_v4 = vadd.f32 %v1169_v19, %v10186_v7  ;;  %v4062_v22 = vsel %vm4057_vm7, %v4059_v49, %v4061_v20  ;;  %v10188_v7 = vld [vmem:[#allocation63_spill] sm:$0xff] }
 0x353   :  { %v8365_v58 = vadd.f32 %v2531_v56, %v2045_v21 }
 0x354   :  { %6020 = vmatmul.msk.bf16.gmra.mxu3 %vm566_vm2, %v3485_v2  ;;  %4819 = vperm.xlu1 %6386, %v4724_v36  }
 0x355   :  { %10185 = vst [vmem:[#allocation118_spill] sm:$0xff] %v8365_v58 }
 0x356   :  { %v1633_v52 = vpop.f32.mrf.mxu2 }
 0x357   :  { %v1737_v15 = vadd.f32 %v1633_v52, %v1170_v4  ;;  %v1172_v47 = vpop.f32.mrf.mxu1  ;;  %v8376_v21 = vpop.f32.mrf.mxu3  ;;  %v3486_v4 = vrot.slane %v10188_v7, 2  ;;  %v10189_v52 = vld [vmem:[#allocation53_spill] sm:$0xff] }
 0x359   :  { %v2046_v56 = vadd.f32 %v8301_v48, %v1737_v15  ;;  %v2536_v6 = vpop.f32.mrf.mxu0  ;;  %v1173_v48 = vadd.f32 %v1172_v47, %v10187_v27  ;;  %v3487_v15 = vrot.slane %v10189_v52, 3 }
 0x35a   :  { %5930 = vmatmul.msk.bf16.gmra.mxu1 %vm566_vm2, %v2658_v17 }
 0x35b   :  { %5976 = vmatmul.msk.bf16.gmra.mxu2 %vm566_vm2, %v2660_v1  ;;  %v8383_v19 = vadd.f32 %v2533_v10, %v2046_v56  ;;  %v3488_v36 = vor.u32 %v3487_v15, %v3486_v4  ;;  %v6421_v10 = vld [vmem:[%s9729_s0 + $0x28] sm:$0xff] }
 0x35c   :  { %6060 = vmatmul.msk.bf16.gmra.mxu0 %vm566_vm2, %v4062_v22  ;;  %v2661_v47 = vrot.slane %v6421_v10, 2  ;;  %v10191_v22 = vld [vmem:[#allocation97_spill] sm:$0xff] }
 0x35d   :  { %v3489_v56 = vsel %vm3466_vm5, %v3484_v54, %v3488_v36 }
 0x35e   :  { %v1636_v8 = vpop.f32.mrf.mxu2  ;;  %v2662_v7 = vsel %vm2653_vm6, %v2659_v13, %v2661_v47 }
 0x35f   :  { %v1738_v2 = vadd.f32 %v1636_v8, %v1173_v48  ;;  %v1174_v49 = vpop.f32.mrf.mxu1  ;;  %v8390_v17 = vpop.f32.mrf.mxu3  ;;  %v4063_v48 = vrot.slane %v6421_v10, 3 }
 0x360   :  { %v1175_v27 = vadd.f32 %v1174_v49, %v10191_v22  ;;  %v10193_v49 = vld [vmem:[#allocation99_spill] sm:$0xff]  ;;  %v10194_v22 = vld [vmem:[#allocation70_spill] sm:$0xff] }
 0x361   :  { %v2047_v58 = vadd.f32 %v8311_v32, %v1738_v2  ;;  %v2538_v0 = vpop.f32.mrf.mxu0  ;;  %v4064_v4 = vsel %vm4057_vm7, %v4061_v20, %v4063_v48 }
 0x363   :  { %v8392_v28 = vadd.f32 %v2536_v6, %v2047_v58 }
 0x364   :  { %6021 = vmatmul.msk.bf16.gmra.mxu3 %vm566_vm2, %v3489_v56 }
 0x365   :  { %10190 = vst [vmem:[#allocation121_spill] sm:$0xff] %v8392_v28 }
 0x366   :  { %v1638_v8 = vpop.f32.mrf.mxu2 }
 0x367   :  { %v1739_v32 = vadd.f32 %v1638_v8, %v1175_v27  ;;  %v1177_v2 = vpop.f32.mrf.mxu1  ;;  %v8403_v52 = vpop.f32.mrf.mxu3  ;;  %v10195_v27 = vld [vmem:[#allocation64_spill] sm:$0xff] }
 0x368   :  { %v1178_v15 = vadd.f32 %v1177_v2, %v10193_v49  ;;  %v3491_v8 = vrot.slane %v10195_v27, 3  ;;  %v6422_v2 = vld [vmem:[%s9729_s0 + $0x30] sm:$0xff] }
 0x369   :  { %v2048_v58 = vadd.f32 %v8323_v11, %v1739_v32  ;;  %v2541_v6 = vpop.f32.mrf.mxu0  ;;  %v3490_v11 = vrot.slane %v10194_v22, 2 }
 0x36a   :  { %5931 = vmatmul.msk.bf16.gmra.mxu1 %vm566_vm2, %v2660_v1 }
 0x36b   :  { %5977 = vmatmul.msk.bf16.gmra.mxu2 %vm566_vm2, %v2662_v7  ;;  %v8407_v54 = vadd.f32 %v2538_v0, %v2048_v58  ;;  %v4727_v0 = vld [vmem:[%s9731_s3 + $0x30] sm:$0xff]  ;;  %v3492_v1 = vor.u32 %v3491_v8, %v3490_v11 }
 0x36c   :  { %6061 = vmatmul.msk.bf16.gmra.mxu0 %vm566_vm2, %v4064_v4  ;;  %4834 = vperm.xlu0 %6385, %v4727_v0   ;;  %v2663_v4 = vrot.slane %v6422_v2, 2 }
 0x36d   :  { %10192 = vst [vmem:[#allocation124_spill] sm:$0xff] %v8407_v54  ;;  %v3493_v49 = vsel %vm3466_vm5, %v3488_v36, %v3492_v1  ;;  %v4725_v36 = vld [vmem:[%s9731_s3 + $0x20] sm:$0xff] }
 0x36e   :  { %v1641_v10 = vpop.f32.mrf.mxu2  ;;  %v2664_v0 = vsel %vm2653_vm6, %v2661_v47, %v2663_v4  ;;  %4824 = vperm.xlu2 %6387, %v4725_v36   ;;  %v10199_v47 = vld [vmem:[#allocation103_spill] sm:$0xff] }
 0x36f   :  { %v1740_v56 = vadd.f32 %v1641_v10, %v1178_v15  ;;  %v1179_v13 = vpop.f32.mrf.mxu1  ;;  %v8414_v28 = vpop.f32.mrf.mxu3  ;;  %v10197_v15 = vld [vmem:[#allocation101_spill] sm:$0xff]  ;;  %v4065_v10 = vrot.slane %v6422_v2, 3 }
 0x371   :  { %v2049_v20 = vadd.f32 %v8346_v43, %v1740_v56  ;;  %v2543_v32 = vpop.f32.mrf.mxu0  ;;  %v1180_v43 = vadd.f32 %v1179_v13, %v10197_v15  ;;  %v4066_v8 = vsel %vm4057_vm7, %v4063_v48, %v4065_v10  ;;  %v4728_v13 = vld [vmem:[%s9731_s3 + $0x38] sm:$0xff] }
 0x372   :  { %4839 = vperm.xlu1 %6386, %v4728_v13  }
 0x373   :  { %v8419_v58 = vadd.f32 %v2541_v6, %v2049_v20 }
 0x374   :  { %6022 = vmatmul.msk.bf16.gmra.mxu3 %vm566_vm2, %v3493_v49 }
 0x375   :  { %10196 = vst [vmem:[#allocation127_spill] sm:$0xff] %v8419_v58 }
 0x376   :  { %v1643_v56 = vpop.f32.mrf.mxu2 }
 0x377   :  { %v1741_v22 = vadd.f32 %v1643_v56, %v1180_v43  ;;  %v1182_v27 = vpop.f32.mrf.mxu1  ;;  %v8430_v20 = vpop.f32.mrf.mxu3  ;;  %v10200_v43 = vld [vmem:[#allocation81_spill] sm:$0xff] }
 0x378   :  { %v1183_v48 = vadd.f32 %v1182_v27, %v10199_v47  ;;  %v3494_v56 = vrot.slane %v10200_v43, 2  ;;  %v6423_v27 = vld [vmem:[%s9729_s0 + $0x38] sm:$0xff] }
 0x379   :  { %v2050_v6 = vadd.f32 %v8360_v42, %v1741_v22  ;;  %v2546_v11 = vpop.f32.mrf.mxu0  ;;  %v10201_v22 = vld [vmem:[#allocation71_spill] sm:$0xff]  ;;  %v2665_v13 = vrot.slane %v6423_v27, 2 }
 0x37a   :  { %5932 = vmatmul.msk.bf16.gmra.mxu1 %vm566_vm2, %v2662_v7  ;;  %v3495_v58 = vrot.slane %v10201_v22, 3 }
 0x37b   :  { %5978 = vmatmul.msk.bf16.gmra.mxu2 %vm566_vm2, %v2664_v0  ;;  %v8440_v42 = vadd.f32 %v2543_v32, %v2050_v6  ;;  %v4726_v32 = vld [vmem:[%s9731_s3 + $0x28] sm:$0xff] }
 0x37c   :  { %6062 = vmatmul.msk.bf16.gmra.mxu0 %vm566_vm2, %v4066_v8  ;;  %4829 = vperm.xlu2 %6387, %v4726_v32   ;;  %v3496_v6 = vor.u32 %v3495_v58, %v3494_v56  ;;  %v2666_v32 = vsel %vm2653_vm6, %v2663_v4, %v2665_v13  ;;  %v10205_v4 = vld [vmem:[#allocation108_spill] sm:$0xff] }
 0x37d   :  { %10198 = vst [vmem:[#allocation18_spill] sm:$0xff] %v8440_v42 }
 0x37e   :  { %v1646_v2 = vpop.f32.mrf.mxu2  ;;  %v3497_v47 = vsel %vm3466_vm5, %v3492_v1, %v3496_v6  ;;  %v4730_v1 = vld [vmem:[%s9731_s3 + $0x48] sm:$0xff] }
 0x37f   :  { %v1742_v49 = vadd.f32 %v1646_v2, %v1183_v48  ;;  %v1184_v15 = vpop.f32.mrf.mxu1  ;;  %v8447_v36 = vpop.f32.mrf.mxu3  ;;  %v10203_v48 = vld [vmem:[#allocation105_spill] sm:$0xff]  ;;  %v4067_v2 = vrot.slane %v6423_v27, 3  ;;  %4849 = vperm.xlu0 %6385, %v4730_v1  }
 0x381   :  { %v2051_v54 = vadd.f32 %v8376_v21, %v1742_v49  ;;  %v2548_v7 = vpop.f32.mrf.mxu0  ;;  %v1185_v21 = vadd.f32 %v1184_v15, %v10203_v48  ;;  %v10206_v48 = vld [vmem:[#allocation90_spill] sm:$0xff] }
 0x383   :  { %v8452_v8 = vadd.f32 %v2546_v11, %v2051_v54  ;;  %v4068_v11 = vsel %vm4057_vm7, %v4065_v10, %v4067_v2 }
 0x384   :  { %6023 = vmatmul.msk.bf16.gmra.mxu3 %vm566_vm2, %v3497_v47 }
 0x385   :  { %10202 = vst [vmem:[#allocation12_spill] sm:$0xff] %v8452_v8 }
 0x386   :  { %v1648_v49 = vpop.f32.mrf.mxu2 }
 0x387   :  { %v1743_v43 = vadd.f32 %v1648_v49, %v1185_v21  ;;  %v1187_v22 = vpop.f32.mrf.mxu1  ;;  %v8463_v56 = vpop.f32.mrf.mxu3  ;;  %v3498_v21 = vrot.slane %v10206_v48, 2  ;;  %v10207_v49 = vld [vmem:[#allocation82_spill] sm:$0xff] }
 0x389   :  { %v2052_v54 = vadd.f32 %v8390_v17, %v1743_v43  ;;  %v2551_v58 = vpop.f32.mrf.mxu0  ;;  %v1188_v17 = vadd.f32 %v1187_v22, %v10205_v4  ;;  %v3499_v43 = vrot.slane %v10207_v49, 3  ;;  %v6424_v22 = vld [vmem:[%s9729_s0 + $0x40] sm:$0xff] }
 0x38a   :  { %5933 = vmatmul.msk.bf16.gmra.mxu1 %vm566_vm2, %v2664_v0  ;;  %v2667_v1 = vrot.slane %v6424_v22, 2 }
 0x38b   :  { %5979 = vmatmul.msk.bf16.gmra.mxu2 %vm566_vm2, %v2666_v32  ;;  %v8470_v15 = vadd.f32 %v2548_v7, %v2052_v54  ;;  %v4731_v7 = vld [vmem:[%s9731_s3 + $0x50] sm:$0xff]  ;;  %v3500_v54 = vor.u32 %v3499_v43, %v3498_v21 }
 0x38c   :  { %6063 = vmatmul.msk.bf16.gmra.mxu0 %vm566_vm2, %v4068_v11  ;;  %4854 = vperm.xlu1 %6386, %v4731_v7   ;;  %v2668_v7 = vsel %vm2653_vm6, %v2665_v13, %v2667_v1  ;;  %v10210_v13 = vld [vmem:[#allocation114_spill] sm:$0xff] }
 0x38d   :  { %10204 = vst [vmem:[#allocation25_spill] sm:$0xff] %v8470_v15  ;;  %v3501_v4 = vsel %vm3466_vm5, %v3496_v6, %v3500_v54  ;;  %v4729_v6 = vld [vmem:[%s9731_s3 + $0x40] sm:$0xff] }
 0x38e   :  { %v1651_v27 = vpop.f32.mrf.mxu2  ;;  %4844 = vperm.xlu2 %6387, %v4729_v6  }
 0x38f   :  { %v1744_v47 = vadd.f32 %v1651_v27, %v1188_v17  ;;  %v1189_v10 = vpop.f32.mrf.mxu1  ;;  %v8477_v0 = vpop.f32.mrf.mxu3  ;;  %v10209_v17 = vld [vmem:[#allocation111_spill] sm:$0xff]  ;;  %v4069_v27 = vrot.slane %v6424_v22, 3 }
 0x391   :  { %v2053_v8 = vadd.f32 %v8403_v52, %v1744_v47  ;;  %v2553_v42 = vpop.f32.mrf.mxu0  ;;  %v1190_v52 = vadd.f32 %v1189_v10, %v10209_v17  ;;  %v4070_v21 = vsel %vm4057_vm7, %v4067_v2, %v4069_v27  ;;  %v10211_v17 = vld [vmem:[#allocation3_spill] sm:$0xff] }
 0x393   :  { %v8482_v11 = vadd.f32 %v2551_v58, %v2053_v8 }
 0x394   :  { %6024 = vmatmul.msk.bf16.gmra.mxu3 %vm566_vm2, %v3501_v4 }
 0x395   :  { %10208 = vst [vmem:[#allocation19_spill] sm:$0xff] %v8482_v11 }
 0x396   :  { %v1653_v47 = vpop.f32.mrf.mxu2 }
 0x397   :  { %v1745_v48 = vadd.f32 %v1653_v47, %v1190_v52  ;;  %v1192_v49 = vpop.f32.mrf.mxu1  ;;  %v8493_v43 = vpop.f32.mrf.mxu3  ;;  %v3502_v52 = vrot.slane %v10211_v17, 2  ;;  %v10212_v47 = vld [vmem:[#allocation2_spill] sm:$0xff] }
 0x399   :  { %v2054_v8 = vadd.f32 %v8414_v28, %v1745_v48  ;;  %v2556_v58 = vpop.f32.mrf.mxu0  ;;  %v1193_v28 = vadd.f32 %v1192_v49, %v10210_v13  ;;  %v3503_v48 = vrot.slane %v10212_v47, 3  ;;  %v6425_v49 = vld [vmem:[%s9729_s0 + $0x48] sm:$0xff] }
 0x39a   :  { %5934 = vmatmul.msk.bf16.gmra.mxu1 %vm566_vm2, %v2666_v32  ;;  %v2669_v6 = vrot.slane %v6425_v49, 2 }
 0x39b   :  { %5980 = vmatmul.msk.bf16.gmra.mxu2 %vm566_vm2, %v2668_v7  ;;  %v8500_v10 = vadd.f32 %v2553_v42, %v2054_v8  ;;  %v4733_v42 = vld [vmem:[%s9731_s3 + $0x60] sm:$0xff]  ;;  %v3504_v8 = vor.u32 %v3503_v48, %v3502_v52 }
 0x39c   :  { %6064 = vmatmul.msk.bf16.gmra.mxu0 %vm566_vm2, %v4070_v21  ;;  %4864 = vperm.xlu0 %6385, %v4733_v42  }
 0x39d   :  { %v3505_v13 = vsel %vm3466_vm5, %v3500_v54, %v3504_v8 }
 0x39e   :  { %v1656_v22 = vpop.f32.mrf.mxu2 }
 0x39f   :  { %v1746_v4 = vadd.f32 %v1656_v22, %v1193_v28  ;;  %v1194_v2 = vpop.f32.mrf.mxu1  ;;  %v1977_v32 = vpop.f32.mrf.mxu3  ;;  %v10213_v28 = vld [vmem:[#allocation117_spill] sm:$0xff] }
 0x3a0   :  { %v1195_v22 = vadd.f32 %v1194_v2, %v10213_v28  ;;  %v2670_v32 = vsel %vm2653_vm6, %v2667_v1, %v2669_v6  ;;  %v10214_v1 = vld [vmem:[#allocation120_spill] sm:$0xff] }
 0x3a1   :  { %v2055_v11 = vadd.f32 %v8430_v20, %v1746_v4  ;;  %v2558_v15 = vpop.f32.mrf.mxu0  ;;  %v4071_v20 = vrot.slane %v6425_v49, 3 }
 0x3a3   :  { %v8510_v21 = vadd.f32 %v2556_v58, %v2055_v11  ;;  %v4734_v11 = vld [vmem:[%s9731_s3 + $0x68] sm:$0xff]  ;;  %v4072_v48 = vsel %vm4057_vm7, %v4069_v27, %v4071_v20  ;;  %v3507_v27 = vrot.slane %v6523_v9, 3 }
 0x3a4   :  { %6025 = vmatmul.msk.bf16.gmra.mxu3 %vm566_vm2, %v3505_v13  ;;  %4869 = vperm.xlu1 %6386, %v4734_v11  }
 0x3a6   :  { %v1658_v4 = vpop.f32.mrf.mxu2 }
 0x3a7   :  { %v1747_v17 = vadd.f32 %v1658_v4, %v1195_v22  ;;  %v1197_v47 = vpop.f32.mrf.mxu1  ;;  %v8524_v54 = vpop.f32.mrf.mxu3 }
 0x3a8   :  { %v1198_v42 = vadd.f32 %v1197_v47, %v10214_v1  ;;  %v6426_v47 = vld [vmem:[%s9729_s0 + $0x50] sm:$0xff] }
 0x3a9   :  { %v2056_v58 = vadd.f32 %v8447_v36, %v1747_v17  ;;  %v2561_v52 = vpop.f32.mrf.mxu0  ;;  %v3506_v36 = vrot.slane %v6591_v40, 2  ;;  %v2671_v40 = vrot.slane %v6426_v47, 2 }
 0x3aa   :  { %5935 = vmatmul.msk.bf16.gmra.mxu1 %vm566_vm2, %v2668_v7 }
 0x3ab   :  { %5981 = vmatmul.msk.bf16.gmra.mxu2 %vm566_vm2, %v2670_v32  ;;  %v8528_v2 = vadd.f32 %v2558_v15, %v2056_v58  ;;  %v4732_v15 = vld [vmem:[%s9731_s3 + $0x58] sm:$0xff]  ;;  %v3508_v7 = vor.u32 %v3507_v27, %v3506_v36  ;;  %v10215_v58 = vld [vmem:[#allocation123_spill] sm:$0xff] }
 0x3ac   :  { %6065 = vmatmul.msk.bf16.gmra.mxu0 %vm566_vm2, %v4072_v48  ;;  %4859 = vperm.xlu2 %6387, %v4732_v15   ;;  %v4073_v48 = vrot.slane %v6426_v47, 3 }
 0x3ad   :  { %v3509_v9 = vsel %vm3466_vm5, %v3504_v8, %v3508_v7  ;;  %v4736_v8 = vld [vmem:[%s9731_s3 + $0x78] sm:$0xff] }
 0x3ae   :  { %v1661_v49 = vpop.f32.mrf.mxu2  ;;  %v4074_v27 = vsel %vm4057_vm7, %v4071_v20, %v4073_v48  ;;  %4879 = vperm.xlu0 %6385, %v4736_v8  }
 0x3af   :  { %v1748_v13 = vadd.f32 %v1661_v49, %v1198_v42  ;;  %v1199_v28 = vpop.f32.mrf.mxu1  ;;  %v8535_v17 = vpop.f32.mrf.mxu3 }
 0x3b1   :  { %v2057_v22 = vadd.f32 %v8463_v56, %v1748_v13  ;;  %v2563_v4 = vpop.f32.mrf.mxu0  ;;  %v1200_v56 = vadd.f32 %v1199_v28, %v10215_v58  ;;  %v2672_v13 = vsel %vm2653_vm6, %v2669_v6, %v2671_v40  ;;  %v10216_v6 = vld [vmem:[#allocation126_spill] sm:$0xff]  ;;  %v3511_v58 = vrot.slane %v6594_v41, 3 }
 0x3b3   :  { %v8540_v11 = vadd.f32 %v2561_v52, %v2057_v22 }
 0x3b4   :  { %6026 = vmatmul.msk.bf16.gmra.mxu3 %vm566_vm2, %v3509_v9  ;;  %v3510_v9 = vrot.slane %v6655_v16, 2 }
 0x3b6   :  { %v1663_v1 = vpop.f32.mrf.mxu2 }
 0x3b7   :  { %v1749_v42 = vadd.f32 %v1663_v1, %v1200_v56  ;;  %v1202_v49 = vpop.f32.mrf.mxu1  ;;  %v8551_v22 = vpop.f32.mrf.mxu3 }
 0x3b9   :  { %v2058_v52 = vadd.f32 %v8477_v0, %v1749_v42  ;;  %v2566_v36 = vpop.f32.mrf.mxu0  ;;  %v1203_v0 = vadd.f32 %v1202_v49, %v10216_v6  ;;  %v3512_v42 = vor.u32 %v3511_v58, %v3510_v9  ;;  %v6427_v49 = vld [vmem:[%s9729_s0 + $0x58] sm:$0xff]  ;;  %v4805_v58 = vpop.permute.xlu0 %4804 }
 0x3ba   :  { %5936 = vmatmul.msk.bf16.gmra.mxu1 %vm566_vm2, %v2670_v32  ;;  %v2673_v16 = vrot.slane %v6427_v49, 2 }
 0x3bb   :  { %5982 = vmatmul.msk.bf16.gmra.mxu2 %vm566_vm2, %v2672_v13  ;;  %v8558_v28 = vadd.f32 %v2563_v4, %v2058_v52  ;;  %v4737_v4 = vld [vmem:[%s9731_s3 + $0x80] sm:$0xff]  ;;  %v3513_v41 = vsel %vm3466_vm5, %v3508_v7, %v3512_v42 }
 0x3bc   :  { %6066 = vmatmul.msk.bf16.gmra.mxu0 %vm566_vm2, %v4074_v27  ;;  %4884 = vperm.xlu1 %6386, %v4737_v4   ;;  %v4075_v27 = vrot.slane %v6427_v49, 3  ;;  %v2674_v6 = vsel %vm2653_vm6, %v2671_v40, %v2673_v16 }
 0x3be   :  { %v1666_v15 = vpop.f32.mrf.mxu2 }
 0x3bf   :  { %v1750_v47 = vadd.f32 %v1666_v15, %v1203_v0  ;;  %v1204_v20 = vpop.f32.mrf.mxu1  ;;  %v8565_v32 = vpop.f32.mrf.mxu3  ;;  %v4076_v15 = vsel %vm4057_vm7, %v4073_v48, %v4075_v27  ;;  %v3514_v48 = vrot.slane %v6707_v55, 2 }
 0x3c1   :  { %v2059_v56 = vadd.f32 %v8493_v43, %v1750_v47  ;;  %v2568_v1 = vpop.f32.mrf.mxu0 }
 0x3c3   :  { %v8570_v52 = vadd.f32 %v2566_v36, %v2059_v56  ;;  %v4735_v36 = vld [vmem:[%s9731_s3 + $0x70] sm:$0xff]  ;;  %v3515_v56 = vrot.slane %v10021_v12, 3 }
 0x3c4   :  { %6027 = vmatmul.msk.bf16.gmra.mxu3 %vm566_vm2, %v3513_v41  ;;  %4874 = vperm.xlu2 %6387, %v4735_v36  }
 0x3c5   :  { %v3516_v49 = vor.u32 %v3515_v56, %v3514_v48 }
 0x3c6   :  { %v1668_v43 = vpop.f32.mrf.mxu2 }
 0x3c7   :  { %v2870_v8 = vpop.f32.mrf.mxu1  ;;  %v8579_v47 = vpop.f32.mrf.mxu3  ;;  %v3517_v12 = vsel %vm3466_vm5, %v3512_v42, %v3516_v49 }
 0x3c8   :  { %v3074_v7 = vadd.f32 %v2870_v8, %v7398_v53  ;;  %v8599_v53 = vld [vmem:[%s9729_s0 + $0x60] sm:$0xff]  ;;  %v4810_v42 = vpop.permute.xlu0 %4809 }
 0x3c9   :  { %v4274_v0 = vpop.f32.mrf.mxu0  ;;  %v2675_v55 = vrot.slane %v8599_v53, 2  ;;  %v4077_v8 = vrot.slane %v8599_v53, 3 }
 0x3ca   :  { %5937 = vmatmul.msk.bf16.gmra.mxu1 %vm566_vm2, %v2672_v13  ;;  %v4739_v13 = vld [vmem:[%s9731_s3 + $0x90] sm:$0xff] }
 0x3cb   :  { %5983 = vmatmul.msk.bf16.gmra.mxu2 %vm566_vm2, %v2674_v6  ;;  %4894 = vperm.xlu0 %6385, %v4739_v13   ;;  %v4078_v56 = vsel %vm4057_vm7, %v4075_v27, %v4077_v8 }
 0x3cc   :  { %6067 = vmatmul.msk.bf16.gmra.mxu0 %vm566_vm2, %v4076_v15 }
 0x3ce   :  { %v3179_v20 = vpop.f32.mrf.mxu2 }
 0x3cf   :  { %v3383_v40 = vadd.f32 %v3179_v20, %v3074_v7  ;;  %v2872_v9 = vpop.f32.mrf.mxu1  ;;  %v8590_v4 = vpop.f32.mrf.mxu3 }
 0x3d0   :  { %v3075_v43 = vadd.f32 %v2872_v9, %v7408_v35  ;;  %v4740_v35 = vld [vmem:[%s9731_s3 + $0x98] sm:$0xff] }
 0x3d1   :  { %v4276_v1 = vpop.f32.mrf.mxu0  ;;  %v3974_v41 = vadd.f32 %v8524_v54, %v3383_v40  ;;  %v2676_v54 = vsel %vm2653_vm6, %v2673_v16, %v2675_v55  ;;  %4899 = vperm.xlu1 %6386, %v4740_v35  }
 0x3d3   :  { %v4478_v36 = vadd.f32 %v4274_v0, %v3974_v41 }
 0x3d4   :  { %6028 = vmatmul.msk.bf16.gmra.mxu3 %vm566_vm2, %v3517_v12 }
 0x3d5   :  { %v5207_v0 = vmul.f32 %v4805_v58, %v4478_v36  ;;  %v4815_v58 = vpop.permute.xlu1 %4814 }
 0x3d6   :  { %v3181_v15 = vpop.f32.mrf.mxu2 }
 0x3d7   :  { %v3384_v7 = vadd.f32 %v3181_v15, %v3075_v43  ;;  %v2875_v20 = vpop.f32.mrf.mxu1  ;;  %v8609_v13 = vpop.f32.mrf.mxu3  ;;  %v5375_v53 = vmul.f32 %v5207_v0, %v4478_v36 }
 0x3d9   :  { %v3975_v40 = vadd.f32 %v8535_v17, %v3384_v7  ;;  %v4279_v48 = vpop.f32.mrf.mxu0  ;;  %v3076_v17 = vadd.f32 %v2875_v20, %v7420_v37  ;;  %v3518_v7 = vrot.slane %v10023_v29, 2 }
 0x3da   :  { %5938 = vmatmul.msk.bf16.gmra.mxu1 %vm566_vm2, %v2674_v6 }
 0x3db   :  { %5984 = vmatmul.msk.bf16.gmra.mxu2 %vm566_vm2, %v2676_v54  ;;  %v4479_v9 = vadd.f32 %v4276_v1, %v3975_v40  ;;  %v3519_v1 = vrot.slane %v10024_v60, 3 }
 0x3dc   :  { %6068 = vmatmul.msk.bf16.gmra.mxu0 %vm566_vm2, %v4078_v56 }
 0x3dd   :  { %v6145_v16 = vpack.c.bf16 %v4479_v9, %v4478_v36  ;;  %v5208_v27 = vmul.f32 %v4810_v42, %v4479_v9  ;;  %v4738_v36 = vld [vmem:[%s9731_s3 + $0x88] sm:$0xff]  ;;  %v3520_v35 = vor.u32 %v3519_v1, %v3518_v7 }
 0x3de   :  { %v3184_v41 = vpop.f32.mrf.mxu2  ;;  %4889 = vperm.xlu2 %6387, %v4738_v36  }
 0x3df   :  { %6146 = vst [vmem:[%s9732_s4] sm:$0xff] %v6145_v16   ;;  %v5288_v12 = vadd.f32 %v5208_v27, %v5207_v0  ;;  %v5376_v6 = vmul.f32 %v5208_v27, %v4479_v9  ;;  %v3385_v43 = vadd.f32 %v3184_v41, %v3076_v17  ;;  %v2877_v15 = vpop.f32.mrf.mxu1  ;;  %v8624_v56 = vpop.f32.mrf.mxu3  ;;  %v8632_v0 = vld [vmem:[%s9729_s0 + $0x68] sm:$0xff]  ;;  %v3521_v60 = vsel %vm3466_vm5, %v3516_v49, %v3520_v35 }
 0x3e0   :  { %v2677_v29 = vrot.slane %v8632_v0, 2  ;;  %v4079_v17 = vrot.slane %v8632_v0, 3 }
 0x3e1   :  { %v5456_v40 = vadd.f32 %v5376_v6, %v5375_v53  ;;  %v3976_v37 = vadd.f32 %v8551_v22, %v3385_v43  ;;  %v4281_v20 = vpop.f32.mrf.mxu0  ;;  %v3077_v22 = vadd.f32 %v2877_v15, %v7432_v62  ;;  %v4742_v62 = vld [vmem:[%s9731_s3 + $0xa8] sm:$0xff] }
 0x3e2   :  { %v2678_v6 = vsel %vm2653_vm6, %v2675_v55, %v2677_v29  ;;  %v4080_v49 = vsel %vm4057_vm7, %v4077_v8, %v4079_v17  ;;  %4909 = vperm.xlu0 %6385, %v4742_v62  }
 0x3e3   :  { %v4480_v42 = vadd.f32 %v4279_v48, %v3976_v37 }
 0x3e4   :  { %6029 = vmatmul.msk.bf16.gmra.mxu3 %vm566_vm2, %v3521_v60  ;;  %v4825_v60 = vpop.permute.xlu2 %4824 }
 0x3e5   :  { %v5209_v9 = vmul.f32 %v4815_v58, %v4480_v42 }
 0x3e6   :  { %v3186_v16 = vpop.f32.mrf.mxu2 }
 0x3e7   :  { %v5289_v27 = vadd.f32 %v5288_v12, %v5209_v9  ;;  %v5377_v41 = vmul.f32 %v5209_v9, %v4480_v42  ;;  %v3386_v48 = vadd.f32 %v3186_v16, %v3077_v22  ;;  %v2880_v53 = vpop.f32.mrf.mxu1  ;;  %v8642_v37 = vpop.f32.mrf.mxu3  ;;  %v3522_v22 = vrot.slane %v10026_v24, 2 }
 0x3e8   :  { %v4820_v12 = vpop.permute.xlu1 %4819 }
 0x3e9   :  { %v5457_v43 = vadd.f32 %v5456_v40, %v5377_v41  ;;  %v3977_v7 = vadd.f32 %v8565_v32, %v3386_v48  ;;  %v4284_v1 = vpop.f32.mrf.mxu0  ;;  %v3078_v32 = vadd.f32 %v2880_v53, %v7444_v5  ;;  %v4743_v41 = vld [vmem:[%s9731_s3 + $0xb0] sm:$0xff] }
 0x3ea   :  { %5939 = vmatmul.msk.bf16.gmra.mxu1 %vm566_vm2, %v2676_v54  ;;  %4914 = vperm.xlu1 %6386, %v4743_v41   ;;  %v8665_v53 = vld [vmem:[%s9729_s0 + $0x70] sm:$0xff] }
 0x3eb   :  { %5985 = vmatmul.msk.bf16.gmra.mxu2 %vm566_vm2, %v2678_v6  ;;  %v4481_v15 = vadd.f32 %v4281_v20, %v3977_v7  ;;  %v3523_v20 = vrot.slane %v10027_v25, 3  ;;  %v2679_v24 = vrot.slane %v8665_v53, 2  ;;  %v4081_v7 = vrot.slane %v8665_v53, 3 }
 0x3ec   :  { %6069 = vmatmul.msk.bf16.gmra.mxu0 %vm566_vm2, %v4080_v49 }
 0x3ed   :  { %v6150_v55 = vpack.c.bf16 %v4481_v15, %v4480_v42  ;;  %v5210_v58 = vmul.f32 %v4820_v12, %v4481_v15 }
 0x3ee   :  { %v3189_v8 = vpop.f32.mrf.mxu2 }
 0x3ef   :  { %6342 = vst [vmem:[%s9732_s4 + $0x8] sm:$0xff] %v6150_v55   ;;  %v5290_v40 = vadd.f32 %v5289_v27, %v5210_v58  ;;  %v5378_v36 = vmul.f32 %v5210_v58, %v4481_v15  ;;  %v3387_v0 = vadd.f32 %v3189_v8, %v3078_v32  ;;  %v2882_v54 = vpop.f32.mrf.mxu1  ;;  %v8657_v42 = vpop.f32.mrf.mxu3  ;;  %v3524_v27 = vor.u32 %v3523_v20, %v3522_v22 }
 0x3f0   :  { %v2680_v32 = vsel %vm2653_vm6, %v2677_v29, %v2679_v24 }
 0x3f1   :  { %v5458_v9 = vadd.f32 %v5457_v43, %v5378_v36  ;;  %v3978_v16 = vadd.f32 %v8579_v47, %v3387_v0  ;;  %v4286_v5 = vpop.f32.mrf.mxu0  ;;  %v3525_v25 = vsel %vm3466_vm5, %v3520_v35, %v3524_v27  ;;  %v3079_v47 = vadd.f32 %v2882_v54, %v7458_v30  ;;  %v4741_v30 = vld [vmem:[%s9731_s3 + $0xa0] sm:$0xff] }
 0x3f2   :  { %v4082_v35 = vsel %vm4057_vm7, %v4079_v17, %v4081_v7  ;;  %4904 = vperm.xlu2 %6387, %v4741_v30  }
 0x3f3   :  { %v4482_v48 = vadd.f32 %v4284_v1, %v3978_v16  ;;  %v3527_v16 = vrot.slane %v10032_v44, 3 }
 0x3f4   :  { %6030 = vmatmul.msk.bf16.gmra.mxu3 %vm566_vm2, %v3525_v25  ;;  %v4835_v25 = vpop.permute.xlu0 %4834 }
 0x3f5   :  { %v5211_v43 = vmul.f32 %v4825_v60, %v4482_v48 }
 0x3f6   :  { %v3191_v49 = vpop.f32.mrf.mxu2 }
 0x3f7   :  { %v5291_v62 = vadd.f32 %v5290_v40, %v5211_v43  ;;  %v5379_v12 = vmul.f32 %v5211_v43, %v4482_v48  ;;  %v3388_v1 = vadd.f32 %v3191_v49, %v3079_v47  ;;  %v2885_v15 = vpop.f32.mrf.mxu1  ;;  %v8675_v36 = vpop.f32.mrf.mxu3 }
 0x3f8   :  { %v4830_v40 = vpop.permute.xlu2 %4829 }
 0x3f9   :  { %v5459_v55 = vadd.f32 %v5458_v9, %v5379_v12  ;;  %v3979_v58 = vadd.f32 %v8590_v4, %v3388_v1  ;;  %v4289_v8 = vpop.f32.mrf.mxu0  ;;  %v3080_v4 = vadd.f32 %v2885_v15, %v7470_v39  ;;  %v3526_v9 = vrot.slane %v10031_v33, 2  ;;  %v8698_v33 = vld [vmem:[%s9729_s0 + $0x78] sm:$0xff] }
 0x3fa   :  { %5940 = vmatmul.msk.bf16.gmra.mxu1 %vm566_vm2, %v2678_v6  ;;  %v2681_v44 = vrot.slane %v8698_v33, 2  ;;  %v4083_v12 = vrot.slane %v8698_v33, 3 }
 0x3fb   :  { %5986 = vmatmul.msk.bf16.gmra.mxu2 %vm566_vm2, %v2680_v32  ;;  %v4483_v0 = vadd.f32 %v4286_v5, %v3979_v58  ;;  %v3528_v47 = vor.u32 %v3527_v16, %v3526_v9  ;;  %v3531_v9 = vrot.slane %v10037_v26, 3 }
 0x3fc   :  { %6070 = vmatmul.msk.bf16.gmra.mxu0 %vm566_vm2, %v4082_v35  ;;  %v2682_v35 = vsel %vm2653_vm6, %v2679_v24, %v2681_v44 }
 0x3fd   :  { %v6155_v29 = vpack.c.bf16 %v4483_v0, %v4482_v48  ;;  %v5212_v54 = vmul.f32 %v4830_v40, %v4483_v0  ;;  %v4745_v48 = vld [vmem:[%s9731_s3 + $0xc0] sm:$0xff] }
 0x3fe   :  { %v3194_v17 = vpop.f32.mrf.mxu2  ;;  %4924 = vperm.xlu0 %6385, %v4745_v48  }
 0x3ff   :  { %6343 = vst [vmem:[%s9732_s4 + $0x10] sm:$0xff] %v6155_v29   ;;  %v5292_v60 = vadd.f32 %v5291_v62, %v5212_v54  ;;  %v5380_v22 = vmul.f32 %v5212_v54, %v4483_v0  ;;  %v3389_v20 = vadd.f32 %v3194_v17, %v3080_v4  ;;  %v2887_v6 = vpop.f32.mrf.mxu1  ;;  %v8690_v39 = vpop.f32.mrf.mxu3 }
 0x400   :  { %v3081_v49 = vadd.f32 %v2887_v6, %v7485_v63  ;;  %v4746_v63 = vld [vmem:[%s9731_s3 + $0xc8] sm:$0xff]  ;;  %v4840_v29 = vpop.permute.xlu1 %4839  ;;  %v3530_v6 = vrot.slane %v10036_v61, 2  ;;  %v4845_v48 = vpop.permute.xlu2 %4844  ;;  %v8731_v61 = vld [vmem:[%s9729_s0 + $0x80] sm:$0xff] }
 0x401   :  { %v5460_v5 = vadd.f32 %v5459_v55, %v5380_v22  ;;  %v3980_v41 = vadd.f32 %v8609_v13, %v3389_v20  ;;  %v4291_v53 = vpop.f32.mrf.mxu0  ;;  %v3529_v13 = vsel %vm3466_vm5, %v3524_v27, %v3528_v47  ;;  %v4084_v27 = vsel %vm4057_vm7, %v4081_v7, %v4083_v12  ;;  %4929 = vperm.xlu1 %6386, %v4746_v63   ;;  %v4850_v63 = vpop.permute.xlu0 %4849 }
 0x402   :  { %v2683_v26 = vrot.slane %v8731_v61, 2 }
 0x403   :  { %v4484_v43 = vadd.f32 %v4289_v8, %v3980_v41 }
 0x404   :  { %6031 = vmatmul.msk.bf16.gmra.mxu3 %vm566_vm2, %v3529_v13 }
 0x405   :  { %v5213_v62 = vmul.f32 %v4835_v25, %v4484_v43  ;;  %v3532_v25 = vor.u32 %v3531_v9, %v3530_v6 }
 0x406   :  { %v3196_v1 = vpop.f32.mrf.mxu2 }
 0x407   :  { %v5293_v15 = vadd.f32 %v5292_v60, %v5213_v62  ;;  %v5381_v55 = vmul.f32 %v5213_v62, %v4484_v43  ;;  %v3390_v58 = vadd.f32 %v3196_v1, %v3081_v49  ;;  %v2890_v8 = vpop.f32.mrf.mxu1  ;;  %v8708_v4 = vpop.f32.mrf.mxu3  ;;  %v4085_v49 = vrot.slane %v8731_v61, 3 }
 0x409   :  { %v5461_v30 = vadd.f32 %v5460_v5, %v5381_v55  ;;  %v3981_v40 = vadd.f32 %v8624_v56, %v3390_v58  ;;  %v4294_v0 = vpop.f32.mrf.mxu0  ;;  %v3082_v56 = vadd.f32 %v2890_v8, %v7498_v3  ;;  %v2684_v8 = vsel %vm2653_vm6, %v2681_v44, %v2683_v26  ;;  %v10217_v44 = vld [vmem:[#allocation15_spill] sm:$0xff] }
 0x40a   :  { %5941 = vmatmul.msk.bf16.gmra.mxu1 %vm566_vm2, %v2680_v32 }
 0x40b   :  { %5987 = vmatmul.msk.bf16.gmra.mxu2 %vm566_vm2, %v2682_v35  ;;  %v4485_v54 = vadd.f32 %v4291_v53, %v3981_v40  ;;  %v4744_v53 = vld [vmem:[%s9731_s3 + $0xb8] sm:$0xff] }
 0x40c   :  { %6071 = vmatmul.msk.bf16.gmra.mxu0 %vm566_vm2, %v4084_v27  ;;  %4919 = vperm.xlu2 %6387, %v4744_v53  }
 0x40d   :  { %v6160_v24 = vpack.c.bf16 %v4485_v54, %v4484_v43  ;;  %v5214_v17 = vmul.f32 %v4840_v29, %v4485_v54 }
 0x40e   :  { %v3199_v7 = vpop.f32.mrf.mxu2 }
 0x40f   :  { %6344 = vst [vmem:[%s9732_s4 + $0x18] sm:$0xff] %v6160_v24   ;;  %v5294_v60 = vadd.f32 %v5293_v15, %v5214_v17  ;;  %v5382_v22 = vmul.f32 %v5214_v17, %v4485_v54  ;;  %v3391_v20 = vadd.f32 %v3199_v7, %v3082_v56  ;;  %v2892_v32 = vpop.f32.mrf.mxu1  ;;  %v8723_v3 = vpop.f32.mrf.mxu3 }
 0x410   :  { %v3083_v33 = vadd.f32 %v2892_v32, %v7513_v31  ;;  %v4748_v31 = vld [vmem:[%s9731_s3 + $0xd8] sm:$0xff] }
 0x411   :  { %v5462_v16 = vadd.f32 %v5461_v30, %v5382_v22  ;;  %v3982_v5 = vadd.f32 %v8642_v37, %v3391_v20  ;;  %v4296_v41 = vpop.f32.mrf.mxu0  ;;  %v3533_v37 = vsel %vm3466_vm5, %v3528_v47, %v3532_v25  ;;  %v4086_v47 = vsel %vm4057_vm7, %v4083_v12, %v4085_v49  ;;  %4939 = vperm.xlu0 %6385, %v4748_v31   ;;  %v4860_v31 = vpop.permute.xlu2 %4859 }
 0x412   :  { %v3535_v22 = vrot.slane %v10042_v23, 3 }
 0x413   :  { %v4486_v43 = vadd.f32 %v4294_v0, %v3982_v5  ;;  %v4855_v5 = vpop.permute.xlu1 %4854 }
 0x414   :  { %6032 = vmatmul.msk.bf16.gmra.mxu3 %vm566_vm2, %v3533_v37 }
 0x415   :  { %v5215_v13 = vmul.f32 %v4845_v48, %v4486_v43  ;;  %v10218_v48 = vld [vmem:[#allocation27_spill] sm:$0xff] }
 0x416   :  { %v3201_v62 = vpop.f32.mrf.mxu2 }
 0x417   :  { %v5295_v1 = vadd.f32 %v5294_v60, %v5215_v13  ;;  %v5383_v15 = vmul.f32 %v5215_v13, %v4486_v43  ;;  %v3392_v55 = vadd.f32 %v3201_v62, %v3083_v33  ;;  %v2895_v58 = vpop.f32.mrf.mxu1  ;;  %v8741_v27 = vpop.f32.mrf.mxu3  ;;  %v3534_v60 = vrot.slane %v10041_v38, 2  ;;  %v8764_v38 = vld [vmem:[%s9729_s0 + $0x88] sm:$0xff] }
 0x418   :  { %v2685_v23 = vrot.slane %v8764_v38, 2  ;;  %v4087_v37 = vrot.slane %v8764_v38, 3 }
 0x419   :  { %v5463_v30 = vadd.f32 %v5462_v16, %v5383_v15  ;;  %v3983_v40 = vadd.f32 %v8657_v42, %v3392_v55  ;;  %v4299_v0 = vpop.f32.mrf.mxu0  ;;  %v3084_v42 = vadd.f32 %v2895_v58, %v10217_v44  ;;  %v4749_v16 = vld [vmem:[%s9731_s3 + $0xe0] sm:$0xff] }
 0x41a   :  { %5942 = vmatmul.msk.bf16.gmra.mxu1 %vm566_vm2, %v2682_v35  ;;  %4944 = vperm.xlu1 %6386, %v4749_v16   ;;  %v2686_v55 = vsel %vm2653_vm6, %v2683_v26, %v2685_v23  ;;  %v10219_v26 = vld [vmem:[#allocation30_spill] sm:$0xff] }
 0x41b   :  { %5988 = vmatmul.msk.bf16.gmra.mxu2 %vm566_vm2, %v2684_v8  ;;  %v4487_v29 = vadd.f32 %v4296_v41, %v3983_v40  ;;  %v3536_v41 = vor.u32 %v3535_v22, %v3534_v60 }
 0x41c   :  { %6072 = vmatmul.msk.bf16.gmra.mxu0 %vm566_vm2, %v4086_v47  ;;  %v4747_v47 = vld [vmem:[%s9731_s3 + $0xd0] sm:$0xff] }
 0x41d   :  { %v6165_v54 = vpack.c.bf16 %v4487_v29, %v4486_v43  ;;  %v5216_v56 = vmul.f32 %v4850_v63, %v4487_v29  ;;  %4934 = vperm.xlu2 %6387, %v4747_v47  }
 0x41e   :  { %v3204_v12 = vpop.f32.mrf.mxu2 }
 0x41f   :  { %6345 = vst [vmem:[%s9732_s4 + $0x20] sm:$0xff] %v6165_v54   ;;  %v5296_v24 = vadd.f32 %v5295_v1, %v5216_v56  ;;  %v5384_v17 = vmul.f32 %v5216_v56, %v4487_v29  ;;  %v3393_v7 = vadd.f32 %v3204_v12, %v3084_v42  ;;  %v2897_v35 = vpop.f32.mrf.mxu1  ;;  %v8756_v9 = vpop.f32.mrf.mxu3  ;;  %v10220_v12 = vld [vmem:[#allocation77_spill] sm:$0xff] }
 0x420   :  { %v3085_v43 = vadd.f32 %v2897_v35, %v10218_v48 }
 0x421   :  { %v5464_v20 = vadd.f32 %v5463_v30, %v5384_v17  ;;  %v3984_v32 = vadd.f32 %v8675_v36, %v3393_v7  ;;  %v4301_v6 = vpop.f32.mrf.mxu0  ;;  %v3537_v36 = vsel %vm3466_vm5, %v3532_v25, %v3536_v41  ;;  %v4088_v25 = vsel %vm4057_vm7, %v4085_v49, %v4087_v37  ;;  %v10221_v17 = vld [vmem:[#allocation67_spill] sm:$0xff] }
 0x422   :  { %v3539_v7 = vrot.slane %v10221_v17, 3 }
 0x423   :  { %v4488_v53 = vadd.f32 %v4299_v0, %v3984_v32  ;;  %v4751_v32 = vld [vmem:[%s9731_s3 + $0xf0] sm:$0xff] }
 0x424   :  { %6033 = vmatmul.msk.bf16.gmra.mxu3 %vm566_vm2, %v3537_v36  ;;  %4954 = vperm.xlu0 %6385, %v4751_v32   ;;  %v10222_v36 = vld [vmem:[#allocation22_spill] sm:$0xff] }
 0x425   :  { %v5217_v61 = vmul.f32 %v4855_v5, %v4488_v53 }
 0x426   :  { %v3206_v33 = vpop.f32.mrf.mxu2 }
 0x427   :  { %v5297_v13 = vadd.f32 %v5296_v24, %v5217_v61  ;;  %v5385_v62 = vmul.f32 %v5217_v61, %v4488_v53  ;;  %v3394_v1 = vadd.f32 %v3206_v33, %v3085_v43  ;;  %v2900_v15 = vpop.f32.mrf.mxu1  ;;  %v8774_v0 = vpop.f32.mrf.mxu3  ;;  %v3538_v24 = vrot.slane %v10220_v12, 2 }
 0x429   :  { %v5465_v58 = vadd.f32 %v5464_v20, %v5385_v62  ;;  %v3985_v30 = vadd.f32 %v8690_v39, %v3394_v1  ;;  %v4304_v40 = vpop.f32.mrf.mxu0  ;;  %v3086_v39 = vadd.f32 %v2900_v15, %v10219_v26  ;;  %v3540_v16 = vor.u32 %v3539_v7, %v3538_v24 }
 0x42a   :  { %5943 = vmatmul.msk.bf16.gmra.mxu1 %vm566_vm2, %v2684_v8 }
 0x42b   :  { %5989 = vmatmul.msk.bf16.gmra.mxu2 %vm566_vm2, %v2686_v55  ;;  %v4489_v63 = vadd.f32 %v4301_v6, %v3985_v30  ;;  %v4865_v6 = vpop.permute.xlu0 %4864 }
 0x42c   :  { %6073 = vmatmul.msk.bf16.gmra.mxu0 %vm566_vm2, %v4088_v25 }
 0x42d   :  { %v6170_v29 = vpack.c.bf16 %v4489_v63, %v4488_v53  ;;  %v5218_v44 = vmul.f32 %v4860_v31, %v4489_v63  ;;  %v8797_v53 = vld [vmem:[%s9729_s0 + $0x90] sm:$0xff]  ;;  %v4752_v31 = vld [vmem:[%s9731_s3 + $0xf8] sm:$0xff] }
 0x42e   :  { %v3209_v49 = vpop.f32.mrf.mxu2  ;;  %v2687_v38 = vrot.slane %v8797_v53, 2  ;;  %v4089_v61 = vrot.slane %v8797_v53, 3  ;;  %4959 = vperm.xlu1 %6386, %v4752_v31  }
 0x42f   :  { %6346 = vst [vmem:[%s9732_s4 + $0x28] sm:$0xff] %v6170_v29   ;;  %v5298_v42 = vadd.f32 %v5297_v13, %v5218_v44  ;;  %v5386_v54 = vmul.f32 %v5218_v44, %v4489_v63  ;;  %v3395_v56 = vadd.f32 %v3209_v49, %v3086_v39  ;;  %v2902_v8 = vpop.f32.mrf.mxu1  ;;  %v8789_v20 = vpop.f32.mrf.mxu3 }
 0x430   :  { %v3087_v48 = vadd.f32 %v2902_v8, %v10222_v36  ;;  %v4870_v63 = vpop.permute.xlu1 %4869  ;;  %v10225_v8 = vld [vmem:[#allocation78_spill] sm:$0xff] }
 0x431   :  { %v5466_v35 = vadd.f32 %v5465_v58, %v5386_v54  ;;  %v3986_v60 = vadd.f32 %v8708_v4, %v3395_v56  ;;  %v4306_v22 = vpop.f32.mrf.mxu0  ;;  %v3541_v4 = vsel %vm3466_vm5, %v3536_v41, %v3540_v16  ;;  %v2688_v58 = vsel %vm2653_vm6, %v2685_v23, %v2687_v38  ;;  %v10223_v23 = vld [vmem:[#allocation36_spill] sm:$0xff] }
 0x432   :  { %v4090_v41 = vsel %vm4057_vm7, %v4087_v37, %v4089_v61  ;;  %v10224_v54 = vld [vmem:[#allocation88_spill] sm:$0xff]  ;;  %v3543_v12 = vrot.slane %v10225_v8, 3 }
 0x433   :  { %v4490_v5 = vadd.f32 %v4304_v40, %v3986_v60  ;;  %v3542_v56 = vrot.slane %v10224_v54, 2  ;;  %v4750_v60 = vld [vmem:[%s9731_s3 + $0xe8] sm:$0xff] }
 0x434   :  { %6034 = vmatmul.msk.bf16.gmra.mxu3 %vm566_vm2, %v3541_v4  ;;  %4949 = vperm.xlu2 %6387, %v4750_v60   ;;  %v10226_v4 = vld [vmem:[#allocation39_spill] sm:$0xff] }
 0x435   :  { %v5219_v43 = vmul.f32 %v4865_v6, %v4490_v5  ;;  %v3544_v32 = vor.u32 %v3543_v12, %v3542_v56 }
 0x436   :  { %v3211_v33 = vpop.f32.mrf.mxu2 }
 0x437   :  { %v5299_v13 = vadd.f32 %v5298_v42, %v5219_v43  ;;  %v5387_v62 = vmul.f32 %v5219_v43, %v4490_v5  ;;  %v3396_v1 = vadd.f32 %v3211_v33, %v3087_v48  ;;  %v2905_v15 = vpop.f32.mrf.mxu1  ;;  %v8807_v47 = vpop.f32.mrf.mxu3 }
 0x439   :  { %v5467_v30 = vadd.f32 %v5466_v35, %v5387_v62  ;;  %v3987_v40 = vadd.f32 %v8723_v3, %v3396_v1  ;;  %v4309_v25 = vpop.f32.mrf.mxu0  ;;  %v3088_v3 = vadd.f32 %v2905_v15, %v10223_v23 }
 0x43a   :  { %5944 = vmatmul.msk.bf16.gmra.mxu1 %vm566_vm2, %v2686_v55 }
 0x43b   :  { %5990 = vmatmul.msk.bf16.gmra.mxu2 %vm566_vm2, %v2688_v58  ;;  %v4491_v26 = vadd.f32 %v4306_v22, %v3987_v40  ;;  %v4875_v22 = vpop.permute.xlu2 %4874 }
 0x43c   :  { %6074 = vmatmul.msk.bf16.gmra.mxu0 %vm566_vm2, %v4090_v41 }
 0x43d   :  { %v6175_v39 = vpack.c.bf16 %v4491_v26, %v4490_v5  ;;  %v5220_v29 = vmul.f32 %v4870_v63, %v4491_v26  ;;  %v8830_v5 = vld [vmem:[%s9729_s0 + $0x98] sm:$0xff]  ;;  %v4754_v63 = vld [vmem:[%s9731_s3 + $0x108] sm:$0xff] }
 0x43e   :  { %v3214_v37 = vpop.f32.mrf.mxu2  ;;  %v2689_v53 = vrot.slane %v8830_v5, 2  ;;  %v4091_v43 = vrot.slane %v8830_v5, 3  ;;  %4969 = vperm.xlu0 %6385, %v4754_v63  }
 0x43f   :  { %6347 = vst [vmem:[%s9732_s4 + $0x30] sm:$0xff] %v6175_v39   ;;  %v5300_v44 = vadd.f32 %v5299_v13, %v5220_v29  ;;  %v5388_v49 = vmul.f32 %v5220_v29, %v4491_v26  ;;  %v3397_v42 = vadd.f32 %v3214_v37, %v3088_v3  ;;  %v2907_v55 = vpop.f32.mrf.mxu1  ;;  %v8822_v35 = vpop.f32.mrf.mxu3 }
 0x440   :  { %v3089_v36 = vadd.f32 %v2907_v55, %v10226_v4  ;;  %v4880_v26 = vpop.permute.xlu0 %4879  ;;  %v10229_v55 = vld [vmem:[#allocation4_spill] sm:$0xff] }
 0x441   :  { %v5468_v24 = vadd.f32 %v5467_v30, %v5388_v49  ;;  %v3988_v17 = vadd.f32 %v8741_v27, %v3397_v42  ;;  %v4311_v7 = vpop.f32.mrf.mxu0  ;;  %v3545_v27 = vsel %vm3466_vm5, %v3540_v16, %v3544_v32  ;;  %v2690_v30 = vsel %vm2653_vm6, %v2687_v38, %v2689_v53  ;;  %v10227_v38 = vld [vmem:[#allocation31_spill] sm:$0xff]  ;;  %v10228_v49 = vld [vmem:[#allocation5_spill] sm:$0xff] }
 0x442   :  { %v4092_v16 = vsel %vm4057_vm7, %v4089_v61, %v4091_v43  ;;  %v3546_v42 = vrot.slane %v10228_v49, 2  ;;  %v3547_v54 = vrot.slane %v10229_v55, 3 }
 0x443   :  { %v4492_v6 = vadd.f32 %v4309_v25, %v3988_v17  ;;  %v4755_v17 = vld [vmem:[%s9731_s3 + $0x110] sm:$0xff] }
 0x444   :  { %6035 = vmatmul.msk.bf16.gmra.mxu3 %vm566_vm2, %v3545_v27  ;;  %4974 = vperm.xlu1 %6386, %v4755_v17   ;;  %v3548_v60 = vor.u32 %v3547_v54, %v3546_v42  ;;  %v10230_v27 = vld [vmem:[#allocation45_spill] sm:$0xff] }
 0x445   :  { %v5221_v48 = vmul.f32 %v4875_v22, %v4492_v6 }
 0x446   :  { %v3216_v33 = vpop.f32.mrf.mxu2 }
 0x447   :  { %v5301_v13 = vadd.f32 %v5300_v44, %v5221_v48  ;;  %v5389_v62 = vmul.f32 %v5221_v48, %v4492_v6  ;;  %v3398_v1 = vadd.f32 %v3216_v33, %v3089_v36  ;;  %v2910_v15 = vpop.f32.mrf.mxu1  ;;  %v8840_v31 = vpop.f32.mrf.mxu3 }
 0x449   :  { %v5469_v40 = vadd.f32 %v5468_v24, %v5389_v62  ;;  %v3989_v25 = vadd.f32 %v8756_v9, %v3398_v1  ;;  %v4314_v41 = vpop.f32.mrf.mxu0  ;;  %v3090_v9 = vadd.f32 %v2910_v15, %v10227_v38 }
 0x44a   :  { %5945 = vmatmul.msk.bf16.gmra.mxu1 %vm566_vm2, %v2688_v58 }
 0x44b   :  { %5991 = vmatmul.msk.bf16.gmra.mxu2 %vm566_vm2, %v2690_v30  ;;  %v4493_v23 = vadd.f32 %v4311_v7, %v3989_v25  ;;  %v4885_v7 = vpop.permute.xlu1 %4884 }
 0x44c   :  { %6075 = vmatmul.msk.bf16.gmra.mxu0 %vm566_vm2, %v4092_v16 }
 0x44d   :  { %v6180_v3 = vpack.c.bf16 %v4493_v23, %v4492_v6  ;;  %v5222_v39 = vmul.f32 %v4880_v26, %v4493_v23  ;;  %v8863_v6 = vld [vmem:[%s9729_s0 + $0xa0] sm:$0xff] }
 0x44e   :  { %v3219_v61 = vpop.f32.mrf.mxu2  ;;  %v2691_v5 = vrot.slane %v8863_v6, 2  ;;  %v4093_v48 = vrot.slane %v8863_v6, 3  ;;  %v4753_v26 = vld [vmem:[%s9731_s3 + $0x100] sm:$0xff] }
 0x44f   :  { %6348 = vst [vmem:[%s9732_s4 + $0x38] sm:$0xff] %v6180_v3   ;;  %v5302_v29 = vadd.f32 %v5301_v13, %v5222_v39  ;;  %v5390_v37 = vmul.f32 %v5222_v39, %v4493_v23  ;;  %v3399_v44 = vadd.f32 %v3219_v61, %v3090_v9  ;;  %v2912_v58 = vpop.f32.mrf.mxu1  ;;  %v8855_v24 = vpop.f32.mrf.mxu3  ;;  %4964 = vperm.xlu2 %6387, %v4753_v26  }
 0x450   :  { %v3091_v4 = vadd.f32 %v2912_v58, %v10230_v27  ;;  %v4890_v23 = vpop.permute.xlu2 %4889  ;;  %v10233_v58 = vld [vmem:[#allocation6_spill] sm:$0xff] }
 0x451   :  { %v5470_v56 = vadd.f32 %v5469_v40, %v5390_v37  ;;  %v3990_v8 = vadd.f32 %v8774_v0, %v3399_v44  ;;  %v4316_v12 = vpop.f32.mrf.mxu0  ;;  %v3549_v0 = vsel %vm3466_vm5, %v3544_v32, %v3548_v60  ;;  %v2692_v40 = vsel %vm2653_vm6, %v2689_v53, %v2691_v5  ;;  %v10231_v53 = vld [vmem:[#allocation48_spill] sm:$0xff]  ;;  %v10232_v37 = vld [vmem:[#allocation9_spill] sm:$0xff] }
 0x452   :  { %v4094_v32 = vsel %vm4057_vm7, %v4091_v43, %v4093_v48  ;;  %v3550_v44 = vrot.slane %v10232_v37, 2  ;;  %v3551_v49 = vrot.slane %v10233_v58, 3 }
 0x453   :  { %v4494_v22 = vadd.f32 %v4314_v41, %v3990_v8  ;;  %v4757_v8 = vld [vmem:[%s9731_s3 + $0x120] sm:$0xff] }
 0x454   :  { %6036 = vmatmul.msk.bf16.gmra.mxu3 %vm566_vm2, %v3549_v0  ;;  %4984 = vperm.xlu0 %6385, %v4757_v8   ;;  %v3552_v17 = vor.u32 %v3551_v49, %v3550_v44  ;;  %v10234_v0 = vld [vmem:[#allocation40_spill] sm:$0xff] }
 0x455   :  { %v5223_v36 = vmul.f32 %v4885_v7, %v4494_v22 }
 0x456   :  { %v3221_v33 = vpop.f32.mrf.mxu2 }
 0x457   :  { %v5303_v13 = vadd.f32 %v5302_v29, %v5223_v36  ;;  %v5391_v62 = vmul.f32 %v5223_v36, %v4494_v22  ;;  %v3400_v1 = vadd.f32 %v3221_v33, %v3091_v4  ;;  %v2915_v15 = vpop.f32.mrf.mxu1  ;;  %v8873_v63 = vpop.f32.mrf.mxu3 }
 0x459   :  { %v5471_v25 = vadd.f32 %v5470_v56, %v5391_v62  ;;  %v3991_v41 = vadd.f32 %v8789_v20, %v3400_v1  ;;  %v4319_v16 = vpop.f32.mrf.mxu0  ;;  %v3092_v20 = vadd.f32 %v2915_v15, %v10231_v53 }
 0x45a   :  { %5946 = vmatmul.msk.bf16.gmra.mxu1 %vm566_vm2, %v2690_v30 }
 0x45b   :  { %5992 = vmatmul.msk.bf16.gmra.mxu2 %vm566_vm2, %v2692_v40  ;;  %v4495_v38 = vadd.f32 %v4316_v12, %v3991_v41  ;;  %v4895_v12 = vpop.permute.xlu0 %4894 }
 0x45c   :  { %6076 = vmatmul.msk.bf16.gmra.mxu0 %vm566_vm2, %v4094_v32 }
 0x45d   :  { %v6185_v9 = vpack.c.bf16 %v4495_v38, %v4494_v22  ;;  %v5224_v3 = vmul.f32 %v4890_v23, %v4495_v38  ;;  %v8896_v22 = vld [vmem:[%s9729_s0 + $0xa8] sm:$0xff] }
 0x45e   :  { %v3224_v43 = vpop.f32.mrf.mxu2  ;;  %v2693_v6 = vrot.slane %v8896_v22, 2  ;;  %v4095_v36 = vrot.slane %v8896_v22, 3  ;;  %v4758_v23 = vld [vmem:[%s9731_s3 + $0x128] sm:$0xff] }
 0x45f   :  { %6349 = vst [vmem:[%s9732_s4 + $0x40] sm:$0xff] %v6185_v9   ;;  %v5304_v39 = vadd.f32 %v5303_v13, %v5224_v3  ;;  %v5392_v61 = vmul.f32 %v5224_v3, %v4495_v38  ;;  %v3401_v29 = vadd.f32 %v3224_v43, %v3092_v20  ;;  %v2917_v30 = vpop.f32.mrf.mxu1  ;;  %v8888_v56 = vpop.f32.mrf.mxu3  ;;  %4989 = vperm.xlu1 %6386, %v4758_v23  }
 0x460   :  { %v3093_v27 = vadd.f32 %v2917_v30, %v10234_v0  ;;  %v4900_v38 = vpop.permute.xlu1 %4899  ;;  %v10237_v30 = vld [vmem:[#allocation10_spill] sm:$0xff] }
 0x461   :  { %v5472_v42 = vadd.f32 %v5471_v25, %v5392_v61  ;;  %v3992_v55 = vadd.f32 %v8807_v47, %v3401_v29  ;;  %v4321_v54 = vpop.f32.mrf.mxu0  ;;  %v3553_v47 = vsel %vm3466_vm5, %v3548_v60, %v3552_v17  ;;  %v2694_v25 = vsel %vm2653_vm6, %v2691_v5, %v2693_v6  ;;  %v10235_v5 = vld [vmem:[#allocation54_spill] sm:$0xff]  ;;  %v10236_v61 = vld [vmem:[#allocation16_spill] sm:$0xff] }
 0x462   :  { %v4096_v60 = vsel %vm4057_vm7, %v4093_v48, %v4095_v36  ;;  %v3554_v29 = vrot.slane %v10236_v61, 2  ;;  %v3555_v37 = vrot.slane %v10237_v30, 3 }
 0x463   :  { %v4496_v7 = vadd.f32 %v4319_v16, %v3992_v55  ;;  %v4756_v55 = vld [vmem:[%s9731_s3 + $0x118] sm:$0xff] }
 0x464   :  { %6037 = vmatmul.msk.bf16.gmra.mxu3 %vm566_vm2, %v3553_v47  ;;  %4979 = vperm.xlu2 %6387, %v4756_v55   ;;  %v3556_v8 = vor.u32 %v3555_v37, %v3554_v29  ;;  %v10238_v47 = vld [vmem:[#allocation57_spill] sm:$0xff]  ;;  %v4761_v37 = vld [vmem:[%s9731_s3 + $0x140] sm:$0xff] }
 0x465   :  { %v5225_v4 = vmul.f32 %v4895_v12, %v4496_v7  ;;  %v10240_v55 = vld [vmem:[#allocation65_spill] sm:$0xff] }
 0x466   :  { %v3226_v33 = vpop.f32.mrf.mxu2 }
 0x467   :  { %v5305_v13 = vadd.f32 %v5304_v39, %v5225_v4  ;;  %v5393_v62 = vmul.f32 %v5225_v4, %v4496_v7  ;;  %v3402_v1 = vadd.f32 %v3226_v33, %v3093_v27  ;;  %v2920_v15 = vpop.f32.mrf.mxu1  ;;  %v8906_v26 = vpop.f32.mrf.mxu3  ;;  %5004 = vperm.xlu1 %6386, %v4761_v37   ;;  %v9000_v37 = vld [vmem:[%s9729_s0 + $0xc0] sm:$0xff] }
 0x469   :  { %v5473_v41 = vadd.f32 %v5472_v42, %v5393_v62  ;;  %v3993_v16 = vadd.f32 %v8822_v35, %v3402_v1  ;;  %v4324_v32 = vpop.f32.mrf.mxu0  ;;  %v3094_v35 = vadd.f32 %v2920_v15, %v10235_v5 }
 0x46a   :  { %5947 = vmatmul.msk.bf16.gmra.mxu1 %vm566_vm2, %v2692_v40 }
 0x46b   :  { %5993 = vmatmul.msk.bf16.gmra.mxu2 %vm566_vm2, %v2694_v25  ;;  %v4497_v53 = vadd.f32 %v4321_v54, %v3993_v16  ;;  %v4905_v54 = vpop.permute.xlu2 %4904 }
 0x46c   :  { %6077 = vmatmul.msk.bf16.gmra.mxu0 %vm566_vm2, %v4096_v60 }
 0x46d   :  { %v6190_v20 = vpack.c.bf16 %v4497_v53, %v4496_v7  ;;  %v5226_v9 = vmul.f32 %v4900_v38, %v4497_v53  ;;  %v8929_v7 = vld [vmem:[%s9729_s0 + $0xb0] sm:$0xff]  ;;  %v4760_v38 = vld [vmem:[%s9731_s3 + $0x138] sm:$0xff] }
 0x46e   :  { %v3229_v48 = vpop.f32.mrf.mxu2  ;;  %v2695_v22 = vrot.slane %v8929_v7, 2  ;;  %v4097_v4 = vrot.slane %v8929_v7, 3  ;;  %4999 = vperm.xlu0 %6385, %v4760_v38  }
 0x46f   :  { %6350 = vst [vmem:[%s9732_s4 + $0x48] sm:$0xff] %v6190_v20   ;;  %v5306_v3 = vadd.f32 %v5305_v13, %v5226_v9  ;;  %v5394_v43 = vmul.f32 %v5226_v9, %v4497_v53  ;;  %v3403_v39 = vadd.f32 %v3229_v48, %v3094_v35  ;;  %v2922_v40 = vpop.f32.mrf.mxu1  ;;  %v8921_v42 = vpop.f32.mrf.mxu3 }
 0x470   :  { %v3095_v0 = vadd.f32 %v2922_v40, %v10238_v47  ;;  %v4910_v53 = vpop.permute.xlu0 %4909 }
 0x471   :  { %v5474_v44 = vadd.f32 %v5473_v41, %v5394_v43  ;;  %v3994_v58 = vadd.f32 %v8840_v31, %v3403_v39  ;;  %v4326_v49 = vpop.f32.mrf.mxu0  ;;  %v3557_v31 = vsel %vm3466_vm5, %v3552_v17, %v3556_v8  ;;  %v2696_v41 = vsel %vm2653_vm6, %v2693_v6, %v2695_v22  ;;  %v10239_v6 = vld [vmem:[#allocation49_spill] sm:$0xff] }
 0x472   :  { %v4098_v17 = vsel %vm4057_vm7, %v4095_v36, %v4097_v4  ;;  %v3558_v43 = vrot.slane %v10071_v59, 2  ;;  %v3559_v39 = vrot.slane %v10072_v45, 3  ;;  %v8962_v59 = vld [vmem:[%s9729_s0 + $0xb8] sm:$0xff] }
 0x473   :  { %v4498_v12 = vadd.f32 %v4324_v32, %v3994_v58  ;;  %v2697_v45 = vrot.slane %v8962_v59, 2  ;;  %v4099_v7 = vrot.slane %v8962_v59, 3  ;;  %v4769_v59 = vld [vmem:[%s9731_s3 + $0x180] sm:$0xff] }
 0x474   :  { %6038 = vmatmul.msk.bf16.gmra.mxu3 %vm566_vm2, %v3557_v31  ;;  %v3560_v58 = vor.u32 %v3559_v39, %v3558_v43 }
 0x475   :  { %v5227_v27 = vmul.f32 %v4905_v54, %v4498_v12 }
 0x476   :  { %v3231_v33 = vpop.f32.mrf.mxu2 }
 0x477   :  { %v5307_v13 = vadd.f32 %v5306_v3, %v5227_v27  ;;  %v5395_v62 = vmul.f32 %v5227_v27, %v4498_v12  ;;  %v3404_v1 = vadd.f32 %v3231_v33, %v3095_v0  ;;  %v2925_v15 = vpop.f32.mrf.mxu1  ;;  %v8939_v23 = vpop.f32.mrf.mxu3 }
 0x479   :  { %v5475_v16 = vadd.f32 %v5474_v44, %v5395_v62  ;;  %v3995_v32 = vadd.f32 %v8855_v24, %v3404_v1  ;;  %v4329_v60 = vpop.f32.mrf.mxu0  ;;  %v3096_v24 = vadd.f32 %v2925_v15, %v10239_v6  ;;  %v4915_v44 = vpop.permute.xlu1 %4914 }
 0x47a   :  { %5948 = vmatmul.msk.bf16.gmra.mxu1 %vm566_vm2, %v2694_v25 }
 0x47b   :  { %5994 = vmatmul.msk.bf16.gmra.mxu2 %vm566_vm2, %v2696_v41  ;;  %v4499_v5 = vadd.f32 %v4326_v49, %v3995_v32  ;;  %v4759_v32 = vld [vmem:[%s9731_s3 + $0x130] sm:$0xff] }
 0x47c   :  { %6078 = vmatmul.msk.bf16.gmra.mxu0 %vm566_vm2, %v4098_v17  ;;  %4994 = vperm.xlu2 %6387, %v4759_v32  }
 0x47d   :  { %v6195_v35 = vpack.c.bf16 %v4499_v5, %v4498_v12  ;;  %v5228_v20 = vmul.f32 %v4910_v53, %v4499_v5 }
 0x47e   :  { %v3234_v36 = vpop.f32.mrf.mxu2 }
 0x47f   :  { %6351 = vst [vmem:[%s9732_s4 + $0x50] sm:$0xff] %v6195_v35   ;;  %v5308_v9 = vadd.f32 %v5307_v13, %v5228_v20  ;;  %v5396_v48 = vmul.f32 %v5228_v20, %v4499_v5  ;;  %v3405_v3 = vadd.f32 %v3234_v36, %v3096_v24  ;;  %v2927_v25 = vpop.f32.mrf.mxu1  ;;  %v8954_v30 = vpop.f32.mrf.mxu3  ;;  %v2698_v13 = vsel %vm2653_vm6, %v2695_v22, %v2697_v45  ;;  %v4764_v20 = vld [vmem:[%s9731_s3 + $0x158] sm:$0xff] }
 0x480   :  { %v3097_v54 = vadd.f32 %v2927_v25, %v10240_v55  ;;  %5019 = vperm.xlu1 %6386, %v4764_v20   ;;  %v3562_v36 = vrot.slane %v10075_v18, 2 }
 0x481   :  { %v5476_v40 = vadd.f32 %v5475_v16, %v5396_v48  ;;  %v3996_v61 = vadd.f32 %v8873_v63, %v3405_v3  ;;  %v4331_v29 = vpop.f32.mrf.mxu0  ;;  %v3561_v63 = vsel %vm3466_vm5, %v3556_v8, %v3560_v58  ;;  %v4100_v8 = vsel %vm4057_vm7, %v4097_v4, %v4099_v7  ;;  %v4763_v4 = vld [vmem:[%s9731_s3 + $0x150] sm:$0xff] }
 0x482   :  { %5014 = vperm.xlu0 %6385, %v4763_v4  }
 0x483   :  { %v4500_v49 = vadd.f32 %v4329_v60, %v3996_v61  ;;  %v4920_v60 = vpop.permute.xlu2 %4919 }
 0x484   :  { %6039 = vmatmul.msk.bf16.gmra.mxu3 %vm566_vm2, %v3561_v63 }
 0x485   :  { %v5229_v12 = vmul.f32 %v4915_v44, %v4500_v49  ;;  %v2699_v44 = vrot.slane %v9000_v37, 2 }
 0x486   :  { %v3236_v31 = vpop.f32.mrf.mxu2 }
 0x487   :  { %v5309_v47 = vadd.f32 %v5308_v9, %v5229_v12  ;;  %v5397_v0 = vmul.f32 %v5229_v12, %v4500_v49  ;;  %v3406_v27 = vadd.f32 %v3236_v31, %v3097_v54  ;;  %v2930_v33 = vpop.f32.mrf.mxu1  ;;  %v8974_v16 = vpop.f32.mrf.mxu3  ;;  %v10242_v9 = vld [vmem:[#allocation24_spill] sm:$0xff]  ;;  %v4766_v54 = vld [vmem:[%s9731_s3 + $0x168] sm:$0xff] }
 0x488   :  { %v3563_v48 = vrot.slane %v10242_v9, 3 }
 0x489   :  { %v5477_v62 = vadd.f32 %v5476_v40, %v5397_v0  ;;  %v3997_v1 = vadd.f32 %v8888_v56, %v3406_v27  ;;  %v4334_v15 = vpop.f32.mrf.mxu0  ;;  %v10241_v56 = vld [vmem:[#allocation66_spill] sm:$0xff]  ;;  %v4925_v40 = vpop.permute.xlu0 %4924 }
 0x48a   :  { %5949 = vmatmul.msk.bf16.gmra.mxu1 %vm566_vm2, %v2696_v41  ;;  %v3098_v17 = vadd.f32 %v2930_v33, %v10241_v56  ;;  %v3564_v61 = vor.u32 %v3563_v48, %v3562_v36  ;;  %5029 = vperm.xlu0 %6385, %v4766_v54   ;;  %v2700_v33 = vsel %vm2653_vm6, %v2697_v45, %v2699_v44  ;;  %v10244_v45 = vld [vmem:[#allocation74_spill] sm:$0xff] }
 0x48b   :  { %5995 = vmatmul.msk.bf16.gmra.mxu2 %vm566_vm2, %v2698_v13  ;;  %v4501_v22 = vadd.f32 %v4331_v29, %v3997_v1 }
 0x48c   :  { %6079 = vmatmul.msk.bf16.gmra.mxu0 %vm566_vm2, %v4100_v8  ;;  %v3565_v18 = vsel %vm3466_vm5, %v3560_v58, %v3564_v61  ;;  %v4767_v58 = vld [vmem:[%s9731_s3 + $0x170] sm:$0xff] }
 0x48d   :  { %v6200_v38 = vpack.c.bf16 %v4501_v22, %v4500_v49  ;;  %v5230_v53 = vmul.f32 %v4920_v60, %v4501_v22  ;;  %v10243_v49 = vld [vmem:[#allocation58_spill] sm:$0xff]  ;;  %5034 = vperm.xlu1 %6386, %v4767_v58   ;;  %v4930_v60 = vpop.permute.xlu1 %4929 }
 0x48e   :  { %v3239_v5 = vpop.f32.mrf.mxu2 }
 0x48f   :  { %6352 = vst [vmem:[%s9732_s4 + $0x58] sm:$0xff] %v6200_v38   ;;  %v5310_v41 = vadd.f32 %v5309_v47, %v5230_v53  ;;  %v5398_v6 = vmul.f32 %v5230_v53, %v4501_v22  ;;  %v3407_v24 = vadd.f32 %v3239_v5, %v3098_v17  ;;  %v2932_v35 = vpop.f32.mrf.mxu1  ;;  %v8995_v39 = vpop.f32.mrf.mxu3  ;;  %v4770_v5 = vld [vmem:[%s9731_s3 + $0x188] sm:$0xff] }
 0x490   :  { %v3099_v63 = vadd.f32 %v2932_v35, %v10243_v49  ;;  %v10247_v49 = vld [vmem:[#allocation73_spill] sm:$0xff] }
 0x491   :  { %v5478_v3 = vadd.f32 %v5477_v62, %v5398_v6  ;;  %v3998_v25 = vadd.f32 %v8906_v26, %v3407_v24  ;;  %v4336_v43 = vpop.f32.mrf.mxu0  ;;  %v4101_v26 = vrot.slane %v9000_v37, 3  ;;  %v10246_v24 = vld [vmem:[#allocation33_spill] sm:$0xff] }
 0x492   :  { %5044 = vperm.xlu0 %6385, %v4769_v59   ;;  %v3567_v35 = vrot.slane %v10246_v24, 3 }
 0x493   :  { %v4502_v29 = vadd.f32 %v4334_v15, %v3998_v25  ;;  %v4102_v8 = vsel %vm4057_vm7, %v4099_v7, %v4101_v26  ;;  %v4935_v25 = vpop.permute.xlu2 %4934 }
 0x494   :  { %6040 = vmatmul.msk.bf16.gmra.mxu3 %vm566_vm2, %v3565_v18 }
 0x495   :  { %v5231_v55 = vmul.f32 %v4925_v40, %v4502_v29  ;;  %5049 = vperm.xlu1 %6386, %v4770_v5  }
 0x496   :  { %v3241_v12 = vpop.f32.mrf.mxu2 }
 0x497   :  { %v5311_v31 = vadd.f32 %v5310_v41, %v5231_v55  ;;  %v5399_v47 = vmul.f32 %v5231_v55, %v4502_v29  ;;  %v3408_v0 = vadd.f32 %v3241_v12, %v3099_v63  ;;  %v2935_v27 = vpop.f32.mrf.mxu1  ;;  %v9022_v32 = vpop.f32.mrf.mxu3  ;;  %v10245_v41 = vld [vmem:[#allocation41_spill] sm:$0xff] }
 0x498   :  { %v3100_v56 = vadd.f32 %v2935_v27, %v10244_v45  ;;  %v3566_v6 = vrot.slane %v10245_v41, 2  ;;  %v4772_v12 = vld [vmem:[%s9731_s3 + $0x198] sm:$0xff]  ;;  %v4765_v45 = vld [vmem:[%s9731_s3 + $0x160] sm:$0xff] }
 0x499   :  { %v5479_v62 = vadd.f32 %v5478_v3, %v5399_v47  ;;  %v3999_v1 = vadd.f32 %v8921_v42, %v3408_v0  ;;  %v4339_v15 = vpop.f32.mrf.mxu0  ;;  %v4762_v3 = vld [vmem:[%s9731_s3 + $0x148] sm:$0xff]  ;;  %v10250_v41 = vld [vmem:[#allocation42_spill] sm:$0xff] }
 0x49a   :  { %5950 = vmatmul.msk.bf16.gmra.mxu1 %vm566_vm2, %v2698_v13  ;;  %5009 = vperm.xlu2 %6387, %v4762_v3   ;;  %v4945_v3 = vpop.permute.xlu1 %4944 }
 0x49b   :  { %5996 = vmatmul.msk.bf16.gmra.mxu2 %vm566_vm2, %v2700_v33  ;;  %v4503_v22 = vadd.f32 %v4336_v43, %v3999_v1  ;;  %v3568_v43 = vor.u32 %v3567_v35, %v3566_v6  ;;  %5059 = vperm.xlu0 %6385, %v4772_v12   ;;  %v3571_v6 = vrot.slane %v10250_v41, 3 }
 0x49c   :  { %6080 = vmatmul.msk.bf16.gmra.mxu0 %vm566_vm2, %v4102_v8 }
 0x49d   :  { %v6205_v42 = vpack.c.bf16 %v4503_v22, %v4502_v29  ;;  %v5232_v17 = vmul.f32 %v4930_v60, %v4503_v22  ;;  %v9048_v29 = vld [vmem:[%s9729_s0 + $0xc8] sm:$0xff] }
 0x49e   :  { %v3244_v38 = vpop.f32.mrf.mxu2  ;;  %v2701_v18 = vrot.slane %v9048_v29, 2  ;;  %v4103_v54 = vrot.slane %v9048_v29, 3 }
 0x49f   :  { %6353 = vst [vmem:[%s9732_s4 + $0x60] sm:$0xff] %v6205_v42   ;;  %v5312_v7 = vadd.f32 %v5311_v31, %v5232_v17  ;;  %v5400_v13 = vmul.f32 %v5232_v17, %v4503_v22  ;;  %v3409_v53 = vadd.f32 %v3244_v38, %v3100_v56  ;;  %v2937_v4 = vpop.f32.mrf.mxu1  ;;  %v9040_v48 = vpop.f32.mrf.mxu3  ;;  %v10248_v56 = vld [vmem:[#allocation76_spill] sm:$0xff] }
 0x4a0   :  { %v3101_v63 = vadd.f32 %v2937_v4, %v10247_v49  ;;  %v4104_v60 = vsel %vm4057_vm7, %v4101_v26, %v4103_v54  ;;  %v4775_v26 = vld [vmem:[%s9731_s3 + $0x1b0] sm:$0xff]  ;;  %v10249_v4 = vld [vmem:[#allocation50_spill] sm:$0xff] }
 0x4a1   :  { %v5480_v20 = vadd.f32 %v5479_v62, %v5400_v13  ;;  %v4000_v36 = vadd.f32 %v8939_v23, %v3409_v53  ;;  %v4341_v9 = vpop.f32.mrf.mxu0  ;;  %v3569_v23 = vsel %vm3466_vm5, %v3564_v61, %v3568_v43  ;;  %v4773_v61 = vld [vmem:[%s9731_s3 + $0x1a0] sm:$0xff]  ;;  %v2702_v62 = vsel %vm2653_vm6, %v2699_v44, %v2701_v18  ;;  %v4940_v44 = vpop.permute.xlu0 %4939  ;;  %v4776_v53 = vld [vmem:[%s9731_s3 + $0x1b8] sm:$0xff] }
 0x4a2   :  { %5064 = vperm.xlu1 %6386, %v4773_v61   ;;  %5024 = vperm.xlu2 %6387, %v4765_v45   ;;  %v3570_v5 = vrot.slane %v10249_v4, 2  ;;  %v10254_v4 = vld [vmem:[#allocation51_spill] sm:$0xff] }
 0x4a3   :  { %v4504_v40 = vadd.f32 %v4339_v15, %v4000_v36  ;;  %5074 = vperm.xlu0 %6385, %v4775_v26  }
 0x4a4   :  { %6041 = vmatmul.msk.bf16.gmra.mxu3 %vm566_vm2, %v3569_v23  ;;  %v9101_v23 = vld [vmem:[%s9729_s0 + $0xd0] sm:$0xff] }
 0x4a5   :  { %v5233_v55 = vmul.f32 %v4935_v25, %v4504_v40  ;;  %v3572_v25 = vor.u32 %v3571_v6, %v3570_v5  ;;  %v2703_v49 = vrot.slane %v9101_v23, 2  ;;  %v3575_v5 = vrot.slane %v10254_v4, 3 }
 0x4a6   :  { %v3246_v31 = vpop.f32.mrf.mxu2 }
 0x4a7   :  { %v5313_v47 = vadd.f32 %v5312_v7, %v5233_v55  ;;  %v5401_v0 = vmul.f32 %v5233_v55, %v4504_v40  ;;  %v3410_v27 = vadd.f32 %v3246_v31, %v3101_v63  ;;  %v2940_v58 = vpop.f32.mrf.mxu1  ;;  %v9072_v22 = vpop.f32.mrf.mxu3  ;;  %v10251_v63 = vld [vmem:[#allocation84_spill] sm:$0xff]  ;;  %v4105_v31 = vrot.slane %v9101_v23, 3 }
 0x4a8   :  { %v3102_v42 = vadd.f32 %v2940_v58, %v10248_v56  ;;  %v4771_v56 = vld [vmem:[%s9731_s3 + $0x190] sm:$0xff] }
 0x4a9   :  { %v5481_v1 = vadd.f32 %v5480_v20, %v5401_v0  ;;  %v4001_v15 = vadd.f32 %v8954_v30, %v3410_v27  ;;  %v4344_v8 = vpop.f32.mrf.mxu0 }
 0x4aa   :  { %5951 = vmatmul.msk.bf16.gmra.mxu1 %vm566_vm2, %v2700_v33  ;;  %5079 = vperm.xlu1 %6386, %v4776_v53  }
 0x4ab   :  { %5997 = vmatmul.msk.bf16.gmra.mxu2 %vm566_vm2, %v2702_v62  ;;  %v4505_v30 = vadd.f32 %v4341_v9, %v4001_v15  ;;  %v4768_v9 = vld [vmem:[%s9731_s3 + $0x178] sm:$0xff]  ;;  %v2704_v15 = vsel %vm2653_vm6, %v2701_v18, %v2703_v49  ;;  %v4950_v18 = vpop.permute.xlu2 %4949 }
 0x4ac   :  { %6081 = vmatmul.msk.bf16.gmra.mxu0 %vm566_vm2, %v4104_v60  ;;  %5039 = vperm.xlu2 %6387, %v4768_v9   ;;  %v4955_v9 = vpop.permute.xlu0 %4954 }
 0x4ad   :  { %v6210_v37 = vpack.c.bf16 %v4505_v30, %v4504_v40  ;;  %v5234_v17 = vmul.f32 %v4940_v44, %v4505_v30  ;;  %v4106_v44 = vsel %vm4057_vm7, %v4103_v54, %v4105_v31  ;;  %v4781_v54 = vld [vmem:[%s9731_s3 + $0x1e0] sm:$0xff] }
 0x4ae   :  { %v3249_v59 = vpop.f32.mrf.mxu2 }
 0x4af   :  { %6354 = vst [vmem:[%s9732_s4 + $0x68] sm:$0xff] %v6210_v37   ;;  %v5314_v33 = vadd.f32 %v5313_v47, %v5234_v17  ;;  %v5402_v38 = vmul.f32 %v5234_v17, %v4505_v30  ;;  %v3411_v7 = vadd.f32 %v3249_v59, %v3102_v42  ;;  %v2942_v13 = vpop.f32.mrf.mxu1  ;;  %v9093_v36 = vpop.f32.mrf.mxu3  ;;  %v4778_v47 = vld [vmem:[%s9731_s3 + $0x1c8] sm:$0xff] }
 0x4b0   :  { %v3103_v55 = vadd.f32 %v2942_v13, %v10251_v63  ;;  %5089 = vperm.xlu0 %6385, %v4778_v47   ;;  %v10252_v42 = vld [vmem:[#allocation87_spill] sm:$0xff] }
 0x4b1   :  { %v5482_v24 = vadd.f32 %v5481_v1, %v5402_v38  ;;  %v4002_v35 = vadd.f32 %v8974_v16, %v3411_v7  ;;  %v4346_v20 = vpop.f32.mrf.mxu0  ;;  %v3573_v16 = vsel %vm3466_vm5, %v3568_v43, %v3572_v25  ;;  %v4779_v43 = vld [vmem:[%s9731_s3 + $0x1d0] sm:$0xff]  ;;  %v4782_v7 = vld [vmem:[%s9731_s3 + $0x1e8] sm:$0xff] }
 0x4b2   :  { %5094 = vperm.xlu1 %6386, %v4779_v43   ;;  %v10253_v13 = vld [vmem:[#allocation59_spill] sm:$0xff] }
 0x4b3   :  { %v4506_v40 = vadd.f32 %v4344_v8, %v4002_v35  ;;  %v3574_v53 = vrot.slane %v10253_v13, 2  ;;  %v10258_v13 = vld [vmem:[#allocation60_spill] sm:$0xff] }
 0x4b4   :  { %6042 = vmatmul.msk.bf16.gmra.mxu3 %vm566_vm2, %v3573_v16  ;;  %5054 = vperm.xlu2 %6387, %v4771_v56   ;;  %v9154_v16 = vld [vmem:[%s9729_s0 + $0xd8] sm:$0xff] }
 0x4b5   :  { %v5235_v12 = vmul.f32 %v4945_v3, %v4506_v40  ;;  %v3576_v3 = vor.u32 %v3575_v5, %v3574_v53  ;;  %v2705_v63 = vrot.slane %v9154_v16, 2  ;;  %v3579_v53 = vrot.slane %v10258_v13, 3 }
 0x4b6   :  { %v3251_v0 = vpop.f32.mrf.mxu2 }
 0x4b7   :  { %v5315_v27 = vadd.f32 %v5314_v33, %v5235_v12  ;;  %v5403_v58 = vmul.f32 %v5235_v12, %v4506_v40  ;;  %v3412_v61 = vadd.f32 %v3251_v0, %v3103_v55  ;;  %v2945_v1 = vpop.f32.mrf.mxu1  ;;  %v9125_v30 = vpop.f32.mrf.mxu3  ;;  %v10255_v55 = vld [vmem:[#allocation93_spill] sm:$0xff]  ;;  %v4107_v0 = vrot.slane %v9154_v16, 3 }
 0x4b8   :  { %v3104_v37 = vadd.f32 %v2945_v1, %v10252_v42  ;;  %5104 = vperm.xlu0 %6385, %v4781_v54   ;;  %v4777_v42 = vld [vmem:[%s9731_s3 + $0x1c0] sm:$0xff] }
 0x4b9   :  { %v5483_v8 = vadd.f32 %v5482_v24, %v5403_v58  ;;  %v4003_v60 = vadd.f32 %v8995_v39, %v3412_v61  ;;  %v4349_v45 = vpop.f32.mrf.mxu0 }
 0x4ba   :  { %5952 = vmatmul.msk.bf16.gmra.mxu1 %vm566_vm2, %v2702_v62  ;;  %5109 = vperm.xlu1 %6386, %v4782_v7  }
 0x4bb   :  { %5998 = vmatmul.msk.bf16.gmra.mxu2 %vm566_vm2, %v2704_v15  ;;  %v4507_v39 = vadd.f32 %v4346_v20, %v4003_v60  ;;  %v4774_v20 = vld [vmem:[%s9731_s3 + $0x1a8] sm:$0xff]  ;;  %v2706_v60 = vsel %vm2653_vm6, %v2703_v49, %v2705_v63  ;;  %v4960_v49 = vpop.permute.xlu1 %4959 }
 0x4bc   :  { %6082 = vmatmul.msk.bf16.gmra.mxu0 %vm566_vm2, %v4106_v44  ;;  %5069 = vperm.xlu2 %6387, %v4774_v20   ;;  %v4965_v20 = vpop.permute.xlu2 %4964 }
 0x4bd   :  { %v6215_v29 = vpack.c.bf16 %v4507_v39, %v4506_v40  ;;  %v5236_v17 = vmul.f32 %v4950_v18, %v4507_v39  ;;  %v4108_v18 = vsel %vm4057_vm7, %v4105_v31, %v4107_v0  ;;  %v4787_v31 = vld [vmem:[%s9731_s3 + $0x210] sm:$0xff] }
 0x4be   :  { %v3254_v26 = vpop.f32.mrf.mxu2 }
 0x4bf   :  { %6355 = vst [vmem:[%s9732_s4 + $0x70] sm:$0xff] %v6215_v29   ;;  %v5316_v62 = vadd.f32 %v5315_v27, %v5236_v17  ;;  %v5404_v59 = vmul.f32 %v5236_v17, %v4507_v39  ;;  %v3413_v33 = vadd.f32 %v3254_v26, %v3104_v37  ;;  %v2947_v38 = vpop.f32.mrf.mxu1  ;;  %v9146_v35 = vpop.f32.mrf.mxu3  ;;  %v4784_v27 = vld [vmem:[%s9731_s3 + $0x1f8] sm:$0xff]  ;;  %v10256_v37 = vld [vmem:[#allocation96_spill] sm:$0xff] }
 0x4c0   :  { %v3105_v12 = vadd.f32 %v2947_v38, %v10255_v55  ;;  %5119 = vperm.xlu0 %6385, %v4784_v27   ;;  %v10257_v38 = vld [vmem:[#allocation68_spill] sm:$0xff] }
 0x4c1   :  { %v5484_v41 = vadd.f32 %v5483_v8, %v5404_v59  ;;  %v4004_v6 = vadd.f32 %v9022_v32, %v3413_v33  ;;  %v4351_v24 = vpop.f32.mrf.mxu0  ;;  %v3577_v32 = vsel %vm3466_vm5, %v3572_v25, %v3576_v3  ;;  %v4785_v25 = vld [vmem:[%s9731_s3 + $0x200] sm:$0xff]  ;;  %v4788_v33 = vld [vmem:[%s9731_s3 + $0x218] sm:$0xff]  ;;  %v3578_v7 = vrot.slane %v10257_v38, 2 }
 0x4c2   :  { %5124 = vperm.xlu1 %6386, %v4785_v25   ;;  %v10262_v38 = vld [vmem:[#allocation69_spill] sm:$0xff] }
 0x4c3   :  { %v4508_v40 = vadd.f32 %v4349_v45, %v4004_v6 }
 0x4c4   :  { %6043 = vmatmul.msk.bf16.gmra.mxu3 %vm566_vm2, %v3577_v32  ;;  %5084 = vperm.xlu2 %6387, %v4777_v42   ;;  %v9207_v32 = vld [vmem:[%s9729_s0 + $0xe0] sm:$0xff] }
 0x4c5   :  { %v5237_v47 = vmul.f32 %v4955_v9, %v4508_v40  ;;  %v3580_v9 = vor.u32 %v3579_v53, %v3578_v7  ;;  %v2707_v55 = vrot.slane %v9207_v32, 2  ;;  %v3583_v7 = vrot.slane %v10262_v38, 3 }
 0x4c6   :  { %v3256_v58 = vpop.f32.mrf.mxu2 }
 0x4c7   :  { %v5317_v61 = vadd.f32 %v5316_v62, %v5237_v47  ;;  %v5405_v1 = vmul.f32 %v5237_v47, %v4508_v40  ;;  %v3414_v43 = vadd.f32 %v3256_v58, %v3105_v12  ;;  %v2950_v8 = vpop.f32.mrf.mxu1  ;;  %v9178_v39 = vpop.f32.mrf.mxu3  ;;  %v10259_v12 = vld [vmem:[#allocation23_spill] sm:$0xff]  ;;  %v4109_v58 = vrot.slane %v9207_v32, 3 }
 0x4c8   :  { %v3106_v29 = vadd.f32 %v2950_v8, %v10256_v37  ;;  %5134 = vperm.xlu0 %6385, %v4787_v31   ;;  %v4783_v37 = vld [vmem:[%s9731_s3 + $0x1f0] sm:$0xff] }
 0x4c9   :  { %v5485_v45 = vadd.f32 %v5484_v41, %v5405_v1  ;;  %v4005_v44 = vadd.f32 %v9040_v48, %v3414_v43  ;;  %v4354_v56 = vpop.f32.mrf.mxu0 }
 0x4ca   :  { %5953 = vmatmul.msk.bf16.gmra.mxu1 %vm566_vm2, %v2704_v15  ;;  %5139 = vperm.xlu1 %6386, %v4788_v33  }
 0x4cb   :  { %5999 = vmatmul.msk.bf16.gmra.mxu2 %vm566_vm2, %v2706_v60  ;;  %v4509_v48 = vadd.f32 %v4351_v24, %v4005_v44  ;;  %v4780_v24 = vld [vmem:[%s9731_s3 + $0x1d8] sm:$0xff]  ;;  %v2708_v44 = vsel %vm2653_vm6, %v2705_v63, %v2707_v55  ;;  %v4970_v63 = vpop.permute.xlu0 %4969 }
 0x4cc   :  { %6083 = vmatmul.msk.bf16.gmra.mxu0 %vm566_vm2, %v4108_v18  ;;  %5099 = vperm.xlu2 %6387, %v4780_v24   ;;  %v4975_v24 = vpop.permute.xlu1 %4974 }
 0x4cd   :  { %v6220_v23 = vpack.c.bf16 %v4509_v48, %v4508_v40  ;;  %v5238_v17 = vmul.f32 %v4960_v49, %v4509_v48  ;;  %v4110_v49 = vsel %vm4057_vm7, %v4107_v0, %v4109_v58  ;;  %v4793_v0 = vld [vmem:[%s9731_s3 + $0x240] sm:$0xff] }
 0x4ce   :  { %v3259_v54 = vpop.f32.mrf.mxu2 }
 0x4cf   :  { %6356 = vst [vmem:[%s9732_s4 + $0x78] sm:$0xff] %v6220_v23   ;;  %v5318_v15 = vadd.f32 %v5317_v61, %v5238_v17  ;;  %v5406_v26 = vmul.f32 %v5238_v17, %v4509_v48  ;;  %v3415_v62 = vadd.f32 %v3259_v54, %v3106_v29  ;;  %v2952_v59 = vpop.f32.mrf.mxu1  ;;  %v9199_v6 = vpop.f32.mrf.mxu3  ;;  %v4790_v61 = vld [vmem:[%s9731_s3 + $0x228] sm:$0xff]  ;;  %v10260_v29 = vld [vmem:[#allocation17_spill] sm:$0xff] }
 0x4d0   :  { %v3107_v47 = vadd.f32 %v2952_v59, %v10259_v12  ;;  %5149 = vperm.xlu0 %6385, %v4790_v61   ;;  %v10261_v59 = vld [vmem:[#allocation79_spill] sm:$0xff] }
 0x4d1   :  { %v5486_v4 = vadd.f32 %v5485_v45, %v5406_v26  ;;  %v4006_v5 = vadd.f32 %v9072_v22, %v3415_v62  ;;  %v4356_v41 = vpop.f32.mrf.mxu0  ;;  %v3581_v22 = vsel %vm3466_vm5, %v3576_v3, %v3580_v9  ;;  %v4791_v3 = vld [vmem:[%s9731_s3 + $0x230] sm:$0xff]  ;;  %v4794_v62 = vld [vmem:[%s9731_s3 + $0x248] sm:$0xff]  ;;  %v3582_v33 = vrot.slane %v10261_v59, 2 }
 0x4d2   :  { %5154 = vperm.xlu1 %6386, %v4791_v3   ;;  %v10266_v59 = vld [vmem:[#allocation80_spill] sm:$0xff] }
 0x4d3   :  { %v4510_v40 = vadd.f32 %v4354_v56, %v4006_v5 }
 0x4d4   :  { %6044 = vmatmul.msk.bf16.gmra.mxu3 %vm566_vm2, %v3581_v22  ;;  %5114 = vperm.xlu2 %6387, %v4783_v37   ;;  %v9260_v22 = vld [vmem:[%s9729_s0 + $0xe8] sm:$0xff] }
 0x4d5   :  { %v5239_v27 = vmul.f32 %v4965_v20, %v4510_v40  ;;  %v3584_v20 = vor.u32 %v3583_v7, %v3582_v33  ;;  %v2709_v12 = vrot.slane %v9260_v22, 2  ;;  %v3587_v33 = vrot.slane %v10266_v59, 3  ;;  %v4798_v59 = vld [vmem:[%s9731_s3 + $0x268] sm:$0xff] }
 0x4d6   :  { %v3261_v1 = vpop.f32.mrf.mxu2 }
 0x4d7   :  { %v5319_v43 = vadd.f32 %v5318_v15, %v5239_v27  ;;  %v5407_v8 = vmul.f32 %v5239_v27, %v4510_v40  ;;  %v3416_v25 = vadd.f32 %v3261_v1, %v3107_v47  ;;  %v2955_v45 = vpop.f32.mrf.mxu1  ;;  %v9231_v48 = vpop.f32.mrf.mxu3  ;;  %v10263_v47 = vld [vmem:[#allocation32_spill] sm:$0xff]  ;;  %v4111_v1 = vrot.slane %v9260_v22, 3 }
 0x4d8   :  { %v3108_v23 = vadd.f32 %v2955_v45, %v10260_v29  ;;  %5164 = vperm.xlu0 %6385, %v4793_v0   ;;  %v4789_v29 = vld [vmem:[%s9731_s3 + $0x220] sm:$0xff] }
 0x4d9   :  { %v5487_v56 = vadd.f32 %v5486_v4, %v5407_v8  ;;  %v4007_v18 = vadd.f32 %v9093_v36, %v3416_v25  ;;  %v4359_v42 = vpop.f32.mrf.mxu0 }
 0x4da   :  { %5954 = vmatmul.msk.bf16.gmra.mxu1 %vm566_vm2, %v2706_v60  ;;  %5169 = vperm.xlu1 %6386, %v4794_v62  }
 0x4db   :  { %6000 = vmatmul.msk.bf16.gmra.mxu2 %vm566_vm2, %v2708_v44  ;;  %v4511_v36 = vadd.f32 %v4356_v41, %v4007_v18  ;;  %v4786_v41 = vld [vmem:[%s9731_s3 + $0x208] sm:$0xff]  ;;  %v2710_v18 = vsel %vm2653_vm6, %v2707_v55, %v2709_v12  ;;  %v4980_v55 = vpop.permute.xlu2 %4979 }
 0x4dc   :  { %6084 = vmatmul.msk.bf16.gmra.mxu0 %vm566_vm2, %v4110_v49  ;;  %5129 = vperm.xlu2 %6387, %v4786_v41   ;;  %v4985_v41 = vpop.permute.xlu0 %4984 }
 0x4dd   :  { %v6225_v16 = vpack.c.bf16 %v4511_v36, %v4510_v40  ;;  %v5240_v17 = vmul.f32 %v4970_v63, %v4511_v36  ;;  %v4112_v63 = vsel %vm4057_vm7, %v4109_v58, %v4111_v1  ;;  %v4799_v58 = vld [vmem:[%s9731_s3 + $0x270] sm:$0xff] }
 0x4de   :  { %v3264_v31 = vpop.f32.mrf.mxu2 }
 0x4df   :  { %6357 = vst [vmem:[%s9732_s4 + $0x80] sm:$0xff] %v6225_v16   ;;  %v5320_v60 = vadd.f32 %v5319_v43, %v5240_v17  ;;  %v5408_v54 = vmul.f32 %v5240_v17, %v4511_v36  ;;  %v3417_v15 = vadd.f32 %v3264_v31, %v3108_v23  ;;  %v2957_v26 = vpop.f32.mrf.mxu1  ;;  %v9252_v5 = vpop.f32.mrf.mxu3  ;;  %v4796_v43 = vld [vmem:[%s9731_s3 + $0x258] sm:$0xff]  ;;  %v10264_v23 = vld [vmem:[#allocation107_spill] sm:$0xff] }
 0x4e0   :  { %v3109_v27 = vadd.f32 %v2957_v26, %v10263_v47  ;;  %5179 = vperm.xlu0 %6385, %v4796_v43   ;;  %v10265_v26 = vld [vmem:[#allocation89_spill] sm:$0xff] }
 0x4e1   :  { %v5488_v13 = vadd.f32 %v5487_v56, %v5408_v54  ;;  %v4008_v53 = vadd.f32 %v9125_v30, %v3417_v15  ;;  %v4361_v4 = vpop.f32.mrf.mxu0  ;;  %v3585_v30 = vsel %vm3466_vm5, %v3580_v9, %v3584_v20  ;;  %v4797_v9 = vld [vmem:[%s9731_s3 + $0x260] sm:$0xff]  ;;  %v4800_v15 = vld [vmem:[%s9731_s3 + $0x278] sm:$0xff]  ;;  %v3586_v62 = vrot.slane %v10265_v26, 2 }
 0x4e2   :  { %5184 = vperm.xlu1 %6386, %v4797_v9  }
 0x4e3   :  { %v4512_v40 = vadd.f32 %v4359_v42, %v4008_v53 }
 0x4e4   :  { %6045 = vmatmul.msk.bf16.gmra.mxu3 %vm566_vm2, %v3585_v30  ;;  %5144 = vperm.xlu2 %6387, %v4789_v29   ;;  %v9313_v30 = vld [vmem:[%s9729_s0 + $0xf0] sm:$0xff] }
 0x4e5   :  { %v5241_v61 = vmul.f32 %v4975_v24, %v4512_v40  ;;  %v3588_v24 = vor.u32 %v3587_v33, %v3586_v62  ;;  %v2711_v47 = vrot.slane %v9313_v30, 2  ;;  %v4995_v33 = vpop.permute.xlu2 %4994 }
 0x4e6   :  { %v3266_v8 = vpop.f32.mrf.mxu2 }
 0x4e7   :  { %v5321_v25 = vadd.f32 %v5320_v60, %v5241_v61  ;;  %v5409_v45 = vmul.f32 %v5241_v61, %v4512_v40  ;;  %v3418_v3 = vadd.f32 %v3266_v8, %v3109_v27  ;;  %v2960_v56 = vpop.f32.mrf.mxu1  ;;  %v9284_v36 = vpop.f32.mrf.mxu3  ;;  %v10267_v27 = vld [vmem:[#allocation110_spill] sm:$0xff]  ;;  %v4113_v8 = vrot.slane %v9313_v30, 3 }
 0x4e8   :  { %v3110_v16 = vadd.f32 %v2960_v56, %v10264_v23  ;;  %5194 = vperm.xlu0 %6385, %v4799_v58  }
 0x4e9   :  { %v5489_v42 = vadd.f32 %v5488_v13, %v5409_v45  ;;  %v4009_v49 = vadd.f32 %v9146_v35, %v3418_v3  ;;  %v4364_v37 = vpop.f32.mrf.mxu0 }
 0x4ea   :  { %5955 = vmatmul.msk.bf16.gmra.mxu1 %vm566_vm2, %v2708_v44  ;;  %5199 = vperm.xlu1 %6386, %v4800_v15  }
 0x4eb   :  { %6001 = vmatmul.msk.bf16.gmra.mxu2 %vm566_vm2, %v2710_v18  ;;  %v4513_v35 = vadd.f32 %v4361_v4, %v4009_v49  ;;  %v4792_v4 = vld [vmem:[%s9731_s3 + $0x238] sm:$0xff] }
 0x4ec   :  { %6085 = vmatmul.msk.bf16.gmra.mxu0 %vm566_vm2, %v4112_v63  ;;  %5159 = vperm.xlu2 %6387, %v4792_v4   ;;  %v4114_v63 = vsel %vm4057_vm7, %v4111_v1, %v4113_v8 }
 0x4ed   :  { %v6230_v32 = vpack.c.bf16 %v4513_v35, %v4512_v40  ;;  %v5242_v17 = vmul.f32 %v4980_v55, %v4513_v35  ;;  %v4795_v55 = vld [vmem:[%s9731_s3 + $0x250] sm:$0xff] }
 0x4ee   :  { %v3269_v0 = vpop.f32.mrf.mxu2 }
 0x4ef   :  { %6358 = vst [vmem:[%s9732_s4 + $0x88] sm:$0xff] %v6230_v32   ;;  %v5322_v44 = vadd.f32 %v5321_v25, %v5242_v17  ;;  %v5410_v31 = vmul.f32 %v5242_v17, %v4513_v35  ;;  %v3419_v60 = vadd.f32 %v3269_v0, %v3110_v16  ;;  %v2962_v54 = vpop.f32.mrf.mxu1  ;;  %v9305_v53 = vpop.f32.mrf.mxu3  ;;  %v10269_v0 = vld [vmem:[#allocation8_spill] sm:$0xff] }
 0x4f0   :  { %v3111_v61 = vadd.f32 %v2962_v54, %v10267_v27  ;;  %v4990_v35 = vpop.permute.xlu1 %4989 }
 0x4f1   :  { %v5490_v38 = vadd.f32 %v5489_v42, %v5410_v31  ;;  %v4010_v7 = vadd.f32 %v9178_v39, %v3419_v60  ;;  %v4366_v13 = vpop.f32.mrf.mxu0  ;;  %v3589_v39 = vsel %vm3466_vm5, %v3584_v20, %v3588_v24  ;;  %v2712_v42 = vsel %vm2653_vm6, %v2709_v12, %v2711_v47  ;;  %v10270_v31 = vld [vmem:[#allocation7_spill] sm:$0xff] }
 0x4f2   :  { %v3591_v60 = vrot.slane %v10270_v31, 3 }
 0x4f3   :  { %v4514_v40 = vadd.f32 %v4364_v37, %v4010_v7 }
 0x4f4   :  { %6046 = vmatmul.msk.bf16.gmra.mxu3 %vm566_vm2, %v3589_v39  ;;  %5174 = vperm.xlu2 %6387, %v4795_v55  }
 0x4f5   :  { %v5243_v43 = vmul.f32 %v4985_v41, %v4514_v40 }
 0x4f6   :  { %v3271_v25 = vpop.f32.mrf.mxu2 }
 0x4f7   :  { %v5323_v45 = vadd.f32 %v5322_v44, %v5243_v43  ;;  %v5411_v3 = vmul.f32 %v5243_v43, %v4514_v40  ;;  %v3420_v56 = vadd.f32 %v3271_v25, %v3111_v61  ;;  %v2965_v9 = vpop.f32.mrf.mxu1  ;;  %v9327_v29 = vpop.f32.mrf.mxu3  ;;  %v3590_v44 = vrot.slane %v10269_v0, 2 }
 0x4f8   :  { %v5005_v31 = vpop.permute.xlu1 %5004 }
 0x4f9   :  { %v5491_v49 = vadd.f32 %v5490_v38, %v5411_v3  ;;  %v4011_v37 = vadd.f32 %v9199_v6, %v3420_v56  ;;  %v4369_v20 = vpop.f32.mrf.mxu0  ;;  %v10268_v6 = vld [vmem:[#allocation113_spill] sm:$0xff]  ;;  %v3592_v38 = vor.u32 %v3591_v60, %v3590_v44 }
 0x4fa   :  { %5956 = vmatmul.msk.bf16.gmra.mxu1 %vm566_vm2, %v2710_v18  ;;  %v3112_v23 = vadd.f32 %v2965_v9, %v10268_v6 }
 0x4fb   :  { %6002 = vmatmul.msk.bf16.gmra.mxu2 %vm566_vm2, %v2712_v42  ;;  %v4515_v12 = vadd.f32 %v4366_v13, %v4011_v37  ;;  %v6447_v13 = vld [vmem:[%s9729_s0 + $0xf8] sm:$0xff]  ;;  %v3593_v41 = vsel %vm3466_vm5, %v3588_v24, %v3592_v38 }
 0x4fc   :  { %6086 = vmatmul.msk.bf16.gmra.mxu0 %vm566_vm2, %v4114_v63  ;;  %5189 = vperm.xlu2 %6387, %v4798_v59   ;;  %v2713_v4 = vrot.slane %v6447_v13, 2  ;;  %v4115_v39 = vrot.slane %v6447_v13, 3  ;;  %v5000_v63 = vpop.permute.xlu0 %4999 }
 0x4fd   :  { %v6235_v22 = vpack.c.bf16 %v4515_v12, %v4514_v40  ;;  %v5244_v16 = vmul.f32 %v4990_v35, %v4515_v12  ;;  %v10271_v40 = vld [vmem:[#allocation116_spill] sm:$0xff] }
 0x4fe   :  { %v3274_v1 = vpop.f32.mrf.mxu2  ;;  %v2714_v3 = vsel %vm2653_vm6, %v2711_v47, %v2713_v4  ;;  %v4116_v37 = vsel %vm4057_vm7, %v4113_v8, %v4115_v39  ;;  %v10272_v47 = vld [vmem:[#allocation119_spill] sm:$0xff] }
 0x4ff   :  { %6359 = vst [vmem:[%s9732_s4 + $0x90] sm:$0xff] %v6235_v22   ;;  %v5324_v32 = vadd.f32 %v5323_v45, %v5244_v16  ;;  %v5412_v17 = vmul.f32 %v5244_v16, %v4515_v12  ;;  %v3421_v58 = vadd.f32 %v3274_v1, %v3112_v23  ;;  %v2967_v18 = vpop.f32.mrf.mxu1  ;;  %v9342_v62 = vpop.f32.mrf.mxu3  ;;  %v10273_v16 = vld [vmem:[#allocation13_spill] sm:$0xff] }
 0x500   :  { %v3594_v1 = vrot.slane %v10273_v16, 2 }
 0x501   :  { %v5492_v54 = vadd.f32 %v5491_v49, %v5412_v17  ;;  %v4012_v15 = vadd.f32 %v9231_v48, %v3421_v58  ;;  %v4371_v26 = vpop.f32.mrf.mxu0  ;;  %v3113_v48 = vadd.f32 %v2967_v18, %v10271_v40 }
 0x503   :  { %v4516_v7 = vadd.f32 %v4369_v20, %v4012_v15  ;;  %v4801_v20 = vld [vmem:[%s9731_s3 + $0x280] sm:$0xff] }
 0x504   :  { %6047 = vmatmul.msk.bf16.gmra.mxu3 %vm566_vm2, %v3593_v41  ;;  %5204 = vperm.xlu2 %6387, %v4801_v20   ;;  %v6448_v15 = vld [vmem:[%s9729_s0 + $0x100] sm:$0xff] }
 0x505   :  { %v5245_v30 = vmul.f32 %v4995_v33, %v4516_v7  ;;  %v10275_v33 = vld [vmem:[#allocation122_spill] sm:$0xff]  ;;  %v4117_v41 = vrot.slane %v6448_v15, 3 }
 0x506   :  { %v3276_v27 = vpop.f32.mrf.mxu2 }
 0x507   :  { %v5325_v61 = vadd.f32 %v5324_v32, %v5245_v30  ;;  %v5413_v43 = vmul.f32 %v5245_v30, %v4516_v7  ;;  %v3422_v25 = vadd.f32 %v3276_v27, %v3113_v48  ;;  %v2970_v45 = vpop.f32.mrf.mxu1  ;;  %v9356_v24 = vpop.f32.mrf.mxu3  ;;  %v10274_v32 = vld [vmem:[#allocation11_spill] sm:$0xff] }
 0x508   :  { %v3595_v17 = vrot.slane %v10274_v32, 3  ;;  %v5015_v32 = vpop.permute.xlu0 %5014 }
 0x509   :  { %v5493_v56 = vadd.f32 %v5492_v54, %v5413_v43  ;;  %v4013_v9 = vadd.f32 %v9252_v5, %v3422_v25  ;;  %v4374_v49 = vpop.f32.mrf.mxu0  ;;  %v3114_v5 = vadd.f32 %v2970_v45, %v10272_v47 }
 0x50a   :  { %5957 = vmatmul.msk.bf16.gmra.mxu1 %vm566_vm2, %v2712_v42  ;;  %v3596_v60 = vor.u32 %v3595_v17, %v3594_v1  ;;  %v6449_v17 = vld [vmem:[%s9729_s0 + $0x108] sm:$0xff] }
 0x50b   :  { %6003 = vmatmul.msk.bf16.gmra.mxu2 %vm566_vm2, %v2714_v3  ;;  %v4517_v55 = vadd.f32 %v4371_v26, %v4013_v9  ;;  %v2715_v26 = vrot.slane %v6448_v15, 2  ;;  %v5010_v9 = vpop.permute.xlu2 %5009  ;;  %v4119_v15 = vrot.slane %v6449_v17, 3 }
 0x50c   :  { %6087 = vmatmul.msk.bf16.gmra.mxu0 %vm566_vm2, %v4116_v37  ;;  %v3597_v59 = vsel %vm3466_vm5, %v3592_v38, %v3596_v60  ;;  %v10276_v37 = vld [vmem:[#allocation125_spill] sm:$0xff] }
 0x50d   :  { %v6240_v35 = vpack.c.bf16 %v4517_v55, %v4516_v7  ;;  %v5246_v12 = vmul.f32 %v5000_v63, %v4517_v55 }
 0x50e   :  { %v3279_v8 = vpop.f32.mrf.mxu2 }
 0x50f   :  { %6360 = vst [vmem:[%s9732_s4 + $0x98] sm:$0xff] %v6240_v35   ;;  %v5326_v6 = vadd.f32 %v5325_v61, %v5246_v12  ;;  %v5414_v23 = vmul.f32 %v5246_v12, %v4517_v55  ;;  %v3423_v22 = vadd.f32 %v3279_v8, %v3114_v5  ;;  %v2972_v42 = vpop.f32.mrf.mxu1  ;;  %v9371_v44 = vpop.f32.mrf.mxu3  ;;  %v2716_v61 = vsel %vm2653_vm6, %v2713_v4, %v2715_v26  ;;  %v10278_v12 = vld [vmem:[#allocation14_spill] sm:$0xff] }
 0x510   :  { %v3115_v7 = vadd.f32 %v2972_v42, %v10275_v33  ;;  %v3599_v8 = vrot.slane %v10278_v12, 3 }
 0x511   :  { %v5494_v58 = vadd.f32 %v5493_v56, %v5414_v23  ;;  %v4014_v18 = vadd.f32 %v9284_v36, %v3423_v22  ;;  %v4376_v0 = vpop.f32.mrf.mxu0  ;;  %v4118_v56 = vsel %vm4057_vm7, %v4115_v39, %v4117_v41 }
 0x513   :  { %v4518_v54 = vadd.f32 %v4374_v49, %v4014_v18  ;;  %v5025_v12 = vpop.permute.xlu2 %5024 }
 0x514   :  { %6048 = vmatmul.msk.bf16.gmra.mxu3 %vm566_vm2, %v3597_v59 }
 0x515   :  { %v5247_v13 = vmul.f32 %v5005_v31, %v4518_v54  ;;  %v10279_v31 = vld [vmem:[#allocation128_spill] sm:$0xff] }
 0x516   :  { %v3281_v40 = vpop.f32.mrf.mxu2 }
 0x517   :  { %v5327_v36 = vadd.f32 %v5326_v6, %v5247_v13  ;;  %v5415_v48 = vmul.f32 %v5247_v13, %v4518_v54  ;;  %v3424_v30 = vadd.f32 %v3281_v40, %v3115_v7  ;;  %v2975_v27 = vpop.f32.mrf.mxu1  ;;  %v9382_v38 = vpop.f32.mrf.mxu3 }
 0x518   :  { %v3116_v20 = vadd.f32 %v2975_v27, %v10276_v37  ;;  %v4120_v27 = vsel %vm4057_vm7, %v4117_v41, %v4119_v15 }
 0x519   :  { %v5495_v43 = vadd.f32 %v5494_v58, %v5415_v48  ;;  %v4015_v25 = vadd.f32 %v9305_v53, %v3424_v30  ;;  %v4379_v45 = vpop.f32.mrf.mxu0  ;;  %v2717_v58 = vrot.slane %v6449_v17, 2 }
 0x51a   :  { %5958 = vmatmul.msk.bf16.gmra.mxu1 %vm566_vm2, %v2714_v3  ;;  %v10277_v3 = vld [vmem:[#allocation20_spill] sm:$0xff] }
 0x51b   :  { %6004 = vmatmul.msk.bf16.gmra.mxu2 %vm566_vm2, %v2716_v61  ;;  %v4519_v49 = vadd.f32 %v4376_v0, %v4015_v25  ;;  %v3598_v35 = vrot.slane %v10277_v3, 2  ;;  %v2718_v40 = vsel %vm2653_vm6, %v2715_v26, %v2717_v58  ;;  %v5020_v25 = vpop.permute.xlu1 %5019 }
 0x51c   :  { %6088 = vmatmul.msk.bf16.gmra.mxu0 %vm566_vm2, %v4118_v56 }
 0x51d   :  { %v6245_v63 = vpack.c.bf16 %v4519_v49, %v4518_v54  ;;  %v5248_v4 = vmul.f32 %v5010_v9, %v4519_v49  ;;  %v3600_v16 = vor.u32 %v3599_v8, %v3598_v35  ;;  %v10280_v9 = vld [vmem:[#allocation130_spill] sm:$0xff]  ;;  %v6450_v8 = vld [vmem:[%s9729_s0 + $0x110] sm:$0xff] }
 0x51e   :  { %v3284_v55 = vpop.f32.mrf.mxu2  ;;  %v4121_v17 = vrot.slane %v6450_v8, 3 }
 0x51f   :  { %6361 = vst [vmem:[%s9732_s4 + $0xa0] sm:$0xff] %v6245_v63   ;;  %v5328_v53 = vadd.f32 %v5327_v36, %v5248_v4  ;;  %v5416_v39 = vmul.f32 %v5248_v4, %v4519_v49  ;;  %v3425_v47 = vadd.f32 %v3284_v55, %v3116_v20  ;;  %v2977_v5 = vpop.f32.mrf.mxu1  ;;  %v9394_v42 = vpop.f32.mrf.mxu3  ;;  %v3601_v18 = vsel %vm3466_vm5, %v3596_v60, %v3600_v16  ;;  %v10282_v4 = vld [vmem:[#allocation21_spill] sm:$0xff] }
 0x520   :  { %v3117_v54 = vadd.f32 %v2977_v5, %v10279_v31  ;;  %v3603_v55 = vrot.slane %v10282_v4, 3 }
 0x521   :  { %v5496_v6 = vadd.f32 %v5495_v43, %v5416_v39  ;;  %v4016_v23 = vadd.f32 %v9327_v29, %v3425_v47  ;;  %v4381_v22 = vpop.f32.mrf.mxu0 }
 0x523   :  { %v4520_v1 = vadd.f32 %v4379_v45, %v4016_v23  ;;  %v5035_v4 = vpop.permute.xlu1 %5034 }
 0x524   :  { %6049 = vmatmul.msk.bf16.gmra.mxu3 %vm566_vm2, %v3601_v18 }
 0x525   :  { %v5249_v0 = vmul.f32 %v5015_v32, %v4520_v1 }
 0x526   :  { %v3286_v59 = vpop.f32.mrf.mxu2 }
 0x527   :  { %v5329_v29 = vadd.f32 %v5328_v53, %v5249_v0  ;;  %v5417_v33 = vmul.f32 %v5249_v0, %v4520_v1  ;;  %v3426_v7 = vadd.f32 %v3286_v59, %v3117_v54  ;;  %v2980_v13 = vpop.f32.mrf.mxu1  ;;  %v9405_v60 = vpop.f32.mrf.mxu3 }
 0x528   :  { %v3118_v26 = vadd.f32 %v2980_v13, %v10280_v9  ;;  %v4122_v13 = vsel %vm4057_vm7, %v4119_v15, %v4121_v17 }
 0x529   :  { %v5497_v36 = vadd.f32 %v5496_v6, %v5417_v33  ;;  %v4017_v48 = vadd.f32 %v9342_v62, %v3426_v7  ;;  %v4384_v30 = vpop.f32.mrf.mxu0  ;;  %v2719_v6 = vrot.slane %v6450_v8, 2 }
 0x52a   :  { %5959 = vmatmul.msk.bf16.gmra.mxu1 %vm566_vm2, %v2716_v61  ;;  %v10281_v61 = vld [vmem:[#allocation28_spill] sm:$0xff] }
 0x52b   :  { %v4521_v43 = vadd.f32 %v4381_v22, %v4017_v48  ;;  %6005 = vmatmul.msk.bf16.gmra.mxu2 %vm566_vm2, %v2718_v40  ;;  %v3602_v63 = vrot.slane %v10281_v61, 2  ;;  %v2720_v59 = vsel %vm2653_vm6, %v2717_v58, %v2719_v6  ;;  %v5030_v48 = vpop.permute.xlu0 %5029 }
 0x52c   :  { %6089 = vmatmul.msk.bf16.gmra.mxu0 %vm566_vm2, %v4120_v27 }
 0x52d   :  { %v6250_v45 = vpack.c.bf16 %v4521_v43, %v4520_v1  ;;  %v5250_v56 = vmul.f32 %v5020_v25, %v4521_v43  ;;  %v3604_v3 = vor.u32 %v3603_v55, %v3602_v63  ;;  %v10283_v1 = vld [vmem:[#allocation132_spill] sm:$0xff]  ;;  %v6451_v55 = vld [vmem:[%s9729_s0 + $0x118] sm:$0xff] }
 0x52e   :  { %v3289_v49 = vpop.f32.mrf.mxu2  ;;  %v4123_v8 = vrot.slane %v6451_v55, 3 }
 0x52f   :  { %6362 = vst [vmem:[%s9732_s4 + $0xa8] sm:$0xff] %v6250_v45   ;;  %v5330_v62 = vadd.f32 %v5329_v29, %v5250_v56  ;;  %v5418_v41 = vmul.f32 %v5250_v56, %v4521_v43  ;;  %v3427_v37 = vadd.f32 %v3289_v49, %v3118_v26  ;;  %v2982_v20 = vpop.f32.mrf.mxu1  ;;  %v9417_v5 = vpop.f32.mrf.mxu3  ;;  %v3605_v23 = vsel %vm3466_vm5, %v3600_v16, %v3604_v3  ;;  %v10284_v43 = vld [vmem:[#allocation134_spill] sm:$0xff]  ;;  %v10286_v26 = vld [vmem:[#allocation29_spill] sm:$0xff] }
 0x530   :  { %v3119_v32 = vadd.f32 %v2982_v20, %v10283_v1  ;;  %v3607_v49 = vrot.slane %v10286_v26, 3 }
 0x531   :  { %v5498_v53 = vadd.f32 %v5497_v36, %v5418_v41  ;;  %v4018_v39 = vadd.f32 %v9356_v24, %v3427_v37  ;;  %v4386_v47 = vpop.f32.mrf.mxu0 }
 0x533   :  { %v4522_v35 = vadd.f32 %v4384_v30, %v4018_v39 }
 0x534   :  { %6050 = vmatmul.msk.bf16.gmra.mxu3 %vm566_vm2, %v3605_v23 }
 0x535   :  { %v5251_v22 = vmul.f32 %v5025_v12, %v4522_v35 }
 0x536   :  { %v3291_v18 = vpop.f32.mrf.mxu2 }
 0x537   :  { %v5331_v24 = vadd.f32 %v5330_v62, %v5251_v22  ;;  %v5419_v0 = vmul.f32 %v5251_v22, %v4522_v35  ;;  %v3428_v31 = vadd.f32 %v3291_v18, %v3119_v32  ;;  %v2985_v54 = vpop.f32.mrf.mxu1  ;;  %v9428_v16 = vpop.f32.mrf.mxu3 }
 0x538   :  { %v3120_v58 = vadd.f32 %v2985_v54, %v10284_v43  ;;  %v4124_v54 = vsel %vm4057_vm7, %v4121_v17, %v4123_v8  ;;  %v3611_v43 = vrot.slane %v10147_v34, 3 }
 0x539   :  { %v5499_v29 = vadd.f32 %v5498_v53, %v5419_v0  ;;  %v4019_v33 = vadd.f32 %v9371_v44, %v3428_v31  ;;  %v4389_v7 = vpop.f32.mrf.mxu0  ;;  %v2721_v53 = vrot.slane %v6451_v55, 2 }
 0x53a   :  { %5960 = vmatmul.msk.bf16.gmra.mxu1 %vm566_vm2, %v2718_v40  ;;  %v10285_v40 = vld [vmem:[#allocation37_spill] sm:$0xff] }
 0x53b   :  { %v4523_v36 = vadd.f32 %v4386_v47, %v4019_v33  ;;  %6006 = vmatmul.msk.bf16.gmra.mxu2 %vm566_vm2, %v2720_v59  ;;  %v3606_v9 = vrot.slane %v10285_v40, 2  ;;  %v2722_v18 = vsel %vm2653_vm6, %v2719_v6, %v2721_v53  ;;  %v5040_v33 = vpop.permute.xlu2 %5039  ;;  %v5045_v40 = vpop.permute.xlu0 %5044 }
 0x53c   :  { %6090 = vmatmul.msk.bf16.gmra.mxu0 %vm566_vm2, %v4122_v13 }
 0x53d   :  { %v6255_v30 = vpack.c.bf16 %v4523_v36, %v4522_v35  ;;  %v5252_v27 = vmul.f32 %v5030_v48, %v4523_v36  ;;  %v3608_v61 = vor.u32 %v3607_v49, %v3606_v9  ;;  %v10287_v35 = vld [vmem:[#allocation136_spill] sm:$0xff]  ;;  %v6452_v9 = vld [vmem:[%s9729_s0 + $0x120] sm:$0xff] }
 0x53e   :  { %v3294_v25 = vpop.f32.mrf.mxu2  ;;  %v2723_v26 = vrot.slane %v6452_v9, 2  ;;  %v4125_v34 = vrot.slane %v6452_v9, 3 }
 0x53f   :  { %6363 = vst [vmem:[%s9732_s4 + $0xb0] sm:$0xff] %v6255_v30   ;;  %v5332_v44 = vadd.f32 %v5331_v24, %v5252_v27  ;;  %v5420_v15 = vmul.f32 %v5252_v27, %v4523_v36  ;;  %v3429_v45 = vadd.f32 %v3294_v25, %v3120_v58  ;;  %v2987_v56 = vpop.f32.mrf.mxu1  ;;  %v9440_v20 = vpop.f32.mrf.mxu3  ;;  %v3609_v39 = vsel %vm3466_vm5, %v3604_v3, %v3608_v61  ;;  %v10288_v36 = vld [vmem:[#allocation75_spill] sm:$0xff] }
 0x540   :  { %v3121_v12 = vadd.f32 %v2987_v56, %v10287_v35 }
 0x541   :  { %v5500_v62 = vadd.f32 %v5499_v29, %v5420_v15  ;;  %v4020_v41 = vadd.f32 %v9382_v38, %v3429_v45  ;;  %v4391_v37 = vpop.f32.mrf.mxu0 }
 0x543   :  { %v4524_v63 = vadd.f32 %v4389_v7, %v4020_v41 }
 0x544   :  { %6051 = vmatmul.msk.bf16.gmra.mxu3 %vm566_vm2, %v3609_v39  ;;  %v2724_v39 = vsel %vm2653_vm6, %v2721_v53, %v2723_v26 }
 0x545   :  { %v5253_v47 = vmul.f32 %v5035_v4, %v4524_v63 }
 0x546   :  { %v3296_v23 = vpop.f32.mrf.mxu2 }
 0x547   :  { %v5333_v38 = vadd.f32 %v5332_v44, %v5253_v47  ;;  %v5421_v22 = vmul.f32 %v5253_v47, %v4524_v63  ;;  %v3430_v1 = vadd.f32 %v3296_v23, %v3121_v12  ;;  %v2990_v32 = vpop.f32.mrf.mxu1  ;;  %v9451_v3 = vpop.f32.mrf.mxu3  ;;  %v4126_v23 = vsel %vm4057_vm7, %v4123_v8, %v4125_v34 }
 0x548   :  { %v3122_v6 = vadd.f32 %v2990_v32, %v10288_v36 }
 0x549   :  { %v5501_v24 = vadd.f32 %v5500_v62, %v5421_v22  ;;  %v4021_v0 = vadd.f32 %v9394_v42, %v3430_v1  ;;  %v4394_v31 = vpop.f32.mrf.mxu0  ;;  %v5050_v22 = vpop.permute.xlu1 %5049 }
 0x54a   :  { %5961 = vmatmul.msk.bf16.gmra.mxu1 %vm566_vm2, %v2720_v59  ;;  %v3610_v59 = vrot.slane %v10146_v57, 2  ;;  %v10289_v57 = vld [vmem:[#allocation83_spill] sm:$0xff] }
 0x54b   :  { %v4525_v29 = vadd.f32 %v4391_v37, %v4021_v0  ;;  %6007 = vmatmul.msk.bf16.gmra.mxu2 %vm566_vm2, %v2722_v18 }
 0x54c   :  { %6091 = vmatmul.msk.bf16.gmra.mxu0 %vm566_vm2, %v4124_v54  ;;  %v3612_v45 = vor.u32 %v3611_v43, %v3610_v59 }
 0x54d   :  { %v6260_v7 = vpack.c.bf16 %v4525_v29, %v4524_v63  ;;  %v5254_v13 = vmul.f32 %v5040_v33, %v4525_v29  ;;  %v10292_v33 = vld [vmem:[#allocation47_spill] sm:$0xff] }
 0x54e   :  { %v3299_v48 = vpop.f32.mrf.mxu2  ;;  %v3613_v49 = vsel %vm3466_vm5, %v3608_v61, %v3612_v45 }
 0x54f   :  { %6364 = vst [vmem:[%s9732_s4 + $0xb8] sm:$0xff] %v6260_v7   ;;  %v5334_v42 = vadd.f32 %v5333_v38, %v5254_v13  ;;  %v5422_v17 = vmul.f32 %v5254_v13, %v4525_v29  ;;  %v3431_v30 = vadd.f32 %v3299_v48, %v3122_v6  ;;  %v2992_v27 = vpop.f32.mrf.mxu1  ;;  %v9463_v15 = vpop.f32.mrf.mxu3  ;;  %v3615_v7 = vrot.slane %v10292_v33, 3 }
 0x550   :  { %v3123_v41 = vadd.f32 %v2992_v27, %v10289_v57  ;;  %v6453_v27 = vld [vmem:[%s9729_s0 + $0x128] sm:$0xff] }
 0x551   :  { %v5502_v58 = vadd.f32 %v5501_v24, %v5422_v17  ;;  %v4022_v25 = vadd.f32 %v9405_v60, %v3431_v30  ;;  %v4396_v44 = vpop.f32.mrf.mxu0  ;;  %v10290_v24 = vld [vmem:[#allocation86_spill] sm:$0xff]  ;;  %v5055_v30 = vpop.permute.xlu2 %5054  ;;  %v2725_v59 = vrot.slane %v6453_v27, 2 }
 0x553   :  { %v4526_v56 = vadd.f32 %v4394_v31, %v4022_v25  ;;  %v10293_v25 = vld [vmem:[#allocation92_spill] sm:$0xff]  ;;  %v2726_v57 = vsel %vm2653_vm6, %v2723_v26, %v2725_v59 }
 0x554   :  { %6052 = vmatmul.msk.bf16.gmra.mxu3 %vm566_vm2, %v3613_v49 }
 0x555   :  { %v5255_v62 = vmul.f32 %v5045_v40, %v4526_v56 }
 0x556   :  { %v3301_v37 = vpop.f32.mrf.mxu2 }
 0x557   :  { %v5335_v60 = vadd.f32 %v5334_v42, %v5255_v62  ;;  %v5423_v63 = vmul.f32 %v5255_v62, %v4526_v56  ;;  %v3432_v4 = vadd.f32 %v3301_v37, %v3123_v41  ;;  %v2995_v55 = vpop.f32.mrf.mxu1  ;;  %v9474_v61 = vpop.f32.mrf.mxu3 }
 0x558   :  { %v3124_v53 = vadd.f32 %v2995_v55, %v10290_v24  ;;  %v5060_v55 = vpop.permute.xlu0 %5059 }
 0x559   :  { %v5503_v47 = vadd.f32 %v5502_v58, %v5423_v63  ;;  %v4023_v35 = vadd.f32 %v9417_v5, %v3432_v4  ;;  %v4399_v12 = vpop.f32.mrf.mxu0 }
 0x55a   :  { %5962 = vmatmul.msk.bf16.gmra.mxu1 %vm566_vm2, %v2722_v18  ;;  %v10291_v18 = vld [vmem:[#allocation61_spill] sm:$0xff] }
 0x55b   :  { %v4527_v38 = vadd.f32 %v4396_v44, %v4023_v35  ;;  %6008 = vmatmul.msk.bf16.gmra.mxu2 %vm566_vm2, %v2724_v39  ;;  %v3614_v29 = vrot.slane %v10291_v18, 2  ;;  %v5065_v18 = vpop.permute.xlu1 %5064 }
 0x55c   :  { %6092 = vmatmul.msk.bf16.gmra.mxu0 %vm566_vm2, %v4126_v23 }
 0x55d   :  { %v6265_v1 = vpack.c.bf16 %v4527_v38, %v4526_v56  ;;  %v5256_v32 = vmul.f32 %v5050_v22, %v4527_v38  ;;  %v3616_v42 = vor.u32 %v3615_v7, %v3614_v29  ;;  %v4127_v56 = vrot.slane %v6453_v27, 3  ;;  %v6454_v29 = vld [vmem:[%s9729_s0 + $0x130] sm:$0xff] }
 0x55e   :  { %v3304_v0 = vpop.f32.mrf.mxu2  ;;  %v2727_v33 = vrot.slane %v6454_v29, 2 }
 0x55f   :  { %6365 = vst [vmem:[%s9732_s4 + $0xc0] sm:$0xff] %v6265_v1   ;;  %v5336_v5 = vadd.f32 %v5335_v60, %v5256_v32  ;;  %v5424_v8 = vmul.f32 %v5256_v32, %v4527_v38  ;;  %v3433_v31 = vadd.f32 %v3304_v0, %v3124_v53  ;;  %v2997_v54 = vpop.f32.mrf.mxu1  ;;  %v9486_v48 = vpop.f32.mrf.mxu3  ;;  %v3617_v43 = vsel %vm3466_vm5, %v3612_v45, %v3616_v42  ;;  %v10296_v32 = vld [vmem:[#allocation62_spill] sm:$0xff] }
 0x560   :  { %v3125_v44 = vadd.f32 %v2997_v54, %v10293_v25  ;;  %v4128_v63 = vsel %vm4057_vm7, %v4125_v34, %v4127_v56  ;;  %v3619_v24 = vrot.slane %v10296_v32, 3  ;;  %v2728_v25 = vsel %vm2653_vm6, %v2725_v59, %v2727_v33  ;;  %v6455_v32 = vld [vmem:[%s9729_s0 + $0x138] sm:$0xff] }
 0x561   :  { %v5504_v13 = vadd.f32 %v5503_v47, %v5424_v8  ;;  %v4024_v36 = vadd.f32 %v9428_v16, %v3433_v31  ;;  %v4401_v6 = vpop.f32.mrf.mxu0 }
 0x563   :  { %v4528_v17 = vadd.f32 %v4399_v12, %v4024_v36  ;;  %v10294_v12 = vld [vmem:[#allocation95_spill] sm:$0xff]  ;;  %v10297_v36 = vld [vmem:[#allocation98_spill] sm:$0xff] }
 0x564   :  { %6053 = vmatmul.msk.bf16.gmra.mxu3 %vm566_vm2, %v3617_v43 }
 0x565   :  { %v5257_v58 = vmul.f32 %v5055_v30, %v4528_v17 }
 0x566   :  { %v3306_v40 = vpop.f32.mrf.mxu2 }
 0x567   :  { %v5337_v16 = vadd.f32 %v5336_v5, %v5257_v58  ;;  %v5425_v9 = vmul.f32 %v5257_v58, %v4528_v17  ;;  %v3434_v49 = vadd.f32 %v3306_v40, %v3125_v44  ;;  %v3000_v62 = vpop.f32.mrf.mxu1  ;;  %v9497_v45 = vpop.f32.mrf.mxu3 }
 0x568   :  { %v3126_v26 = vadd.f32 %v3000_v62, %v10294_v12  ;;  %v5070_v62 = vpop.permute.xlu2 %5069 }
 0x569   :  { %v5505_v41 = vadd.f32 %v5504_v13, %v5425_v9  ;;  %v4025_v37 = vadd.f32 %v9440_v20, %v3434_v49  ;;  %v4404_v60 = vpop.f32.mrf.mxu0 }
 0x56a   :  { %5963 = vmatmul.msk.bf16.gmra.mxu1 %vm566_vm2, %v2724_v39  ;;  %v10295_v39 = vld [vmem:[#allocation72_spill] sm:$0xff] }
 0x56b   :  { %v4529_v4 = vadd.f32 %v4401_v6, %v4025_v37  ;;  %6009 = vmatmul.msk.bf16.gmra.mxu2 %vm566_vm2, %v2726_v57  ;;  %v3618_v1 = vrot.slane %v10295_v39, 2 }
 0x56c   :  { %6093 = vmatmul.msk.bf16.gmra.mxu0 %vm566_vm2, %v4128_v63 }
 0x56d   :  { %v6270_v47 = vpack.c.bf16 %v4529_v4, %v4528_v17  ;;  %v5258_v35 = vmul.f32 %v5060_v55, %v4529_v4  ;;  %v3620_v31 = vor.u32 %v3619_v24, %v3618_v1  ;;  %v4129_v17 = vrot.slane %v6454_v29, 3  ;;  %v5075_v1 = vpop.permute.xlu0 %5074 }
 0x56e   :  { %v3309_v23 = vpop.f32.mrf.mxu2  ;;  %v2729_v24 = vrot.slane %v6455_v32, 2 }
 0x56f   :  { %6366 = vst [vmem:[%s9732_s4 + $0xc8] sm:$0xff] %v6270_v47   ;;  %v5338_v20 = vadd.f32 %v5337_v16, %v5258_v35  ;;  %v5426_v34 = vmul.f32 %v5258_v35, %v4529_v4  ;;  %v3435_v38 = vadd.f32 %v3309_v23, %v3126_v26  ;;  %v3002_v22 = vpop.f32.mrf.mxu1  ;;  %v9509_v8 = vpop.f32.mrf.mxu3  ;;  %v3621_v7 = vsel %vm3466_vm5, %v3616_v42, %v3620_v31 }
 0x570   :  { %v3127_v6 = vadd.f32 %v3002_v22, %v10297_v36  ;;  %v4130_v9 = vsel %vm4057_vm7, %v4127_v56, %v4129_v17 }
 0x571   :  { %v5506_v53 = vadd.f32 %v5505_v41, %v5426_v34  ;;  %v4026_v0 = vadd.f32 %v9451_v3, %v3435_v38  ;;  %v4406_v5 = vpop.f32.mrf.mxu0 }
 0x573   :  { %v4530_v54 = vadd.f32 %v4404_v60, %v4026_v0  ;;  %v10298_v60 = vld [vmem:[#allocation100_spill] sm:$0xff] }
 0x574   :  { %6054 = vmatmul.msk.bf16.gmra.mxu3 %vm566_vm2, %v3621_v7 }
 0x575   :  { %v5259_v13 = vmul.f32 %v5065_v18, %v4530_v54  ;;  %v4131_v18 = vrot.slane %v6455_v32, 3 }
 0x576   :  { %v3311_v30 = vpop.f32.mrf.mxu2 }
 0x577   :  { %v5339_v3 = vadd.f32 %v5338_v20, %v5259_v13  ;;  %v5427_v27 = vmul.f32 %v5259_v13, %v4530_v54  ;;  %v3436_v43 = vadd.f32 %v3311_v30, %v3127_v6  ;;  %v3005_v58 = vpop.f32.mrf.mxu1  ;;  %v9520_v42 = vpop.f32.mrf.mxu3  ;;  %v2730_v6 = vsel %vm2653_vm6, %v2727_v33, %v2729_v24  ;;  %v9553_v33 = vld [vmem:[%s9730_s1 + $0xc] sm:$0xff] }
 0x578   :  { %v3128_v59 = vadd.f32 %v3005_v58, %v10298_v60 }
 0x579   :  { %v5507_v44 = vadd.f32 %v5506_v53, %v5427_v27  ;;  %v4027_v40 = vadd.f32 %v9463_v15, %v3436_v43  ;;  %v4409_v16 = vpop.f32.mrf.mxu0  ;;  %v4132_v43 = vsel %vm4057_vm7, %v4129_v17, %v4131_v18 }
 0x57a   :  { %5964 = vmatmul.msk.bf16.gmra.mxu1 %vm566_vm2, %v2726_v57  ;;  %v10299_v57 = vld [vmem:[#allocation104_spill] sm:$0xff] }
 0x57b   :  { %v4531_v49 = vadd.f32 %v4406_v5, %v4027_v40  ;;  %6010 = vmatmul.msk.bf16.gmra.mxu2 %vm566_vm2, %v2728_v25  ;;  %v10300_v47 = vshrl.u32 %v10299_v57, 16  ;;  %v10301_v12 = vshll.u32 %v10299_v57, 16  ;;  %v10302_v5 = vld [vmem:[#allocation102_spill] sm:$0xff] }
 0x57c   :  { %6094 = vmatmul.msk.bf16.gmra.mxu0 %vm566_vm2, %v4130_v9 }
 0x57d   :  { %v6275_v41 = vpack.c.bf16 %v4531_v49, %v4530_v54  ;;  %v5260_v37 = vmul.f32 %v5070_v62, %v4531_v49  ;;  %v3622_v35 = vrot.slane %v10300_v47, 2  ;;  %v3623_v26 = vrot.slane %v10301_v12, 3  ;;  %v10304_v12 = vld [vmem:[#allocation56_spill] sm:$0xff] }
 0x57e   :  { %v3314_v63 = vpop.f32.mrf.mxu2 }
 0x57f   :  { %6367 = vst [vmem:[%s9732_s4 + $0xd0] sm:$0xff] %v6275_v41   ;;  %v5340_v15 = vadd.f32 %v5339_v3, %v5260_v37  ;;  %v5428_v56 = vmul.f32 %v5260_v37, %v4531_v49  ;;  %v3437_v4 = vadd.f32 %v3314_v63, %v3128_v59  ;;  %v3007_v55 = vpop.f32.mrf.mxu1  ;;  %v9534_v38 = vpop.f32.mrf.mxu3  ;;  %v3624_v22 = vor.u32 %v3623_v26, %v3622_v35 }
 0x580   :  { %v3129_v54 = vadd.f32 %v3007_v55, %v10302_v5  ;;  %v3627_v49 = vshrl.u32 %v9553_v33, 16  ;;  %v5085_v35 = vpop.permute.xlu2 %5084  ;;  %v2731_v26 = vrot.slane %v10304_v12, 2 }
 0x581   :  { %v5508_v23 = vadd.f32 %v5507_v44, %v5428_v56  ;;  %v4028_v20 = vadd.f32 %v9474_v61, %v3437_v4  ;;  %v4411_v34 = vpop.f32.mrf.mxu0  ;;  %v3625_v53 = vsel %vm3466_vm5, %v3620_v31, %v3624_v22  ;;  %v5080_v44 = vpop.permute.xlu1 %5079 }
 0x582   :  { %v3629_v59 = vrot.slane %v3627_v49, 2 }
 0x583   :  { %v4532_v39 = vadd.f32 %v4409_v16, %v4028_v20  ;;  %v10303_v16 = vld [vmem:[#allocation106_spill] sm:$0xff] }
 0x584   :  { %6055 = vmatmul.msk.bf16.gmra.mxu3 %vm566_vm2, %v3625_v53 }
 0x585   :  { %v5261_v0 = vmul.f32 %v5075_v1, %v4532_v39  ;;  %v4133_v1 = vrot.slane %v10304_v12, 3 }
 0x586   :  { %v3316_v29 = vpop.f32.mrf.mxu2 }
 0x587   :  { %v5341_v61 = vadd.f32 %v5340_v15, %v5261_v0  ;;  %v5429_v7 = vmul.f32 %v5261_v0, %v4532_v39  ;;  %v3438_v13 = vadd.f32 %v3316_v29, %v3129_v54  ;;  %v3010_v36 = vpop.f32.mrf.mxu1  ;;  %v9545_v31 = vpop.f32.mrf.mxu3  ;;  %v2732_v54 = vsel %vm2653_vm6, %v2729_v24, %v2731_v26 }
 0x588   :  { %v3130_v9 = vadd.f32 %v3010_v36, %v10303_v16 }
 0x589   :  { %v5509_v30 = vadd.f32 %v5508_v23, %v5429_v7  ;;  %v4029_v3 = vadd.f32 %v9486_v48, %v3438_v13  ;;  %v4414_v27 = vpop.f32.mrf.mxu0  ;;  %v5095_v49 = vpop.permute.xlu1 %5094 }
 0x58a   :  { %5965 = vmatmul.msk.bf16.gmra.mxu1 %vm566_vm2, %v2728_v25  ;;  %v3630_v25 = vshll.u32 %v9553_v33, 16 }
 0x58b   :  { %v4533_v58 = vadd.f32 %v4411_v34, %v4029_v3  ;;  %6011 = vmatmul.msk.bf16.gmra.mxu2 %vm566_vm2, %v2730_v6  ;;  %v10305_v34 = vld [vmem:[#allocation109_spill] sm:$0xff] }
 0x58c   :  { %6095 = vmatmul.msk.bf16.gmra.mxu0 %vm566_vm2, %v4132_v43  ;;  %v3632_v63 = vrot.slane %v3630_v25, 3  ;;  %v10306_v43 = vld [vmem:[#allocation46_spill] sm:$0xff] }
 0x58d   :  { %v6280_v40 = vpack.c.bf16 %v4533_v58, %v4532_v39  ;;  %v5262_v48 = vmul.f32 %v5080_v44, %v4533_v58  ;;  %v6456_v25 = vld [vmem:[%s9730_s1 + $0x4] sm:$0xff] }
 0x58e   :  { %v3319_v17 = vpop.f32.mrf.mxu2  ;;  %v3633_v57 = vor.u32 %v3632_v63, %v3629_v59  ;;  %v4135_v59 = vrot.slane %v6456_v25, 3 }
 0x58f   :  { %6368 = vst [vmem:[%s9732_s4 + $0xd8] sm:$0xff] %v6280_v40   ;;  %v5342_v62 = vadd.f32 %v5341_v61, %v5262_v48  ;;  %v5430_v41 = vmul.f32 %v5262_v48, %v4533_v58  ;;  %v3439_v37 = vadd.f32 %v3319_v17, %v3130_v9  ;;  %v3012_v60 = vpop.f32.mrf.mxu1  ;;  %v9562_v55 = vpop.f32.mrf.mxu3 }
 0x590   :  { %v3634_v23 = vsel %vm3466_vm5, %v3624_v22, %v3633_v57  ;;  %v3131_v39 = vadd.f32 %v3012_v60, %v10305_v34  ;;  %v4134_v22 = vsel %vm4057_vm7, %v4131_v18, %v4133_v1 }
 0x591   :  { %v5510_v15 = vadd.f32 %v5509_v30, %v5430_v41  ;;  %v4030_v56 = vadd.f32 %v9497_v45, %v3439_v37  ;;  %v4416_v4 = vpop.f32.mrf.mxu0  ;;  %v5090_v30 = vpop.permute.xlu0 %5089  ;;  %v10307_v37 = vld [vmem:[#allocation38_spill] sm:$0xff] }
 0x593   :  { %v4534_v47 = vadd.f32 %v4414_v27, %v4030_v56 }
 0x594   :  { %6056 = vmatmul.msk.bf16.gmra.mxu3 %vm566_vm2, %v3634_v23 }
 0x595   :  { %v5263_v20 = vmul.f32 %v5085_v35, %v4534_v47 }
 0x596   :  { %v3321_v32 = vpop.f32.mrf.mxu2 }
 0x597   :  { %v5343_v53 = vadd.f32 %v5342_v62, %v5263_v20  ;;  %v5431_v45 = vmul.f32 %v5263_v20, %v4534_v47  ;;  %v3440_v0 = vadd.f32 %v3321_v32, %v3131_v39  ;;  %v3015_v5 = vpop.f32.mrf.mxu1  ;;  %v9572_v13 = vpop.f32.mrf.mxu3  ;;  %v9587_v62 = vrot.slane %v6456_v25, 2 }
 0x598   :  { %v3132_v24 = vadd.f32 %v3015_v5, %v10306_v43  ;;  %v4136_v20 = vsel %vm4057_vm7, %v4133_v1, %v4135_v59 }
 0x599   :  { %v5511_v29 = vadd.f32 %v5510_v15, %v5431_v45  ;;  %v4031_v61 = vadd.f32 %v9509_v8, %v3440_v0  ;;  %v4419_v7 = vpop.f32.mrf.mxu0 }
 0x59a   :  { %5966 = vmatmul.msk.bf16.gmra.mxu1 %vm566_vm2, %v2730_v6 }
 0x59b   :  { %v4535_v36 = vadd.f32 %v4416_v4, %v4031_v61  ;;  %6012 = vmatmul.msk.bf16.gmra.mxu2 %vm566_vm2, %v2732_v54 }
 0x59c   :  { %6096 = vmatmul.msk.bf16.gmra.mxu0 %vm566_vm2, %v4134_v22 }
 0x59d   :  { %v6285_v3 = vpack.c.bf16 %v4535_v36, %v4534_v47  ;;  %v5264_v27 = vmul.f32 %v5090_v30, %v4535_v36  ;;  %v2734_v47 = vsel %vm2653_vm6, %v2731_v26, %v9587_v62  ;;  %v3159_v30 = vrot.slane %v9553_v33, 2 }
 0x59e   :  { %v3324_v58 = vpop.f32.mrf.mxu2 }
 0x59f   :  { %6369 = vst [vmem:[%s9732_s4 + $0xe0] sm:$0xff] %v6285_v3   ;;  %v5344_v8 = vadd.f32 %v5343_v53, %v5264_v27  ;;  %v5432_v18 = vmul.f32 %v5264_v27, %v4535_v36  ;;  %v3441_v44 = vadd.f32 %v3324_v58, %v3132_v24  ;;  %v3017_v40 = vpop.f32.mrf.mxu1  ;;  %v9582_v9 = vpop.f32.mrf.mxu3  ;;  %v4137_v27 = vrot.slane %v9553_v33, 3 }
 0x5a0   :  { %v3133_v60 = vadd.f32 %v3017_v40, %v10307_v37  ;;  %v5105_v36 = vpop.permute.xlu0 %5104  ;;  %v5110_v33 = vpop.permute.xlu1 %5109 }
 0x5a1   :  { %v5512_v6 = vadd.f32 %v5511_v29, %v5432_v18  ;;  %v4032_v48 = vadd.f32 %v9520_v42, %v3441_v44  ;;  %v4421_v16 = vpop.f32.mrf.mxu0 }
 0x5a3   :  { %v4536_v17 = vadd.f32 %v4419_v7, %v4032_v48  ;;  %v4138_v48 = vsel %vm4057_vm7, %v4135_v59, %v4137_v27 }
 0x5a4   :  { %6057 = vmatmul.msk.bf16.gmra.mxu3 %vm566_vm2, %v3633_v57  ;;  %v5100_v57 = vpop.permute.xlu2 %5099 }
 0x5a5   :  { %v5265_v41 = vmul.f32 %v5095_v49, %v4536_v17 }
 0x5a6   :  { %v3326_v63 = vpop.f32.mrf.mxu2 }
 0x5a7   :  { %v5345_v15 = vadd.f32 %v5344_v8, %v5265_v41  ;;  %v5433_v42 = vmul.f32 %v5265_v41, %v4536_v17  ;;  %v3442_v56 = vadd.f32 %v3326_v63, %v3133_v60  ;;  %v3020_v4 = vpop.f32.mrf.mxu1  ;;  %v9595_v34 = vpop.f32.mrf.mxu3 }
 0x5a8   :  { %v3134_v26 = vadd.f32 %v3020_v4, %v8281_v51 }
 0x5a9   :  { %v5513_v35 = vadd.f32 %v5512_v6, %v5433_v42  ;;  %v4033_v12 = vadd.f32 %v9534_v38, %v3442_v56  ;;  %v4424_v23 = vpop.f32.mrf.mxu0 }
 0x5aa   :  { %5967 = vmatmul.msk.bf16.gmra.mxu1 %vm566_vm2, %v2732_v54 }
 0x5ab   :  { %v4537_v39 = vadd.f32 %v4421_v16, %v4033_v12  ;;  %6013 = vmatmul.msk.bf16.gmra.mxu2 %vm566_vm2, %v2734_v47 }
 0x5ac   :  { %6097 = vmatmul.msk.bf16.gmra.mxu0 %vm566_vm2, %v4136_v20 }
 0x5ad   :  { %v6290_v32 = vpack.c.bf16 %v4537_v39, %v4536_v17  ;;  %v5266_v53 = vmul.f32 %v5100_v57, %v4537_v39 }
 0x5ae   :  { %v3329_v45 = vpop.f32.mrf.mxu2 }
 0x5af   :  { %6370 = vst [vmem:[%s9732_s4 + $0xe8] sm:$0xff] %v6290_v32   ;;  %v5346_v38 = vadd.f32 %v5345_v15, %v5266_v53  ;;  %v5434_v1 = vmul.f32 %v5266_v53, %v4537_v39  ;;  %v3443_v0 = vadd.f32 %v3329_v45, %v3134_v26  ;;  %v3022_v5 = vpop.f32.mrf.mxu1  ;;  %v9605_v7 = vpop.f32.mrf.mxu3 }
 0x5b0   :  { %v3135_v3 = vadd.f32 %v3022_v5, %v8294_v46 }
 0x5b1   :  { %v5514_v54 = vadd.f32 %v5513_v35, %v5434_v1  ;;  %v4034_v29 = vadd.f32 %v9545_v31, %v3443_v0  ;;  %v4426_v61 = vpop.f32.mrf.mxu0  ;;  %v3160_v31 = vsel %vm2653_vm6, %v9587_v62, %v3159_v30  ;;  %v10308_v0 = vld [vmem:[#allocation112_spill] sm:$0xff] }
 0x5b3   :  { %v4538_v22 = vadd.f32 %v4424_v23, %v4034_v29 }
 0x5b5   :  { %v5267_v51 = vmul.f32 %v5105_v36, %v4538_v22 }
 0x5b6   :  { %v3331_v43 = vpop.f32.mrf.mxu2 }
 0x5b7   :  { %v5347_v24 = vadd.f32 %v5346_v38, %v5267_v51  ;;  %v5435_v58 = vmul.f32 %v5267_v51, %v4538_v22  ;;  %v3444_v8 = vadd.f32 %v3331_v43, %v3135_v3  ;;  %v3025_v18 = vpop.f32.mrf.mxu1  ;;  %v9614_v16 = vpop.f32.mrf.mxu3 }
 0x5b8   :  { %v3136_v25 = vadd.f32 %v3025_v18, %v8303_v50  ;;  %v5120_v38 = vpop.permute.xlu0 %5119 }
 0x5b9   :  { %v5515_v44 = vadd.f32 %v5514_v54, %v5435_v58  ;;  %v4035_v40 = vadd.f32 %v9562_v55, %v3444_v8  ;;  %v4429_v6 = vpop.f32.mrf.mxu0 }
 0x5ba   :  { %5968 = vmatmul.msk.bf16.gmra.mxu1 %vm566_vm2, %v2734_v47  ;;  %v5115_v47 = vpop.permute.xlu2 %5114 }
 0x5bb   :  { %v4539_v46 = vadd.f32 %v4426_v61, %v4035_v40  ;;  %6014 = vmatmul.msk.bf16.gmra.mxu2 %vm566_vm2, %v3160_v31 }
 0x5bc   :  { %6098 = vmatmul.msk.bf16.gmra.mxu0 %vm566_vm2, %v4138_v48 }
 0x5bd   :  { %v6295_v17 = vpack.c.bf16 %v4539_v46, %v4538_v22  ;;  %v5268_v49 = vmul.f32 %v5110_v33, %v4539_v46 }
 0x5be   :  { %v3334_v41 = vpop.f32.mrf.mxu2 }
 0x5bf   :  { %6371 = vst [vmem:[%s9732_s4 + $0xf0] sm:$0xff] %v6295_v17   ;;  %v5348_v55 = vadd.f32 %v5347_v24, %v5268_v49  ;;  %v5436_v37 = vmul.f32 %v5268_v49, %v4539_v46  ;;  %v3445_v60 = vadd.f32 %v3334_v41, %v3136_v25  ;;  %v3027_v59 = vpop.f32.mrf.mxu1  ;;  %v9624_v56 = vpop.f32.mrf.mxu3  ;;  %v10309_v24 = vld [vmem:[#allocation115_spill] sm:$0xff]  ;;  %v10310_v41 = vld [vmem:[#allocation118_spill] sm:$0xff] }
 0x5c0   :  { %v3137_v50 = vadd.f32 %v3027_v59, %v8316_v14 }
 0x5c1   :  { %v5516_v63 = vadd.f32 %v5515_v44, %v5436_v37  ;;  %v4036_v15 = vadd.f32 %v9572_v13, %v3445_v60  ;;  %v4431_v42 = vpop.f32.mrf.mxu0 }
 0x5c2   :  { %v5130_v17 = vpop.permute.xlu2 %5129 }
 0x5c3   :  { %v4540_v4 = vadd.f32 %v4429_v6, %v4036_v15 }
 0x5c5   :  { %v5269_v35 = vmul.f32 %v5115_v47, %v4540_v4 }
 0x5c6   :  { %v3336_v12 = vpop.f32.mrf.mxu2 }
 0x5c7   :  { %v5349_v23 = vadd.f32 %v5348_v55, %v5269_v35  ;;  %v5437_v20 = vmul.f32 %v5269_v35, %v4540_v4  ;;  %v3446_v39 = vadd.f32 %v3336_v12, %v3137_v50  ;;  %v3030_v57 = vpop.f32.mrf.mxu1  ;;  %v9628_v45 = vpop.f32.mrf.mxu3 }
 0x5c8   :  { %v3138_v5 = vadd.f32 %v3030_v57, %v10308_v0  ;;  %v5135_v50 = vpop.permute.xlu0 %5134 }
 0x5c9   :  { %v5517_v32 = vadd.f32 %v5516_v63, %v5437_v20  ;;  %v4037_v53 = vadd.f32 %v9582_v9, %v3446_v39  ;;  %v4434_v26 = vpop.f32.mrf.mxu0 }
 0x5ca   :  { %5969 = vmatmul.msk.bf16.gmra.mxu1 %vm566_vm2, %v9587_v62 }
 0x5cb   :  { %v4541_v13 = vadd.f32 %v4431_v42, %v4037_v53  ;;  %6015 = vmatmul.msk.bf16.gmra.mxu2 %vm566_vm2, %v3159_v30 }
 0x5cc   :  { %6099 = vmatmul.msk.bf16.gmra.mxu0 %vm566_vm2, %v4137_v27  ;;  %v5125_v27 = vpop.permute.xlu1 %5124 }
 0x5cd   :  { %v6300_v14 = vpack.c.bf16 %v4541_v13, %v4540_v4  ;;  %v5270_v1 = vmul.f32 %v5120_v38, %v4541_v13 }
 0x5ce   :  { %v3339_v54 = vpop.f32.mrf.mxu2 }
 0x5cf   :  { %6372 = vst [vmem:[%s9732_s4 + $0xf8] sm:$0xff] %v6300_v14   ;;  %v5350_v9 = vadd.f32 %v5349_v23, %v5270_v1  ;;  %v5438_v29 = vmul.f32 %v5270_v1, %v4541_v13  ;;  %v3447_v61 = vadd.f32 %v3339_v54, %v3138_v5  ;;  %v3032_v22 = vpop.f32.mrf.mxu1  ;;  %v9639_v51 = vpop.f32.mrf.mxu3  ;;  %v10311_v54 = vld [vmem:[#allocation121_spill] sm:$0xff] }
 0x5d0   :  { %v3139_v58 = vadd.f32 %v3032_v22, %v10309_v24 }
 0x5d1   :  { %v5518_v62 = vadd.f32 %v5517_v32, %v5438_v29  ;;  %v4038_v36 = vadd.f32 %v9595_v34, %v3447_v61  ;;  %v4436_v30 = vpop.f32.mrf.mxu0 }
 0x5d3   :  { %v4542_v3 = vadd.f32 %v4434_v26, %v4038_v36 }
 0x5d4   :  { %v5140_v1 = vpop.permute.xlu1 %5139 }
 0x5d5   :  { %v5271_v43 = vmul.f32 %v5125_v27, %v4542_v3 }
 0x5d6   :  { %v3341_v8 = vpop.f32.mrf.mxu2 }
 0x5d7   :  { %v5351_v18 = vadd.f32 %v5350_v9, %v5271_v43  ;;  %v5439_v31 = vmul.f32 %v5271_v43, %v4542_v3  ;;  %v3448_v44 = vadd.f32 %v3341_v8, %v3139_v58  ;;  %v3035_v40 = vpop.f32.mrf.mxu1  ;;  %v9643_v33 = vpop.f32.mrf.mxu3  ;;  %v10312_v58 = vld [vmem:[#allocation124_spill] sm:$0xff] }
 0x5d8   :  { %v3140_v55 = vadd.f32 %v3035_v40, %v10310_v41  ;;  %v5145_v43 = vpop.permute.xlu2 %5144 }
 0x5d9   :  { %v5519_v6 = vadd.f32 %v5518_v62, %v5439_v31  ;;  %v4039_v48 = vadd.f32 %v9605_v7, %v3448_v44  ;;  %v4439_v46 = vpop.f32.mrf.mxu0 }
 0x5db   :  { %v4543_v34 = vadd.f32 %v4436_v30, %v4039_v48 }
 0x5dd   :  { %v6305_v49 = vpack.c.bf16 %v4543_v34, %v4542_v3  ;;  %v5272_v25 = vmul.f32 %v5130_v17, %v4543_v34 }
 0x5de   :  { %v3344_v37 = vpop.f32.mrf.mxu2 }
 0x5df   :  { %6373 = vst [vmem:[%s9732_s4 + $0x100] sm:$0xff] %v6305_v49   ;;  %v5352_v60 = vadd.f32 %v5351_v18, %v5272_v25  ;;  %v5440_v59 = vmul.f32 %v5272_v25, %v4543_v34  ;;  %v3449_v63 = vadd.f32 %v3344_v37, %v3140_v55  ;;  %v3037_v15 = vpop.f32.mrf.mxu1  ;;  %v9650_v47 = vpop.f32.mrf.mxu3  ;;  %v10313_v55 = vld [vmem:[#allocation127_spill] sm:$0xff] }
 0x5e0   :  { %v3141_v23 = vadd.f32 %v3037_v15, %v8383_v19  ;;  %v5150_v49 = vpop.permute.xlu0 %5149 }
 0x5e1   :  { %v5520_v42 = vadd.f32 %v5519_v6, %v5440_v59  ;;  %v4040_v7 = vadd.f32 %v9614_v16, %v3449_v63  ;;  %v4441_v4 = vpop.f32.mrf.mxu0 }
 0x5e3   :  { %v4544_v35 = vadd.f32 %v4439_v46, %v4040_v7 }
 0x5e5   :  { %v5273_v12 = vmul.f32 %v5135_v50, %v4544_v35 }
 0x5e6   :  { %v3346_v20 = vpop.f32.mrf.mxu2 }
 0x5e7   :  { %v5353_v39 = vadd.f32 %v5352_v60, %v5273_v12  ;;  %v5441_v57 = vmul.f32 %v5273_v12, %v4544_v35  ;;  %v3450_v32 = vadd.f32 %v3346_v20, %v3141_v23  ;;  %v3040_v53 = vpop.f32.mrf.mxu1  ;;  %v9654_v14 = vpop.f32.mrf.mxu3  ;;  %v10314_v20 = vld [vmem:[#allocation18_spill] sm:$0xff] }
 0x5e8   :  { %v3142_v9 = vadd.f32 %v3040_v53, %v10311_v54  ;;  %v5155_v12 = vpop.permute.xlu1 %5154 }
 0x5e9   :  { %v5521_v26 = vadd.f32 %v5520_v42, %v5441_v57  ;;  %v4041_v13 = vadd.f32 %v9624_v56, %v3450_v32  ;;  %v4444_v38 = vpop.f32.mrf.mxu0 }
 0x5eb   :  { %v4545_v16 = vadd.f32 %v4441_v4, %v4041_v13 }
 0x5ed   :  { %v6310_v0 = vpack.c.bf16 %v4545_v16, %v4544_v35  ;;  %v5274_v5 = vmul.f32 %v5140_v1, %v4545_v16 }
 0x5ee   :  { %v3349_v29 = vpop.f32.mrf.mxu2 }
 0x5ef   :  { %6374 = vst [vmem:[%s9732_s4 + $0x108] sm:$0xff] %v6310_v0   ;;  %v5354_v19 = vadd.f32 %v5353_v39, %v5274_v5  ;;  %v5442_v61 = vmul.f32 %v5274_v5, %v4545_v16  ;;  %v3451_v22 = vadd.f32 %v3349_v29, %v3142_v9  ;;  %v3042_v62 = vpop.f32.mrf.mxu1  ;;  %v9661_v3 = vpop.f32.mrf.mxu3  ;;  %v10315_v29 = vld [vmem:[#allocation12_spill] sm:$0xff] }
 0x5f0   :  { %v3143_v8 = vadd.f32 %v3042_v62, %v10312_v58  ;;  %v5160_v5 = vpop.permute.xlu2 %5159  ;;  %v5165_v58 = vpop.permute.xlu0 %5164 }
 0x5f1   :  { %v5522_v36 = vadd.f32 %v5521_v26, %v5442_v61  ;;  %v4042_v56 = vadd.f32 %v9628_v45, %v3451_v22  ;;  %v4446_v30 = vpop.f32.mrf.mxu0 }
 0x5f3   :  { %v4546_v27 = vadd.f32 %v4444_v38, %v4042_v56 }
 0x5f5   :  { %v5275_v24 = vmul.f32 %v5145_v43, %v4546_v27 }
 0x5f6   :  { %v3351_v18 = vpop.f32.mrf.mxu2 }
 0x5f7   :  { %v5355_v31 = vadd.f32 %v5354_v19, %v5275_v24  ;;  %v5443_v44 = vmul.f32 %v5275_v24, %v4546_v27  ;;  %v3452_v40 = vadd.f32 %v3351_v18, %v3143_v8  ;;  %v3045_v6 = vpop.f32.mrf.mxu1  ;;  %v9665_v17 = vpop.f32.mrf.mxu3  ;;  %v10316_v18 = vld [vmem:[#allocation25_spill] sm:$0xff] }
 0x5f8   :  { %v3144_v37 = vadd.f32 %v3045_v6, %v10313_v55 }
 0x5f9   :  { %v5523_v48 = vadd.f32 %v5522_v36, %v5443_v44  ;;  %v4043_v46 = vadd.f32 %v9639_v51, %v3452_v40  ;;  %v4449_v34 = vpop.f32.mrf.mxu0 }
 0x5fb   :  { %v4547_v45 = vadd.f32 %v4446_v30, %v4043_v46 }
 0x5fd   :  { %v6315_v25 = vpack.c.bf16 %v4547_v45, %v4546_v27  ;;  %v5276_v41 = vmul.f32 %v5150_v49, %v4547_v45 }
 0x5fe   :  { %v3354_v60 = vpop.f32.mrf.mxu2 }
 0x5ff   :  { %6375 = vst [vmem:[%s9732_s4 + $0x110] sm:$0xff] %v6315_v25   ;;  %v5356_v59 = vadd.f32 %v5355_v31, %v5276_v41  ;;  %v5444_v63 = vmul.f32 %v5276_v41, %v4547_v45  ;;  %v3453_v15 = vadd.f32 %v3354_v60, %v3144_v37  ;;  %v3047_v42 = vpop.f32.mrf.mxu1  ;;  %v9672_v35 = vpop.f32.mrf.mxu3  ;;  %v10317_v60 = vld [vmem:[#allocation19_spill] sm:$0xff] }
 0x600   :  { %v3145_v39 = vadd.f32 %v3047_v42, %v10314_v20  ;;  %v5170_v41 = vpop.permute.xlu1 %5169  ;;  %v5175_v20 = vpop.permute.xlu2 %5174 }
 0x601   :  { %v5524_v7 = vadd.f32 %v5523_v48, %v5444_v63  ;;  %v4044_v51 = vadd.f32 %v9643_v33, %v3453_v15  ;;  %v4451_v4 = vpop.f32.mrf.mxu0 }
 0x603   :  { %v4548_v50 = vadd.f32 %v4449_v34, %v4044_v51 }
 0x605   :  { %v5277_v23 = vmul.f32 %v5155_v12, %v4548_v50 }
 0x606   :  { %v3356_v57 = vpop.f32.mrf.mxu2 }
 0x607   :  { %v5357_v32 = vadd.f32 %v5356_v59, %v5277_v23  ;;  %v5445_v53 = vmul.f32 %v5277_v23, %v4548_v50  ;;  %v3454_v26 = vadd.f32 %v3356_v57, %v3145_v39  ;;  %v3050_v13 = vpop.f32.mrf.mxu1  ;;  %v9676_v0 = vpop.f32.mrf.mxu3 }
 0x608   :  { %v3146_v19 = vadd.f32 %v3050_v13, %v10315_v29 }
 0x609   :  { %v5525_v38 = vadd.f32 %v5524_v7, %v5445_v53  ;;  %v4045_v16 = vadd.f32 %v9650_v47, %v3454_v26  ;;  %v4454_v1 = vpop.f32.mrf.mxu0 }
 0x60b   :  { %v4549_v33 = vadd.f32 %v4451_v4, %v4045_v16 }
 0x60d   :  { %v6320_v54 = vpack.c.bf16 %v4549_v33, %v4548_v50  ;;  %v5278_v9 = vmul.f32 %v5160_v5, %v4549_v33 }
 0x60e   :  { %v3359_v61 = vpop.f32.mrf.mxu2 }
 0x60f   :  { %6376 = vst [vmem:[%s9732_s4 + $0x118] sm:$0xff] %v6320_v54   ;;  %v5358_v22 = vadd.f32 %v5357_v32, %v5278_v9  ;;  %v5446_v62 = vmul.f32 %v5278_v9, %v4549_v33  ;;  %v3455_v36 = vadd.f32 %v3359_v61, %v3146_v19  ;;  %v3052_v56 = vpop.f32.mrf.mxu1  ;;  %v9683_v43 = vpop.f32.mrf.mxu3 }
 0x610   :  { %v3147_v31 = vadd.f32 %v3052_v56, %v10316_v18  ;;  %v5180_v54 = vpop.permute.xlu0 %5179 }
 0x611   :  { %v5526_v30 = vadd.f32 %v5525_v38, %v5446_v62  ;;  %v4046_v47 = vadd.f32 %v9654_v14, %v3455_v36  ;;  %v4456_v27 = vpop.f32.mrf.mxu0 }
 0x613   :  { %v4550_v24 = vadd.f32 %v4454_v1, %v4046_v47 }
 0x615   :  { %v5279_v8 = vmul.f32 %v5165_v58, %v4550_v24 }
 0x616   :  { %v3361_v44 = vpop.f32.mrf.mxu2 }
 0x617   :  { %v5359_v40 = vadd.f32 %v5358_v22, %v5279_v8  ;;  %v5447_v6 = vmul.f32 %v5279_v8, %v4550_v24  ;;  %v3456_v48 = vadd.f32 %v3361_v44, %v3147_v31  ;;  %v3055_v46 = vpop.f32.mrf.mxu1  ;;  %v9687_v25 = vpop.f32.mrf.mxu3 }
 0x618   :  { %v3148_v59 = vadd.f32 %v3055_v46, %v10317_v60 }
 0x619   :  { %v5527_v34 = vadd.f32 %v5526_v30, %v5447_v6  ;;  %v4047_v45 = vadd.f32 %v9661_v3, %v3456_v48  ;;  %v4459_v49 = vpop.f32.mrf.mxu0 }
 0x61b   :  { %v4551_v14 = vadd.f32 %v4456_v27, %v4047_v45  ;;  %v5190_v45 = vpop.permute.xlu2 %5189 }
 0x61d   :  { %v6325_v55 = vpack.c.bf16 %v4551_v14, %v4550_v24  ;;  %v5280_v37 = vmul.f32 %v5170_v41, %v4551_v14  ;;  %v5185_v24 = vpop.permute.xlu1 %5184 }
 0x61e   :  { %v3364_v63 = vpop.f32.mrf.mxu2 }
 0x61f   :  { %6377 = vst [vmem:[%s9732_s4 + $0x120] sm:$0xff] %v6325_v55   ;;  %v5360_v15 = vadd.f32 %v5359_v40, %v5280_v37  ;;  %v5448_v42 = vmul.f32 %v5280_v37, %v4551_v14  ;;  %v3457_v7 = vadd.f32 %v3364_v63, %v3148_v59  ;;  %v3057_v51 = vpop.f32.mrf.mxu1  ;;  %v9694_v12 = vpop.f32.mrf.mxu3 }
 0x620   :  { %v3149_v57 = vadd.f32 %v3057_v51, %v8500_v10 }
 0x621   :  { %v5528_v4 = vadd.f32 %v5527_v34, %v5448_v42  ;;  %v4048_v3 = vadd.f32 %v9665_v17, %v3457_v7  ;;  %v4461_v50 = vpop.f32.mrf.mxu0  ;;  %v5195_v42 = vpop.permute.xlu0 %5194 }
 0x623   :  { %v4552_v23 = vadd.f32 %v4459_v49, %v4048_v3 }
 0x625   :  { %v5281_v39 = vmul.f32 %v5175_v20, %v4552_v23 }
 0x626   :  { %v3366_v32 = vpop.f32.mrf.mxu2 }
 0x627   :  { %v5361_v53 = vadd.f32 %v5360_v15, %v5281_v39  ;;  %v5449_v26 = vmul.f32 %v5281_v39, %v4552_v23  ;;  %v3458_v13 = vadd.f32 %v3366_v32, %v3149_v57  ;;  %v3060_v38 = vpop.f32.mrf.mxu1  ;;  %v9698_v5 = vpop.f32.mrf.mxu3 }
 0x628   :  { %v3150_v19 = vadd.f32 %v3060_v38, %v8510_v21 }
 0x629   :  { %v5529_v16 = vadd.f32 %v5528_v4, %v5449_v26  ;;  %v4049_v1 = vadd.f32 %v9672_v35, %v3458_v13  ;;  %v4464_v33 = vpop.f32.mrf.mxu0 }
 0x62b   :  { %v4553_v17 = vadd.f32 %v4461_v50, %v4049_v1 }
 0x62d   :  { %v6330_v9 = vpack.c.bf16 %v4553_v17, %v4552_v23  ;;  %v5282_v29 = vmul.f32 %v5180_v54, %v4553_v17 }
 0x62e   :  { %v3369_v61 = vpop.f32.mrf.mxu2 }
 0x62f   :  { %6378 = vst [vmem:[%s9732_s4 + $0x128] sm:$0xff] %v6330_v9   ;;  %v5362_v10 = vadd.f32 %v5361_v53, %v5282_v29  ;;  %v5450_v22 = vmul.f32 %v5282_v29, %v4553_v17  ;;  %v3459_v62 = vadd.f32 %v3369_v61, %v3150_v19  ;;  %v3062_v36 = vpop.f32.mrf.mxu1  ;;  %v3972_v47 = vpop.f32.mrf.mxu3 }
 0x630   :  { %v3151_v8 = vadd.f32 %v3062_v36, %v8528_v2  ;;  %v5200_v53 = vpop.permute.xlu1 %5199  ;;  %v5205_v29 = vpop.permute.xlu2 %5204 }
 0x631   :  { %v5530_v56 = vadd.f32 %v5529_v16, %v5450_v22  ;;  %v4050_v35 = vadd.f32 %v9676_v0, %v3459_v62  ;;  %v4466_v30 = vpop.f32.mrf.mxu0 }
 0x633   :  { %v4554_v27 = vadd.f32 %v4464_v33, %v4050_v35 }
 0x635   :  { %v5283_v58 = vmul.f32 %v5185_v24, %v4554_v27 }
 0x636   :  { %v3371_v21 = vpop.f32.mrf.mxu2 }
 0x637   :  { %v5363_v18 = vadd.f32 %v5362_v10, %v5283_v58  ;;  %v5451_v31 = vmul.f32 %v5283_v58, %v4554_v27  ;;  %v3460_v44 = vadd.f32 %v3371_v21, %v3151_v8  ;;  %v3065_v40 = vpop.f32.mrf.mxu1 }
 0x638   :  { %v3152_v14 = vadd.f32 %v3065_v40, %v8540_v11 }
 0x639   :  { %v5531_v6 = vadd.f32 %v5530_v56, %v5451_v31  ;;  %v4051_v48 = vadd.f32 %v9683_v43, %v3460_v44  ;;  %v4469_v46 = vpop.f32.mrf.mxu0 }
 0x63b   :  { %v4555_v34 = vadd.f32 %v4466_v30, %v4051_v48 }
 0x63d   :  { %v6335_v49 = vpack.c.bf16 %v4555_v34, %v4554_v27  ;;  %v5284_v0 = vmul.f32 %v5190_v45, %v4555_v34 }
 0x63e   :  { %v3374_v41 = vpop.f32.mrf.mxu2 }
 0x63f   :  { %6379 = vst [vmem:[%s9732_s4 + $0x130] sm:$0xff] %v6335_v49   ;;  %v5364_v2 = vadd.f32 %v5363_v18, %v5284_v0  ;;  %v5452_v55 = vmul.f32 %v5284_v0, %v4555_v34  ;;  %v3461_v37 = vadd.f32 %v3374_v41, %v3152_v14  ;;  %v3067_v60 = vpop.f32.mrf.mxu1 }
 0x640   :  { %v3153_v51 = vadd.f32 %v3067_v60, %v8558_v28 }
 0x641   :  { %v5532_v59 = vadd.f32 %v5531_v6, %v5452_v55  ;;  %v4052_v63 = vadd.f32 %v9687_v25, %v3461_v37  ;;  %v4471_v43 = vpop.f32.mrf.mxu0 }
 0x643   :  { %v4556_v15 = vadd.f32 %v4469_v46, %v4052_v63 }
 0x645   :  { %v5285_v7 = vmul.f32 %v5195_v42, %v4556_v15 }
 0x646   :  { %v3376_v4 = vpop.f32.mrf.mxu2 }
 0x647   :  { %v5365_v11 = vadd.f32 %v5364_v2, %v5285_v7  ;;  %v5453_v3 = vmul.f32 %v5285_v7, %v4556_v15  ;;  %v3462_v50 = vadd.f32 %v3376_v4, %v3153_v51  ;;  %v3070_v23 = vpop.f32.mrf.mxu1 }
 0x648   :  { %v3154_v25 = vadd.f32 %v3070_v23, %v8570_v52 }
 0x649   :  { %v5533_v20 = vadd.f32 %v5532_v59, %v5453_v3  ;;  %v4053_v39 = vadd.f32 %v9694_v12, %v3462_v50  ;;  %v4474_v57 = vpop.f32.mrf.mxu0 }
 0x64b   :  { %v4557_v32 = vadd.f32 %v4471_v43, %v4053_v39 }
 0x64d   :  { %v6340_v26 = vpack.c.bf16 %v4557_v32, %v4556_v15  ;;  %v5286_v13 = vmul.f32 %v5200_v53, %v4557_v32 }
 0x64e   :  { %v3379_v38 = vpop.f32.mrf.mxu2 }
 0x64f   :  { %6380 = vst [vmem:[%s9732_s4 + $0x138] sm:$0xff] %v6340_v26   ;;  %v5366_v28 = vadd.f32 %v5365_v11, %v5286_v13  ;;  %v5454_v16 = vmul.f32 %v5286_v13, %v4557_v32  ;;  %v3463_v1 = vadd.f32 %v3379_v38, %v3154_v25  ;;  %v3072_v33 = vpop.f32.mrf.mxu1 }
 0x651   :  { %v5534_v17 = vadd.f32 %v5533_v20, %v5454_v16  ;;  %v4054_v54 = vadd.f32 %v9698_v5, %v3463_v1  ;;  %v4476_v12 = vpop.f32.mrf.mxu0 }
 0x653   :  { %v4558_v9 = vadd.f32 %v4474_v57, %v4054_v54 }
 0x655   :  { %v4639_v19 = vpack.c.bf16 %v4558_v9, %v4558_v9  ;;  %v5287_v61 = vmul.f32 %v5205_v29, %v4558_v9 }
 0x656   :  { %v3381_v10 = vpop.f32.mrf.mxu2 }
 0x657   :  { %4720 = vst [vmem:[%s9732_s4 + $0x140] sm:$0xf] %v4639_v19  ;;  %v5367_v52 = vadd.f32 %v5366_v28, %v5287_v61  ;;  %v5455_v22 = vmul.f32 %v5287_v61, %v4558_v9 }
 0x659   :  { %v5368_v62 = vrot.slane %v5367_v52, 4  ;;  %v5535_v36 = vadd.f32 %v5534_v17, %v5455_v22 }
 0x65b   :  { %v5369_v56 = vadd.f32 %v5368_v62, %v5367_v52  ;;  %v5536_v35 = vrot.slane %v5535_v36, 4 }
 0x65d   :  { %v5370_v30 = vrot.slane %v5369_v56, 2  ;;  %v5537_v47 = vadd.f32 %v5536_v35, %v5535_v36 }
 0x65f   :  { %v5371_v27 = vadd.f32 %v5370_v30, %v5369_v56  ;;  %v5538_v5 = vrot.slane %v5537_v47, 2 }
 0x661   :  { %v5372_v24 = vrot.slane %v5371_v27, 1  ;;  %v5539_v58 = vadd.f32 %v5538_v5, %v5537_v47 }
 0x663   :  { %v5373_v8 = vadd.f32 %v5372_v24, %v5371_v27  ;;  %v5540_v21 = vrot.slane %v5539_v58, 1 }
 0x665   :  { %5374 = vst [vmem:[%s9733_s5] sm:$0x1] %v5373_v8  ;;  %v5541_v18 = vadd.f32 %v5540_v21, %v5539_v58 }
 0x667   :  { %5542 = vst [vmem:[%s9734_s6] sm:$0x1] %v5541_v18 }

</bundles_post_ra>
